<compile_context>
chip_gen: v5e
topology: v5e:2x2
jax: 0.10.0
libtpu: 0.0.40
codegen_flags: <defaults>
</compile_context>

<pallas_src>
import functools

import jax
import jax.numpy as jnp
from jax import lax
from jax.experimental import pallas as pl
from jax.experimental.pallas import tpu as pltpu

_COMPUTE_DTYPE = jnp.bfloat16          # MXU input dtype (accumulation stays f32 everywhere)
_VMEM_LIMIT = 48 * 1024 * 1024         # scoped-VMEM limit: headroom on v7x (64 MiB physical),
                                       # comfortably raises the 16/32 MiB defaults on v5e/v6e


def _row_tile(m, cap=512):
    """Largest multiple of 128 that divides m and is <= cap; keeps >= 2 grid steps when
    m >= 256 so both v7x TensorCores get work. Non-128-multiples fall back to the full
    extent (callers pad the sequence dim so this only happens for tiny shapes)."""
    if m % 128 != 0:
        return m
    cap = min(cap, m)
    if m >= 256:
        half = (m // 2) - (m // 2) % 128
        cap = min(cap, max(half, 128))
    t = max(128, cap - cap % 128)
    while m % t != 0:
        t -= 128
    return t


# ----------------------------- exact GELU (erf via A&S 7.1.26) -----------------------------
def _erf(x):
    # Abramowitz & Stegun 7.1.26, |err| < 1.5e-7 — matches PyTorch's exact-erf nn.GELU to f32
    # precision while using only exp / mul / add (guaranteed Mosaic lowering).
    a1, a2, a3, a4, a5 = 0.254829592, -0.284496736, 1.421413741, -1.453152027, 1.061405429
    p = 0.3275911
    s = jnp.where(x < 0.0, -1.0, 1.0)
    z = jnp.abs(x)
    t = 1.0 / (1.0 + p * z)
    poly = t * (a1 + t * (a2 + t * (a3 + t * (a4 + t * a5))))
    return s * (1.0 - poly * jnp.exp(-z * z))


def _gelu_exact(x):
    return 0.5 * x * (1.0 + _erf(x * 0.7071067811865476))


# ------------------------- fused LayerNorm + linear (+GELU) kernel -------------------------
def _ln_linear_kernel(*refs, eps, activation, has_bias):
    if has_bias:
        x_ref, g_ref, b_ref, w_ref, bias_ref, o_ref = refs
    else:
        x_ref, g_ref, b_ref, w_ref, o_ref = refs
        bias_ref = None

    # LayerNorm prologue on the (tm, K) row block, f32.
    x = x_ref[...].astype(jnp.float32)
    mean = jnp.mean(x, axis=-1, keepdims=True)
    xc = x - mean
    var = jnp.mean(xc * xc, axis=-1, keepdims=True)
    y = xc * lax.rsqrt(var + eps) * g_ref[...] + b_ref[...]

    # Single-pass matmul against the VMEM-resident full [K, N] weight, f32 accumulate.
    acc = jnp.dot(y.astype(w_ref.dtype), w_ref[...], preferred_element_type=jnp.float32)
    if has_bias:
        acc = acc + bias_ref[...]
    if activation == "gelu":
        acc = _gelu_exact(acc)
    o_ref[...] = acc.astype(o_ref.dtype)


def ln_linear(x, gamma, beta, w, bias, *, eps, activation, out_dtype, tm_cap=512):
    """out = activation(LayerNorm(x) @ w [+ bias]); weight resident, grid over M only."""
    M, K = x.shape
    Kw, N = w.shape
    assert Kw == K
    tm = _row_tile(M, tm_cap)

    in_specs = [
        pl.BlockSpec((tm, K), lambda i: (i, 0)),
        pl.BlockSpec((1, K), lambda i: (0, 0)),
        pl.BlockSpec((1, K), lambda i: (0, 0)),
        pl.BlockSpec((K, N), lambda i: (0, 0)),      # constant index map -> fetched once
    ]
    args = [x,
            gamma.reshape(1, K).astype(jnp.float32),
            beta.reshape(1, K).astype(jnp.float32),
            w]
    has_bias = bias is not None
    if has_bias:
        in_specs.append(pl.BlockSpec((1, N), lambda i: (0, 0)))
        args.append(bias.reshape(1, N).astype(jnp.float32))

    return pl.pallas_call(
        functools.partial(_ln_linear_kernel, eps=eps, activation=activation,
                          has_bias=has_bias),
        out_shape=jax.ShapeDtypeStruct((M, N), out_dtype),
        grid_spec=pltpu.PrefetchScalarGridSpec(
            num_scalar_prefetch=0, grid=(M // tm,),
            in_specs=in_specs,
            out_specs=pl.BlockSpec((tm, N), lambda i: (i, 0))),
        compiler_params=pltpu.CompilerParams(
            dimension_semantics=("parallel",),
            vmem_limit_bytes=_VMEM_LIMIT),
    )(*args)


# --------------------------- linear + bias + residual kernel -------------------------------
def _linear_residual_kernel(x_ref, w_ref, bias_ref, r_ref, o_ref):
    acc = jnp.dot(x_ref[...], w_ref[...], preferred_element_type=jnp.float32)
    acc = acc + bias_ref[...] + r_ref[...].astype(jnp.float32)
    o_ref[...] = acc.astype(o_ref.dtype)


def linear_residual(x, w, bias, residual, *, out_dtype, tm_cap=512):
    """out = x @ w + bias + residual; weight resident, grid over M only."""
    M, K = x.shape
    Kw, N = w.shape
    assert Kw == K
    tm = _row_tile(M, tm_cap)
    return pl.pallas_call(
        _linear_residual_kernel,
        out_shape=jax.ShapeDtypeStruct((M, N), out_dtype),
        grid_spec=pltpu.PrefetchScalarGridSpec(
            num_scalar_prefetch=0, grid=(M // tm,),
            in_specs=[
                pl.BlockSpec((tm, K), lambda i: (i, 0)),
                pl.BlockSpec((K, N), lambda i: (0, 0)),   # resident weight
                pl.BlockSpec((1, N), lambda i: (0, 0)),
                pl.BlockSpec((tm, N), lambda i: (i, 0)),
            ],
            out_specs=pl.BlockSpec((tm, N), lambda i: (i, 0))),
        compiler_params=pltpu.CompilerParams(
            dimension_semantics=("parallel",),
            vmem_limit_bytes=_VMEM_LIMIT),
    )(x, w, bias.reshape(1, N).astype(jnp.float32), residual)


# --------------------------------- attention kernel --------------------------------------
def _attention_kernel(q_ref, k_ref, v_ref, o_ref, *, group, head_dim, scale, kv_len):
    # q_ref/k_ref/v_ref/o_ref: (N_pad, group*head_dim) bf16 blocks, one (batch, head-group)
    # per grid step. Scale folded into q; exact divide after the PV matmul (N*D elements).
    outs = []
    for h in range(group):
        sl = pl.ds(h * head_dim, head_dim)
        q = q_ref[:, sl] * scale
        k = k_ref[:, sl]
        v = v_ref[:, sl]
        s = lax.dot_general(q, k, (((1,), (1,)), ((), ())),
                            preferred_element_type=jnp.float32)          # [N, N] f32
        if kv_len < s.shape[-1]:                                         # mask padded keys
            col = lax.broadcasted_iota(jnp.int32, s.shape, 1)
            s = jnp.where(col < kv_len, s, -1e9)
        m = jnp.max(s, axis=-1, keepdims=True)
        p = jnp.exp(s - m)
        denom = jnp.sum(p, axis=-1, keepdims=True)
        o = jnp.dot(p.astype(v.dtype), v, preferred_element_type=jnp.float32)
        outs.append(o / denom)
    out = outs[0] if group == 1 else jnp.concatenate(outs, axis=-1)
    o_ref[...] = out.astype(o_ref.dtype)      # single lane-dense (N, G*D) store


def attention_from_qkv(qkv, *, batch, seq, num_heads, head_dim, group, scale, kv_len,
                       out_dtype):
    """softmax(q k^T * scale) @ v, reading q/k/v straight out of the [M, 3C] qkv tensor
    (column offsets 0 / C / 2C) and writing an [M, C]-layout output (no transposes)."""
    M, threeC = qkv.shape
    C = threeC // 3
    gd = group * head_dim
    n_groups = num_heads // group
    q_spec = pl.BlockSpec((seq, gd), lambda b, g: (b, g))
    k_spec = pl.BlockSpec((seq, gd), lambda b, g: (b, g + n_groups))
    v_spec = pl.BlockSpec((seq, gd), lambda b, g: (b, g + 2 * n_groups))
    o_spec = pl.BlockSpec((seq, gd), lambda b, g: (b, g))
    return pl.pallas_call(
        functools.partial(_attention_kernel, group=group, head_dim=head_dim,
                          scale=scale, kv_len=kv_len),
        out_shape=jax.ShapeDtypeStruct((M, C), out_dtype),
        grid_spec=pltpu.PrefetchScalarGridSpec(
            num_scalar_prefetch=0, grid=(batch, n_groups),
            in_specs=[q_spec, k_spec, v_spec],
            out_specs=o_spec),
        compiler_params=pltpu.CompilerParams(
            dimension_semantics=("parallel", "parallel"),
            vmem_limit_bytes=_VMEM_LIMIT),
    )(qkv, qkv, qkv)


# ----------------------------------- Block forward ---------------------------------------
def block_forward(x, params, *, num_heads, eps=1e-5):
    """Forward of the PyTorch Block at module defaults (eval; drop/drop_path = 0)."""
    B, N, C = x.shape
    H = num_heads
    D = C // H
    scale = D ** (-0.5)
    cd = _COMPUTE_DTYPE

    # Pad the sequence so every row tile is (8,128)-legal and lane-dense; padded key columns
    # are masked inside attention and padded rows are sliced off at the end.
    n_pad = ((N + 127) // 128) * 128
    if n_pad != N:
        x = jnp.pad(x, ((0, 0), (0, n_pad - N), (0, 0)))
    M = B * n_pad

    # Group heads so each attention block is 128 lanes wide.
    G = min(max(1, 128 // D), H)
    while H % G:
        G -= 1
    assert (G * D) % 128 == 0, "num_heads/head_dim must allow a 128-lane head group"

    # Weights: PyTorch nn.Linear layout [out, in] -> matmul layout [in, out], bf16 MXU inputs.
    w_qkv = params["qkv_w"].T.astype(cd)     # [C, 3C]
    w_proj = params["proj_w"].T.astype(cd)   # [C, C]
    w_fc1 = params["fc1_w"].T.astype(cd)     # [C, hidden]
    w_fc2 = params["fc2_w"].T.astype(cd)     # [hidden, C]

    x2 = x.reshape(M, C)                     # residual stream, f32

    # ----- attention branch: LN1 fused into qkv; attention reads/writes (M, *) layout -----
    qkv = ln_linear(x2, params["norm1_w"], params["norm1_b"], w_qkv, params["qkv_b"],
                    eps=eps, activation=None, out_dtype=cd)                     # [M, 3C]
    y = attention_from_qkv(qkv, batch=B, seq=n_pad, num_heads=H, head_dim=D, group=G,
                           scale=scale, kv_len=N, out_dtype=cd)                 # [M, C]
    x2 = linear_residual(y, w_proj, params["proj_b"], x2, out_dtype=jnp.float32)

    # ----- MLP branch: LN2 fused into fc1 (+GELU); fc2 fuses bias + residual -----
    h = ln_linear(x2, params["norm2_w"], params["norm2_b"], w_fc1, params["fc1_b"],
                  eps=eps, activation="gelu", out_dtype=cd)                     # [M, hidden]
    x2 = linear_residual(h, w_fc2, params["fc2_b"], x2, out_dtype=jnp.float32)

    out = x2.reshape(B, n_pad, C)
    if n_pad != N:
        out = out[:, :N, :]
    return out


# ------------------------------------ reference -------------------------------------------
def block_forward_ref(x, params, *, num_heads, eps=1e-5):
    B, N, C = x.shape
    H = num_heads
    D = C // H
    scale = D ** (-0.5)

    def ln(v, g, b):
        mu = jnp.mean(v, axis=-1, keepdims=True)
        var = jnp.mean((v - mu) ** 2, axis=-1, keepdims=True)
        return (v - mu) / jnp.sqrt(var + eps) * g + b

    h = ln(x, params["norm1_w"], params["norm1_b"])
    qkv = h @ params["qkv_w"].T
    if params["qkv_b"] is not None:
        qkv = qkv + params["qkv_b"]
    qkv = qkv.reshape(B, N, 3, H, D).transpose(2, 0, 3, 1, 4)
    q, k, v = qkv[0], qkv[1], qkv[2]
    attn = (q @ jnp.swapaxes(k, -1, -2)) * scale
    attn = jax.nn.softmax(attn, axis=-1)
    y = (attn @ v).transpose(0, 2, 1, 3).reshape(B, N, C)
    y = y @ params["proj_w"].T + params["proj_b"]
    x = x + y
    h = ln(x, params["norm2_w"], params["norm2_b"])
    h = jax.nn.gelu(h @ params["fc1_w"].T + params["fc1_b"], approximate=False)
    return x + (h @ params["fc2_w"].T + params["fc2_b"])


if __name__ == "__main__":
    # Small, TPU-friendly (128-lane-dense) shapes consistent with the module.
    B, N, C = 2, 128, 128
    num_heads = 4
    mlp_ratio = 4.0
    hidden = int(C * mlp_ratio)

    key = jax.random.PRNGKey(0)
    ks = jax.random.split(key, 10)

    def uni(k, shape, fan_in):
        bound = 1.0 / (fan_in ** 0.5)
        return jax.random.uniform(k, shape, minval=-bound, maxval=bound, dtype=jnp.float32)

    x = jax.random.normal(ks[0], (B, N, C), dtype=jnp.float32)
    params = {
        "norm1_w": 1.0 + 0.1 * jax.random.normal(ks[1], (C,), dtype=jnp.float32),
        "norm1_b": 0.1 * jax.random.normal(ks[2], (C,), dtype=jnp.float32),
        "qkv_w": uni(ks[3], (3 * C, C), C),          # qkv_bias=False (module default)
        "qkv_b": None,
        "proj_w": uni(ks[4], (C, C), C),
        "proj_b": uni(ks[5], (C,), C),
        "norm2_w": 1.0 + 0.1 * jax.random.normal(ks[6], (C,), dtype=jnp.float32),
        "norm2_b": 0.1 * jax.random.normal(ks[7], (C,), dtype=jnp.float32),
        "fc1_w": uni(ks[8], (hidden, C), C),
        "fc1_b": uni(ks[8], (hidden,), C),
        "fc2_w": uni(ks[9], (C, hidden), hidden),
        "fc2_b": uni(ks[9], (C,), hidden),
    }

    fwd = jax.jit(functools.partial(block_forward, num_heads=num_heads))
    out = jax.block_until_ready(fwd(x, params))

    ref = block_forward_ref(x, params, num_heads=num_heads)

    assert out.shape == (B, N, C)
    # bf16 MXU inputs with f32 accumulation (exact softmax divide) -> loosened tolerance.
    assert jnp.allclose(out, ref, atol=5e-2, rtol=5e-2), float(jnp.max(jnp.abs(out - ref)))
    print("KERNEL_OK")
</pallas_src>

<mosaic_0001>
module attributes {stable_mosaic.version = 11 : i64} {
  func.func @_ln_linear_kernel(%arg0: i32, %arg1: memref<128x128xf32, #tpu.memory_space<vmem>>, %arg2: memref<1x128xf32, #tpu.memory_space<vmem>>, %arg3: memref<1x128xf32, #tpu.memory_space<vmem>>, %arg4: memref<128x384xbf16, #tpu.memory_space<vmem>>, %arg5: memref<128x384xbf16, #tpu.memory_space<vmem>>) attributes {dimension_semantics = [#tpu.dimension_semantics<parallel>], iteration_bounds = array<i64: 2>, scalar_prefetch = 0 : i64, scratch_operands = 0 : i64, tpu.core_type = #tpu.core_type<tc>, window_params = [{transform_indices = @transform_0, window_bounds = array<i64: 128, 128>}, {pipeline_mode = #tpu.pipeline_mode<synchronous>, transform_indices = @transform_1, window_bounds = array<i64: 1, 128>}, {pipeline_mode = #tpu.pipeline_mode<synchronous>, transform_indices = @transform_2, window_bounds = array<i64: 1, 128>}, {pipeline_mode = #tpu.pipeline_mode<synchronous>, transform_indices = @transform_3, window_bounds = array<i64: 128, 384>}, {transform_indices = @transform_4, window_bounds = array<i64: 128, 384>}]} {
    %c0 = arith.constant 0 : index
    %c0_0 = arith.constant 0 : index
    %0 = vector.load %arg1[%c0, %c0_0] : memref<128x128xf32, #tpu.memory_space<vmem>>, vector<128x128xf32>
    %cst = arith.constant dense<0.000000e+00> : vector<128xf32>
    %1 = vector.multi_reduction <add>, %0, %cst [1] : vector<128x128xf32> to vector<128xf32>
    %2 = vector.shape_cast %1 : vector<128xf32> to vector<128x1xf32>
    %cst_1 = arith.constant 1.280000e+02 : f32
    %3 = vector.broadcast %cst_1 : f32 to vector<128x1xf32>
    %4 = arith.divf %2, %3 : vector<128x1xf32>
    %5 = vector.broadcast %4 : vector<128x1xf32> to vector<128x128xf32>
    %6 = arith.subf %0, %5 : vector<128x128xf32>
    %7 = arith.mulf %6, %6 : vector<128x128xf32>
    %cst_2 = arith.constant dense<0.000000e+00> : vector<128xf32>
    %8 = vector.multi_reduction <add>, %7, %cst_2 [1] : vector<128x128xf32> to vector<128xf32>
    %9 = vector.shape_cast %8 : vector<128xf32> to vector<128x1xf32>
    %cst_3 = arith.constant 1.280000e+02 : f32
    %10 = vector.broadcast %cst_3 : f32 to vector<128x1xf32>
    %11 = arith.divf %9, %10 : vector<128x1xf32>
    %cst_4 = arith.constant 9.99999974E-6 : f32
    %12 = vector.broadcast %cst_4 : f32 to vector<128x1xf32>
    %13 = arith.addf %11, %12 : vector<128x1xf32>
    %14 = math.rsqrt %13 : vector<128x1xf32>
    %15 = vector.broadcast %14 : vector<128x1xf32> to vector<128x128xf32>
    %16 = arith.mulf %6, %15 : vector<128x128xf32>
    %c0_5 = arith.constant 0 : index
    %c0_6 = arith.constant 0 : index
    %17 = vector.load %arg2[%c0_5, %c0_6] : memref<1x128xf32, #tpu.memory_space<vmem>>, vector<1x128xf32>
    %18 = vector.broadcast %17 : vector<1x128xf32> to vector<128x128xf32>
    %19 = arith.mulf %16, %18 : vector<128x128xf32>
    %c0_7 = arith.constant 0 : index
    %c0_8 = arith.constant 0 : index
    %20 = vector.load %arg3[%c0_7, %c0_8] : memref<1x128xf32, #tpu.memory_space<vmem>>, vector<1x128xf32>
    %21 = vector.broadcast %20 : vector<1x128xf32> to vector<128x128xf32>
    %22 = arith.addf %19, %21 : vector<128x128xf32>
    %23 = arith.truncf %22 : vector<128x128xf32> to vector<128x128xbf16>
    %c0_9 = arith.constant 0 : index
    %c0_10 = arith.constant 0 : index
    %24 = vector.load %arg4[%c0_9, %c0_10] : memref<128x384xbf16, #tpu.memory_space<vmem>>, vector<128x384xbf16>
    %cst_11 = arith.constant dense<0.000000e+00> : vector<128x384xf32>
    %25 = tpu.matmul %23, %24, %cst_11 {dimension_numbers = #tpu.dot_dimension_numbers<[1], [0], [0], [1], [0, 0, 1, 1], [], []>} : vector<128x128xbf16>, vector<128x384xbf16>, vector<128x384xf32> -> vector<128x384xf32>
    %26 = arith.truncf %25 : vector<128x384xf32> to vector<128x384xbf16>
    %c0_12 = arith.constant 0 : index
    %c0_13 = arith.constant 0 : index
    %27 = vector.load %arg5[%c0_12, %c0_13] : memref<128x384xbf16, #tpu.memory_space<vmem>>, vector<128x384xbf16>
    tpu.vector_store %arg5[%c0_12, %c0_13], %26 {strides = array<i32>} : memref<128x384xbf16, #tpu.memory_space<vmem>>, vector<128x384xbf16>,
    return
  }
  func.func @transform_0(%arg0: i32) -> (i32, i32) {
    %c0_i32 = arith.constant 0 : i32
    %c0_i32_0 = arith.constant 0 : i32
    return %arg0, %c0_i32 : i32, i32
  }
  func.func @transform_1(%arg0: i32) -> (i32, i32) {
    %c0_i32 = arith.constant 0 : i32
    %c0_i32_0 = arith.constant 0 : i32
    %c0_i32_1 = arith.constant 0 : i32
    return %c0_i32, %c0_i32_0 : i32, i32
  }
  func.func @transform_2(%arg0: i32) -> (i32, i32) {
    %c0_i32 = arith.constant 0 : i32
    %c0_i32_0 = arith.constant 0 : i32
    %c0_i32_1 = arith.constant 0 : i32
    return %c0_i32, %c0_i32_0 : i32, i32
  }
  func.func @transform_3(%arg0: i32) -> (i32, i32) {
    %c0_i32 = arith.constant 0 : i32
    %c0_i32_0 = arith.constant 0 : i32
    %c0_i32_1 = arith.constant 0 : i32
    return %c0_i32, %c0_i32_0 : i32, i32
  }
  func.func @transform_4(%arg0: i32) -> (i32, i32) {
    %c0_i32 = arith.constant 0 : i32
    %c0_i32_0 = arith.constant 0 : i32
    return %arg0, %c0_i32 : i32, i32
  }
}

module attributes {stable_mosaic.version = 11 : i64} {
  func.func @_attention_kernel(%arg0: i32, %arg1: i32, %arg2: memref<128x128xbf16, #tpu.memory_space<vmem>>, %arg3: memref<128x128xbf16, #tpu.memory_space<vmem>>, %arg4: memref<128x128xbf16, #tpu.memory_space<vmem>>, %arg5: memref<128x128xbf16, #tpu.memory_space<vmem>>) attributes {dimension_semantics = [#tpu.dimension_semantics<parallel>, #tpu.dimension_semantics<parallel>], iteration_bounds = array<i64: 2, 1>, scalar_prefetch = 0 : i64, scratch_operands = 0 : i64, tpu.core_type = #tpu.core_type<tc>, window_params = [{transform_indices = @transform_0, window_bounds = array<i64: 128, 128>}, {transform_indices = @transform_1, window_bounds = array<i64: 128, 128>}, {transform_indices = @transform_2, window_bounds = array<i64: 128, 128>}, {transform_indices = @transform_3, window_bounds = array<i64: 128, 128>}]} {
    %c0 = arith.constant 0 : index
    %c0_0 = arith.constant 0 : index
    %0 = vector.load %arg2[%c0, %c0_0] : memref<128x128xbf16, #tpu.memory_space<vmem>>, vector<128x32xbf16>
    %cst = arith.constant 1.767580e-01 : bf16
    %1 = vector.broadcast %cst : bf16 to vector<128x32xbf16>
    %2 = arith.mulf %0, %1 : vector<128x32xbf16>
    %c0_1 = arith.constant 0 : index
    %c0_2 = arith.constant 0 : index
    %3 = vector.load %arg3[%c0_1, %c0_2] : memref<128x128xbf16, #tpu.memory_space<vmem>>, vector<128x32xbf16>
    %c0_3 = arith.constant 0 : index
    %c0_4 = arith.constant 0 : index
    %4 = vector.load %arg4[%c0_3, %c0_4] : memref<128x128xbf16, #tpu.memory_space<vmem>>, vector<128x32xbf16>
    %cst_5 = arith.constant dense<0.000000e+00> : vector<128x128xf32>
    %5 = tpu.matmul %2, %3, %cst_5 {dimension_numbers = #tpu.dot_dimension_numbers<[1], [1], [0], [0], [0, 0, 1, 0], [], []>} : vector<128x32xbf16>, vector<128x32xbf16>, vector<128x128xf32> -> vector<128x128xf32>
    %cst_6 = arith.constant dense<0xFF800000> : vector<128xf32>
    %6 = vector.multi_reduction <maximumf>, %5, %cst_6 [1] : vector<128x128xf32> to vector<128xf32>
    %7 = vector.shape_cast %6 : vector<128xf32> to vector<128x1xf32>
    %8 = vector.broadcast %7 : vector<128x1xf32> to vector<128x128xf32>
    %9 = arith.subf %5, %8 : vector<128x128xf32>
    %10 = math.exp %9 : vector<128x128xf32>
    %cst_7 = arith.constant dense<0.000000e+00> : vector<128xf32>
    %11 = vector.multi_reduction <add>, %10, %cst_7 [1] : vector<128x128xf32> to vector<128xf32>
    %12 = vector.shape_cast %11 : vector<128xf32> to vector<128x1xf32>
    %13 = arith.truncf %10 : vector<128x128xf32> to vector<128x128xbf16>
    %cst_8 = arith.constant dense<0.000000e+00> : vector<128x32xf32>
    %14 = tpu.matmul %13, %4, %cst_8 {dimension_numbers = #tpu.dot_dimension_numbers<[1], [0], [0], [1], [0, 0, 1, 1], [], []>} : vector<128x128xbf16>, vector<128x32xbf16>, vector<128x32xf32> -> vector<128x32xf32>
    %15 = vector.broadcast %12 : vector<128x1xf32> to vector<128x32xf32>
    %16 = arith.divf %14, %15 : vector<128x32xf32>
    %c0_9 = arith.constant 0 : index
    %c32 = arith.constant 32 : index
    %17 = vector.load %arg2[%c0_9, %c32] : memref<128x128xbf16, #tpu.memory_space<vmem>>, vector<128x32xbf16>
    %cst_10 = arith.constant 1.767580e-01 : bf16
    %18 = vector.broadcast %cst_10 : bf16 to vector<128x32xbf16>
    %19 = arith.mulf %17, %18 : vector<128x32xbf16>
    %c0_11 = arith.constant 0 : index
    %c32_12 = arith.constant 32 : index
    %20 = vector.load %arg3[%c0_11, %c32_12] : memref<128x128xbf16, #tpu.memory_space<vmem>>, vector<128x32xbf16>
    %c0_13 = arith.constant 0 : index
    %c32_14 = arith.constant 32 : index
    %21 = vector.load %arg4[%c0_13, %c32_14] : memref<128x128xbf16, #tpu.memory_space<vmem>>, vector<128x32xbf16>
    %cst_15 = arith.constant dense<0.000000e+00> : vector<128x128xf32>
    %22 = tpu.matmul %19, %20, %cst_15 {dimension_numbers = #tpu.dot_dimension_numbers<[1], [1], [0], [0], [0, 0, 1, 0], [], []>} : vector<128x32xbf16>, vector<128x32xbf16>, vector<128x128xf32> -> vector<128x128xf32>
    %cst_16 = arith.constant dense<0xFF800000> : vector<128xf32>
    %23 = vector.multi_reduction <maximumf>, %22, %cst_16 [1] : vector<128x128xf32> to vector<128xf32>
    %24 = vector.shape_cast %23 : vector<128xf32> to vector<128x1xf32>
    %25 = vector.broadcast %24 : vector<128x1xf32> to vector<128x128xf32>
    %26 = arith.subf %22, %25 : vector<128x128xf32>
    %27 = math.exp %26 : vector<128x128xf32>
    %cst_17 = arith.constant dense<0.000000e+00> : vector<128xf32>
    %28 = vector.multi_reduction <add>, %27, %cst_17 [1] : vector<128x128xf32> to vector<128xf32>
    %29 = vector.shape_cast %28 : vector<128xf32> to vector<128x1xf32>
    %30 = arith.truncf %27 : vector<128x128xf32> to vector<128x128xbf16>
    %cst_18 = arith.constant dense<0.000000e+00> : vector<128x32xf32>
    %31 = tpu.matmul %30, %21, %cst_18 {dimension_numbers = #tpu.dot_dimension_numbers<[1], [0], [0], [1], [0, 0, 1, 1], [], []>} : vector<128x128xbf16>, vector<128x32xbf16>, vector<128x32xf32> -> vector<128x32xf32>
    %32 = vector.broadcast %29 : vector<128x1xf32> to vector<128x32xf32>
    %33 = arith.divf %31, %32 : vector<128x32xf32>
    %c0_19 = arith.constant 0 : index
    %c64 = arith.constant 64 : index
    %34 = vector.load %arg2[%c0_19, %c64] : memref<128x128xbf16, #tpu.memory_space<vmem>>, vector<128x32xbf16>
    %cst_20 = arith.constant 1.767580e-01 : bf16
    %35 = vector.broadcast %cst_20 : bf16 to vector<128x32xbf16>
    %36 = arith.mulf %34, %35 : vector<128x32xbf16>
    %c0_21 = arith.constant 0 : index
    %c64_22 = arith.constant 64 : index
    %37 = vector.load %arg3[%c0_21, %c64_22] : memref<128x128xbf16, #tpu.memory_space<vmem>>, vector<128x32xbf16>
    %c0_23 = arith.constant 0 : index
    %c64_24 = arith.constant 64 : index
    %38 = vector.load %arg4[%c0_23, %c64_24] : memref<128x128xbf16, #tpu.memory_space<vmem>>, vector<128x32xbf16>
    %cst_25 = arith.constant dense<0.000000e+00> : vector<128x128xf32>
    %39 = tpu.matmul %36, %37, %cst_25 {dimension_numbers = #tpu.dot_dimension_numbers<[1], [1], [0], [0], [0, 0, 1, 0], [], []>} : vector<128x32xbf16>, vector<128x32xbf16>, vector<128x128xf32> -> vector<128x128xf32>
    %cst_26 = arith.constant dense<0xFF800000> : vector<128xf32>
    %40 = vector.multi_reduction <maximumf>, %39, %cst_26 [1] : vector<128x128xf32> to vector<128xf32>
    %41 = vector.shape_cast %40 : vector<128xf32> to vector<128x1xf32>
    %42 = vector.broadcast %41 : vector<128x1xf32> to vector<128x128xf32>
    %43 = arith.subf %39, %42 : vector<128x128xf32>
    %44 = math.exp %43 : vector<128x128xf32>
    %cst_27 = arith.constant dense<0.000000e+00> : vector<128xf32>
    %45 = vector.multi_reduction <add>, %44, %cst_27 [1] : vector<128x128xf32> to vector<128xf32>
    %46 = vector.shape_cast %45 : vector<128xf32> to vector<128x1xf32>
    %47 = arith.truncf %44 : vector<128x128xf32> to vector<128x128xbf16>
    %cst_28 = arith.constant dense<0.000000e+00> : vector<128x32xf32>
    %48 = tpu.matmul %47, %38, %cst_28 {dimension_numbers = #tpu.dot_dimension_numbers<[1], [0], [0], [1], [0, 0, 1, 1], [], []>} : vector<128x128xbf16>, vector<128x32xbf16>, vector<128x32xf32> -> vector<128x32xf32>
    %49 = vector.broadcast %46 : vector<128x1xf32> to vector<128x32xf32>
    %50 = arith.divf %48, %49 : vector<128x32xf32>
    %c0_29 = arith.constant 0 : index
    %c96 = arith.constant 96 : index
    %51 = vector.load %arg2[%c0_29, %c96] : memref<128x128xbf16, #tpu.memory_space<vmem>>, vector<128x32xbf16>
    %cst_30 = arith.constant 1.767580e-01 : bf16
    %52 = vector.broadcast %cst_30 : bf16 to vector<128x32xbf16>
    %53 = arith.mulf %51, %52 : vector<128x32xbf16>
    %c0_31 = arith.constant 0 : index
    %c96_32 = arith.constant 96 : index
    %54 = vector.load %arg3[%c0_31, %c96_32] : memref<128x128xbf16, #tpu.memory_space<vmem>>, vector<128x32xbf16>
    %c0_33 = arith.constant 0 : index
    %c96_34 = arith.constant 96 : index
    %55 = vector.load %arg4[%c0_33, %c96_34] : memref<128x128xbf16, #tpu.memory_space<vmem>>, vector<128x32xbf16>
    %cst_35 = arith.constant dense<0.000000e+00> : vector<128x128xf32>
    %56 = tpu.matmul %53, %54, %cst_35 {dimension_numbers = #tpu.dot_dimension_numbers<[1], [1], [0], [0], [0, 0, 1, 0], [], []>} : vector<128x32xbf16>, vector<128x32xbf16>, vector<128x128xf32> -> vector<128x128xf32>
    %cst_36 = arith.constant dense<0xFF800000> : vector<128xf32>
    %57 = vector.multi_reduction <maximumf>, %56, %cst_36 [1] : vector<128x128xf32> to vector<128xf32>
    %58 = vector.shape_cast %57 : vector<128xf32> to vector<128x1xf32>
    %59 = vector.broadcast %58 : vector<128x1xf32> to vector<128x128xf32>
    %60 = arith.subf %56, %59 : vector<128x128xf32>
    %61 = math.exp %60 : vector<128x128xf32>
    %cst_37 = arith.constant dense<0.000000e+00> : vector<128xf32>
    %62 = vector.multi_reduction <add>, %61, %cst_37 [1] : vector<128x128xf32> to vector<128xf32>
    %63 = vector.shape_cast %62 : vector<128xf32> to vector<128x1xf32>
    %64 = arith.truncf %61 : vector<128x128xf32> to vector<128x128xbf16>
    %cst_38 = arith.constant dense<0.000000e+00> : vector<128x32xf32>
    %65 = tpu.matmul %64, %55, %cst_38 {dimension_numbers = #tpu.dot_dimension_numbers<[1], [0], [0], [1], [0, 0, 1, 1], [], []>} : vector<128x128xbf16>, vector<128x32xbf16>, vector<128x32xf32> -> vector<128x32xf32>
    %66 = vector.broadcast %63 : vector<128x1xf32> to vector<128x32xf32>
    %67 = arith.divf %65, %66 : vector<128x32xf32>
    %68 = tpu.concatenate %16, %33, %50, %67 in 1 : vector<128x32xf32>, vector<128x32xf32>, vector<128x32xf32>, vector<128x32xf32> -> vector<128x128xf32>
    %69 = arith.truncf %68 : vector<128x128xf32> to vector<128x128xbf16>
    %c0_39 = arith.constant 0 : index
    %c0_40 = arith.constant 0 : index
    %70 = vector.load %arg5[%c0_39, %c0_40] : memref<128x128xbf16, #tpu.memory_space<vmem>>, vector<128x128xbf16>
    tpu.vector_store %arg5[%c0_39, %c0_40], %69 {strides = array<i32>} : memref<128x128xbf16, #tpu.memory_space<vmem>>, vector<128x128xbf16>,
    return
  }
  func.func @transform_0(%arg0: i32, %arg1: i32) -> (i32, i32) {
    %c0_i32 = arith.constant 0 : i32
    return %arg0, %arg1 : i32, i32
  }
  func.func @transform_1(%arg0: i32, %arg1: i32) -> (i32, i32) {
    %c1_i32 = arith.constant 1 : i32
    %0 = arith.addi %arg1, %c1_i32 : i32
    %c0_i32 = arith.constant 0 : i32
    return %arg0, %0 : i32, i32
  }
  func.func @transform_2(%arg0: i32, %arg1: i32) -> (i32, i32) {
    %c2_i32 = arith.constant 2 : i32
    %0 = arith.addi %arg1, %c2_i32 : i32
    %c0_i32 = arith.constant 0 : i32
    return %arg0, %0 : i32, i32
  }
  func.func @transform_3(%arg0: i32, %arg1: i32) -> (i32, i32) {
    %c0_i32 = arith.constant 0 : i32
    return %arg0, %arg1 : i32, i32
  }
}

module attributes {stable_mosaic.version = 11 : i64} {
  func.func @_linear_residual_kernel(%arg0: i32, %arg1: memref<128x128xbf16, #tpu.memory_space<vmem>>, %arg2: memref<128x128xbf16, #tpu.memory_space<vmem>>, %arg3: memref<1x128xf32, #tpu.memory_space<vmem>>, %arg4: memref<128x128xf32, #tpu.memory_space<vmem>>, %arg5: memref<128x128xf32, #tpu.memory_space<vmem>>) attributes {dimension_semantics = [#tpu.dimension_semantics<parallel>], iteration_bounds = array<i64: 2>, scalar_prefetch = 0 : i64, scratch_operands = 0 : i64, tpu.core_type = #tpu.core_type<tc>, window_params = [{transform_indices = @transform_0, window_bounds = array<i64: 128, 128>}, {pipeline_mode = #tpu.pipeline_mode<synchronous>, transform_indices = @transform_1, window_bounds = array<i64: 128, 128>}, {pipeline_mode = #tpu.pipeline_mode<synchronous>, transform_indices = @transform_2, window_bounds = array<i64: 1, 128>}, {transform_indices = @transform_3, window_bounds = array<i64: 128, 128>}, {transform_indices = @transform_4, window_bounds = array<i64: 128, 128>}]} {
    %c0 = arith.constant 0 : index
    %c0_0 = arith.constant 0 : index
    %0 = vector.load %arg1[%c0, %c0_0] : memref<128x128xbf16, #tpu.memory_space<vmem>>, vector<128x128xbf16>
    %c0_1 = arith.constant 0 : index
    %c0_2 = arith.constant 0 : index
    %1 = vector.load %arg2[%c0_1, %c0_2] : memref<128x128xbf16, #tpu.memory_space<vmem>>, vector<128x128xbf16>
    %cst = arith.constant dense<0.000000e+00> : vector<128x128xf32>
    %2 = tpu.matmul %0, %1, %cst {dimension_numbers = #tpu.dot_dimension_numbers<[1], [0], [0], [1], [0, 0, 1, 1], [], []>} : vector<128x128xbf16>, vector<128x128xbf16>, vector<128x128xf32> -> vector<128x128xf32>
    %c0_3 = arith.constant 0 : index
    %c0_4 = arith.constant 0 : index
    %3 = vector.load %arg3[%c0_3, %c0_4] : memref<1x128xf32, #tpu.memory_space<vmem>>, vector<1x128xf32>
    %4 = vector.broadcast %3 : vector<1x128xf32> to vector<128x128xf32>
    %5 = arith.addf %2, %4 : vector<128x128xf32>
    %c0_5 = arith.constant 0 : index
    %c0_6 = arith.constant 0 : index
    %6 = vector.load %arg4[%c0_5, %c0_6] : memref<128x128xf32, #tpu.memory_space<vmem>>, vector<128x128xf32>
    %7 = arith.addf %5, %6 : vector<128x128xf32>
    %c0_7 = arith.constant 0 : index
    %c0_8 = arith.constant 0 : index
    %8 = vector.load %arg5[%c0_7, %c0_8] : memref<128x128xf32, #tpu.memory_space<vmem>>, vector<128x128xf32>
    tpu.vector_store %arg5[%c0_7, %c0_8], %7 {strides = array<i32>} : memref<128x128xf32, #tpu.memory_space<vmem>>, vector<128x128xf32>,
    return
  }
  func.func @transform_0(%arg0: i32) -> (i32, i32) {
    %c0_i32 = arith.constant 0 : i32
    %c0_i32_0 = arith.constant 0 : i32
    return %arg0, %c0_i32 : i32, i32
  }
  func.func @transform_1(%arg0: i32) -> (i32, i32) {
    %c0_i32 = arith.constant 0 : i32
    %c0_i32_0 = arith.constant 0 : i32
    %c0_i32_1 = arith.constant 0 : i32
    return %c0_i32, %c0_i32_0 : i32, i32
  }
  func.func @transform_2(%arg0: i32) -> (i32, i32) {
    %c0_i32 = arith.constant 0 : i32
    %c0_i32_0 = arith.constant 0 : i32
    %c0_i32_1 = arith.constant 0 : i32
    return %c0_i32, %c0_i32_0 : i32, i32
  }
  func.func @transform_3(%arg0: i32) -> (i32, i32) {
    %c0_i32 = arith.constant 0 : i32
    %c0_i32_0 = arith.constant 0 : i32
    return %arg0, %c0_i32 : i32, i32
  }
  func.func @transform_4(%arg0: i32) -> (i32, i32) {
    %c0_i32 = arith.constant 0 : i32
    %c0_i32_0 = arith.constant 0 : i32
    return %arg0, %c0_i32 : i32, i32
  }
}

module attributes {stable_mosaic.version = 11 : i64} {
  func.func @_ln_linear_kernel(%arg0: i32, %arg1: memref<128x128xf32, #tpu.memory_space<vmem>>, %arg2: memref<1x128xf32, #tpu.memory_space<vmem>>, %arg3: memref<1x128xf32, #tpu.memory_space<vmem>>, %arg4: memref<128x512xbf16, #tpu.memory_space<vmem>>, %arg5: memref<1x512xf32, #tpu.memory_space<vmem>>, %arg6: memref<128x512xbf16, #tpu.memory_space<vmem>>) attributes {dimension_semantics = [#tpu.dimension_semantics<parallel>], iteration_bounds = array<i64: 2>, scalar_prefetch = 0 : i64, scratch_operands = 0 : i64, tpu.core_type = #tpu.core_type<tc>, window_params = [{transform_indices = @transform_0, window_bounds = array<i64: 128, 128>}, {pipeline_mode = #tpu.pipeline_mode<synchronous>, transform_indices = @transform_1, window_bounds = array<i64: 1, 128>}, {pipeline_mode = #tpu.pipeline_mode<synchronous>, transform_indices = @transform_2, window_bounds = array<i64: 1, 128>}, {pipeline_mode = #tpu.pipeline_mode<synchronous>, transform_indices = @transform_3, window_bounds = array<i64: 128, 512>}, {pipeline_mode = #tpu.pipeline_mode<synchronous>, transform_indices = @transform_4, window_bounds = array<i64: 1, 512>}, {transform_indices = @transform_5, window_bounds = array<i64: 128, 512>}]} {
    %c0 = arith.constant 0 : index
    %c0_0 = arith.constant 0 : index
    %0 = vector.load %arg1[%c0, %c0_0] : memref<128x128xf32, #tpu.memory_space<vmem>>, vector<128x128xf32>
    %cst = arith.constant dense<0.000000e+00> : vector<128xf32>
    %1 = vector.multi_reduction <add>, %0, %cst [1] : vector<128x128xf32> to vector<128xf32>
    %2 = vector.shape_cast %1 : vector<128xf32> to vector<128x1xf32>
    %cst_1 = arith.constant 1.280000e+02 : f32
    %3 = vector.broadcast %cst_1 : f32 to vector<128x1xf32>
    %4 = arith.divf %2, %3 : vector<128x1xf32>
    %5 = vector.broadcast %4 : vector<128x1xf32> to vector<128x128xf32>
    %6 = arith.subf %0, %5 : vector<128x128xf32>
    %7 = arith.mulf %6, %6 : vector<128x128xf32>
    %cst_2 = arith.constant dense<0.000000e+00> : vector<128xf32>
    %8 = vector.multi_reduction <add>, %7, %cst_2 [1] : vector<128x128xf32> to vector<128xf32>
    %9 = vector.shape_cast %8 : vector<128xf32> to vector<128x1xf32>
    %cst_3 = arith.constant 1.280000e+02 : f32
    %10 = vector.broadcast %cst_3 : f32 to vector<128x1xf32>
    %11 = arith.divf %9, %10 : vector<128x1xf32>
    %cst_4 = arith.constant 9.99999974E-6 : f32
    %12 = vector.broadcast %cst_4 : f32 to vector<128x1xf32>
    %13 = arith.addf %11, %12 : vector<128x1xf32>
    %14 = math.rsqrt %13 : vector<128x1xf32>
    %15 = vector.broadcast %14 : vector<128x1xf32> to vector<128x128xf32>
    %16 = arith.mulf %6, %15 : vector<128x128xf32>
    %c0_5 = arith.constant 0 : index
    %c0_6 = arith.constant 0 : index
    %17 = vector.load %arg2[%c0_5, %c0_6] : memref<1x128xf32, #tpu.memory_space<vmem>>, vector<1x128xf32>
    %18 = vector.broadcast %17 : vector<1x128xf32> to vector<128x128xf32>
    %19 = arith.mulf %16, %18 : vector<128x128xf32>
    %c0_7 = arith.constant 0 : index
    %c0_8 = arith.constant 0 : index
    %20 = vector.load %arg3[%c0_7, %c0_8] : memref<1x128xf32, #tpu.memory_space<vmem>>, vector<1x128xf32>
    %21 = vector.broadcast %20 : vector<1x128xf32> to vector<128x128xf32>
    %22 = arith.addf %19, %21 : vector<128x128xf32>
    %23 = arith.truncf %22 : vector<128x128xf32> to vector<128x128xbf16>
    %c0_9 = arith.constant 0 : index
    %c0_10 = arith.constant 0 : index
    %24 = vector.load %arg4[%c0_9, %c0_10] : memref<128x512xbf16, #tpu.memory_space<vmem>>, vector<128x512xbf16>
    %cst_11 = arith.constant dense<0.000000e+00> : vector<128x512xf32>
    %25 = tpu.matmul %23, %24, %cst_11 {dimension_numbers = #tpu.dot_dimension_numbers<[1], [0], [0], [1], [0, 0, 1, 1], [], []>} : vector<128x128xbf16>, vector<128x512xbf16>, vector<128x512xf32> -> vector<128x512xf32>
    %c0_12 = arith.constant 0 : index
    %c0_13 = arith.constant 0 : index
    %26 = vector.load %arg5[%c0_12, %c0_13] : memref<1x512xf32, #tpu.memory_space<vmem>>, vector<1x512xf32>
    %27 = vector.broadcast %26 : vector<1x512xf32> to vector<128x512xf32>
    %28 = arith.addf %25, %27 : vector<128x512xf32>
    %cst_14 = arith.constant 5.000000e-01 : f32
    %29 = vector.broadcast %cst_14 : f32 to vector<128x512xf32>
    %30 = arith.mulf %29, %28 : vector<128x512xf32>
    %cst_15 = arith.constant 0.707106769 : f32
    %31 = vector.broadcast %cst_15 : f32 to vector<128x512xf32>
    %32 = arith.mulf %28, %31 : vector<128x512xf32>
    %cst_16 = arith.constant 0.000000e+00 : f32
    %33 = vector.broadcast %cst_16 : f32 to vector<128x512xf32>
    %34 = arith.cmpf olt, %32, %33 : vector<128x512xf32>
    %cst_17 = arith.constant -1.000000e+00 : f32
    %cst_18 = arith.constant 1.000000e+00 : f32
    %35 = vector.broadcast %cst_17 : f32 to vector<128x512xf32>
    %36 = vector.broadcast %cst_18 : f32 to vector<128x512xf32>
    %37 = arith.select %34, %35, %36 : vector<128x512xi1>, vector<128x512xf32>
    %38 = math.absf %32 : vector<128x512xf32>
    %cst_19 = arith.constant 0.327591091 : f32
    %39 = vector.broadcast %cst_19 : f32 to vector<128x512xf32>
    %40 = arith.mulf %39, %38 : vector<128x512xf32>
    %cst_20 = arith.constant 1.000000e+00 : f32
    %41 = vector.broadcast %cst_20 : f32 to vector<128x512xf32>
    %42 = arith.addf %41, %40 : vector<128x512xf32>
    %cst_21 = arith.constant 1.000000e+00 : f32
    %43 = vector.broadcast %cst_21 : f32 to vector<128x512xf32>
    %44 = arith.divf %43, %42 : vector<128x512xf32>
    %cst_22 = arith.constant 1.06140542 : f32
    %45 = vector.broadcast %cst_22 : f32 to vector<128x512xf32>
    %46 = arith.mulf %44, %45 : vector<128x512xf32>
    %cst_23 = arith.constant -1.45315206 : f32
    %47 = vector.broadcast %cst_23 : f32 to vector<128x512xf32>
    %48 = arith.addf %47, %46 : vector<128x512xf32>
    %49 = arith.mulf %44, %48 : vector<128x512xf32>
    %cst_24 = arith.constant 1.42141378 : f32
    %50 = vector.broadcast %cst_24 : f32 to vector<128x512xf32>
    %51 = arith.addf %50, %49 : vector<128x512xf32>
    %52 = arith.mulf %44, %51 : vector<128x512xf32>
    %cst_25 = arith.constant -0.284496725 : f32
    %53 = vector.broadcast %cst_25 : f32 to vector<128x512xf32>
    %54 = arith.addf %53, %52 : vector<128x512xf32>
    %55 = arith.mulf %44, %54 : vector<128x512xf32>
    %cst_26 = arith.constant 0.254829586 : f32
    %56 = vector.broadcast %cst_26 : f32 to vector<128x512xf32>
    %57 = arith.addf %56, %55 : vector<128x512xf32>
    %58 = arith.mulf %44, %57 : vector<128x512xf32>
    %cst_27 = arith.constant 0.000000e+00 : f32
    %59 = vector.broadcast %cst_27 : f32 to vector<128x512xf32>
    %60 = arith.subf %59, %38 : vector<128x512xf32>
    %61 = arith.mulf %60, %38 : vector<128x512xf32>
    %62 = math.exp %61 : vector<128x512xf32>
    %63 = arith.mulf %58, %62 : vector<128x512xf32>
    %cst_28 = arith.constant 1.000000e+00 : f32
    %64 = vector.broadcast %cst_28 : f32 to vector<128x512xf32>
    %65 = arith.subf %64, %63 : vector<128x512xf32>
    %66 = arith.mulf %37, %65 : vector<128x512xf32>
    %cst_29 = arith.constant 1.000000e+00 : f32
    %67 = vector.broadcast %cst_29 : f32 to vector<128x512xf32>
    %68 = arith.addf %67, %66 : vector<128x512xf32>
    %69 = arith.mulf %30, %68 : vector<128x512xf32>
    %70 = arith.truncf %69 : vector<128x512xf32> to vector<128x512xbf16>
    %c0_30 = arith.constant 0 : index
    %c0_31 = arith.constant 0 : index
    %71 = vector.load %arg6[%c0_30, %c0_31] : memref<128x512xbf16, #tpu.memory_space<vmem>>, vector<128x512xbf16>
    tpu.vector_store %arg6[%c0_30, %c0_31], %70 {strides = array<i32>} : memref<128x512xbf16, #tpu.memory_space<vmem>>, vector<128x512xbf16>,
    return
  }
  func.func @transform_0(%arg0: i32) -> (i32, i32) {
    %c0_i32 = arith.constant 0 : i32
    %c0_i32_0 = arith.constant 0 : i32
    return %arg0, %c0_i32 : i32, i32
  }
  func.func @transform_1(%arg0: i32) -> (i32, i32) {
    %c0_i32 = arith.constant 0 : i32
    %c0_i32_0 = arith.constant 0 : i32
    %c0_i32_1 = arith.constant 0 : i32
    return %c0_i32, %c0_i32_0 : i32, i32
  }
  func.func @transform_2(%arg0: i32) -> (i32, i32) {
    %c0_i32 = arith.constant 0 : i32
    %c0_i32_0 = arith.constant 0 : i32
    %c0_i32_1 = arith.constant 0 : i32
    return %c0_i32, %c0_i32_0 : i32, i32
  }
  func.func @transform_3(%arg0: i32) -> (i32, i32) {
    %c0_i32 = arith.constant 0 : i32
    %c0_i32_0 = arith.constant 0 : i32
    %c0_i32_1 = arith.constant 0 : i32
    return %c0_i32, %c0_i32_0 : i32, i32
  }
  func.func @transform_4(%arg0: i32) -> (i32, i32) {
    %c0_i32 = arith.constant 0 : i32
    %c0_i32_0 = arith.constant 0 : i32
    %c0_i32_1 = arith.constant 0 : i32
    return %c0_i32, %c0_i32_0 : i32, i32
  }
  func.func @transform_5(%arg0: i32) -> (i32, i32) {
    %c0_i32 = arith.constant 0 : i32
    %c0_i32_0 = arith.constant 0 : i32
    return %arg0, %c0_i32 : i32, i32
  }
}

module attributes {stable_mosaic.version = 11 : i64} {
  func.func @_linear_residual_kernel(%arg0: i32, %arg1: memref<128x512xbf16, #tpu.memory_space<vmem>>, %arg2: memref<512x128xbf16, #tpu.memory_space<vmem>>, %arg3: memref<1x128xf32, #tpu.memory_space<vmem>>, %arg4: memref<128x128xf32, #tpu.memory_space<vmem>>, %arg5: memref<128x128xf32, #tpu.memory_space<vmem>>) attributes {dimension_semantics = [#tpu.dimension_semantics<parallel>], iteration_bounds = array<i64: 2>, scalar_prefetch = 0 : i64, scratch_operands = 0 : i64, tpu.core_type = #tpu.core_type<tc>, window_params = [{transform_indices = @transform_0, window_bounds = array<i64: 128, 512>}, {pipeline_mode = #tpu.pipeline_mode<synchronous>, transform_indices = @transform_1, window_bounds = array<i64: 512, 128>}, {pipeline_mode = #tpu.pipeline_mode<synchronous>, transform_indices = @transform_2, window_bounds = array<i64: 1, 128>}, {transform_indices = @transform_3, window_bounds = array<i64: 128, 128>}, {transform_indices = @transform_4, window_bounds = array<i64: 128, 128>}]} {
    %c0 = arith.constant 0 : index
    %c0_0 = arith.constant 0 : index
    %0 = vector.load %arg1[%c0, %c0_0] : memref<128x512xbf16, #tpu.memory_space<vmem>>, vector<128x512xbf16>
    %c0_1 = arith.constant 0 : index
    %c0_2 = arith.constant 0 : index
    %1 = vector.load %arg2[%c0_1, %c0_2] : memref<512x128xbf16, #tpu.memory_space<vmem>>, vector<512x128xbf16>
    %cst = arith.constant dense<0.000000e+00> : vector<128x128xf32>
    %2 = tpu.matmul %0, %1, %cst {dimension_numbers = #tpu.dot_dimension_numbers<[1], [0], [0], [1], [0, 0, 1, 1], [], []>} : vector<128x512xbf16>, vector<512x128xbf16>, vector<128x128xf32> -> vector<128x128xf32>
    %c0_3 = arith.constant 0 : index
    %c0_4 = arith.constant 0 : index
    %3 = vector.load %arg3[%c0_3, %c0_4] : memref<1x128xf32, #tpu.memory_space<vmem>>, vector<1x128xf32>
    %4 = vector.broadcast %3 : vector<1x128xf32> to vector<128x128xf32>
    %5 = arith.addf %2, %4 : vector<128x128xf32>
    %c0_5 = arith.constant 0 : index
    %c0_6 = arith.constant 0 : index
    %6 = vector.load %arg4[%c0_5, %c0_6] : memref<128x128xf32, #tpu.memory_space<vmem>>, vector<128x128xf32>
    %7 = arith.addf %5, %6 : vector<128x128xf32>
    %c0_7 = arith.constant 0 : index
    %c0_8 = arith.constant 0 : index
    %8 = vector.load %arg5[%c0_7, %c0_8] : memref<128x128xf32, #tpu.memory_space<vmem>>, vector<128x128xf32>
    tpu.vector_store %arg5[%c0_7, %c0_8], %7 {strides = array<i32>} : memref<128x128xf32, #tpu.memory_space<vmem>>, vector<128x128xf32>,
    return
  }
  func.func @transform_0(%arg0: i32) -> (i32, i32) {
    %c0_i32 = arith.constant 0 : i32
    %c0_i32_0 = arith.constant 0 : i32
    return %arg0, %c0_i32 : i32, i32
  }
  func.func @transform_1(%arg0: i32) -> (i32, i32) {
    %c0_i32 = arith.constant 0 : i32
    %c0_i32_0 = arith.constant 0 : i32
    %c0_i32_1 = arith.constant 0 : i32
    return %c0_i32, %c0_i32_0 : i32, i32
  }
  func.func @transform_2(%arg0: i32) -> (i32, i32) {
    %c0_i32 = arith.constant 0 : i32
    %c0_i32_0 = arith.constant 0 : i32
    %c0_i32_1 = arith.constant 0 : i32
    return %c0_i32, %c0_i32_0 : i32, i32
  }
  func.func @transform_3(%arg0: i32) -> (i32, i32) {
    %c0_i32 = arith.constant 0 : i32
    %c0_i32_0 = arith.constant 0 : i32
    return %arg0, %c0_i32 : i32, i32
  }
  func.func @transform_4(%arg0: i32) -> (i32, i32) {
    %c0_i32 = arith.constant 0 : i32
    %c0_i32_0 = arith.constant 0 : i32
    return %arg0, %c0_i32 : i32, i32
  }
}

</mosaic_0001>

<bundles_post_ra>
// kernel: block_forward.7
= control target key start
LH: loop header
LB: loop body
LE: loop exit
PB: predicated region body
PF: predicated region fallthrough
CT: control target
= control target key end

     0   :  { %s679_s15 = smov 0   ;;  %s784_s0 = inlined_call_operand.vmem [shape: bf16[256,128], index: 0, kind: input, shape index: {}]   ;;  %s785_s1 = inlined_call_operand.vmem [shape: bf16[128,128], index: 1, kind: input, shape index: {}]   ;;  %s786_s2 = inlined_call_operand.vmem [shape: f32[1,128], index: 2, kind: input, shape index: {}]   ;;  %s787_s3 = inlined_call_operand.vmem [shape: f32[256,128], index: 3, kind: input, shape index: {}]   ;;  %s788_s4 = inlined_call_operand.vmem [shape: f32[256,128], index: 4, kind: output, shape index: {}]  }
   0x1 LB: > { %s520_s16 = sadd.s32 4294967295, %s652_s15   ;;  %p524_p0 = scmp.ge.s32.totalorder %s652_s15, 1  ;;  %s652_s15 = sphi %s679_s15, %s14_s15  }
   0x2   : > { %p174_p1 = scmp.lt.s32.totalorder %s652_s15, 3 }
   0x4   : > { %p175_p2 = pnand %p524_p0, %p174_p1 }
   0x5   : > { %s525_s25 = sshll.u32 (!%p175_p2), %s520_s16, 4 }
   0x6   : > { %178 = sbr.rel (%p175_p2) target bundleno = 206 (0xce), region = 36  ;;  %p206_p3 = scmp.lt.s32.totalorder (!%p175_p2), %s525_s25, 31 }
   0xb   : > { %v612_v0 = vld [vmem:[%s785_s1 + $0x38] sm:$0xff]  ;;  %v611_v1 = vld [vmem:[%s785_s1 + $0x30] sm:$0xff]  ;;  %v610_v2 = vld [vmem:[%s785_s1 + $0x28] sm:$0xff]  ;;  %s790_s25 = smov (!%p206_p3, %s525_s25), 31 }
   0xc   : > { %355 = vmatpush.bf16.msra.mxu0 %v612_v0  ;;  %613 = vmatpush.bf16.msra.mxu1 %v612_v0  ;;  %v609_v3 = vld [vmem:[%s785_s1 + $0x20] sm:$0xff]  ;;  %v608_v4 = vld [vmem:[%s785_s1 + $0x18] sm:$0xff]  ;;  %v607_v5 = vld [vmem:[%s785_s1 + $0x10] sm:$0xff]  ;;  %s526_s6 = sshll.u32 %s790_s25, 2  ;;  %s528_s12 = sshll.u32 %s790_s25, 3 }
   0xd   : > { %614 = vmatpush.bf16.msra.mxu2 %v612_v0  ;;  %615 = vmatpush.bf16.msra.mxu3 %v612_v0  ;;  %v606_v6 = vld [vmem:[%s785_s1 + $0x8] sm:$0xff]  ;;  %v605_v7 = vld [vmem:[%s785_s1] sm:$0xff]  ;;  %s209_s11 = scalar_lea.vmem %s784_s0, %s526_s6  ;;  %s721_s16 = scalar_lea.vmem %s787_s3, %s528_s12 }
   0xe   : > { %v597_v8 = vld [vmem:[%s209_s11] sm:$0xff]  ;;  %v599_v9 = vld [vmem:[%s209_s11 + $0x10] sm:$0xff]  ;;  %v598_v12 = vld [vmem:[%s209_s11 + $0x8] sm:$0xff]  ;;  %s735_s21 = scalar_lea.vmem %s788_s4, %s528_s12 }
   0xf   : > { %v601_v10 = vld [vmem:[%s209_s11 + $0x20] sm:$0xff]  ;;  %v603_v11 = vld [vmem:[%s209_s11 + $0x30] sm:$0xff]  ;;  %v600_v13 = vld [vmem:[%s209_s11 + $0x18] sm:$0xff] }
  0x10   : > { %356 = vmatpush.bf16.msra.mxu0 %v611_v1  ;;  %616 = vmatpush.bf16.msra.mxu1 %v611_v1  ;;  %v602_v14 = vld [vmem:[%s209_s11 + $0x28] sm:$0xff]  ;;  %v604_v15 = vld [vmem:[%s209_s11 + $0x38] sm:$0xff]  ;;  %v726_v16 = vld [vmem:[%s786_s2] ss:$0 sm:$0xff] }
  0x11   : > { %617 = vmatpush.bf16.msra.mxu2 %v611_v1  ;;  %618 = vmatpush.bf16.msra.mxu3 %v611_v1  ;;  %v404_v18 = vld [vmem:[%s721_s16] sm:$0xff]  ;;  %v405_v32 = vld [vmem:[%s721_s16 + $0x8] sm:$0xff]  ;;  %v406_v48 = vld [vmem:[%s721_s16 + $0x10] sm:$0xff] }
  0x12   : > { %v408_v20 = vld [vmem:[%s721_s16 + $0x20] sm:$0xff]  ;;  %v409_v34 = vld [vmem:[%s721_s16 + $0x28] sm:$0xff]  ;;  %v410_v50 = vld [vmem:[%s721_s16 + $0x30] sm:$0xff] }
  0x13   : > { %v412_v26 = vld [vmem:[%s721_s16 + $0x40] sm:$0xff]  ;;  %v413_v42 = vld [vmem:[%s721_s16 + $0x48] sm:$0xff]  ;;  %v414_v58 = vld [vmem:[%s721_s16 + $0x50] sm:$0xff] }
  0x14   : > { %357 = vmatpush.bf16.msra.mxu0 %v610_v2  ;;  %619 = vmatpush.bf16.msra.mxu1 %v610_v2  ;;  %v416_v28 = vld [vmem:[%s721_s16 + $0x60] sm:$0xff]  ;;  %v417_v44 = vld [vmem:[%s721_s16 + $0x68] sm:$0xff]  ;;  %v418_v60 = vld [vmem:[%s721_s16 + $0x70] sm:$0xff] }
  0x15   : > { %620 = vmatpush.bf16.msra.mxu2 %v610_v2  ;;  %621 = vmatpush.bf16.msra.mxu3 %v610_v2  ;;  %v407_v0 = vld [vmem:[%s721_s16 + $0x18] sm:$0xff] }
  0x16   : > { %v411_v2 = vld [vmem:[%s721_s16 + $0x38] sm:$0xff] }
  0x18   : > { %358 = vmatpush.bf16.msra.mxu0 %v609_v3  ;;  %622 = vmatpush.bf16.msra.mxu1 %v609_v3 }
  0x19   : > { %623 = vmatpush.bf16.msra.mxu2 %v609_v3  ;;  %624 = vmatpush.bf16.msra.mxu3 %v609_v3 }
  0x1c   : > { %359 = vmatpush.bf16.msra.mxu0 %v608_v4  ;;  %625 = vmatpush.bf16.msra.mxu1 %v608_v4 }
  0x1d   : > { %626 = vmatpush.bf16.msra.mxu2 %v608_v4  ;;  %627 = vmatpush.bf16.msra.mxu3 %v608_v4 }
  0x20   : > { %360 = vmatpush.bf16.msra.mxu0 %v607_v5  ;;  %628 = vmatpush.bf16.msra.mxu1 %v607_v5 }
  0x21   : > { %629 = vmatpush.bf16.msra.mxu2 %v607_v5  ;;  %630 = vmatpush.bf16.msra.mxu3 %v607_v5 }
  0x24   : > { %361 = vmatpush.bf16.msra.mxu0 %v606_v6  ;;  %631 = vmatpush.bf16.msra.mxu1 %v606_v6 }
  0x25   : > { %632 = vmatpush.bf16.msra.mxu2 %v606_v6  ;;  %633 = vmatpush.bf16.msra.mxu3 %v606_v6 }
  0x28   : > { %362 = vmatpush.bf16.msra.mxu0 %v605_v7  ;;  %634 = vmatpush.bf16.msra.mxu1 %v605_v7 }
  0x29   : > { %635 = vmatpush.bf16.msra.mxu2 %v605_v7  ;;  %636 = vmatpush.bf16.msra.mxu3 %v605_v7 }
  0x2b   : > { %363 = vmatmul.bf16.vlgmr.msra.gmra.mxu0 %v597_v8  ;;  %373 = vmatmul.bf16.vlgmr.msra.gmra.mxu1 %v599_v9 }
  0x2c   : > { %383 = vmatmul.bf16.vlgmr.msra.gmra.mxu2 %v601_v10  ;;  %393 = vmatmul.bf16.vlgmr.msra.gmra.mxu3 %v603_v11  ;;  %v415_v10 = vld [vmem:[%s721_s16 + $0x58] sm:$0xff] }
  0x3b   : > { %368 = vmatmul.bf16.gmra.mxu0 %v598_v12  ;;  %378 = vmatmul.bf16.gmra.mxu1 %v600_v13  ;;  %v419_v12 = vld [vmem:[%s721_s16 + $0x78] sm:$0xff] }
  0x3c   : > { %388 = vmatmul.bf16.gmra.mxu2 %v602_v14  ;;  %398 = vmatmul.bf16.gmra.mxu3 %v604_v15 }
  0xa8   : > { %v364_v17 = vpop.f32.mrf.mxu0  ;;  %v374_v19 = vpop.f32.mrf.mxu1 }
  0xa9   : > { %v365_v21 = vadd.f32 %v726_v16, %v364_v17  ;;  %v375_v22 = vadd.f32 %v726_v16, %v374_v19 }
  0xab   : > { %v420_v23 = vadd.f32 %v404_v18, %v365_v21  ;;  %v424_v24 = vadd.f32 %v408_v20, %v375_v22 }
  0xad   : > { %436 = vst [vmem:[%s735_s21] sm:$0xff] %v420_v23 }
  0xae   : > { %440 = vst [vmem:[%s735_s21 + $0x20] sm:$0xff] %v424_v24 }
  0xaf   : > { %v384_v25 = vpop.f32.mrf.mxu2  ;;  %v394_v27 = vpop.f32.mrf.mxu3 }
  0xb0   : > { %v385_v29 = vadd.f32 %v726_v16, %v384_v25  ;;  %v395_v30 = vadd.f32 %v726_v16, %v394_v27  ;;  %v366_v31 = vpop.f32.mrf.mxu0  ;;  %v376_v33 = vpop.f32.mrf.mxu1 }
  0xb1   : > { %v367_v35 = vadd.f32 %v726_v16, %v366_v31  ;;  %v377_v36 = vadd.f32 %v726_v16, %v376_v33 }
  0xb2   : > { %v428_v37 = vadd.f32 %v412_v26, %v385_v29  ;;  %v432_v38 = vadd.f32 %v416_v28, %v395_v30 }
  0xb3   : > { %v421_v39 = vadd.f32 %v405_v32, %v367_v35  ;;  %v425_v40 = vadd.f32 %v409_v34, %v377_v36 }
  0xb4   : > { %444 = vst [vmem:[%s735_s21 + $0x40] sm:$0xff] %v428_v37 }
  0xb5   : > { %448 = vst [vmem:[%s735_s21 + $0x60] sm:$0xff] %v432_v38 }
  0xb6   : > { %437 = vst [vmem:[%s735_s21 + $0x8] sm:$0xff] %v421_v39 }
  0xb7   : > { %441 = vst [vmem:[%s735_s21 + $0x28] sm:$0xff] %v425_v40  ;;  %v386_v41 = vpop.f32.mrf.mxu2  ;;  %v396_v43 = vpop.f32.mrf.mxu3 }
  0xb8   : > { %v387_v45 = vadd.f32 %v726_v16, %v386_v41  ;;  %v397_v46 = vadd.f32 %v726_v16, %v396_v43  ;;  %v369_v47 = vpop.f32.mrf.mxu0  ;;  %v379_v49 = vpop.f32.mrf.mxu1 }
  0xb9   : > { %v370_v51 = vadd.f32 %v726_v16, %v369_v47  ;;  %v380_v52 = vadd.f32 %v726_v16, %v379_v49 }
  0xba   : > { %v429_v53 = vadd.f32 %v413_v42, %v387_v45  ;;  %v433_v54 = vadd.f32 %v417_v44, %v397_v46 }
  0xbb   : > { %v422_v55 = vadd.f32 %v406_v48, %v370_v51  ;;  %v426_v56 = vadd.f32 %v410_v50, %v380_v52 }
  0xbc   : > { %445 = vst [vmem:[%s735_s21 + $0x48] sm:$0xff] %v429_v53 }
  0xbd   : > { %449 = vst [vmem:[%s735_s21 + $0x68] sm:$0xff] %v433_v54 }
  0xbe   : > { %438 = vst [vmem:[%s735_s21 + $0x10] sm:$0xff] %v422_v55 }
  0xbf   : > { %442 = vst [vmem:[%s735_s21 + $0x30] sm:$0xff] %v426_v56  ;;  %v389_v57 = vpop.f32.mrf.mxu2  ;;  %v399_v59 = vpop.f32.mrf.mxu3 }
  0xc0   : > { %v390_v61 = vadd.f32 %v726_v16, %v389_v57  ;;  %v400_v62 = vadd.f32 %v726_v16, %v399_v59  ;;  %v371_v63 = vpop.f32.mrf.mxu0  ;;  %v381_v1 = vpop.f32.mrf.mxu1 }
  0xc1   : > { %v372_v3 = vadd.f32 %v726_v16, %v371_v63  ;;  %v382_v4 = vadd.f32 %v726_v16, %v381_v1 }
  0xc2   : > { %v430_v5 = vadd.f32 %v414_v58, %v390_v61  ;;  %v434_v6 = vadd.f32 %v418_v60, %v400_v62 }
  0xc3   : > { %v423_v7 = vadd.f32 %v407_v0, %v372_v3  ;;  %v427_v8 = vadd.f32 %v411_v2, %v382_v4 }
  0xc4   : > { %446 = vst [vmem:[%s735_s21 + $0x50] sm:$0xff] %v430_v5 }
  0xc5   : > { %450 = vst [vmem:[%s735_s21 + $0x70] sm:$0xff] %v434_v6 }
  0xc6   : > { %439 = vst [vmem:[%s735_s21 + $0x18] sm:$0xff] %v423_v7 }
  0xc7   : > { %443 = vst [vmem:[%s735_s21 + $0x38] sm:$0xff] %v427_v8  ;;  %v391_v9 = vpop.f32.mrf.mxu2  ;;  %v401_v11 = vpop.f32.mrf.mxu3 }
  0xc8   : > { %v392_v13 = vadd.f32 %v726_v16, %v391_v9  ;;  %v402_v14 = vadd.f32 %v726_v16, %v401_v11 }
  0xca   : > { %v431_v15 = vadd.f32 %v415_v10, %v392_v13  ;;  %v435_v17 = vadd.f32 %v419_v12, %v402_v14 }
  0xcc   : > { %447 = vst [vmem:[%s735_s21 + $0x58] sm:$0xff] %v431_v15 }
  0xcd   : > { %451 = vst [vmem:[%s735_s21 + $0x78] sm:$0xff] %v435_v17 }
  0xce PF: > { %s14_s15 = sadd.s32 1, %s652_s15  }
  0xcf   : > { %p11_p4 = scmp.ge.s32.totalorder %s14_s15, 4  }
  0xd1   :  { %13 = sbr.rel (!%p11_p4) target bundleno = 1 (0x1), region = 69 }

// kernel: block_forward.5
= control target key start
LH: loop header
LB: loop body
LE: loop exit
PB: predicated region body
PF: predicated region fallthrough
CT: control target
= control target key end

     0   :  { %s1258_s15 = smov 0   ;;  %s1878_s0 = inlined_call_operand.vmem [shape: f32[256,128], index: 0, kind: input, shape index: {}]   ;;  %s1879_s1 = inlined_call_operand.vmem [shape: f32[1,128], index: 1, kind: input, shape index: {}]   ;;  %s1880_s2 = inlined_call_operand.vmem [shape: f32[1,128], index: 2, kind: input, shape index: {}]   ;;  %s1881_s3 = inlined_call_operand.vmem [shape: bf16[128,384], index: 3, kind: input, shape index: {}]   ;;  %s1882_s4 = inlined_call_operand.vmem [shape: bf16[256,384], index: 4, kind: output, shape index: {}]  }
   0x1 LB: > { %s1023_s16 = sadd.s32 4294967295, %s1230_s15   ;;  %p1027_p0 = scmp.ge.s32.totalorder %s1230_s15, 1  ;;  %s1230_s15 = sphi %s1258_s15, %s14_s15  }
   0x2   : > { %p163_p1 = scmp.lt.s32.totalorder %s1230_s15, 3 }
   0x4   : > { %p164_p2 = pnand %p1027_p0, %p163_p1 }
   0x5   : > { %s1028_s17 = sshll.u32 (!%p164_p2), %s1023_s16, 4 }
   0x6   : > { %167 = sbr.rel (%p164_p2) target bundleno = 599 (0x257), region = 36  ;;  %p191_p3 = scmp.lt.s32.totalorder (!%p164_p2), %s1028_s17, 31 }
   0xb   : > { %s1894_s17 = smov (!%p191_p3, %s1028_s17), 31  ;;  %v1232_v10 = vmov 128.0   ;;  %v1118_v63 = vld [vmem:[%s1881_s3 + $0xa8] sm:$0xf] }
   0xc   : > { %s1029_s18 = sshll.u32 %s1894_s17, 3  ;;  %1190 = vrcp.f32 %v1232_v10  ;;  %v1148_v10 = vld [vmem:[%s1881_s3 + $0x94] sm:$0xf]  ;;  %s1178_s26 = smul.u32 12, %s1894_s17 }
   0xd   : > { %s1272_s21 = scalar_lea.vmem %s1878_s0, %s1029_s18 }
   0xe   : > { %v215_v0 = vld [vmem:[%s1272_s21 + $0x60] sm:$0xff]  ;;  %v205_v2 = vld [vmem:[%s1272_s21 + $0x10] sm:$0xff]  ;;  %v216_v3 = vld [vmem:[%s1272_s21 + $0x68] sm:$0xff]  ;;  %s1799_s29 = scalar_lea.vmem %s1882_s4, %s1178_s26 }
   0xf   : > { %v203_v1 = vld [vmem:[%s1272_s21] sm:$0xff]  ;;  %243 = vadd.xlane.f32.xlu1 %v215_v0  ;;  %223 = vadd.xlane.f32.xlu2 %v205_v2  ;;  %v204_v4 = vld [vmem:[%s1272_s21 + $0x8] sm:$0xff]  ;;  %v206_v5 = vld [vmem:[%s1272_s21 + $0x18] sm:$0xff] }
  0x10   : > { %219 = vadd.xlane.f32.xlu0 %v203_v1  ;;  %v217_v6 = vld [vmem:[%s1272_s21 + $0x70] sm:$0xff]  ;;  %v218_v7 = vld [vmem:[%s1272_s21 + $0x78] sm:$0xff]  ;;  %v207_v8 = vld [vmem:[%s1272_s21 + $0x20] sm:$0xff] }
  0x11   : > { %v1284_v9 = vld [vmem:[%s1272_s21 + $0x28] sm:$0xff]  ;;  %v1307_v33 = vld [vmem:[%s1272_s21 + $0x38] sm:$0xff]  ;;  %v1324_v45 = vld [vmem:[%s1272_s21 + $0x30] sm:$0xff] }
  0x12   : > { %v1191_v11 = vpop.eup %1190  ;;  %v1339_v53 = vld [vmem:[%s1272_s21 + $0x48] sm:$0xff]  ;;  %v1347_v57 = vld [vmem:[%s1272_s21 + $0x50] sm:$0xff]  ;;  %v1351_v59 = vld [vmem:[%s1272_s21 + $0x40] sm:$0xff] }
  0x13   : > { %v252_v12 = vmul.f32 128.0, %v1191_v11  ;;  %vm256_vm0 = vweird.f32 %v1191_v11  ;;  %v1359_v61 = vld [vmem:[%s1272_s21 + $0x58] sm:$0xff] }
  0x15   : > { %v253_v13 = vsub.f32 1.0, %v252_v12  ;;  %v1108_v12 = vld [vmem:[%s1881_s3 + $0x9c] sm:$0xf0] }
  0x17   : > { %245 = vadd.xlane.f32.xlu1 %v216_v3  ;;  %225 = vadd.xlane.f32.xlu2 %v206_v5  ;;  %v254_v14 = vmul.f32 %v1191_v11, %v253_v13  ;;  %v1114_v13 = vld [vmem:[%s1881_s3 + $0x98] sm:$0xf] }
  0x18   : > { %221 = vadd.xlane.f32.xlu0 %v204_v4 }
  0x19   : > { %v255_v15 = vadd.f32 %v1191_v11, %v254_v14  ;;  %v1150_v14 = vld [vmem:[%s1881_s3 + $0xa0] sm:$0xf0] }
  0x1b   : > { %v1287_v16 = vsel %vm256_vm0, %v1191_v11, %v255_v15  ;;  %v1406_v15 = vor.u32 %v1148_v10, %v1108_v12  ;;  %v1046_v10 = vld [vmem:[%s1881_s3 + $0x18] sm:$0xf]  ;;  %v1133_v12 = vld [vmem:[%s1881_s3 + $0x1c] sm:$0xf] }
  0x1f   : > { %249 = vadd.xlane.f32.xlu1 %v218_v7  ;;  %227 = vadd.xlane.f32.xlu2 %v207_v8 }
  0x20   : > { %247 = vadd.xlane.f32.xlu0 %v217_v6 }
  0x28   : > { %229 = vadd.xlane.f32.xlu0 %v1284_v9 }
  0x82   : > { %v244_v17 = vpop.xlane.xlu1 %243  ;;  %v224_v23 = vpop.xlane.xlu2 %223 }
  0x83   : > { %v220_v18 = vpop.xlane.xlu0 %219  ;;  %v270_v19 = vmul.f32 %v1287_v16, %v244_v17  ;;  %v260_v32 = vmul.f32 %v1287_v16, %v224_v23  ;;  %v1408_v17 = vor.u32 %v1150_v14, %v1114_v13 }
  0x84   : > { %v258_v20 = vmul.f32 %v1287_v16, %v220_v18  ;;  %v1094_v18 = vld [vmem:[%s1881_s3 + $0x78] sm:$0xf] }
  0x85   : > { %v1291_v21 = vsub.f32 %v215_v0, %v270_v19  ;;  %v1314_v37 = vsub.f32 %v205_v2, %v260_v32  ;;  %v1152_v0 = vld [vmem:[%s1881_s3 + $0xb0] sm:$0xf0]  ;;  %v1146_v19 = vld [vmem:[%s1881_s3 + $0x80] sm:$0xf0]  ;;  %v1143_v32 = vld [vmem:[%s1881_s3 + $0x68] sm:$0xf0] }
  0x86   : > { %v1293_v22 = vsub.f32 %v203_v1, %v258_v20  ;;  %v1151_v1 = vld [vmem:[%s1881_s3 + $0xac] sm:$0xf]  ;;  %v1119_v2 = vor.u32 %v1152_v0, %v1118_v63  ;;  %v1145_v20 = vld [vmem:[%s1881_s3 + $0x7c] sm:$0xf]  ;;  %v1095_v23 = vor.u32 %v1146_v19, %v1094_v18  ;;  %v1136_v63 = vld [vmem:[%s1881_s3 + $0x34] sm:$0xf] }
  0x87   : > { %v302_v24 = vmul.f32 %v1291_v21, %v1291_v21  ;;  %v292_v42 = vmul.f32 %v1314_v37, %v1314_v37  ;;  %v1048_v19 = vld [vmem:[%s1881_s3 + $0x24] sm:$0xf0] }
  0x88   : > { %v290_v25 = vmul.f32 %v1293_v22, %v1293_v22  ;;  %754 = vmatpush.bf16.msra.mxu0 %v1119_v2  ;;  %1154 = vmatpush.bf16.msra.mxu3 %v1119_v2  ;;  %v1066_v2 = vld [vmem:[%s1881_s3 + $0x38] sm:$0xf] }
  0x89   : > { %330 = vadd.xlane.f32.xlu0 %v302_v24  ;;  %v1096_v24 = vld [vmem:[%s1881_s3 + $0x84] sm:$0xf0] }
  0x8a   : > { %306 = vadd.xlane.f32.xlu1 %v290_v25  ;;  %v246_v26 = vpop.xlane.xlu1 %245  ;;  %v226_v36 = vpop.xlane.xlu2 %225  ;;  %v1102_v25 = vld [vmem:[%s1881_s3 + $0x80] sm:$0xf] }
  0x8b   : > { %v222_v27 = vpop.xlane.xlu0 %221  ;;  %v271_v28 = vmul.f32 %v1287_v16, %v246_v26  ;;  %v261_v44 = vmul.f32 %v1287_v16, %v226_v36  ;;  %v1147_v26 = vld [vmem:[%s1881_s3 + $0x88] sm:$0xf0]  ;;  %v1084_v36 = vld [vmem:[%s1881_s3 + $0x6c] sm:$0xf0] }
  0x8c   : > { %v259_v29 = vmul.f32 %v1287_v16, %v222_v27  ;;  %v1430_v27 = vor.u32 %v1145_v20, %v1096_v24  ;;  %v1054_v20 = vld [vmem:[%s1881_s3 + $0x20] sm:$0xf]  ;;  %v1528_v24 = vor.u32 %v1133_v12, %v1048_v19 }
  0x8d   : > { %v1301_v30 = vsub.f32 %v216_v3, %v271_v28  ;;  %v1331_v48 = vsub.f32 %v206_v5, %v261_v44  ;;  %v1120_v3 = vld [vmem:[%s1881_s3 + $0xb4] sm:$0xf0]  ;;  %v1153_v5 = vld [vmem:[%s1881_s3 + $0xb8] sm:$0xf0]  ;;  %v1432_v28 = vor.u32 %v1147_v26, %v1102_v25  ;;  %v1140_v44 = vld [vmem:[%s1881_s3 + $0x50] sm:$0xf0] }
  0x8e   : > { %v1303_v31 = vsub.f32 %v204_v4, %v259_v29  ;;  %v1126_v4 = vld [vmem:[%s1881_s3 + $0xb0] sm:$0xf]  ;;  %v1082_v29 = vld [vmem:[%s1881_s3 + $0x60] sm:$0xf] }
  0x8f   : > { %v303_v34 = vmul.f32 %v1301_v30, %v1301_v30  ;;  %v293_v52 = vmul.f32 %v1331_v48, %v1331_v48 }
  0x90   : > { %v291_v35 = vmul.f32 %v1303_v31, %v1303_v31 }
  0x91   : > { %233 = vadd.xlane.f32.xlu0 %v1307_v33 }
  0x92   : > { %332 = vadd.xlane.f32.xlu1 %v303_v34  ;;  %308 = vadd.xlane.f32.xlu2 %v291_v35  ;;  %v250_v39 = vpop.xlane.xlu1 %249  ;;  %v228_v49 = vpop.xlane.xlu2 %227  ;;  %v1142_v34 = vld [vmem:[%s1881_s3 + $0x64] sm:$0xf]  ;;  %v1083_v35 = vor.u32 %v1143_v32, %v1082_v29  ;;  %v1034_v32 = vld [vmem:[%s1881_s3] sm:$0xf] }
  0x93   : > { %v248_v38 = vpop.xlane.xlu0 %247  ;;  %v273_v43 = vmul.f32 %v1287_v16, %v250_v39  ;;  %v262_v51 = vmul.f32 %v1287_v16, %v228_v49  ;;  %v1144_v39 = vld [vmem:[%s1881_s3 + $0x70] sm:$0xf0] }
  0x94   : > { %v272_v40 = vmul.f32 %v1287_v16, %v248_v38  ;;  %v1090_v38 = vld [vmem:[%s1881_s3 + $0x68] sm:$0xf] }
  0x95   : > { %v1328_v47 = vsub.f32 %v218_v7, %v273_v43  ;;  %v1342_v54 = vsub.f32 %v207_v8, %v262_v51  ;;  %v1384_v7 = vor.u32 %v1153_v5, %v1126_v4  ;;  %v1106_v8 = vld [vmem:[%s1881_s3 + $0x90] sm:$0xf]  ;;  %v1070_v43 = vld [vmem:[%s1881_s3 + $0x48] sm:$0xf] }
  0x96   : > { %v1317_v41 = vsub.f32 %v217_v6, %v272_v40  ;;  %v1382_v6 = vor.u32 %v1151_v1, %v1120_v3  ;;  %v1454_v40 = vor.u32 %v1142_v34, %v1084_v36  ;;  %v1071_v49 = vor.u32 %v1140_v44, %v1070_v43  ;;  %v1078_v51 = vld [vmem:[%s1881_s3 + $0x50] sm:$0xf]  ;;  %v1060_v1 = vld [vmem:[%s1881_s3 + $0x3c] sm:$0xf0]  ;;  %v1138_v3 = vld [vmem:[%s1881_s3 + $0x40] sm:$0xf0] }
  0x97   : > { %v305_v50 = vmul.f32 %v1328_v47, %v1328_v47  ;;  %v294_v56 = vmul.f32 %v1342_v54, %v1342_v54  ;;  %852 = vmatpush.bf16.msra.mxu2 %v1384_v7  ;;  %v1502_v4 = vor.u32 %v1136_v63, %v1060_v1  ;;  %v1504_v5 = vor.u32 %v1138_v3, %v1066_v2  ;;  %v1131_v34 = vld [vmem:[%s1881_s3 + $0x8] sm:$0xf0]  ;;  %v1132_v43 = vld [vmem:[%s1881_s3 + $0x10] sm:$0xf0] }
  0x98   : > { %v304_v46 = vmul.f32 %v1317_v41, %v1317_v41  ;;  %803 = vmatpush.bf16.msra.mxu1 %v1382_v6  ;;  %v1035_v36 = vor.u32 %v1131_v34, %v1034_v32 }
  0x9a   : > { %310 = vadd.xlane.f32.xlu1 %v292_v42  ;;  %334 = vadd.xlane.f32.xlu0 %v304_v46  ;;  %v1456_v42 = vor.u32 %v1144_v39, %v1090_v38  ;;  %v1139_v46 = vld [vmem:[%s1881_s3 + $0x4c] sm:$0xf]  ;;  %v1036_v38 = vld [vmem:[%s1881_s3 + $0xc] sm:$0xf0]  ;;  %v1042_v39 = vld [vmem:[%s1881_s3 + $0x8] sm:$0xf] }
  0x9b   : > { %231 = vadd.xlane.f32.xlu2 %v1324_v45  ;;  %v230_v55 = vpop.xlane.xlu0 %229  ;;  %853 = vmatpush.bf16.msra.mxu2 %v1408_v17 }
  0x9c   : > { %v263_v58 = vmul.f32 %v1287_v16, %v230_v55  ;;  %804 = vmatpush.bf16.msra.mxu1 %v1406_v15 }
  0x9e   : > { %v1356_v60 = vsub.f32 %v1284_v9, %v263_v58  ;;  %v1149_v9 = vld [vmem:[%s1881_s3 + $0x98] sm:$0xf0]  ;;  %v1058_v58 = vld [vmem:[%s1881_s3 + $0x30] sm:$0xf] }
  0x9f   : > { %v1107_v11 = vor.u32 %v1149_v9, %v1106_v8  ;;  %854 = vmatpush.bf16.msra.mxu2 %v1432_v28 }
  0xa0   : > { %v295_v62 = vmul.f32 %v1356_v60, %v1356_v60  ;;  %805 = vmatpush.bf16.msra.mxu1 %v1430_v27 }
  0xa1   : > { %755 = vmatpush.bf16.msra.mxu0 %v1107_v11  ;;  %1155 = vmatpush.bf16.msra.mxu3 %v1107_v11  ;;  %v1134_v11 = vld [vmem:[%s1881_s3 + $0x20] sm:$0xf0] }
  0xa2   : > { %336 = vadd.xlane.f32.xlu1 %v305_v50  ;;  %237 = vadd.xlane.f32.xlu0 %v1339_v53  ;;  %v1072_v50 = vld [vmem:[%s1881_s3 + $0x54] sm:$0xf0]  ;;  %v1047_v18 = vor.u32 %v1134_v11, %v1046_v10 }
  0xa3   : > { %312 = vadd.xlane.f32.xlu2 %v293_v52  ;;  %855 = vmatpush.bf16.msra.mxu2 %v1456_v42  ;;  %v1141_v52 = vld [vmem:[%s1881_s3 + $0x58] sm:$0xf0]  ;;  %v1478_v55 = vor.u32 %v1139_v46, %v1072_v50  ;;  %v1560_v46 = vor.u32 %v1132_v43, %v1042_v39 }
  0xa4   : > { %806 = vmatpush.bf16.msra.mxu1 %v1454_v40 }
  0xa5   : > { %756 = vmatpush.bf16.msra.mxu0 %v1095_v23  ;;  %1156 = vmatpush.bf16.msra.mxu3 %v1095_v23  ;;  %v1135_v23 = vld [vmem:[%s1881_s3 + $0x28] sm:$0xf0] }
  0xa6   : > { %v1530_v25 = vor.u32 %v1135_v23, %v1054_v20 }
  0xa8   : > { %807 = vmatpush.bf16.msra.mxu1 %v1478_v55 }
  0xa9   : > { %757 = vmatpush.bf16.msra.mxu0 %v1083_v35  ;;  %1157 = vmatpush.bf16.msra.mxu3 %v1083_v35  ;;  %v1130_v35 = vld [vmem:[%s1881_s3 + $0x4] sm:$0xf] }
  0xaa   : > { %314 = vadd.xlane.f32.xlu1 %v294_v56  ;;  %239 = vadd.xlane.f32.xlu0 %v1347_v57  ;;  %v1480_v56 = vor.u32 %v1141_v52, %v1078_v51  ;;  %v1558_v44 = vor.u32 %v1130_v35, %v1036_v38 }
  0xab   : > { %235 = vadd.xlane.f32.xlu2 %v1351_v59 }
  0xac   : > { %856 = vmatpush.bf16.msra.mxu2 %v1480_v56  ;;  %808 = vmatpush.bf16.msra.mxu1 %v1502_v4 }
  0xad   : > { %758 = vmatpush.bf16.msra.mxu0 %v1071_v49  ;;  %1158 = vmatpush.bf16.msra.mxu3 %v1071_v49 }
  0xb0   : > { %857 = vmatpush.bf16.msra.mxu2 %v1504_v5  ;;  %809 = vmatpush.bf16.msra.mxu1 %v1528_v24 }
  0xb2   : > { %241 = vadd.xlane.f32.xlu1 %v1359_v61 }
  0xb3   : > { %316 = vadd.xlane.f32.xlu2 %v295_v62  ;;  %v1137_v62 = vld [vmem:[%s1881_s3 + $0x38] sm:$0xf0] }
  0xb4   : > { %v1059_v0 = vor.u32 %v1137_v62, %v1058_v58  ;;  %858 = vmatpush.bf16.msra.mxu2 %v1530_v25  ;;  %810 = vmatpush.bf16.msra.mxu1 %v1558_v44 }
  0xb6   : > { %759 = vmatpush.bf16.msra.mxu0 %v1059_v0  ;;  %1159 = vmatpush.bf16.msra.mxu3 %v1059_v0 }
  0xb8   : > { %859 = vmatpush.bf16.msra.mxu2 %v1560_v46 }
  0xba   : > { %760 = vmatpush.bf16.msra.mxu0 %v1047_v18  ;;  %1160 = vmatpush.bf16.msra.mxu3 %v1047_v18 }
  0xbe   : > { %761 = vmatpush.bf16.msra.mxu0 %v1035_v36  ;;  %1161 = vmatpush.bf16.msra.mxu3 %v1035_v36 }
  0xc2   : > { %1162 = vmatpush.bf16.msrb.mxu3 %v1382_v6 }
  0xc6   : > { %1163 = vmatpush.bf16.msrb.mxu3 %v1406_v15 }
  0xca   : > { %1164 = vmatpush.bf16.msrb.mxu3 %v1430_v27 }
  0xce   : > { %1165 = vmatpush.bf16.msrb.mxu3 %v1454_v40 }
  0xd2   : > { %1166 = vmatpush.bf16.msrb.mxu3 %v1478_v55 }
  0xd6   : > { %1167 = vmatpush.bf16.msrb.mxu3 %v1502_v4  ;;  %v1670_v4 = vld [vmem:[%s1880_s2] ss:$0 sm:$0xff] }
  0xda   : > { %1168 = vmatpush.bf16.msrb.mxu3 %v1528_v24 }
  0xde   : > { %1169 = vmatpush.bf16.msrb.mxu3 %v1558_v44 }
  0xfc   : > { %v331_v9 = vpop.xlane.xlu0 %330 }
  0xfd   : > { %v307_v8 = vpop.xlane.xlu1 %306  ;;  %v350_v14 = vmul.f32 %v331_v9, %v1287_v16 }
  0xfe   : > { %v338_v13 = vmul.f32 %v307_v8, %v1287_v16 }
  0xff   : > { %v1534_v29 = vadd.f32 1e-05, %v350_v14 }
 0x100   : > { %v1532_v26 = vadd.f32 1e-05, %v338_v13 }
 0x101   : > { %vm496_vm4 = vweird.f32 %v1534_v29 }
 0x102   : > { %1192 = vrsqrt.f32 %v1532_v26  ;;  %vm376_vm2 = vweird.f32 %v1532_v26 }
 0x103   : > { %1194 = vrsqrt.f32 %v1534_v29 }
 0x104   : > { %v234_v50 = vpop.xlane.xlu0 %233 }
 0x105   : > { %v333_v49 = vpop.xlane.xlu1 %332  ;;  %v309_v52 = vpop.xlane.xlu2 %308  ;;  %v265_v58 = vmul.f32 %v1287_v16, %v234_v50 }
 0x106   : > { %v351_v51 = vmul.f32 %v333_v49, %v1287_v16  ;;  %v339_v62 = vmul.f32 %v309_v52, %v1287_v16 }
 0x107   : > { %v1573_v1 = vsub.f32 %v1307_v33, %v265_v58 }
 0x108   : > { %v1568_v63 = vpop.eup %1192  ;;  %v1570_v0 = vadd.f32 1e-05, %v351_v51  ;;  %v1579_v8 = vadd.f32 1e-05, %v339_v62 }
 0x109   : > { %v1575_v2 = vpop.eup %1194  ;;  %v371_v3 = vmul.f32 %v1568_v63, %v1532_v26  ;;  %v297_v33 = vmul.f32 %v1573_v1, %v1573_v1  ;;  %vm377_vm1 = vweird.f32 %v1568_v63 }
 0x10a   : > { %v491_v9 = vmul.f32 %v1575_v2, %v1534_v29  ;;  %1196 = vrsqrt.f32 %v1570_v0  ;;  %vm1609_vm3 = vmor %vm376_vm2, %vm377_vm1  ;;  %vm497_vm5 = vweird.f32 %v1575_v2  ;;  %vm506_vm6 = vweird.f32 %v1570_v0 }
 0x10b   : > { %v372_v6 = vmul.f32 %v1568_v63, %v371_v3  ;;  %1198 = vrsqrt.f32 %v1579_v8  ;;  %320 = vadd.xlane.f32.xlu0 %v297_v33  ;;  %vm1625_vm7 = vmor %vm496_vm4, %vm497_vm5  ;;  %vm386_vm11 = vweird.f32 %v1579_v8 }
 0x10c   : > { %v492_v10 = vmul.f32 %v1575_v2, %v491_v9 }
 0x10d   : > { %v373_v11 = vmul.f32 0.5, %v372_v6  ;;  %v311_v12 = vpop.xlane.xlu1 %310  ;;  %v335_v13 = vpop.xlane.xlu0 %334 }
 0x10e   : > { %v493_v14 = vmul.f32 0.5, %v492_v10  ;;  %v340_v18 = vmul.f32 %v311_v12, %v1287_v16  ;;  %v232_v19 = vpop.xlane.xlu2 %231  ;;  %v352_v20 = vmul.f32 %v335_v13, %v1287_v16 }
 0x10f   : > { %v374_v15 = vsub.f32 1.5, %v373_v11  ;;  %v264_v23 = vmul.f32 %v1287_v16, %v232_v19  ;;  %v1641_v19 = vld [vmem:[%s1879_s1] ss:$0 sm:$0xff] }
 0x110   : > { %v1197_v32 = vpop.eup %1196  ;;  %v494_v34 = vsub.f32 1.5, %v493_v14  ;;  %v1594_v35 = vadd.f32 1e-05, %v340_v18  ;;  %v1596_v36 = vadd.f32 1e-05, %v352_v20 }
 0x111   : > { %v1199_v38 = vpop.eup %1198  ;;  %v375_v39 = vmul.f32 %v1568_v63, %v374_v15  ;;  %v501_v43 = vmul.f32 %v1197_v32, %v1570_v0  ;;  %v1602_v49 = vsub.f32 %v1324_v45, %v264_v23  ;;  %vm507_vm8 = vweird.f32 %v1197_v32 }
 0x112   : > { %v381_v27 = vmul.f32 %v1199_v38, %v1579_v8  ;;  %1200 = vrsqrt.f32 %v1594_v35  ;;  %v495_v52 = vmul.f32 %v1575_v2, %v494_v34  ;;  %vm387_vm9 = vweird.f32 %v1199_v38  ;;  %vm508_vm10 = vmor %vm506_vm6, %vm507_vm8 }
 0x113   : > { %v502_v50 = vmul.f32 %v1197_v32, %v501_v43  ;;  %1202 = vrsqrt.f32 %v1596_v36  ;;  %v379_v40 = vsel %vm1609_vm3, %v1568_v63, %v375_v39  ;;  %v296_v26 = vmul.f32 %v1602_v49, %v1602_v49  ;;  %vm388_vm12 = vmor %vm386_vm11, %vm387_vm9 }
 0x114   : > { %v382_v45 = vmul.f32 %v1199_v38, %v381_v27  ;;  %v530_v13 = vmul.f32 %v379_v40, %v1293_v22  ;;  %v499_v14 = vsel %vm1625_vm7, %v1575_v2, %v495_v52  ;;  %vm516_vm13 = vweird.f32 %v1596_v36 }
 0x115   : > { %v503_v58 = vmul.f32 0.5, %v502_v50  ;;  %v337_v62 = vpop.xlane.xlu1 %336  ;;  %v238_v3 = vpop.xlane.xlu0 %237  ;;  %318 = vadd.xlane.f32.xlu2 %v296_v26  ;;  %v542_v43 = vmul.f32 %v499_v14, %v1291_v21  ;;  %vm396_vm0 = vweird.f32 %v1594_v35 }
 0x116   : > { %v383_v9 = vmul.f32 0.5, %v382_v45  ;;  %v353_v6 = vmul.f32 %v337_v62, %v1287_v16  ;;  %v313_v33 = vpop.xlane.xlu2 %312  ;;  %v267_v29 = vmul.f32 %v1287_v16, %v238_v3  ;;  %v550_v51 = vmul.f32 %v1641_v19, %v530_v13 }
 0x117   : > { %v504_v63 = vsub.f32 1.5, %v503_v58  ;;  %v341_v11 = vmul.f32 %v313_v33, %v1287_v16 }
 0x118   : > { %v1630_v12 = vpop.eup %1200  ;;  %v384_v18 = vsub.f32 1.5, %v383_v9  ;;  %v1636_v55 = vadd.f32 1e-05, %v353_v6  ;;  %v1650_v22 = vsub.f32 %v1339_v53, %v267_v29  ;;  %v562_v6 = vmul.f32 %v1641_v19, %v542_v43 }
 0x119   : > { %v1643_v20 = vpop.eup %1202  ;;  %v505_v15 = vmul.f32 %v1197_v32, %v504_v63  ;;  %v391_v23 = vmul.f32 %v1630_v12, %v1594_v35  ;;  %v1647_v34 = vadd.f32 1e-05, %v341_v11  ;;  %vm397_vm14 = vweird.f32 %v1630_v12 }
 0x11a   : > { %v385_v2 = vmul.f32 %v1199_v38, %v384_v18  ;;  %v511_v39 = vmul.f32 %v1643_v20, %v1596_v36  ;;  %1204 = vrsqrt.f32 %v1636_v55  ;;  %v299_v52 = vmul.f32 %v1650_v22, %v1650_v22  ;;  %vm1712_vm1 = vmor %vm396_vm0, %vm397_vm14 }
 0x11b   : > { %v509_v27 = vsel %vm508_vm10, %v1197_v32, %v505_v15  ;;  %v392_v53 = vmul.f32 %v1630_v12, %v391_v23  ;;  %1206 = vrsqrt.f32 %v1647_v34  ;;  %v570_v63 = vadd.f32 %v1670_v4, %v550_v51 }
 0x11c   : > { %v543_v0 = vmul.f32 %v509_v27, %v1301_v30  ;;  %v389_v50 = vsel %vm388_vm12, %v1199_v38, %v385_v2  ;;  %v512_v8 = vmul.f32 %v1643_v20, %v511_v39  ;;  %vm517_vm15 = vweird.f32 %v1643_v20 }
 0x11d   : > { %v531_v21 = vmul.f32 %v389_v50, %v1303_v31  ;;  %v393_v32 = vmul.f32 0.5, %v392_v53  ;;  %v315_v45 = vpop.xlane.xlu1 %314  ;;  %v240_v30 = vpop.xlane.xlu0 %239  ;;  %324 = vadd.xlane.f32.xlu2 %v299_v52  ;;  %v582_v43 = vadd.f32 %v1670_v4, %v562_v6  ;;  %vm526_vm2 = vweird.f32 %v1636_v55  ;;  %vm1726_vm3 = vmor %vm516_vm13, %vm517_vm15 }
 0x11e   : > { %v513_v38 = vmul.f32 0.5, %v512_v8  ;;  %v342_v40 = vmul.f32 %v315_v45, %v1287_v16  ;;  %v236_v58 = vpop.xlane.xlu2 %235  ;;  %v268_v26 = vmul.f32 %v1287_v16, %v240_v30  ;;  %v563_v62 = vmul.f32 %v1641_v19, %v543_v0 }
 0x11f   : > { %v394_v3 = vsub.f32 1.5, %v393_v32  ;;  %v266_v31 = vmul.f32 %v1287_v16, %v236_v58  ;;  %v551_v9 = vmul.f32 %v1641_v19, %v531_v21  ;;  %vm406_vm7 = vweird.f32 %v1647_v34 }
 0x120   : > { %v1683_v33 = vpop.eup %1204  ;;  %v514_v29 = vsub.f32 1.5, %v513_v38  ;;  %v1686_v10 = vadd.f32 1e-05, %v342_v40  ;;  %v583_v14 = vadd.f32 %v1670_v4, %v563_v62  ;;  %v1700_v23 = vsub.f32 %v1347_v57, %v268_v26 }
 0x121   : > { %v1207_v11 = vpop.eup %1206  ;;  %v521_v24 = vmul.f32 %v1683_v33, %v1636_v55  ;;  %v1693_v13 = vsub.f32 %v1351_v59, %v266_v31  ;;  %v395_v18 = vmul.f32 %v1630_v12, %v394_v3  ;;  %v571_v59 = vadd.f32 %v1670_v4, %v551_v9 }
 0x122   : > { %v401_v15 = vmul.f32 %v1207_v11, %v1647_v34  ;;  %1208 = vrsqrt.f32 %v1686_v10  ;;  %v515_v2 = vmul.f32 %v1643_v20, %v514_v29  ;;  %v1717_v50 = vpack.c.bf16 %v583_v14, %v582_v43 }
 0x123   : > { %v522_v39 = vmul.f32 %v1683_v33, %v521_v24  ;;  %v298_v53 = vmul.f32 %v1693_v13, %v1693_v13  ;;  %v586_v0 = vpack.c.bf16 %v571_v59, %v570_v63  ;;  %v399_v35 = vsel %vm1712_vm1, %v1630_v12, %v395_v18 }
 0x124   : > { %v402_v27 = vmul.f32 %v1207_v11, %v401_v15  ;;  %v300_v32 = vmul.f32 %v1700_v23, %v1700_v23  ;;  %v519_v12 = vsel %vm1726_vm3, %v1643_v20, %v515_v2  ;;  %vm527_vm4 = vweird.f32 %v1683_v33  ;;  %792 = vmatmul.bf16.vlgmr.msra.gmra.mxu3 %v1717_v50 }
 0x125   : > { %v523_v44 = vmul.f32 0.5, %v522_v39  ;;  %v242_v8 = vpop.xlane.xlu1 %241  ;;  %322 = vadd.xlane.f32.xlu1 %v298_v53  ;;  %762 = vmatmul.bf16.vlgmr.msra.gmra.mxu0 %v586_v0  ;;  %vm407_vm5 = vweird.f32 %v1207_v11  ;;  %v532_v26 = vmul.f32 %v399_v35, %v1314_v37  ;;  %v544_v31 = vmul.f32 %v519_v12, %v1317_v41  ;;  %vm528_vm6 = vmor %vm526_vm2, %vm527_vm4 }
 0x126   : > { %v403_v21 = vmul.f32 0.5, %v402_v27  ;;  %v269_v52 = vmul.f32 %v1287_v16, %v242_v8  ;;  %v317_v45 = vpop.xlane.xlu2 %316  ;;  %811 = vmatmul.bf16.vlgmr.msra.gmra.mxu1 %v586_v0  ;;  %860 = vmatmul.bf16.vlgmr.msra.gmra.mxu2 %v586_v0  ;;  %vm408_vm8 = vmor %vm406_vm7, %vm407_vm5  ;;  %vm416_vm9 = vweird.f32 %v1686_v10 }
 0x127   : > { %v524_v30 = vsub.f32 1.5, %v523_v44  ;;  %v343_v36 = vmul.f32 %v317_v45, %v1287_v16  ;;  %326 = vadd.xlane.f32.xlu0 %v300_v32  ;;  %1170 = vmatpush.bf16.msra.mxu3 %v1384_v7  ;;  %v552_v55 = vmul.f32 %v1641_v19, %v532_v26  ;;  %v564_v34 = vmul.f32 %v1641_v19, %v544_v31 }
 0x128   : > { %v1209_v38 = vpop.eup %1208  ;;  %v404_v40 = vsub.f32 1.5, %v403_v21  ;;  %v1740_v58 = vsub.f32 %v1359_v61, %v269_v52 }
 0x129   : > { %v525_v20 = vmul.f32 %v1683_v33, %v524_v30  ;;  %v411_v62 = vmul.f32 %v1209_v38, %v1686_v10  ;;  %v359_v3 = vadd.f32 1e-05, %v343_v36  ;;  %vm417_vm10 = vweird.f32 %v1209_v38 }
 0x12a   : > { %v405_v9 = vmul.f32 %v1207_v11, %v404_v40  ;;  %v301_v37 = vmul.f32 %v1740_v58, %v1740_v58  ;;  %v584_v2 = vadd.f32 %v1670_v4, %v564_v34  ;;  %vm418_vm11 = vmor %vm416_vm9, %vm417_vm10 }
 0x12b   : > { %v529_v61 = vsel %vm528_vm6, %v1683_v33, %v525_v20  ;;  %v412_v6 = vmul.f32 %v1209_v38, %v411_v62  ;;  %1210 = vrsqrt.f32 %v359_v3  ;;  %1171 = vmatpush.bf16.msra.mxu3 %v1408_v17  ;;  %vm426_vm12 = vweird.f32 %v359_v3 }
 0x12c   : > { %v545_v7 = vmul.f32 %v529_v61, %v1328_v47  ;;  %v409_v41 = vsel %vm408_vm8, %v1207_v11, %v405_v9  ;;  %v572_v47 = vadd.f32 %v1670_v4, %v552_v55 }
 0x12d   : > { %v533_v29 = vmul.f32 %v409_v41, %v1331_v48  ;;  %v413_v63 = vmul.f32 0.5, %v412_v6  ;;  %328 = vadd.xlane.f32.xlu1 %v301_v37 }
 0x12e   : > { %v565_v24 = vmul.f32 %v1641_v19, %v545_v7 }
 0x12f   : > { %v414_v33 = vsub.f32 1.5, %v413_v63  ;;  %v553_v14 = vmul.f32 %v1641_v19, %v533_v29  ;;  %1172 = vmatpush.bf16.msra.mxu3 %v1432_v28 }
 0x130   : > { %v585_v18 = vadd.f32 %v1670_v4, %v565_v24 }
 0x131   : > { %v1211_v15 = vpop.eup %1210  ;;  %v573_v48 = vadd.f32 %v1670_v4, %v553_v14  ;;  %v415_v17 = vmul.f32 %v1209_v38, %v414_v33 }
 0x132   : > { %v421_v11 = vmul.f32 %v1211_v15, %v359_v3  ;;  %v593_v43 = vpack.c.bf16 %v585_v18, %v584_v2  ;;  %vm427_vm13 = vweird.f32 %v1211_v15 }
 0x133   : > { %v587_v39 = vpack.c.bf16 %v573_v48, %v572_v47  ;;  %1173 = vmatpush.bf16.msra.mxu3 %v1456_v42  ;;  %v419_v27 = vsel %vm418_vm11, %v1209_v38, %v415_v17  ;;  %vm428_vm14 = vmor %vm426_vm12, %vm427_vm13 }
 0x134   : > { %v422_v59 = vmul.f32 %v1211_v15, %v421_v11  ;;  %797 = vmatmul.bf16.gmra.mxu3 %v593_v43  ;;  %v534_v28 = vmul.f32 %v419_v27, %v1342_v54 }
 0x135   : > { %767 = vmatmul.bf16.gmra.mxu0 %v587_v39 }
 0x136   : > { %v423_v53 = vmul.f32 0.5, %v422_v59  ;;  %816 = vmatmul.bf16.gmra.mxu1 %v587_v39  ;;  %865 = vmatmul.bf16.gmra.mxu2 %v587_v39  ;;  %v554_v42 = vmul.f32 %v1641_v19, %v534_v28 }
 0x137   : > { %1174 = vmatpush.bf16.msra.mxu3 %v1480_v56 }
 0x138   : > { %v424_v10 = vsub.f32 1.5, %v423_v53  ;;  %v574_v35 = vadd.f32 %v1670_v4, %v554_v42 }
 0x13a   : > { %v425_v57 = vmul.f32 %v1211_v15, %v424_v10 }
 0x13b   : > { %1175 = vmatpush.bf16.msra.mxu3 %v1504_v5 }
 0x13c   : > { %v429_v44 = vsel %vm428_vm14, %v1211_v15, %v425_v57 }
 0x13d   : > { %v535_v0 = vmul.f32 %v429_v44, %v1356_v60 }
 0x13f   : > { %v555_v8 = vmul.f32 %v1641_v19, %v535_v0  ;;  %1176 = vmatpush.bf16.msra.mxu3 %v1530_v25 }
 0x141   : > { %v575_v51 = vadd.f32 %v1670_v4, %v555_v8 }
 0x143   : > { %v588_v54 = vpack.c.bf16 %v575_v51, %v574_v35  ;;  %1177 = vmatpush.bf16.msra.mxu3 %v1560_v46 }
 0x144   : > { %841 = vmatmul.bf16.vlgmr.msrb.gmra.mxu3 %v1717_v50 }
 0x145   : > { %772 = vmatmul.bf16.gmra.mxu0 %v588_v54 }
 0x146   : > { %821 = vmatmul.bf16.gmra.mxu1 %v588_v54  ;;  %870 = vmatmul.bf16.gmra.mxu2 %v588_v54 }
 0x154   : > { %846 = vmatmul.bf16.gmra.mxu3 %v593_v43 }
 0x164   : > { %890 = vmatmul.bf16.vlgmr.msra.gmra.mxu3 %v1717_v50 }
 0x174   : > { %895 = vmatmul.bf16.gmra.mxu3 %v593_v43 }
 0x17e   : > { %v321_v60 = vpop.xlane.xlu0 %320 }
 0x17f   : > { %v345_v56 = vmul.f32 %v321_v60, %v1287_v16 }
 0x181   : > { %v361_v5 = vadd.f32 1e-05, %v345_v56 }
 0x183   : > { %1212 = vrsqrt.f32 %v361_v5  ;;  %vm446_vm15 = vweird.f32 %v361_v5 }
 0x188   : > { %v319_v21 = vpop.xlane.xlu2 %318 }
 0x189   : > { %v1213_v32 = vpop.eup %1212  ;;  %v344_v25 = vmul.f32 %v319_v21, %v1287_v16 }
 0x18a   : > { %v441_v52 = vmul.f32 %v1213_v32, %v361_v5  ;;  %vm447_vm0 = vweird.f32 %v1213_v32 }
 0x18b   : > { %v360_v46 = vadd.f32 1e-05, %v344_v25  ;;  %vm448_vm1 = vmor %vm446_vm15, %vm447_vm0 }
 0x18c   : > { %v442_v45 = vmul.f32 %v1213_v32, %v441_v52 }
 0x18d   : > { %1214 = vrsqrt.f32 %v360_v46  ;;  %vm436_vm3 = vweird.f32 %v360_v46 }
 0x18e   : > { %v443_v12 = vmul.f32 0.5, %v442_v45 }
 0x190   : > { %v444_v30 = vsub.f32 1.5, %v443_v12  ;;  %v325_v36 = vpop.xlane.xlu2 %324 }
 0x191   : > { %v347_v38 = vmul.f32 %v325_v36, %v1287_v16 }
 0x192   : > { %v445_v40 = vmul.f32 %v1213_v32, %v444_v30 }
 0x193   : > { %v1215_v50 = vpop.eup %1214  ;;  %v363_v26 = vadd.f32 1e-05, %v347_v38 }
 0x194   : > { %v431_v20 = vmul.f32 %v1215_v50, %v360_v46  ;;  %v449_v3 = vsel %vm448_vm1, %v1213_v32, %v445_v40  ;;  %vm437_vm2 = vweird.f32 %v1215_v50 }
 0x195   : > { %1216 = vrsqrt.f32 %v363_v26  ;;  %v537_v61 = vmul.f32 %v449_v3, %v1573_v1  ;;  %vm438_vm4 = vmor %vm436_vm3, %vm437_vm2  ;;  %vm466_vm5 = vweird.f32 %v363_v26 }
 0x196   : > { %v432_v62 = vmul.f32 %v1215_v50, %v431_v20 }
 0x197   : > { %v557_v18 = vmul.f32 %v1641_v19, %v537_v61 }
 0x198   : > { %v323_v31 = vpop.xlane.xlu1 %322  ;;  %v433_v9 = vmul.f32 0.5, %v432_v62 }
 0x199   : > { %v346_v37 = vmul.f32 %v323_v31, %v1287_v16  ;;  %v577_v43 = vadd.f32 %v1670_v4, %v557_v18 }
 0x19a   : > { %v434_v6 = vsub.f32 1.5, %v433_v9  ;;  %v327_v41 = vpop.xlane.xlu0 %326 }
 0x19b   : > { %v362_v7 = vadd.f32 1e-05, %v346_v37  ;;  %v1217_v29 = vpop.eup %1216  ;;  %v348_v63 = vmul.f32 %v327_v41, %v1287_v16 }
 0x19c   : > { %v435_v55 = vmul.f32 %v1215_v50, %v434_v6  ;;  %v461_v34 = vmul.f32 %v1217_v29, %v363_v26  ;;  %vm467_vm6 = vweird.f32 %v1217_v29 }
 0x19d   : > { %1218 = vrsqrt.f32 %v362_v7  ;;  %v1788_v24 = vadd.f32 1e-05, %v348_v63  ;;  %vm468_vm7 = vmor %vm466_vm5, %vm467_vm6  ;;  %vm456_vm9 = vweird.f32 %v362_v7 }
 0x19e   : > { %v439_v33 = vsel %vm438_vm4, %v1215_v50, %v435_v55  ;;  %v462_v14 = vmul.f32 %v1217_v29, %v461_v34 }
 0x19f   : > { %v536_v1 = vmul.f32 %v439_v33, %v1602_v49  ;;  %1220 = vrsqrt.f32 %v1788_v24  ;;  %vm476_vm11 = vweird.f32 %v1788_v24 }
 0x1a0   : > { %v329_v15 = vpop.xlane.xlu1 %328  ;;  %v463_v47 = vmul.f32 0.5, %v462_v14 }
 0x1a1   : > { %v349_v48 = vmul.f32 %v329_v15, %v1287_v16  ;;  %v556_v17 = vmul.f32 %v1641_v19, %v536_v1 }
 0x1a2   : > { %v464_v2 = vsub.f32 1.5, %v463_v47  ;;  %v763_v49 = vpop.f32.mrf.mxu0 }
 0x1a3   : > { %v1219_v11 = vpop.eup %1218  ;;  %v1801_v39 = vadd.f32 1e-05, %v349_v48  ;;  %v812_v59 = vpop.f32.mrf.mxu1  ;;  %v576_v53 = vadd.f32 %v1670_v4, %v556_v17 }
 0x1a4   : > { %v451_v27 = vmul.f32 %v1219_v11, %v362_v7  ;;  %v901_v16 = vpack.c.bf16 %v812_v59, %v763_v49  ;;  %v465_v10 = vmul.f32 %v1217_v29, %v464_v2  ;;  %vm457_vm8 = vweird.f32 %v1219_v11 }
 0x1a5   : > { %1222 = vrsqrt.f32 %v1801_v39  ;;  %v1806_v28 = vpop.eup %1220  ;;  %v589_v44 = vpack.c.bf16 %v577_v43, %v576_v53  ;;  %vm458_vm10 = vmor %vm456_vm9, %vm457_vm8  ;;  %vm486_vm13 = vweird.f32 %v1801_v39 }
 0x1a6   : > { %v452_v57 = vmul.f32 %v1219_v11, %v451_v27  ;;  %933 = vst [vmem:[%s1799_s29] sm:$0xff] %v901_v16  ;;  %v471_v0 = vmul.f32 %v1806_v28, %v1788_v24  ;;  %v469_v42 = vsel %vm468_vm7, %v1217_v29, %v465_v10  ;;  %vm477_vm12 = vweird.f32 %v1806_v28 }
 0x1a7   : > { %777 = vmatmul.bf16.gmra.mxu0 %v589_v44  ;;  %826 = vmatmul.bf16.gmra.mxu1 %v589_v44  ;;  %v1813_v54 = vpop.f32.mrf.mxu3  ;;  %v539_v5 = vmul.f32 %v469_v42, %v1650_v22  ;;  %vm1830_vm15 = vmor %vm476_vm11, %vm477_vm12 }
 0x1a8   : > { %v453_v8 = vmul.f32 0.5, %v452_v57  ;;  %v472_v35 = vmul.f32 %v1806_v28, %v471_v0  ;;  %875 = vmatmul.bf16.gmra.mxu2 %v589_v44 }
 0x1a9   : > { %v861_v60 = vpop.f32.mrf.mxu2  ;;  %v559_v50 = vmul.f32 %v1641_v19, %v539_v5 }
 0x1aa   : > { %v454_v51 = vsub.f32 1.5, %v453_v8  ;;  %v902_v21 = vpack.c.bf16 %v861_v60, %v861_v60  ;;  %v765_v32 = vpop.f32.mrf.mxu0  ;;  %v473_v12 = vmul.f32 0.5, %v472_v35 }
 0x1ab   : > { %v1223_v56 = vpop.eup %1222  ;;  %v814_v25 = vpop.f32.mrf.mxu1  ;;  %v579_v61 = vadd.f32 %v1670_v4, %v559_v50 }
 0x1ac   : > { %v455_v52 = vmul.f32 %v1219_v11, %v454_v51  ;;  %v481_v46 = vmul.f32 %v1223_v56, %v1801_v39  ;;  %v903_v45 = vpack.c.bf16 %v814_v25, %v765_v32  ;;  %934 = vst [vmem:[%s1799_s29 + $0x8] sm:$0xf] %v902_v21  ;;  %v474_v22 = vsub.f32 1.5, %v473_v12 }
 0x1ad   : > { %vm487_vm14 = vweird.f32 %v1223_v56 }
 0x1ae   : > { %v459_v30 = vsel %vm458_vm10, %v1219_v11, %v455_v52  ;;  %v482_v36 = vmul.f32 %v1223_v56, %v481_v46  ;;  %935 = vst [vmem:[%s1799_s29 + $0xc] sm:$0xff] %v903_v45  ;;  %v475_v41 = vmul.f32 %v1806_v28, %v474_v22  ;;  %vm488_vm0 = vmor %vm486_vm13, %vm487_vm14 }
 0x1af   : > { %v538_v38 = vmul.f32 %v459_v30, %v1693_v13  ;;  %v795_v62 = vpop.f32.mrf.mxu3 }
 0x1b0   : > { %v483_v40 = vmul.f32 0.5, %v482_v36  ;;  %v479_v34 = vsel %vm1830_vm15, %v1806_v28, %v475_v41 }
 0x1b1   : > { %v558_v26 = vmul.f32 %v1641_v19, %v538_v38  ;;  %v863_v3 = vpop.f32.mrf.mxu2  ;;  %v540_v47 = vmul.f32 %v479_v34, %v1700_v23 }
 0x1b2   : > { %v484_v20 = vsub.f32 1.5, %v483_v40  ;;  %v904_v31 = vpack.c.bf16 %v863_v3, %v863_v3  ;;  %v768_v13 = vpop.f32.mrf.mxu0 }
 0x1b3   : > { %v817_v9 = vpop.f32.mrf.mxu1  ;;  %v578_v37 = vadd.f32 %v1670_v4, %v558_v26  ;;  %v560_v11 = vmul.f32 %v1641_v19, %v540_v47 }
 0x1b4   : > { %v485_v6 = vmul.f32 %v1223_v56, %v484_v20  ;;  %v905_v7 = vpack.c.bf16 %v817_v9, %v768_v13  ;;  %936 = vst [vmem:[%s1799_s29 + $0x14] sm:$0xf] %v904_v31 }
 0x1b5   : > { %v590_v63 = vpack.c.bf16 %v579_v61, %v578_v37  ;;  %v580_v16 = vadd.f32 %v1670_v4, %v560_v11 }
 0x1b6   : > { %937 = vst [vmem:[%s1799_s29 + $0x18] sm:$0xff] %v905_v7  ;;  %v489_v55 = vsel %vm488_vm0, %v1223_v56, %v485_v6 }
 0x1b7   : > { %782 = vmatmul.bf16.gmra.mxu0 %v590_v63  ;;  %831 = vmatmul.bf16.gmra.mxu1 %v590_v63  ;;  %v541_v24 = vmul.f32 %v489_v55, %v1740_v58  ;;  %v798_v33 = vpop.f32.mrf.mxu3 }
 0x1b8   : > { %880 = vmatmul.bf16.gmra.mxu2 %v590_v63 }
 0x1b9   : > { %v866_v14 = vpop.f32.mrf.mxu2  ;;  %v561_v17 = vmul.f32 %v1641_v19, %v541_v24 }
 0x1ba   : > { %v906_v18 = vpack.c.bf16 %v866_v14, %v866_v14  ;;  %v770_v1 = vpop.f32.mrf.mxu0 }
 0x1bb   : > { %v819_v15 = vpop.f32.mrf.mxu1  ;;  %v581_v58 = vadd.f32 %v1670_v4, %v561_v17 }
 0x1bc   : > { %v907_v48 = vpack.c.bf16 %v819_v15, %v770_v1  ;;  %938 = vst [vmem:[%s1799_s29 + $0x20] sm:$0xf] %v906_v18 }
 0x1bd   : > { %v591_v23 = vpack.c.bf16 %v581_v58, %v580_v16 }
 0x1be   : > { %939 = vst [vmem:[%s1799_s29 + $0x24] sm:$0xff] %v907_v48 }
 0x1bf   : > { %v800_v2 = vpop.f32.mrf.mxu3 }
 0x1c1   : > { %v868_v39 = vpop.f32.mrf.mxu2 }
 0x1c2   : > { %v908_v49 = vpack.c.bf16 %v868_v39, %v868_v39  ;;  %v773_v59 = vpop.f32.mrf.mxu0 }
 0x1c3   : > { %v822_v43 = vpop.f32.mrf.mxu1 }
 0x1c4   : > { %v909_v27 = vpack.c.bf16 %v822_v43, %v773_v59  ;;  %940 = vst [vmem:[%s1799_s29 + $0x2c] sm:$0xf] %v908_v49 }
 0x1c6   : > { %941 = vst [vmem:[%s1799_s29 + $0x30] sm:$0xff] %v909_v27 }
 0x1c7   : > { %787 = vmatmul.bf16.gmra.mxu0 %v591_v23  ;;  %836 = vmatmul.bf16.gmra.mxu1 %v591_v23  ;;  %v842_v19 = vpop.f32.mrf.mxu3 }
 0x1c8   : > { %885 = vmatmul.bf16.gmra.mxu2 %v591_v23  ;;  %v925_v10 = vpack.c.bf16 %v842_v19, %v1813_v54 }
 0x1c9   : > { %v871_v53 = vpop.f32.mrf.mxu2 }
 0x1ca   : > { %v910_v28 = vpack.c.bf16 %v871_v53, %v871_v53  ;;  %v775_v57 = vpop.f32.mrf.mxu0  ;;  %957 = vst [vmem:[%s1799_s29 + $0x90] sm:$0xff] %v925_v10 }
 0x1cb   : > { %v824_v44 = vpop.f32.mrf.mxu1 }
 0x1cc   : > { %v911_v0 = vpack.c.bf16 %v824_v44, %v775_v57  ;;  %942 = vst [vmem:[%s1799_s29 + $0x38] sm:$0xf] %v910_v28 }
 0x1ce   : > { %943 = vst [vmem:[%s1799_s29 + $0x3c] sm:$0xff] %v911_v0 }
 0x1cf   : > { %v844_v4 = vpop.f32.mrf.mxu3 }
 0x1d0   : > { %v927_v8 = vpack.c.bf16 %v844_v4, %v795_v62 }
 0x1d1   : > { %v873_v42 = vpop.f32.mrf.mxu2 }
 0x1d2   : > { %v912_v35 = vpack.c.bf16 %v873_v42, %v873_v42  ;;  %959 = vst [vmem:[%s1799_s29 + $0x9c] sm:$0xff] %v927_v8 }
 0x1d4   : > { %944 = vst [vmem:[%s1799_s29 + $0x44] sm:$0xf] %v912_v35 }
 0x1d7   : > { %v847_v51 = vpop.f32.mrf.mxu3 }
 0x1d8   : > { %v929_v54 = vpack.c.bf16 %v847_v51, %v798_v33 }
 0x1da   : > { %961 = vst [vmem:[%s1799_s29 + $0xa8] sm:$0xff] %v929_v54 }
 0x1df   : > { %v849_v60 = vpop.f32.mrf.mxu3 }
 0x1e0   : > { %v931_v56 = vpack.c.bf16 %v849_v60, %v800_v2 }
 0x1e2   : > { %963 = vst [vmem:[%s1799_s29 + $0xb4] sm:$0xff] %v931_v56 }
 0x1e7   : > { %v891_v5 = vpop.f32.mrf.mxu3 }
 0x1e8   : > { %v926_v21 = vpack.c.bf16 %v891_v5, %v891_v5 }
 0x1ea   : > { %958 = vst [vmem:[%s1799_s29 + $0x98] sm:$0xf] %v926_v21 }
 0x1ef   : > { %v893_v32 = vpop.f32.mrf.mxu3 }
 0x1f0   : > { %v928_v25 = vpack.c.bf16 %v893_v32, %v893_v32 }
 0x1f2   : > { %960 = vst [vmem:[%s1799_s29 + $0xa4] sm:$0xf] %v928_v25 }
 0x1f7   : > { %v896_v52 = vpop.f32.mrf.mxu3 }
 0x1f8   : > { %v930_v46 = vpack.c.bf16 %v896_v52, %v896_v52 }
 0x1fa   : > { %962 = vst [vmem:[%s1799_s29 + $0xb0] sm:$0xf] %v930_v46 }
 0x1ff   : > { %v898_v45 = vpop.f32.mrf.mxu3 }
 0x200   : > { %v932_v12 = vpack.c.bf16 %v898_v45, %v898_v45 }
 0x202   : > { %964 = vst [vmem:[%s1799_s29 + $0xbc] sm:$0xf] %v932_v12 }
 0x224   : > { %v778_v30 = vpop.f32.mrf.mxu0  ;;  %v827_v36 = vpop.f32.mrf.mxu1 }
 0x225   : > { %v913_v38 = vpack.c.bf16 %v827_v36, %v778_v30 }
 0x227   : > { %945 = vst [vmem:[%s1799_s29 + $0x48] sm:$0xff] %v913_v38 }
 0x22b   : > { %v876_v50 = vpop.f32.mrf.mxu2 }
 0x22c   : > { %v914_v40 = vpack.c.bf16 %v876_v50, %v876_v50  ;;  %v780_v22 = vpop.f32.mrf.mxu0  ;;  %v829_v26 = vpop.f32.mrf.mxu1 }
 0x22d   : > { %v915_v20 = vpack.c.bf16 %v829_v26, %v780_v22 }
 0x22e   : > { %946 = vst [vmem:[%s1799_s29 + $0x50] sm:$0xf] %v914_v40 }
 0x22f   : > { %947 = vst [vmem:[%s1799_s29 + $0x54] sm:$0xff] %v915_v20 }
 0x233   : > { %v878_v62 = vpop.f32.mrf.mxu2 }
 0x234   : > { %v916_v3 = vpack.c.bf16 %v878_v62, %v878_v62  ;;  %v783_v31 = vpop.f32.mrf.mxu0  ;;  %v832_v13 = vpop.f32.mrf.mxu1 }
 0x235   : > { %v917_v9 = vpack.c.bf16 %v832_v13, %v783_v31 }
 0x236   : > { %948 = vst [vmem:[%s1799_s29 + $0x5c] sm:$0xf] %v916_v3 }
 0x237   : > { %949 = vst [vmem:[%s1799_s29 + $0x60] sm:$0xff] %v917_v9 }
 0x23b   : > { %v881_v37 = vpop.f32.mrf.mxu2 }
 0x23c   : > { %v918_v61 = vpack.c.bf16 %v881_v37, %v881_v37  ;;  %v785_v6 = vpop.f32.mrf.mxu0  ;;  %v834_v7 = vpop.f32.mrf.mxu1 }
 0x23d   : > { %v919_v41 = vpack.c.bf16 %v834_v7, %v785_v6 }
 0x23e   : > { %950 = vst [vmem:[%s1799_s29 + $0x68] sm:$0xf] %v918_v61 }
 0x23f   : > { %951 = vst [vmem:[%s1799_s29 + $0x6c] sm:$0xff] %v919_v41 }
 0x243   : > { %v883_v29 = vpop.f32.mrf.mxu2 }
 0x244   : > { %v920_v63 = vpack.c.bf16 %v883_v29, %v883_v29  ;;  %v788_v55 = vpop.f32.mrf.mxu0  ;;  %v837_v34 = vpop.f32.mrf.mxu1 }
 0x245   : > { %v921_v24 = vpack.c.bf16 %v837_v34, %v788_v55 }
 0x246   : > { %952 = vst [vmem:[%s1799_s29 + $0x74] sm:$0xf] %v920_v63 }
 0x247   : > { %953 = vst [vmem:[%s1799_s29 + $0x78] sm:$0xff] %v921_v24 }
 0x24b   : > { %v886_v33 = vpop.f32.mrf.mxu2 }
 0x24c   : > { %v922_v14 = vpack.c.bf16 %v886_v33, %v886_v33  ;;  %v790_v18 = vpop.f32.mrf.mxu0  ;;  %v839_v1 = vpop.f32.mrf.mxu1 }
 0x24d   : > { %v923_v15 = vpack.c.bf16 %v839_v1, %v790_v18 }
 0x24e   : > { %954 = vst [vmem:[%s1799_s29 + $0x80] sm:$0xf] %v922_v14 }
 0x24f   : > { %955 = vst [vmem:[%s1799_s29 + $0x84] sm:$0xff] %v923_v15 }
 0x253   : > { %v888_v47 = vpop.f32.mrf.mxu2 }
 0x254   : > { %v924_v48 = vpack.c.bf16 %v888_v47, %v888_v47 }
 0x256   : > { %956 = vst [vmem:[%s1799_s29 + $0x8c] sm:$0xf] %v924_v48 }
 0x257 PF: > { %s14_s15 = sadd.s32 1, %s1230_s15  }
 0x258   : > { %p11_p4 = scmp.ge.s32.totalorder %s14_s15, 4  }
 0x25a   :  { %13 = sbr.rel (!%p11_p4) target bundleno = 1 (0x1), region = 66 }

// kernel: block_forward.6
= control target key start
LH: loop header
LB: loop body
LE: loop exit
PB: predicated region body
PF: predicated region fallthrough
CT: control target
= control target key end

     0   :  { %s4098_s12 = smov 0   ;;  %s4100_s13 = smov 0   ;;  %s6948_s0 = inlined_call_operand.vmem [shape: bf16[256,384], index: 0, kind: input, shape index: {}, may-alias: {0,1,2}]   ;;  %s6949_s1 = inlined_call_operand.vmem [shape: bf16[256,384], index: 1, kind: input, shape index: {}, may-alias: {0,1,2}]   ;;  %s6950_s2 = inlined_call_operand.vmem [shape: bf16[256,384], index: 2, kind: input, shape index: {}, may-alias: {0,1,2}]   ;;  %s6951_s3 = inlined_call_operand.vmem [shape: bf16[256,128], index: 3, kind: output, shape index: {}]  }
   0x1   :  { %s4102_s14 = smov 0   ;;  %s4104_s15 = smov 0  }
   0x2   :  { %s4106_s16 = smov 0  }
   0x3 LB: > { %s25_s17 = sadd.s32 1, %s4069_s15  ;;  %p41_p1 = scmp.ne.s32.totalorder %s4061_s13, %s4057_s12  ;;  %s4073_s16 = sphi %s4106_s16, %s13_s16   ;;  %s4069_s15 = sphi %s4104_s15, %s7212_s15   ;;  %s4065_s14 = sphi %s4102_s14, %s7211_s14   ;;  %s4061_s13 = sphi %s4100_s13, %s7210_s13   ;;  %s4057_s12 = sphi %s4098_s12, %s7209_s12  }
   0x4   : > { %p27_p0 = scmp.ge.s32.totalorder %s25_s17, 2  ;;  %p42_p2 = scmp.eq.s32.totalorder %s4073_s16, 0 }
   0x5   : > { %s34_s20 = sadd.s32 1, %s4061_s13  ;;  %p3346_p5 = scmp.ge.s32.totalorder %s4073_s16, 2 }
   0x6   : > { %s7214_s17 = smov (%p27_p0, %s25_s17), 0  ;;  %p4129_p3 = por %p42_p2, %p41_p1 }
   0x7   : > { %s29_s19 = ssub.s32 %s4069_s15, %s7214_s17  ;;  %155 = sbr.rel (%p3346_p5) target bundleno = 75 (0x4b), region = 16 }
   0x8   : > { %p32_p4 = scmp.eq.s32.totalorder %s29_s19, 0 }
   0xa   : > { %s4137_s21 = scalar_select %p32_p4, %s4061_s13, %s34_s20  }
   0xc   : > { %158 = sbr.rel (!%p4129_p3) target bundleno = 33 (0x21), region = 20  ;;  %s160_s22 = sand.u32 (%p4129_p3), 1, %s4061_s13  }
   0xd   : > { %s3609_s23 = smul.u32 (%p4129_p3), 192, %s4069_s15  ;;  %s3347_s24 = sshll.u32 (%p4129_p3), %s160_s22, 6 }
   0xe   : > { %s162_s28 = scalar_lea.vmem (%p4129_p3), [#allocation2], %s3347_s24 }
   0xf   : > { %s4147_s27 = scalar_lea.vmem (%p4129_p3), %s6948_s0, %s3609_s23 }
  0x10   : > { %v184_v0 = vld [vmem:[%s4147_s27] sm:$0xf] (%p4129_p3)  ;;  %v186_v1 = vld [vmem:[%s4147_s27 + $0xc] sm:$0xf] (%p4129_p3)  ;;  %v188_v2 = vld [vmem:[%s4147_s27 + $0x18] sm:$0xf] (%p4129_p3) }
  0x11   : > { %185 = vst [vmem:[%s162_s28] sm:$0xf] %v184_v0  ;;  %v190_v3 = vld [vmem:[%s4147_s27 + $0x24] sm:$0xf]  ;;  %v192_v4 = vld [vmem:[%s4147_s27 + $0x30] sm:$0xf] }
  0x12   : > { %187 = vst [vmem:[%s162_s28 + $0x4] sm:$0xf] %v186_v1  ;;  %v194_v5 = vld [vmem:[%s4147_s27 + $0x3c] sm:$0xf]  ;;  %v196_v6 = vld [vmem:[%s4147_s27 + $0x48] sm:$0xf] }
  0x13   : > { %189 = vst [vmem:[%s162_s28 + $0x8] sm:$0xf] %v188_v2  ;;  %v198_v7 = vld [vmem:[%s4147_s27 + $0x54] sm:$0xf]  ;;  %v200_v8 = vld [vmem:[%s4147_s27 + $0x60] sm:$0xf] }
  0x14   : > { %191 = vst [vmem:[%s162_s28 + $0xc] sm:$0xf] %v190_v3  ;;  %v202_v9 = vld [vmem:[%s4147_s27 + $0x6c] sm:$0xf]  ;;  %v204_v10 = vld [vmem:[%s4147_s27 + $0x78] sm:$0xf] }
  0x15   : > { %193 = vst [vmem:[%s162_s28 + $0x10] sm:$0xf] %v192_v4  ;;  %v206_v11 = vld [vmem:[%s4147_s27 + $0x84] sm:$0xf]  ;;  %v208_v12 = vld [vmem:[%s4147_s27 + $0x90] sm:$0xf] }
  0x16   : > { %195 = vst [vmem:[%s162_s28 + $0x14] sm:$0xf] %v194_v5  ;;  %v210_v13 = vld [vmem:[%s4147_s27 + $0x9c] sm:$0xf]  ;;  %v212_v14 = vld [vmem:[%s4147_s27 + $0xa8] sm:$0xf] }
  0x17   : > { %197 = vst [vmem:[%s162_s28 + $0x18] sm:$0xf] %v196_v6  ;;  %v214_v15 = vld [vmem:[%s4147_s27 + $0xb4] sm:$0xf] }
  0x18   : > { %199 = vst [vmem:[%s162_s28 + $0x1c] sm:$0xf] %v198_v7 }
  0x19   : > { %201 = vst [vmem:[%s162_s28 + $0x20] sm:$0xf] %v200_v8 }
  0x1a   : > { %203 = vst [vmem:[%s162_s28 + $0x24] sm:$0xf] %v202_v9 }
  0x1b   : > { %205 = vst [vmem:[%s162_s28 + $0x28] sm:$0xf] %v204_v10 }
  0x1c   : > { %207 = vst [vmem:[%s162_s28 + $0x2c] sm:$0xf] %v206_v11 }
  0x1d   : > { %209 = vst [vmem:[%s162_s28 + $0x30] sm:$0xf] %v208_v12 }
  0x1e   : > { %211 = vst [vmem:[%s162_s28 + $0x34] sm:$0xf] %v210_v13 }
  0x1f   : > { %213 = vst [vmem:[%s162_s28 + $0x38] sm:$0xf] %v212_v14 }
  0x20   : > { %215 = vst [vmem:[%s162_s28 + $0x3c] sm:$0xf] %v214_v15 }
  0x21 PF: > { %271 = sbr.rel (!%p4129_p3) target bundleno = 54 (0x36), region = 61  ;;  %s273_s29 = sand.u32 (%p4129_p3), 1, %s4061_s13  }
  0x22   : > { %s3352_s30 = smul.u32 (%p4129_p3), 192, %s4069_s15  ;;  %s3351_s4 = sshll.u32 (%p4129_p3), %s273_s29, 6 }
  0x23   : > { %s275_s8 = scalar_lea.vmem (%p4129_p3), [#allocation3], %s3351_s4 }
  0x24   : > { %s4172_s7 = scalar_lea.vmem (%p4129_p3), %s6949_s1, %s3352_s30 }
  0x25   : > { %v3353_v16 = vld [vmem:[%s4172_s7 + $0x4] sm:$0xf] (%p4129_p3)  ;;  %v3354_v17 = vld [vmem:[%s4172_s7 + $0x10] sm:$0xf] (%p4129_p3)  ;;  %v3355_v18 = vld [vmem:[%s4172_s7 + $0x1c] sm:$0xf] (%p4129_p3) }
  0x26   : > { %299 = vst [vmem:[%s275_s8] sm:$0xf] %v3353_v16  ;;  %v3356_v19 = vld [vmem:[%s4172_s7 + $0x28] sm:$0xf]  ;;  %v3357_v20 = vld [vmem:[%s4172_s7 + $0x34] sm:$0xf] }
  0x27   : > { %301 = vst [vmem:[%s275_s8 + $0x4] sm:$0xf] %v3354_v17  ;;  %v3358_v21 = vld [vmem:[%s4172_s7 + $0x40] sm:$0xf]  ;;  %v3359_v22 = vld [vmem:[%s4172_s7 + $0x4c] sm:$0xf] }
  0x28   : > { %303 = vst [vmem:[%s275_s8 + $0x8] sm:$0xf] %v3355_v18  ;;  %v3360_v23 = vld [vmem:[%s4172_s7 + $0x58] sm:$0xf]  ;;  %v3361_v24 = vld [vmem:[%s4172_s7 + $0x64] sm:$0xf] }
  0x29   : > { %305 = vst [vmem:[%s275_s8 + $0xc] sm:$0xf] %v3356_v19  ;;  %v3362_v25 = vld [vmem:[%s4172_s7 + $0x70] sm:$0xf]  ;;  %v3363_v26 = vld [vmem:[%s4172_s7 + $0x7c] sm:$0xf] }
  0x2a   : > { %307 = vst [vmem:[%s275_s8 + $0x10] sm:$0xf] %v3357_v20  ;;  %v3364_v27 = vld [vmem:[%s4172_s7 + $0x88] sm:$0xf]  ;;  %v3365_v28 = vld [vmem:[%s4172_s7 + $0x94] sm:$0xf] }
  0x2b   : > { %309 = vst [vmem:[%s275_s8 + $0x14] sm:$0xf] %v3358_v21  ;;  %v3366_v29 = vld [vmem:[%s4172_s7 + $0xa0] sm:$0xf]  ;;  %v3367_v30 = vld [vmem:[%s4172_s7 + $0xac] sm:$0xf] }
  0x2c   : > { %311 = vst [vmem:[%s275_s8 + $0x18] sm:$0xf] %v3359_v22  ;;  %v3368_v31 = vld [vmem:[%s4172_s7 + $0xb8] sm:$0xf] }
  0x2d   : > { %313 = vst [vmem:[%s275_s8 + $0x1c] sm:$0xf] %v3360_v23 }
  0x2e   : > { %315 = vst [vmem:[%s275_s8 + $0x20] sm:$0xf] %v3361_v24 }
  0x2f   : > { %317 = vst [vmem:[%s275_s8 + $0x24] sm:$0xf] %v3362_v25 }
  0x30   : > { %319 = vst [vmem:[%s275_s8 + $0x28] sm:$0xf] %v3363_v26 }
  0x31   : > { %321 = vst [vmem:[%s275_s8 + $0x2c] sm:$0xf] %v3364_v27 }
  0x32   : > { %323 = vst [vmem:[%s275_s8 + $0x30] sm:$0xf] %v3365_v28 }
  0x33   : > { %325 = vst [vmem:[%s275_s8 + $0x34] sm:$0xf] %v3366_v29 }
  0x34   : > { %327 = vst [vmem:[%s275_s8 + $0x38] sm:$0xf] %v3367_v30 }
  0x35   : > { %329 = vst [vmem:[%s275_s8 + $0x3c] sm:$0xf] %v3368_v31 }
  0x36 PF: > { %385 = sbr.rel (!%p4129_p3) target bundleno = 75 (0x4b), region = 102  ;;  %s387_s9 = sand.u32 (%p4129_p3), 1, %s4061_s13  }
  0x37   : > { %s3370_s10 = smul.u32 (%p4129_p3), 192, %s4069_s15  ;;  %s3369_s11 = sshll.u32 (%p4129_p3), %s387_s9, 6 }
  0x38   : > { %s389_s18 = scalar_lea.vmem (%p4129_p3), [#allocation4], %s3369_s11 }
  0x39   : > { %s4197_s22 = scalar_lea.vmem (%p4129_p3), %s6950_s2, %s3370_s10 }
  0x3a   : > { %v3371_v32 = vld [vmem:[%s4197_s22 + $0x8] sm:$0xf] (%p4129_p3)  ;;  %v3372_v33 = vld [vmem:[%s4197_s22 + $0x14] sm:$0xf] (%p4129_p3)  ;;  %v3373_v34 = vld [vmem:[%s4197_s22 + $0x20] sm:$0xf] (%p4129_p3) }
  0x3b   : > { %413 = vst [vmem:[%s389_s18] sm:$0xf] %v3371_v32  ;;  %v3374_v35 = vld [vmem:[%s4197_s22 + $0x2c] sm:$0xf]  ;;  %v3375_v36 = vld [vmem:[%s4197_s22 + $0x38] sm:$0xf] }
  0x3c   : > { %415 = vst [vmem:[%s389_s18 + $0x4] sm:$0xf] %v3372_v33  ;;  %v3376_v37 = vld [vmem:[%s4197_s22 + $0x44] sm:$0xf]  ;;  %v3377_v38 = vld [vmem:[%s4197_s22 + $0x50] sm:$0xf] }
  0x3d   : > { %417 = vst [vmem:[%s389_s18 + $0x8] sm:$0xf] %v3373_v34  ;;  %v3378_v39 = vld [vmem:[%s4197_s22 + $0x5c] sm:$0xf]  ;;  %v3379_v40 = vld [vmem:[%s4197_s22 + $0x68] sm:$0xf] }
  0x3e   : > { %419 = vst [vmem:[%s389_s18 + $0xc] sm:$0xf] %v3374_v35  ;;  %v3380_v41 = vld [vmem:[%s4197_s22 + $0x74] sm:$0xf]  ;;  %v3381_v42 = vld [vmem:[%s4197_s22 + $0x80] sm:$0xf] }
  0x3f   : > { %421 = vst [vmem:[%s389_s18 + $0x10] sm:$0xf] %v3375_v36  ;;  %v3382_v43 = vld [vmem:[%s4197_s22 + $0x8c] sm:$0xf]  ;;  %v3383_v44 = vld [vmem:[%s4197_s22 + $0x98] sm:$0xf] }
  0x40   : > { %423 = vst [vmem:[%s389_s18 + $0x14] sm:$0xf] %v3376_v37  ;;  %v3384_v45 = vld [vmem:[%s4197_s22 + $0xa4] sm:$0xf]  ;;  %v3385_v46 = vld [vmem:[%s4197_s22 + $0xb0] sm:$0xf] }
  0x41   : > { %425 = vst [vmem:[%s389_s18 + $0x18] sm:$0xf] %v3377_v38  ;;  %v3386_v47 = vld [vmem:[%s4197_s22 + $0xbc] sm:$0xf] }
  0x42   : > { %427 = vst [vmem:[%s389_s18 + $0x1c] sm:$0xf] %v3378_v39 }
  0x43   : > { %429 = vst [vmem:[%s389_s18 + $0x20] sm:$0xf] %v3379_v40 }
  0x44   : > { %431 = vst [vmem:[%s389_s18 + $0x24] sm:$0xf] %v3380_v41 }
  0x45   : > { %433 = vst [vmem:[%s389_s18 + $0x28] sm:$0xf] %v3381_v42 }
  0x46   : > { %435 = vst [vmem:[%s389_s18 + $0x2c] sm:$0xf] %v3382_v43 }
  0x47   : > { %437 = vst [vmem:[%s389_s18 + $0x30] sm:$0xf] %v3383_v44 }
  0x48   : > { %439 = vst [vmem:[%s389_s18 + $0x34] sm:$0xf] %v3384_v45 }
  0x49   : > { %441 = vst [vmem:[%s389_s18 + $0x38] sm:$0xf] %v3385_v46 }
  0x4a   : > { %443 = vst [vmem:[%s389_s18 + $0x3c] sm:$0xf] %v3386_v47 }
  0x4b PF: > { %p3387_p6 = scmp.ge.s32.totalorder %s4073_s16, 1  ;;  %p498_p7 = scmp.lt.s32.totalorder %s4073_s16, 3 }
  0x4d   : > { %p499_p8 = pnand %p3387_p6, %p498_p7 }
  0x4f   : > { %502 = sbr.rel (%p499_p8) target bundleno = 1330 (0x532), region = 143 }
  0x54   : > { %s505_s23 = sand.u32 1, %s4057_s12   ;;  %vm695_vm0 = vcmask 261120   ;;  %s4075_s26 = smov 96  }
  0x55   : > { %s4218_s24 = sshll.u32 %s505_s23, 6  ;;  %s4076_s27 = smov 64  }
  0x56   : > { %s4221_s25 = scalar_lea.vmem [#allocation3], %s4218_s24  ;;  %s4241_s12 = scalar_lea.vmem [#allocation2], %s4218_s24 }
  0x57   : > { %v4224_v48 = vld [vmem:[%s4221_s25 + $0x38] sm:$0xff]  ;;  %v4227_v49 = vld [vmem:[%s4221_s25 + $0x30] sm:$0xff]  ;;  %v4230_v50 = vld [vmem:[%s4221_s25 + $0x28] sm:$0xff]  ;;  %s4077_s28 = smov 32   ;;  %s4340_s29 = scalar_lea.vmem [#allocation4], %s4218_s24 }
  0x58   : > { %1288 = vrot.lane.b32.xlu1 %v4224_v48, %s4075_s26  ;;  %v742_v51 = vsel %vm695_vm0, %v4224_v48, 0  ;;  %1286 = vrot.lane.b32.xlu0 %v4227_v49, %s4075_s26  ;;  %v3580_v52 = vld [vmem:[%s4241_s12 + $0x10] sm:$0xff]   ;;  %v3581_v55 = vld [vmem:[%s4241_s12 + $0x18] sm:$0xff]   ;;  %v739_v60 = vsel %vm695_vm0, %v4227_v49, 0  ;;  %v736_v8 = vsel %vm695_vm0, %v4230_v50, 0  ;;  %s3391_s30 = sshll.u32 %s4065_s14, 4 }
  0x59   : > { %744 = vmatpush.bf16.xpose.msra.mxu0 %v742_v51  ;;  %1284 = vrot.lane.b32.xlu2 %v4230_v50, %s4075_s26  ;;  %v3517_v53 = vunpack.c.l.bf16 %v3580_v52  ;;  %v3518_v54 = vunpack.c.h.bf16 %v3580_v52  ;;  %v4246_v56 = vld [vmem:[%s4221_s25 + $0x20] sm:$0xff]  ;;  %v4249_v57 = vld [vmem:[%s4221_s25 + $0x18] sm:$0xff]  ;;  %v3521_v62 = vunpack.c.l.bf16 %v3581_v55  ;;  %v3522_v63 = vunpack.c.h.bf16 %v3581_v55  ;;  %v4263_v3 = vld [vmem:[%s4221_s25 + $0x10] sm:$0xff]  ;;  %p559_p9 = scmp.lt.s32.totalorder %s3391_s30, 31 }
  0x5a   : > { %v3508_v0 = vld [vmem:[%s4241_s12] sm:$0xff]   ;;  %v4266_v4 = vld [vmem:[%s4221_s25 + $0x8] sm:$0xff]  ;;  %v733_v22 = vsel %vm695_vm0, %v4246_v56, 0  ;;  %v730_v32 = vsel %vm695_vm0, %v4249_v57, 0  ;;  %v3584_v33 = vld [vmem:[%s4241_s12 + $0x30] sm:$0xff]   ;;  %v727_v36 = vsel %vm695_vm0, %v4263_v3, 0 }
  0x5b   : > { %v603_v58 = vmul.f32 0.17675781, %v3517_v53  ;;  %v604_v59 = vmul.f32 0.17675781, %v3518_v54  ;;  %v605_v1 = vmul.f32 0.17675781, %v3521_v62  ;;  %v606_v2 = vmul.f32 0.17675781, %v3522_v63  ;;  %v3582_v11 = vld [vmem:[%s4241_s12 + $0x20] sm:$0xff]   ;;  %v3579_v12 = vld [vmem:[%s4241_s12 + $0x8] sm:$0xff]  }
  0x5c   : > { %v3509_v5 = vunpack.c.l.bf16 %v3508_v0  ;;  %v3510_v6 = vunpack.c.h.bf16 %v3508_v0  ;;  %v3583_v13 = vld [vmem:[%s4241_s12 + $0x28] sm:$0xff]   ;;  %v3525_v14 = vunpack.c.l.bf16 %v3582_v11  ;;  %v4282_v15 = vld [vmem:[%s4221_s25] sm:$0xff]  ;;  %v3526_v17 = vunpack.c.h.bf16 %v3582_v11  ;;  %v3585_v37 = vld [vmem:[%s4241_s12 + $0x38] sm:$0xff]   ;;  %s7216_s30 = smov (!%p559_p9, %s3391_s30), 31 }
  0x5d   : > { %v4253_v61 = vpack.c.bf16 %v604_v59, %v603_v58  ;;  %v4268_v7 = vpack.c.bf16 %v606_v2, %v605_v1  ;;  %v3513_v18 = vunpack.c.l.bf16 %v3579_v12  ;;  %v3514_v19 = vunpack.c.h.bf16 %v3579_v12  ;;  %v4375_v52 = vld [vmem:[%s4340_s29 + $0x30] sm:$0xff]  ;;  %v4389_v54 = vld [vmem:[%s4340_s29 + $0x20] sm:$0xff]  ;;  %v4409_v59 = vld [vmem:[%s4340_s29 + $0x8] sm:$0xff]  ;;  %s3392_s14 = sshll.u32 %s7216_s30, 2 }
  0x5e   : > { %v599_v9 = vmul.f32 0.17675781, %v3509_v5  ;;  %v600_v10 = vmul.f32 0.17675781, %v3510_v6  ;;  %v3529_v20 = vunpack.c.l.bf16 %v3583_v13  ;;  %v3530_v21 = vunpack.c.h.bf16 %v3583_v13  ;;  %v4415_v63 = vld [vmem:[%s4340_s29] sm:$0xff]  ;;  %s6825_s6 = scalar_lea.vmem %s6951_s3, %s3392_s14 }
  0x5f   : > { %v607_v23 = vmul.f32 0.17675781, %v3525_v14  ;;  %v608_v24 = vmul.f32 0.17675781, %v3526_v17  ;;  %v601_v25 = vmul.f32 0.17675781, %v3513_v18  ;;  %v602_v26 = vmul.f32 0.17675781, %v3514_v19 }
  0x60   : > { %1282 = vrot.lane.b32.xlu1 %v4246_v56, %s4075_s26  ;;  %1280 = vrot.lane.b32.xlu0 %v4249_v57, %s4075_s26  ;;  %v4284_v16 = vpack.c.bf16 %v600_v10, %v599_v9  ;;  %v609_v27 = vmul.f32 0.17675781, %v3529_v20  ;;  %v610_v28 = vmul.f32 0.17675781, %v3530_v21  ;;  %v3533_v34 = vunpack.c.l.bf16 %v3584_v33 }
  0x61   : > { %745 = vmatpush.bf16.xpose.msra.mxu0 %v739_v60  ;;  %1262 = vrot.lane.b32.xlu2 %v4253_v61, %s4075_s26  ;;  %v4294_v29 = vpack.c.bf16 %v608_v24, %v607_v23  ;;  %v616_v30 = vpack.c.bf16 %v602_v26, %v601_v25  ;;  %v3534_v35 = vunpack.c.h.bf16 %v3584_v33  ;;  %v3537_v40 = vunpack.c.l.bf16 %v3585_v37 }
  0x62   : > { %v4296_v31 = vpack.c.bf16 %v610_v28, %v609_v27  ;;  %v611_v38 = vmul.f32 0.17675781, %v3533_v34  ;;  %v3538_v41 = vunpack.c.h.bf16 %v3585_v37  ;;  %v724_v43 = vsel %vm695_vm0, %v4266_v4, 0 }
  0x63   : > { %v612_v39 = vmul.f32 0.17675781, %v3534_v35  ;;  %v613_v44 = vmul.f32 0.17675781, %v3537_v40  ;;  %v721_v47 = vsel %vm695_vm0, %v4282_v15, 0 }
  0x64   : > { %v614_v45 = vmul.f32 0.17675781, %v3538_v41 }
  0x65   : > { %v4315_v42 = vpack.c.bf16 %v612_v39, %v611_v38 }
  0x66   : > { %v4325_v46 = vpack.c.bf16 %v614_v45, %v613_v44 }
  0x68   : > { %1278 = vrot.lane.b32.xlu1 %v4263_v3, %s4075_s26  ;;  %1276 = vrot.lane.b32.xlu0 %v4266_v4, %s4075_s26 }
  0x69   : > { %746 = vmatpush.bf16.xpose.msra.mxu0 %v736_v8  ;;  %1264 = vrot.lane.b32.xlu2 %v4268_v7, %s4075_s26 }
  0x70   : > { %1274 = vrot.lane.b32.xlu1 %v4282_v15, %s4075_s26  ;;  %1258 = vrot.lane.b32.xlu0 %v4284_v16, %s4075_s26 }
  0x71   : > { %747 = vmatpush.bf16.xpose.msra.mxu0 %v733_v22  ;;  %1850 = vrot.lane.b32.xlu2 %v4224_v48, %s4076_s27 }
  0x78   : > { %1266 = vrot.lane.b32.xlu1 %v4294_v29, %s4075_s26  ;;  %1260 = vrot.lane.b32.xlu0 %v616_v30, %s4075_s26 }
  0x79   : > { %748 = vmatpush.bf16.xpose.msra.mxu0 %v730_v32  ;;  %1268 = vrot.lane.b32.xlu2 %v4296_v31, %s4075_s26 }
  0x80   : > { %1844 = vrot.lane.b32.xlu1 %v4246_v56, %s4076_s27  ;;  %1848 = vrot.lane.b32.xlu0 %v4227_v49, %s4076_s27 }
  0x81   : > { %749 = vmatpush.bf16.xpose.msra.mxu0 %v727_v36  ;;  %1846 = vrot.lane.b32.xlu2 %v4230_v50, %s4076_s27 }
  0x88   : > { %2412 = vrot.lane.b32.xlu1 %v4224_v48, %s4077_s28  ;;  %1842 = vrot.lane.b32.xlu0 %v4249_v57, %s4076_s27  ;;  %v4343_v48 = vld [vmem:[%s4340_s29 + $0x38] sm:$0xff] }
  0x89   : > { %750 = vmatpush.bf16.xpose.msra.mxu0 %v724_v43  ;;  %1270 = vrot.lane.b32.xlu2 %v4315_v42, %s4075_s26 }
  0x8a   : > { %961 = vmatpush.bf16.msra.mxu1 %v4343_v48 }
  0x8e   : > { %962 = vmatpush.bf16.msra.mxu1 %v4375_v52 }
  0x90   : > { %1272 = vrot.lane.b32.xlu1 %v4325_v46, %s4075_s26  ;;  %2410 = vrot.lane.b32.xlu0 %v4227_v49, %s4077_s28  ;;  %v4353_v49 = vld [vmem:[%s4340_s29 + $0x28] sm:$0xff] }
  0x91   : > { %751 = vmatpush.bf16.xpose.msra.mxu0 %v721_v47  ;;  %1840 = vrot.lane.b32.xlu2 %v4263_v3, %s4076_s27 }
  0x92   : > { %963 = vmatpush.bf16.msra.mxu1 %v4353_v49 }
  0x96   : > { %964 = vmatpush.bf16.msra.mxu1 %v4389_v54 }
  0x98   : > { %3425 = vmatmul.msk.bf16.vlgmr.msra.gmra.mxu0 %vm695_vm0, %v4284_v16  ;;  %1836 = vrot.lane.b32.xlu1 %v4282_v15, %s4076_s27 }
  0x99   : > { %2408 = vrot.lane.b32.xlu0 %v4230_v50, %s4077_s28  ;;  %1838 = vrot.lane.b32.xlu2 %v4266_v4, %s4076_s27  ;;  %v4365_v50 = vld [vmem:[%s4340_s29 + $0x10] sm:$0xff] }
  0xa0   : > { %1820 = vrot.lane.b32.xlu1 %v4284_v16, %s4076_s27 }
  0xa1   : > { %2406 = vrot.lane.b32.xlu2 %v4246_v56, %s4077_s28  ;;  %1517 = vrot.lane.b32.xlu0 %v4353_v49, %s4075_s26  ;;  %v4399_v56 = vld [vmem:[%s4340_s29 + $0x18] sm:$0xff] }
  0xa2   : > { %965 = vmatpush.bf16.msra.mxu1 %v4399_v56 }
  0xa6   : > { %966 = vmatpush.bf16.msra.mxu1 %v4365_v50 }
  0xa8   : > { %3426 = vmatmul.msk.bf16.gmra.mxu0 %vm695_vm0, %v616_v30  ;;  %2402 = vrot.lane.b32.xlu1 %v4263_v3, %s4077_s28 }
  0xa9   : > { %2404 = vrot.lane.b32.xlu2 %v4249_v57, %s4077_s28  ;;  %1511 = vrot.lane.b32.xlu0 %v4365_v50, %s4075_s26 }
  0xaa   : > { %967 = vmatpush.bf16.msra.mxu1 %v4409_v59 }
  0xae   : > { %968 = vmatpush.bf16.msra.mxu1 %v4415_v63 }
  0xb0   : > { %2400 = vrot.lane.b32.xlu1 %v4266_v4, %s4077_s28 }
  0xb1   : > { %1822 = vrot.lane.b32.xlu2 %v616_v30, %s4076_s27  ;;  %1826 = vrot.lane.b32.xlu0 %v4268_v7, %s4076_s27 }
  0xb3   : > { %v1285_v51 = vpop.permute.xlu2 %1284 }
  0xb4   : > { %v1330_v5 = vsel %vm695_vm0, %v1285_v51, 0 }
  0xb8   : > { %3427 = vmatmul.msk.bf16.gmra.mxu0 %vm695_vm0, %v4253_v61  ;;  %1521 = vrot.lane.b32.xlu1 %v4343_v48, %s4075_s26 }
  0xb9   : > { %2398 = vrot.lane.b32.xlu2 %v4282_v15, %s4077_s28  ;;  %2384 = vrot.lane.b32.xlu0 %v616_v30, %s4077_s28 }
  0xbb   : > { %v4384_v53 = vpop.permute.xlu2 %1262 }
  0xc0   : > { %1824 = vrot.lane.b32.xlu1 %v4253_v61, %s4076_s27 }
  0xc1   : > { %1519 = vrot.lane.b32.xlu2 %v4375_v52, %s4075_s26  ;;  %1509 = vrot.lane.b32.xlu0 %v4409_v59, %s4075_s26 }
  0xc3   : > { %v4396_v55 = vpop.permute.xlu2 %1264 }
  0xc8   : > { %3428 = vmatmul.msk.bf16.gmra.mxu0 %vm695_vm0, %v4268_v7  ;;  %1515 = vrot.lane.b32.xlu1 %v4389_v54, %s4075_s26 }
  0xc9   : > { %2382 = vrot.lane.b32.xlu2 %v4284_v16, %s4077_s28 }
  0xca   : > { %v1289_v57 = vpop.permute.xlu1 %1288  ;;  %v1287_v58 = vpop.permute.xlu0 %1286 }
  0xcb   : > { %v1336_v60 = vsel %vm695_vm0, %v1289_v57, 0  ;;  %v1851_v62 = vpop.permute.xlu2 %1850  ;;  %v1333_v0 = vsel %vm695_vm0, %v1287_v58, 0 }
  0xcc   : > { %1338 = vmatpush.bf16.xpose.msra.mxu2 %v1336_v60  ;;  %v1898_v4 = vsel %vm695_vm0, %v1851_v62, 0 }
  0xcd   : > { %1900 = vmatpush.bf16.xpose.msrb.mxu1 %v1898_v4 }
  0xd0   : > { %1507 = vrot.lane.b32.xlu1 %v4415_v63, %s4075_s26 }
  0xd1   : > { %1513 = vrot.lane.b32.xlu2 %v4399_v56, %s4075_s26 }
  0xd2   : > { %v1283_v1 = vpop.permute.xlu1 %1282  ;;  %v1281_v2 = vpop.permute.xlu0 %1280 }
  0xd3   : > { %v4424_v3 = vpop.permute.xlu2 %1268  ;;  %v1327_v10 = vsel %vm695_vm0, %v1283_v1, 0 }
  0xd4   : > { %1339 = vmatpush.bf16.xpose.msra.mxu2 %v1333_v0 }
  0xd8   : > { %3429 = vmatmul.msk.bf16.gmra.mxu0 %vm695_vm0, %v4294_v29  ;;  %2386 = vrot.lane.b32.xlu1 %v4253_v61, %s4077_s28  ;;  %v1324_v61 = vsel %vm695_vm0, %v1281_v2, 0 }
  0xd9   : > { %1828 = vrot.lane.b32.xlu2 %v4294_v29, %s4076_s27 }
  0xda   : > { %v1279_v6 = vpop.permute.xlu1 %1278  ;;  %v1277_v8 = vpop.permute.xlu0 %1276 }
  0xdb   : > { %v1847_v9 = vpop.permute.xlu2 %1846  ;;  %v1321_v17 = vsel %vm695_vm0, %v1279_v6, 0  ;;  %v1318_v22 = vsel %vm695_vm0, %v1277_v8, 0 }
  0xdc   : > { %1340 = vmatpush.bf16.xpose.msra.mxu2 %v1330_v5  ;;  %v1892_v25 = vsel %vm695_vm0, %v1847_v9, 0 }
  0xe2   : > { %v1275_v11 = vpop.permute.xlu1 %1274  ;;  %v1259_v12 = vpop.permute.xlu0 %1258 }
  0xe3   : > { %v4436_v13 = vpop.permute.xlu2 %1270  ;;  %v1315_v28 = vsel %vm695_vm0, %v1275_v11, 0 }
  0xe4   : > { %1341 = vmatpush.bf16.xpose.msra.mxu2 %v1327_v10 }
  0xe8   : > { %3430 = vmatmul.msk.bf16.gmra.mxu0 %vm695_vm0, %v4296_v31 }
  0xea   : > { %v4441_v14 = vpop.permute.xlu1 %1266  ;;  %v1261_v15 = vpop.permute.xlu0 %1260 }
  0xeb   : > { %v1841_v16 = vpop.permute.xlu2 %1840 }
  0xec   : > { %1342 = vmatpush.bf16.xpose.msra.mxu2 %v1324_v61  ;;  %v1883_v43 = vsel %vm695_vm0, %v1841_v16, 0 }
  0xf2   : > { %v1845_v18 = vpop.permute.xlu1 %1844  ;;  %v1849_v19 = vpop.permute.xlu0 %1848 }
  0xf3   : > { %v1895_v20 = vsel %vm695_vm0, %v1849_v19, 0  ;;  %v1839_v21 = vpop.permute.xlu2 %1838  ;;  %v1889_v33 = vsel %vm695_vm0, %v1845_v18, 0 }
  0xf4   : > { %1343 = vmatpush.bf16.xpose.msra.mxu2 %v1321_v17  ;;  %1901 = vmatpush.bf16.xpose.msrb.mxu1 %v1895_v20  ;;  %v1880_v57 = vsel %vm695_vm0, %v1839_v21, 0 }
  0xf8   : > { %3431 = vmatmul.msk.bf16.gmra.mxu0 %vm695_vm0, %v4315_v42 }
  0xfa   : > { %v2413_v23 = vpop.permute.xlu1 %2412  ;;  %v1843_v24 = vpop.permute.xlu0 %1842 }
  0xfb   : > { %v4450_v26 = vsel %vm695_vm0, %v2413_v23, 0  ;;  %v2407_v27 = vpop.permute.xlu2 %2406  ;;  %v1886_v37 = vsel %vm695_vm0, %v1843_v24, 0 }
  0xfc   : > { %1344 = vmatpush.bf16.xpose.msra.mxu2 %v1318_v22  ;;  %2462 = vmatpush.bf16.xpose.msrb.mxu0 %v4450_v26  ;;  %v4472_v41 = vsel %vm695_vm0, %v2407_v27, 0 }
  0xfd   : > { %1902 = vmatpush.bf16.xpose.msrb.mxu1 %v1892_v25 }
 0x102   : > { %v4454_v30 = vpop.permute.xlu1 %1272  ;;  %v2411_v32 = vpop.permute.xlu0 %2410 }
 0x103   : > { %v4458_v34 = vsel %vm695_vm0, %v2411_v32, 0  ;;  %v2405_v35 = vpop.permute.xlu2 %2404 }
 0x104   : > { %1345 = vmatpush.bf16.xpose.msra.mxu2 %v1315_v28  ;;  %2463 = vmatpush.bf16.xpose.msrb.mxu0 %v4458_v34  ;;  %v4482_v51 = vsel %vm695_vm0, %v2405_v35, 0 }
 0x105   : > { %1903 = vmatpush.bf16.xpose.msrb.mxu1 %v1889_v33 }
 0x108   : > { %3432 = vmatmul.msk.bf16.gmra.mxu0 %vm695_vm0, %v4325_v46 }
 0x10a   : > { %v1837_v36 = vpop.permute.xlu1 %1836 }
 0x10b   : > { %3465 = vmatmul.msk.bf16.vlgmr.msra.gmra.mxu2 %vm695_vm0, %v1259_v12  ;;  %v2409_v38 = vpop.permute.xlu0 %2408  ;;  %v4475_v44 = vpop.permute.xlu2 %1822  ;;  %v1877_v2 = vsel %vm695_vm0, %v1837_v36, 0 }
 0x10c   : > { %v4466_v39 = vsel %vm695_vm0, %v2409_v38, 0 }
 0x10d   : > { %2464 = vmatpush.bf16.xpose.msrb.mxu0 %v4466_v39  ;;  %1904 = vmatpush.bf16.xpose.msrb.mxu1 %v1886_v37 }
 0x112   : > { %v4469_v40 = vpop.permute.xlu1 %1820 }
 0x113   : > { %v2399_v60 = vpop.permute.xlu2 %2398  ;;  %v1518_v62 = vpop.permute.xlu0 %1517 }
 0x114   : > { %v4510_v61 = vsel %vm695_vm0, %v2399_v60, 0 }
 0x115   : > { %v4477_v45 = vpop.f32.mrf.mxu0  ;;  %2465 = vmatpush.bf16.xpose.msrb.mxu0 %v4472_v41  ;;  %1905 = vmatpush.bf16.xpose.msrb.mxu1 %v1883_v43 }
 0x116   : > { %793 = vmax.xlane.f32.xlu0 %v4477_v45 }
 0x11a   : > { %v2403_v47 = vpop.permute.xlu1 %2402 }
 0x11b   : > { %3466 = vmatmul.msk.bf16.gmra.mxu2 %vm695_vm0, %v1261_v15  ;;  %v4491_v1 = vsel %vm695_vm0, %v2403_v47, 0  ;;  %v1520_v5 = vpop.permute.xlu2 %1519  ;;  %v1512_v6 = vpop.permute.xlu0 %1511 }
 0x11d   : > { %v4486_v58 = vpop.f32.mrf.mxu0  ;;  %2466 = vmatpush.bf16.xpose.msrb.mxu0 %v4482_v51  ;;  %1906 = vmatpush.bf16.xpose.msrb.mxu1 %v1880_v57 }
 0x11e   : > { %795 = vmax.xlane.f32.xlu0 %v4486_v58 }
 0x122   : > { %v2401_v0 = vpop.permute.xlu1 %2400 }
 0x123   : > { %v4499_v9 = vsel %vm695_vm0, %v2401_v0, 0  ;;  %v2383_v11 = vpop.permute.xlu2 %2382  ;;  %v4512_v15 = vpop.permute.xlu0 %1826 }
 0x125   : > { %v4494_v4 = vpop.f32.mrf.mxu0  ;;  %2467 = vmatpush.bf16.xpose.msrb.mxu0 %v4491_v1  ;;  %1907 = vmatpush.bf16.xpose.msrb.mxu1 %v1877_v2 }
 0x126   : > { %797 = vmax.xlane.f32.xlu1 %v4494_v4 }
 0x12a   : > { %v1522_v8 = vpop.permute.xlu1 %1521 }
 0x12b   : > { %3467 = vmatmul.msk.bf16.gmra.mxu2 %vm695_vm0, %v4384_v53  ;;  %1531 = vmatpush.bf16.msra.mxu3 %v1522_v8  ;;  %v1514_v17 = vpop.permute.xlu2 %1513  ;;  %v2385_v18 = vpop.permute.xlu0 %2384 }
 0x12d   : > { %v4503_v10 = vpop.f32.mrf.mxu0  ;;  %2468 = vmatpush.bf16.xpose.msrb.mxu0 %v4499_v9 }
 0x12e   : > { %799 = vmax.xlane.f32.xlu1 %v4503_v10 }
 0x12f   : > { %1532 = vmatpush.bf16.msra.mxu3 %v1520_v5 }
 0x132   : > { %v4507_v12 = vpop.permute.xlu1 %1824 }
 0x133   : > { %1533 = vmatpush.bf16.msra.mxu3 %v1518_v62  ;;  %v1510_v20 = vpop.permute.xlu0 %1509 }
 0x135   : > { %v4514_v16 = vpop.f32.mrf.mxu0  ;;  %2469 = vmatpush.bf16.xpose.msrb.mxu0 %v4510_v61 }
 0x136   : > { %801 = vmax.xlane.f32.xlu2 %v4514_v16 }
 0x13a   : > { %v1516_v53 = vpop.permute.xlu1 %1515 }
 0x13b   : > { %3468 = vmatmul.msk.bf16.gmra.mxu2 %vm695_vm0, %v4396_v55  ;;  %1534 = vmatpush.bf16.msra.mxu3 %v1516_v53 }
 0x13c   : > { %3481 = vmatmul.msk.bf16.vlgmr.msrb.gmra.mxu0 %vm695_vm0, %v2383_v11 }
 0x13d   : > { %v4521_v19 = vpop.f32.mrf.mxu0 }
 0x13e   : > { %803 = vmax.xlane.f32.xlu2 %v4521_v19 }
 0x13f   : > { %1535 = vmatpush.bf16.msra.mxu3 %v1514_v17 }
 0x142   : > { %v1508_v22 = vpop.permute.xlu1 %1507 }
 0x143   : > { %1536 = vmatpush.bf16.msra.mxu3 %v1512_v6 }
 0x145   : > { %v4524_v21 = vpop.f32.mrf.mxu0 }
 0x146   : > { %805 = vmax.xlane.f32.xlu0 %v4524_v21 }
 0x147   : > { %1537 = vmatpush.bf16.msra.mxu3 %v1510_v20 }
 0x14a   : > { %v2387_v24 = vpop.permute.xlu1 %2386 }
 0x14b   : > { %3469 = vmatmul.msk.bf16.gmra.mxu2 %vm695_vm0, %v4441_v14  ;;  %1538 = vmatpush.bf16.msra.mxu3 %v1508_v22 }
 0x14c   : > { %3482 = vmatmul.msk.bf16.gmra.mxu0 %vm695_vm0, %v2385_v18 }
 0x14d   : > { %v4530_v55 = vpop.f32.mrf.mxu0 }
 0x14e   : > { %807 = vmax.xlane.f32.xlu1 %v4530_v55 }
 0x155   : > { %v4533_v23 = vpop.f32.mrf.mxu0 }
 0x156   : > { %809 = vmax.xlane.f32.xlu2 %v4533_v23 }
 0x15b   : > { %3470 = vmatmul.msk.bf16.gmra.mxu2 %vm695_vm0, %v4424_v3 }
 0x15c   : > { %3483 = vmatmul.msk.bf16.gmra.mxu0 %vm695_vm0, %v2387_v24 }
 0x15d   : > { %v4539_v25 = vpop.f32.mrf.mxu0 }
 0x15e   : > { %811 = vmax.xlane.f32.xlu0 %v4539_v25 }
 0x165   : > { %v4542_v14 = vpop.f32.mrf.mxu0 }
 0x166   : > { %813 = vmax.xlane.f32.xlu1 %v4542_v14 }
 0x16b   : > { %3471 = vmatmul.msk.bf16.gmra.mxu2 %vm695_vm0, %v4436_v13 }
 0x16d   : > { %v4547_v27 = vpop.f32.mrf.mxu0 }
 0x16e   : > { %815 = vmax.xlane.f32.xlu2 %v4547_v27 }
 0x175   : > { %v4550_v28 = vpop.f32.mrf.mxu0 }
 0x176   : > { %817 = vmax.xlane.f32.xlu0 %v4550_v28 }
 0x17b   : > { %3472 = vmatmul.msk.bf16.gmra.mxu2 %vm695_vm0, %v4454_v30 }
 0x17d   : > { %v4555_v3 = vpop.f32.mrf.mxu0 }
 0x17e   : > { %819 = vmax.xlane.f32.xlu1 %v4555_v3 }
 0x185   : > { %v4558_v32 = vpop.f32.mrf.mxu0 }
 0x186   : > { %821 = vmax.xlane.f32.xlu2 %v4558_v32 }
 0x189   : > { %v794_v13 = vpop.xlane.xlu0 %793 }
 0x18a   : > { %v825_v33 = vsub.f32 %v4477_v45, %v794_v13 }
 0x18c   : > { %v841_v35 = vmul.f32 1.442695, %v825_v33 }
 0x18d   : > { %v4562_v36 = vpop.f32.mrf.mxu0 }
 0x18e   : > { %v4564_v37 = vpop.f32.mrf.mxu2  ;;  %823 = vmax.xlane.f32.xlu0 %v4562_v36  ;;  %3773 = vpow2.f32 %v841_v35 }
 0x18f   : > { %1387 = vmax.xlane.f32.xlu1 %v4564_v37 }
 0x191   : > { %v796_v30 = vpop.xlane.xlu0 %795 }
 0x192   : > { %v826_v38 = vsub.f32 %v4486_v58, %v796_v30  ;;  %v4577_v58 = vpop.permute.xlu2 %1828 }
 0x194   : > { %v843_v43 = vmul.f32 1.442695, %v826_v38  ;;  %v3774_v47 = vpop.eup %3773 }
 0x196   : > { %3775 = vpow2.f32 %v843_v43  ;;  %v4569_v57 = vpop.f32.mrf.mxu2 }
 0x197   : > { %873 = vadd.xlane.f32.xlu1 %v3774_v47  ;;  %1389 = vmax.xlane.f32.xlu2 %v4569_v57 }
 0x199   : > { %v798_v45 = vpop.xlane.xlu1 %797 }
 0x19a   : > { %v827_v60 = vsub.f32 %v4494_v4, %v798_v45 }
 0x19c   : > { %v3776_v62 = vpop.eup %3775  ;;  %v845_v0 = vmul.f32 1.442695, %v827_v60 }
 0x19d   : > { %v905_v2 = vpack.c.bf16 %v3776_v62, %v3774_v47 }
 0x19e   : > { %v4573_v5 = vpop.f32.mrf.mxu2  ;;  %3777 = vpow2.f32 %v845_v0 }
 0x19f   : > { %969 = vmatmul.bf16.vlgmr.msra.gmra.mxu1 %v905_v2  ;;  %875 = vadd.xlane.f32.xlu2 %v3776_v62 }
 0x1a0   : > { %3593 = vmatpush.bf16.xpose.msra.mxu1 %v4450_v26  ;;  %1391 = vmax.xlane.f32.xlu0 %v4573_v5 }
 0x1a1   : > { %v800_v6 = vpop.xlane.xlu1 %799 }
 0x1a2   : > { %v828_v8 = vsub.f32 %v4503_v10, %v800_v6 }
 0x1a4   : > { %v847_v11 = vmul.f32 1.442695, %v828_v8  ;;  %v3778_v53 = vpop.eup %3777 }
 0x1a6   : > { %3779 = vpow2.f32 %v847_v11  ;;  %v4580_v4 = vpop.f32.mrf.mxu2 }
 0x1a7   : > { %1393 = vmax.xlane.f32.xlu2 %v4580_v4 }
 0x1a8   : > { %3594 = vmatpush.bf16.xpose.msra.mxu1 %v4458_v34  ;;  %877 = vadd.xlane.f32.xlu0 %v3778_v53 }
 0x1a9   : > { %v802_v17 = vpop.xlane.xlu2 %801 }
 0x1aa   : > { %v829_v26 = vsub.f32 %v4514_v16, %v802_v17 }
 0x1ac   : > { %v3780_v18 = vpop.eup %3779  ;;  %v849_v20 = vmul.f32 1.442695, %v829_v26 }
 0x1ad   : > { %v906_v22 = vpack.c.bf16 %v3780_v18, %v3778_v53 }
 0x1ae   : > { %v4585_v24 = vpop.f32.mrf.mxu2  ;;  %3781 = vpow2.f32 %v849_v20 }
 0x1af   : > { %974 = vmatmul.bf16.gmra.mxu1 %v906_v22  ;;  %1395 = vmax.xlane.f32.xlu1 %v4585_v24 }
 0x1b0   : > { %3595 = vmatpush.bf16.xpose.msra.mxu1 %v4466_v39  ;;  %879 = vadd.xlane.f32.xlu2 %v3780_v18 }
 0x1b1   : > { %v804_v10 = vpop.xlane.xlu2 %803 }
 0x1b2   : > { %v830_v13 = vsub.f32 %v4521_v19, %v804_v10 }
 0x1b4   : > { %v851_v34 = vmul.f32 1.442695, %v830_v13  ;;  %v3782_v33 = vpop.eup %3781 }
 0x1b6   : > { %3783 = vpow2.f32 %v851_v34  ;;  %v4594_v38 = vpop.f32.mrf.mxu2 }
 0x1b8   : > { %3596 = vmatpush.bf16.xpose.msra.mxu1 %v4472_v41  ;;  %881 = vadd.xlane.f32.xlu2 %v3782_v33 }
 0x1b9   : > { %v806_v16 = vpop.xlane.xlu0 %805 }
 0x1ba   : > { %v831_v30 = vsub.f32 %v4524_v21, %v806_v16 }
 0x1bc   : > { %v3784_v35 = vpop.eup %3783  ;;  %1830 = vrot.lane.b32.xlu0 %v4296_v31, %s4076_s27  ;;  %v853_v19 = vmul.f32 1.442695, %v831_v30 }
 0x1bd   : > { %883 = vadd.xlane.f32.xlu1 %v3784_v35  ;;  %v907_v39 = vpack.c.bf16 %v3784_v35, %v3782_v33 }
 0x1be   : > { %3785 = vpow2.f32 %v853_v19  ;;  %v4602_v21 = vpop.f32.mrf.mxu2 }
 0x1bf   : > { %979 = vmatmul.bf16.gmra.mxu1 %v907_v39 }
 0x1c0   : > { %3597 = vmatpush.bf16.xpose.msra.mxu1 %v4482_v51  ;;  %1397 = vmax.xlane.f32.xlu2 %v4594_v38 }
 0x1c1   : > { %v808_v43 = vpop.xlane.xlu1 %807 }
 0x1c2   : > { %v832_v41 = vsub.f32 %v4530_v55, %v808_v43 }
 0x1c4   : > { %v855_v47 = vmul.f32 1.442695, %v832_v41  ;;  %2388 = vrot.lane.b32.xlu0 %v4268_v7, %s4077_s28  ;;  %v3786_v60 = vpop.eup %3785 }
 0x1c6   : > { %3787 = vpow2.f32 %v855_v47  ;;  %v4607_v6 = vpop.f32.mrf.mxu2 }
 0x1c8   : > { %3598 = vmatpush.bf16.xpose.msra.mxu1 %v4491_v1 }
 0x1c9   : > { %v810_v45 = vpop.xlane.xlu2 %809 }
 0x1ca   : > { %v833_v51 = vsub.f32 %v4533_v23, %v810_v45 }
 0x1cc   : > { %v3788_v62 = vpop.eup %3787  ;;  %v857_v55 = vmul.f32 1.442695, %v833_v51 }
 0x1cd   : > { %887 = vadd.xlane.f32.xlu1 %v3788_v62  ;;  %v908_v0 = vpack.c.bf16 %v3788_v62, %v3786_v60 }
 0x1ce   : > { %3789 = vpow2.f32 %v857_v55  ;;  %v4615_v20 = vpop.f32.mrf.mxu2 }
 0x1cf   : > { %984 = vmatmul.bf16.gmra.mxu1 %v908_v0 }
 0x1d0   : > { %3599 = vmatpush.bf16.xpose.msra.mxu1 %v4499_v9 }
 0x1d1   : > { %v812_v2 = vpop.xlane.xlu0 %811 }
 0x1d2   : > { %v834_v7 = vsub.f32 %v4539_v25, %v812_v2 }
 0x1d4   : > { %v859_v8 = vmul.f32 1.442695, %v834_v7  ;;  %v3790_v23 = vpop.eup %3789 }
 0x1d5   : > { %1401 = vmax.xlane.f32.xlu1 %v4607_v6 }
 0x1d6   : > { %3791 = vpow2.f32 %v859_v8  ;;  %v4627_v16 = vpop.f32.mrf.mxu2 }
 0x1d8   : > { %3600 = vmatpush.bf16.xpose.msra.mxu1 %v4510_v61  ;;  %1832 = vrot.lane.b32.xlu2 %v4315_v42, %s4076_s27 }
 0x1d9   : > { %v814_v1 = vpop.xlane.xlu1 %813 }
 0x1da   : > { %v835_v9 = vsub.f32 %v4542_v14, %v814_v1 }
 0x1dc   : > { %v3792_v11 = vpop.eup %3791  ;;  %v861_v25 = vmul.f32 1.442695, %v835_v9 }
 0x1dd   : > { %v909_v53 = vpack.c.bf16 %v3792_v11, %v3790_v23 }
 0x1de   : > { %3793 = vpow2.f32 %v861_v25  ;;  %v4636_v43 = vpop.f32.mrf.mxu2 }
 0x1df   : > { %989 = vmatmul.bf16.gmra.mxu1 %v909_v53 }
 0x1e1   : > { %v816_v17 = vpop.xlane.xlu2 %815 }
 0x1e2   : > { %v836_v26 = vsub.f32 %v4547_v27, %v816_v17 }
 0x1e4   : > { %v863_v18 = vmul.f32 1.442695, %v836_v26  ;;  %v4617_v22 = vpop.eup %3793 }
 0x1e6   : > { %3795 = vpow2.f32 %v863_v18 }
 0x1e9   : > { %v818_v61 = vpop.xlane.xlu0 %817 }
 0x1ea   : > { %v837_v13 = vsub.f32 %v4550_v28, %v818_v61 }
 0x1ec   : > { %v4619_v10 = vpop.eup %3795  ;;  %v865_v27 = vmul.f32 1.442695, %v837_v13 }
 0x1ed   : > { %v910_v14 = vpack.c.bf16 %v4619_v10, %v4617_v22 }
 0x1ee   : > { %885 = vadd.xlane.f32.xlu0 %v3786_v60  ;;  %2390 = vrot.lane.b32.xlu1 %v4294_v29, %s4077_s28  ;;  %3797 = vpow2.f32 %v865_v27 }
 0x1ef   : > { %994 = vmatmul.bf16.gmra.mxu1 %v910_v14 }
 0x1f1   : > { %v820_v34 = vpop.xlane.xlu1 %819 }
 0x1f2   : > { %v838_v33 = vsub.f32 %v4555_v3, %v820_v34 }
 0x1f4   : > { %v867_v35 = vmul.f32 1.442695, %v838_v33  ;;  %v4629_v28 = vpop.eup %3797 }
 0x1f6   : > { %3799 = vpow2.f32 %v867_v35  ;;  %889 = vadd.xlane.f32.xlu0 %v3790_v23 }
 0x1f9   : > { %v822_v30 = vpop.xlane.xlu2 %821 }
 0x1fa   : > { %v839_v19 = vsub.f32 %v4558_v32, %v822_v30  ;;  %v4642_v32 = vpop.f32.mrf.mxu2 }
 0x1fc   : > { %v4631_v39 = vpop.eup %3799  ;;  %v869_v3 = vmul.f32 1.442695, %v839_v19 }
 0x1fd   : > { %v911_v29 = vpack.c.bf16 %v4631_v39, %v4629_v28 }
 0x1fe   : > { %891 = vadd.xlane.f32.xlu0 %v3792_v11  ;;  %3801 = vpow2.f32 %v869_v3 }
 0x1ff   : > { %999 = vmatmul.bf16.gmra.mxu1 %v911_v29 }
 0x201   : > { %1403 = vmax.xlane.f32.xlu2 %v4615_v20  ;;  %v824_v41 = vpop.xlane.xlu0 %823 }
 0x202   : > { %v840_v47 = vsub.f32 %v4562_v36, %v824_v41  ;;  %v1388_v45 = vpop.xlane.xlu1 %1387 }
 0x203   : > { %v1419_v62 = vsub.f32 %v4564_v37, %v1388_v45 }
 0x204   : > { %v871_v60 = vmul.f32 1.442695, %v840_v47  ;;  %v4645_v55 = vpop.eup %3801 }
 0x205   : > { %v1435_v51 = vmul.f32 1.442695, %v1419_v62 }
 0x206   : > { %3803 = vpow2.f32 %v871_v60  ;;  %1399 = vmax.xlane.f32.xlu0 %v4602_v21 }
 0x207   : > { %3805 = vpow2.f32 %v1435_v51 }
 0x209   : > { %1409 = vmax.xlane.f32.xlu2 %v4642_v32 }
 0x20a   : > { %v1390_v0 = vpop.xlane.xlu2 %1389  ;;  %v4673_v3 = vpop.xlane.xlu1 %873 }
 0x20b   : > { %v1420_v2 = vsub.f32 %v4569_v57, %v1390_v0  ;;  %6972 = vst [vmem:[#allocation6_spill] sm:$0xff] %v4673_v3 }
 0x20c   : > { %v4648_v7 = vpop.eup %3803 }
 0x20d   : > { %v1437_v36 = vmul.f32 1.442695, %v1420_v2  ;;  %v912_v8 = vpack.c.bf16 %v4648_v7, %v4645_v55  ;;  %v4652_v23 = vpop.eup %3805 }
 0x20f   : > { %3807 = vpow2.f32 %v1437_v36  ;;  %1004 = vmatmul.bf16.gmra.mxu1 %v912_v8 }
 0x212   : > { %v876_v37 = vpop.xlane.xlu2 %875 }
 0x213   : > { %3809 = vrcp.f32 %v876_v37  ;;  %v1392_v1 = vpop.xlane.xlu0 %1391  ;;  %v1034_v34 = vand.u32 2147483647, %v876_v37  ;;  %vm1030_vm2 = vweird.f32 %v876_v37 }
 0x214   : > { %v1421_v9 = vsub.f32 %v4573_v5, %v1392_v1  ;;  %v1036_v5 = vand.u32 2147483648, %v876_v37 }
 0x215   : > { %v4654_v11 = vpop.eup %3807  ;;  %vm1035_vm4 = vcmp.eq.f32.partialorder %v1034_v34, 8.507059e+37 }
 0x216   : > { %v1499_v57 = vpack.c.bf16 %v4654_v11, %v4652_v23  ;;  %v1439_v17 = vmul.f32 1.442695, %v1421_v9 }
 0x218   : > { %1405 = vmax.xlane.f32.xlu1 %v4627_v16  ;;  %1539 = vmatmul.bf16.vlgmr.msra.gmra.mxu3 %v1499_v57  ;;  %3811 = vpow2.f32 %v1439_v17  ;;  %v4692_v17 = vpop.f32.mrf.mxu2 }
 0x219   : > { %v3810_v53 = vpop.eup %3809 }
 0x21a   : > { %v1026_v25 = vmul.f32 %v3810_v53, %v876_v37  ;;  %1834 = vrot.lane.b32.xlu0 %v4325_v46, %s4076_s27  ;;  %v1394_v26 = vpop.xlane.xlu2 %1393  ;;  %vm1031_vm1 = vweird.f32 %v3810_v53 }
 0x21b   : > { %v1422_v18 = vsub.f32 %v4580_v4, %v1394_v26  ;;  %vm1032_vm3 = vmor %vm1030_vm2, %vm1031_vm1  ;;  %v1037_v4 = vor.u32 1.1754944e-38, %v1036_v5 }
 0x21c   : > { %v1027_v61 = vsub.f32 1.0, %v1026_v25  ;;  %v4663_v13 = vpop.f32.mrf.mxu1 }
 0x21d   : > { %6971 = vst [vmem:[#allocation5_spill] sm:$0xff] %v4663_v13  ;;  %v1441_v14 = vmul.f32 1.442695, %v1422_v18 }
 0x21e   : > { %v1028_v27 = vmul.f32 %v3810_v53, %v1027_v61  ;;  %v4671_v29 = vpop.eup %3811 }
 0x21f   : > { %3813 = vpow2.f32 %v1441_v14  ;;  %3473 = vmatmul.msk.bf16.vlgmr.msrb.gmra.mxu1 %vm695_vm0, %v4469_v40 }
 0x220   : > { %v1029_v33 = vadd.f32 %v3810_v53, %v1028_v27 }
 0x221   : > { %2396 = vrot.lane.b32.xlu2 %v4325_v46, %s4077_s28  ;;  %v4679_v46 = vpop.xlane.xlu0 %877 }
 0x222   : > { %2392 = vrot.lane.b32.xlu0 %v4296_v31, %s4077_s28  ;;  %v1033_v35 = vsel %vm1032_vm3, %v3810_v53, %v1029_v33  ;;  %6974 = vst [vmem:[#allocation8_spill] sm:$0xff] %v4679_v46  ;;  %v1396_v51 = vpop.xlane.xlu1 %1395 }
 0x223   : > { %v880_v30 = vpop.xlane.xlu2 %879  ;;  %v1038_v19 = vsel %vm1035_vm4, %v1037_v4, %v1033_v35  ;;  %v1423_v37 = vsub.f32 %v4585_v24, %v1396_v51  ;;  %v4700_v51 = vpop.f32.mrf.mxu2 }
 0x224   : > { %3815 = vrcp.f32 %v880_v30  ;;  %v972_v40 = vpop.f32.mrf.mxu1  ;;  %v1066_v36 = vand.u32 2147483648, %v880_v30  ;;  %v1064_v9 = vand.u32 2147483647, %v880_v30  ;;  %vm1060_vm6 = vweird.f32 %v880_v30 }
 0x225   : > { %v4675_v41 = vpop.eup %3813  ;;  %v4677_v47 = vmul.f32 %v1038_v19, %v972_v40  ;;  %v1443_v26 = vmul.f32 1.442695, %v1423_v37 }
 0x226   : > { %v1500_v45 = vpack.c.bf16 %v4675_v41, %v4671_v29  ;;  %v1067_v25 = vor.u32 1.1754944e-38, %v1066_v36  ;;  %vm1065_vm8 = vcmp.eq.f32.partialorder %v1064_v9, 8.507059e+37 }
 0x227   : > { %6973 = vst [vmem:[#allocation7_spill] sm:$0xff] %v4677_v47 }
 0x228   : > { %1544 = vmatmul.bf16.gmra.mxu3 %v1500_v45 }
 0x22a   : > { %v3816_v31 = vpop.eup %3815 }
 0x22b   : > { %v1056_v60 = vmul.f32 %v3816_v31, %v880_v30  ;;  %v882_v62 = vpop.xlane.xlu2 %881  ;;  %vm1061_vm5 = vweird.f32 %v3816_v31  ;;  %v4714_v9 = vpop.f32.mrf.mxu2 }
 0x22c   : > { %3817 = vrcp.f32 %v882_v62  ;;  %v4683_v0 = vpop.f32.mrf.mxu1  ;;  %vm1062_vm7 = vmor %vm1060_vm6, %vm1061_vm5  ;;  %v1081_v33 = vand.u32 2147483648, %v882_v62  ;;  %v1079_v30 = vand.u32 2147483647, %v882_v62  ;;  %vm1075_vm10 = vweird.f32 %v882_v62 }
 0x22d   : > { %6975 = vst [vmem:[#allocation9_spill] sm:$0xff] %v4683_v0  ;;  %v1057_v2 = vsub.f32 1.0, %v1056_v60  ;;  %3819 = vpow2.f32 %v1443_v26 }
 0x22e   : > { %v4685_v8 = vpop.permute.xlu0 %1830  ;;  %v1082_v40 = vor.u32 1.1754944e-38, %v1081_v33  ;;  %vm1080_vm12 = vcmp.eq.f32.partialorder %v1079_v30, 8.507059e+37 }
 0x22f   : > { %v1058_v1 = vmul.f32 %v3816_v31, %v1057_v2  ;;  %3474 = vmatmul.msk.bf16.gmra.mxu1 %vm695_vm0, %v4475_v44 }
 0x231   : > { %2394 = vrot.lane.b32.xlu1 %v4315_v42, %s4077_s28  ;;  %v1059_v57 = vadd.f32 %v3816_v31, %v1058_v1  ;;  %v4712_v1 = vpop.xlane.xlu1 %883 }
 0x232   : > { %v3818_v53 = vpop.eup %3817  ;;  %6979 = vst [vmem:[#allocation13_spill] sm:$0xff] %v4712_v1 }
 0x233   : > { %v1071_v18 = vmul.f32 %v3818_v53, %v882_v62  ;;  %v1398_v61 = vpop.xlane.xlu2 %1397  ;;  %v1063_v24 = vsel %vm1062_vm7, %v3816_v31, %v1059_v57  ;;  %vm1076_vm9 = vweird.f32 %v3818_v53  ;;  %v4698_v60 = vpop.eup %3819 }
 0x234   : > { %v1424_v14 = vsub.f32 %v4594_v38, %v1398_v61  ;;  %v977_v44 = vpop.f32.mrf.mxu1  ;;  %v1068_v5 = vsel %vm1065_vm8, %v1067_v25, %v1063_v24  ;;  %vm1077_vm11 = vmor %vm1075_vm10, %vm1076_vm9 }
 0x235   : > { %v1072_v27 = vsub.f32 1.0, %v1071_v18  ;;  %v4695_v34 = vmul.f32 %v1068_v5, %v977_v44 }
 0x236   : > { %v1445_v42 = vmul.f32 1.442695, %v1424_v14  ;;  %v2389_v4 = vpop.permute.xlu0 %2388 }
 0x237   : > { %6976 = vst [vmem:[#allocation10_spill] sm:$0xff] %v4695_v34  ;;  %v1073_v35 = vmul.f32 %v3818_v53, %v1072_v27  ;;  %3484 = vmatmul.msk.bf16.gmra.mxu0 %vm695_vm0, %v2389_v4 }
 0x238   : > { %3821 = vpow2.f32 %v1445_v42 }
 0x239   : > { %v1074_v19 = vadd.f32 %v3818_v53, %v1073_v35 }
 0x23b   : > { %v1078_v38 = vsel %vm1077_vm11, %v3818_v53, %v1074_v19  ;;  %v1833_v4 = vpop.permute.xlu2 %1832 }
 0x23c   : > { %v980_v45 = vpop.f32.mrf.mxu1  ;;  %v1083_v31 = vsel %vm1080_vm12, %v1082_v40, %v1078_v38 }
 0x23d   : > { %v4702_v2 = vmul.f32 %v1083_v31, %v980_v45 }
 0x23e   : > { %v4704_v36 = vpop.eup %3821 }
 0x23f   : > { %6977 = vst [vmem:[#allocation11_spill] sm:$0xff] %v4702_v2  ;;  %3475 = vmatmul.msk.bf16.gmra.mxu1 %vm695_vm0, %v4507_v12  ;;  %v1501_v62 = vpack.c.bf16 %v4704_v36, %v4698_v60  ;;  %v4724_v12 = vpop.f32.mrf.mxu2 }
 0x240   : > { %v4720_v53 = vpop.xlane.xlu1 %887 }
 0x241   : > { %1549 = vmatmul.bf16.gmra.mxu3 %v1501_v62  ;;  %6981 = vst [vmem:[#allocation15_spill] sm:$0xff] %v4720_v53 }
 0x244   : > { %v4710_v37 = vpop.f32.mrf.mxu1 }
 0x245   : > { %6978 = vst [vmem:[#allocation12_spill] sm:$0xff] %v4710_v37 }
 0x248   : > { %v1402_v26 = vpop.xlane.xlu1 %1401 }
 0x249   : > { %v1426_v5 = vsub.f32 %v4607_v6, %v1402_v26 }
 0x24a   : > { %1411 = vmax.xlane.f32.xlu2 %v4692_v17 }
 0x24b   : > { %v1449_v27 = vmul.f32 1.442695, %v1426_v5 }
 0x24c   : > { %1407 = vmax.xlane.f32.xlu0 %v4636_v43  ;;  %v4718_v57 = vpop.f32.mrf.mxu1 }
 0x24d   : > { %6980 = vst [vmem:[#allocation14_spill] sm:$0xff] %v4718_v57  ;;  %3823 = vpow2.f32 %v1449_v27 }
 0x24f   : > { %3476 = vmatmul.msk.bf16.gmra.mxu1 %vm695_vm0, %v4512_v15 }
 0x252   : > { %1417 = vmax.xlane.f32.xlu2 %v4724_v12 }
 0x254   : > { %v4727_v25 = vpop.f32.mrf.mxu1 }
 0x255   : > { %6982 = vst [vmem:[#allocation16_spill] sm:$0xff] %v4727_v25 }
 0x25b   : > { %1413 = vmax.xlane.f32.xlu1 %v4700_v51 }
 0x25c   : > { %v4730_v18 = vpop.f32.mrf.mxu1 }
 0x25d   : > { %6983 = vst [vmem:[#allocation17_spill] sm:$0xff] %v4730_v18 }
 0x25f   : > { %3477 = vmatmul.msk.bf16.gmra.mxu1 %vm695_vm0, %v4577_v58 }
 0x260   : > { %2083 = vrot.lane.b32.xlu0 %v4343_v48, %s4076_s27  ;;  %v2391_v61 = vpop.permute.xlu1 %2390 }
 0x261   : > { %v4736_v24 = vpop.xlane.xlu0 %885  ;;  %3485 = vmatmul.msk.bf16.gmra.mxu0 %vm695_vm0, %v2391_v61 }
 0x262   : > { %6984 = vst [vmem:[#allocation18_spill] sm:$0xff] %v4736_v24 }
 0x264   : > { %v4739_v15 = vpop.f32.mrf.mxu1 }
 0x265   : > { %6985 = vst [vmem:[#allocation19_spill] sm:$0xff] %v4739_v15 }
 0x269   : > { %v4741_v14 = vpop.xlane.xlu0 %889 }
 0x26a   : > { %6986 = vst [vmem:[#allocation20_spill] sm:$0xff] %v4741_v14  ;;  %2079 = vrot.lane.b32.xlu2 %v4353_v49, %s4076_s27 }
 0x26c   : > { %v4745_v44 = vpop.f32.mrf.mxu1 }
 0x26d   : > { %6987 = vst [vmem:[#allocation21_spill] sm:$0xff] %v4745_v44 }
 0x26f   : > { %3478 = vmatmul.msk.bf16.gmra.mxu1 %vm695_vm0, %v4685_v8  ;;  %v4762_v8 = vpop.eup %3823 }
 0x271   : > { %v4749_v58 = vpop.xlane.xlu0 %891 }
 0x272   : > { %6988 = vst [vmem:[#allocation22_spill] sm:$0xff] %v4749_v58 }
 0x274   : > { %v4751_v48 = vpop.f32.mrf.mxu1  ;;  %2081 = vrot.lane.b32.xlu1 %v4375_v52, %s4076_s27  ;;  %v1404_v6 = vpop.xlane.xlu2 %1403 }
 0x275   : > { %6989 = vst [vmem:[#allocation23_spill] sm:$0xff] %v4751_v48  ;;  %v1427_v40 = vsub.f32 %v4615_v20, %v1404_v6 }
 0x277   : > { %v1451_v38 = vmul.f32 1.442695, %v1427_v40  ;;  %v4029_v40 = vld [vmem:[%s4340_s29 + $0x38] sm:$0xff] }
 0x279   : > { %v1400_v42 = vpop.xlane.xlu0 %1399 }
 0x27a   : > { %v1425_v33 = vsub.f32 %v4602_v21, %v1400_v42 }
 0x27c   : > { %v1447_v49 = vmul.f32 1.442695, %v1425_v33  ;;  %2077 = vrot.lane.b32.xlu1 %v4389_v54, %s4076_s27  ;;  %v4759_v35 = vpop.f32.mrf.mxu1  ;;  %v1410_v5 = vpop.xlane.xlu2 %1409 }
 0x27d   : > { %6990 = vst [vmem:[#allocation24_spill] sm:$0xff] %v4759_v35 }
 0x27e   : > { %3825 = vpow2.f32 %v1447_v49 }
 0x27f   : > { %3479 = vmatmul.msk.bf16.gmra.mxu1 %vm695_vm0, %v1833_v4  ;;  %3827 = vpow2.f32 %v1451_v38  ;;  %v4030_v38 = vld [vmem:[%s4340_s29 + $0x28] sm:$0xff] }
 0x284   : > { %v4764_v30 = vpop.eup %3825  ;;  %v4766_v19 = vpop.f32.mrf.mxu1 }
 0x285   : > { %6991 = vst [vmem:[#allocation25_spill] sm:$0xff] %v4766_v19  ;;  %v1502_v21 = vpack.c.bf16 %v4762_v8, %v4764_v30  ;;  %v4778_v20 = vpop.eup %3827  ;;  %v2397_v49 = vpop.permute.xlu2 %2396  ;;  %v4032_v19 = vld [vmem:[%s4340_s29 + $0x10] sm:$0xff] }
 0x287   : > { %1554 = vmatmul.bf16.gmra.mxu3 %v1502_v21 }
 0x28a   : > { %1415 = vmax.xlane.f32.xlu0 %v4714_v9 }
 0x28b   : > { %v1406_v45 = vpop.xlane.xlu1 %1405 }
 0x28c   : > { %v1428_v31 = vsub.f32 %v4627_v16, %v1406_v45  ;;  %v1835_v62 = vpop.permute.xlu0 %1834  ;;  %v4773_v26 = vpop.f32.mrf.mxu1 }
 0x28d   : > { %6992 = vst [vmem:[#allocation26_spill] sm:$0xff] %v4773_v26 }
 0x28e   : > { %v1453_v61 = vmul.f32 1.442695, %v1428_v31 }
 0x28f   : > { %3480 = vmatmul.msk.bf16.gmra.mxu1 %vm695_vm0, %v1835_v62 }
 0x290   : > { %3829 = vpow2.f32 %v1453_v61 }
 0x294   : > { %v2393_v27 = vpop.permute.xlu0 %2392  ;;  %v4776_v42 = vpop.f32.mrf.mxu1 }
 0x295   : > { %6993 = vst [vmem:[#allocation27_spill] sm:$0xff] %v4776_v42  ;;  %3486 = vmatmul.msk.bf16.gmra.mxu0 %vm695_vm0, %v2393_v27 }
 0x296   : > { %v4781_v33 = vpop.eup %3829 }
 0x297   : > { %v1503_v16 = vpack.c.bf16 %v4781_v33, %v4778_v20 }
 0x299   : > { %1559 = vmatmul.bf16.gmra.mxu3 %v1503_v16 }
 0x29c   : > { %v4785_v4 = vpop.f32.mrf.mxu1 }
 0x29d   : > { %1949 = vmax.xlane.f32.xlu2 %v4785_v4 }
 0x29e   : > { %2075 = vrot.lane.b32.xlu0 %v4399_v56, %s4076_s27  ;;  %v1430_v56 = vsub.f32 %v4642_v32, %v1410_v5 }
 0x29f   : > { %3488 = vmatmul.msk.bf16.vlgmr.msra.gmra.mxu1 %vm695_vm0, %v2397_v49 }
 0x2a0   : > { %v1457_v45 = vmul.f32 1.442695, %v1430_v56 }
 0x2a2   : > { %3831 = vpow2.f32 %v1457_v45  ;;  %v4831_v45 = vpop.f32.mrf.mxu0 }
 0x2a3   : > { %v2395_v6 = vpop.permute.xlu1 %2394 }
 0x2a4   : > { %v4791_v21 = vpop.f32.mrf.mxu1 }
 0x2a5   : > { %3487 = vmatmul.msk.bf16.gmra.mxu0 %vm695_vm0, %v2395_v6 }
 0x2a6   : > { %2073 = vrot.lane.b32.xlu0 %v4365_v50, %s4076_s27  ;;  %1951 = vmax.xlane.f32.xlu1 %v4791_v21 }
 0x2a8   : > { %v4813_v32 = vpop.eup %3831 }
 0x2ae   : > { %2071 = vrot.lane.b32.xlu0 %v4409_v59, %s4076_s27  ;;  %v4809_v59 = vpop.f32.mrf.mxu1 }
 0x2b5   : > { %2645 = vrot.lane.b32.xlu2 %v4029_v40, %s4077_s28 }
 0x2b6   : > { %2069 = vrot.lane.b32.xlu0 %v4415_v63, %s4076_s27 }
 0x2bd   : > { %2641 = vrot.lane.b32.xlu2 %v4030_v38, %s4077_s28  ;;  %v1412_v63 = vpop.xlane.xlu2 %1411 }
 0x2be   : > { %v1431_v5 = vsub.f32 %v4692_v17, %v1412_v63  ;;  %v4837_v63 = vpop.f32.mrf.mxu0 }
 0x2bf   : > { %v1408_v31 = vpop.xlane.xlu0 %1407  ;;  %2643 = vrot.lane.b32.xlu1 %v4375_v52, %s4077_s28 }
 0x2c0   : > { %v1429_v50 = vsub.f32 %v4636_v43, %v1408_v31  ;;  %v4820_v43 = vpop.f32.mrf.mxu1  ;;  %v1459_v27 = vmul.f32 1.442695, %v1431_v5 }
 0x2c2   : > { %v1455_v62 = vmul.f32 1.442695, %v1429_v50 }
 0x2c4   : > { %3833 = vpow2.f32 %v1455_v62 }
 0x2c5   : > { %2639 = vrot.lane.b32.xlu2 %v4389_v54, %s4077_s28  ;;  %3835 = vpow2.f32 %v1459_v27  ;;  %v1418_v31 = vpop.xlane.xlu2 %1417 }
 0x2c6   : > { %v4844_v27 = vpop.f32.mrf.mxu0 }
 0x2c8   : > { %v4825_v56 = vpop.f32.mrf.mxu1 }
 0x2ca   : > { %v4815_v61 = vpop.eup %3833 }
 0x2cb   : > { %v1504_v52 = vpack.c.bf16 %v4813_v32, %v4815_v61  ;;  %v4823_v40 = vpop.eup %3835 }
 0x2cd   : > { %1564 = vmatmul.bf16.gmra.mxu3 %v1504_v52  ;;  %v2080_v62 = vpop.permute.xlu2 %2079 }
 0x2ce   : > { %v1414_v16 = vpop.xlane.xlu1 %1413 }
 0x2cf   : > { %v1432_v49 = vsub.f32 %v4700_v51, %v1414_v16 }
 0x2d0   : > { %v4834_v51 = vpop.f32.mrf.mxu1 }
 0x2d1   : > { %v1461_v6 = vmul.f32 1.442695, %v1432_v49  ;;  %v1434_v49 = vsub.f32 %v4724_v12, %v1418_v31  ;;  %v4033_v12 = vld [vmem:[%s4340_s29] sm:$0xff] }
 0x2d2   : > { %v2084_v54 = vpop.permute.xlu0 %2083 }
 0x2d3   : > { %3837 = vpow2.f32 %v1461_v6  ;;  %2093 = vmatpush.bf16.msrb.mxu3 %v2084_v54  ;;  %v4849_v6 = vpop.f32.mrf.mxu0  ;;  %v1465_v54 = vmul.f32 1.442695, %v1434_v49 }
 0x2d5   : > { %3839 = vpow2.f32 %v1465_v54 }
 0x2d8   : > { %v4840_v5 = vpop.f32.mrf.mxu1 }
 0x2d9   : > { %v4827_v17 = vpop.eup %3837 }
 0x2da   : > { %v1505_v38 = vpack.c.bf16 %v4827_v17, %v4823_v40 }
 0x2db   : > { %v4858_v35 = vpop.f32.mrf.mxu0  ;;  %v4862_v31 = vpop.eup %3839 }
 0x2dd   : > { %1569 = vmatmul.bf16.gmra.mxu3 %v1505_v38 }
 0x2e0   : > { %1953 = vmax.xlane.f32.xlu0 %v4809_v59  ;;  %v4846_v16 = vpop.f32.mrf.mxu1 }
 0x2e6   : > { %v2082_v50 = vpop.permute.xlu1 %2081 }
 0x2e7   : > { %2094 = vmatpush.bf16.msrb.mxu3 %v2082_v50 }
 0x2e8   : > { %1959 = vmax.xlane.f32.xlu0 %v4834_v51 }
 0x2e9   : > { %1955 = vmax.xlane.f32.xlu1 %v4820_v43 }
 0x2eb   : > { %2095 = vmatpush.bf16.msrb.mxu3 %v2080_v62  ;;  %v4852_v62 = vpop.f32.mrf.mxu1 }
 0x2ee   : > { %v2078_v52 = vpop.permute.xlu1 %2077  ;;  %1957 = vmax.xlane.f32.xlu2 %v4825_v56 }
 0x2ef   : > { %2096 = vmatpush.bf16.msrb.mxu3 %v2078_v52  ;;  %v4031_v52 = vld [vmem:[%s4340_s29 + $0x18] sm:$0xff] }
 0x2f0   : > { %2513 = vmax.xlane.f32.xlu0 %v4837_v63 }
 0x2f3   : > { %v4868_v54 = vpop.f32.mrf.mxu1 }
 0x2fd   : > { %v1416_v38 = vpop.xlane.xlu0 %1415 }
 0x2fe   : > { %v1433_v50 = vsub.f32 %v4714_v9, %v1416_v38  ;;  %v4872_v38 = vpop.f32.mrf.mxu0 }
 0x300   : > { %v1463_v42 = vmul.f32 1.442695, %v1433_v50 }
 0x302   : > { %3841 = vpow2.f32 %v1463_v42  ;;  %2637 = vrot.lane.b32.xlu1 %v4031_v52, %s4077_s28  ;;  %v4034_v42 = vld [vmem:[%s4340_s29 + $0x8] sm:$0xff]  ;;  %v4874_v52 = vpop.f32.mrf.mxu1 }
 0x304   : > { %2635 = vrot.lane.b32.xlu0 %v4032_v19, %s4077_s28 }
 0x306   : > { %2631 = vrot.lane.b32.xlu2 %v4033_v12, %s4077_s28  ;;  %v4876_v12 = vpop.f32.mrf.mxu0 }
 0x308   : > { %v4864_v9 = vpop.eup %3841 }
 0x309   : > { %v1506_v49 = vpack.c.bf16 %v4862_v31, %v4864_v9 }
 0x30b   : > { %1574 = vmatmul.bf16.gmra.mxu3 %v1506_v49 }
 0x30c   : > { %2633 = vrot.lane.b32.xlu0 %v4034_v42, %s4077_s28  ;;  %v4880_v42 = vpop.f32.mrf.mxu1 }
 0x310   : > { %v2076_v19 = vpop.permute.xlu0 %2075  ;;  %v1950_v50 = vpop.xlane.xlu2 %1949 }
 0x311   : > { %2097 = vmatpush.bf16.msrb.mxu3 %v2076_v19  ;;  %v1981_v49 = vsub.f32 %v4785_v4, %v1950_v50  ;;  %v4882_v19 = vpop.f32.mrf.mxu0 }
 0x313   : > { %v1997_v37 = vmul.f32 1.442695, %v1981_v49 }
 0x314   : > { %v4886_v26 = vpop.f32.mrf.mxu1 }
 0x318   : > { %v2074_v57 = vpop.permute.xlu0 %2073  ;;  %v2646_v25 = vpop.permute.xlu2 %2645 }
 0x319   : > { %v1952_v47 = vpop.xlane.xlu1 %1951  ;;  %2098 = vmatpush.bf16.msrb.mxu3 %v2074_v57  ;;  %2655 = vmatpush.bf16.msrb.mxu2 %v2646_v25 }
 0x31a   : > { %v1982_v13 = vsub.f32 %v4791_v21, %v1952_v47  ;;  %v4890_v47 = vpop.f32.mrf.mxu0 }
 0x31c   : > { %v1999_v2 = vmul.f32 1.442695, %v1982_v13 }
 0x31e   : > { %3843 = vpow2.f32 %v1999_v2 }
 0x31f   : > { %3845 = vpow2.f32 %v1997_v37 }
 0x320   : > { %v2072_v24 = vpop.permute.xlu0 %2071  ;;  %v2642_v2 = vpop.permute.xlu2 %2641 }
 0x321   : > { %2099 = vmatpush.bf16.msrb.mxu3 %v2072_v24  ;;  %v4896_v24 = vpop.f32.mrf.mxu1 }
 0x322   : > { %v4898_v4 = vpop.f32.mrf.mxu0 }
 0x324   : > { %v4884_v53 = vpop.eup %3843 }
 0x325   : > { %v4888_v44 = vpop.eup %3845 }
 0x326   : > { %v2061_v13 = vpack.c.bf16 %v4884_v53, %v4888_v44 }
 0x328   : > { %v2070_v57 = vpop.permute.xlu0 %2069 }
 0x329   : > { %2100 = vmatpush.bf16.msrb.mxu3 %v2070_v57  ;;  %v4903_v21 = vpop.f32.mrf.mxu1 }
 0x32a   : > { %v4905_v50 = vpop.f32.mrf.mxu0 }
 0x32c   : > { %2101 = vmatmul.bf16.vlgmr.msrb.gmra.mxu3 %v2061_v13  ;;  %2511 = vmax.xlane.f32.xlu1 %v4831_v45 }
 0x32d   : > { %3601 = vmatpush.bf16.msra.mxu3 %v2646_v25  ;;  %v2640_v25 = vpop.permute.xlu2 %2639 }
 0x32f   : > { %1965 = vmax.xlane.f32.xlu2 %v4852_v62 }
 0x331   : > { %v2644_v37 = vpop.permute.xlu1 %2643  ;;  %v4910_v49 = vpop.f32.mrf.mxu1 }
 0x332   : > { %2656 = vmatpush.bf16.msrb.mxu2 %v2644_v37  ;;  %3602 = vmatpush.bf16.msra.mxu3 %v2644_v37  ;;  %v4913_v57 = vpop.f32.mrf.mxu0 }
 0x334   : > { %1961 = vmax.xlane.f32.xlu1 %v4840_v5 }
 0x336   : > { %1963 = vmax.xlane.f32.xlu0 %v4846_v16  ;;  %2657 = vmatpush.bf16.msrb.mxu2 %v2642_v2 }
 0x337   : > { %1975 = vmax.xlane.f32.xlu2 %v4896_v24  ;;  %3603 = vmatpush.bf16.msra.mxu3 %v2642_v2 }
 0x339   : > { %v4918_v13 = vpop.f32.mrf.mxu1 }
 0x33a   : > { %2658 = vmatpush.bf16.msrb.mxu2 %v2640_v25 }
 0x33b   : > { %3604 = vmatpush.bf16.msra.mxu3 %v2640_v25  ;;  %v4926_v25 = vpop.f32.mrf.mxu0 }
 0x33c   : > { %2515 = vmax.xlane.f32.xlu1 %v4844_v27 }
 0x33e   : > { %1969 = vmax.xlane.f32.xlu0 %v4874_v52 }
 0x33f   : > { %1977 = vmax.xlane.f32.xlu2 %v4903_v21 }
 0x344   : > { %2517 = vmax.xlane.f32.xlu1 %v4849_v6 }
 0x346   : > { %2523 = vmax.xlane.f32.xlu0 %v4876_v12 }
 0x347   : > { %2533 = vmax.xlane.f32.xlu2 %v4913_v57 }
 0x34c   : > { %1967 = vmax.xlane.f32.xlu1 %v4868_v54 }
 0x34e   : > { %1973 = vmax.xlane.f32.xlu0 %v4886_v26 }
 0x34f   : > { %2539 = vmax.xlane.f32.xlu2 %v4918_v13 }
 0x353   : > { %v1954_v2 = vpop.xlane.xlu0 %1953 }
 0x354   : > { %2519 = vmax.xlane.f32.xlu1 %v4858_v35  ;;  %v1983_v37 = vsub.f32 %v4809_v59, %v1954_v2 }
 0x356   : > { %2529 = vmax.xlane.f32.xlu0 %v4898_v4  ;;  %v2001_v48 = vmul.f32 1.442695, %v1983_v37 }
 0x357   : > { %1469 = vadd.xlane.f32.xlu2 %v4654_v11  ;;  %v4933_v11 = vpop.f32.mrf.mxu0 }
 0x358   : > { %3847 = vpow2.f32 %v2001_v48 }
 0x35b   : > { %v1960_v0 = vpop.xlane.xlu0 %1959 }
 0x35c   : > { %v1956_v34 = vpop.xlane.xlu1 %1955  ;;  %2521 = vmax.xlane.f32.xlu1 %v4872_v38 }
 0x35d   : > { %v1984_v15 = vsub.f32 %v4820_v43, %v1956_v34  ;;  %v4942_v43 = vpop.f32.mrf.mxu3 }
 0x35e   : > { %2531 = vmax.xlane.f32.xlu0 %v4905_v50  ;;  %v3848_v59 = vpop.eup %3847 }
 0x35f   : > { %v2003_v18 = vmul.f32 1.442695, %v1984_v15  ;;  %1475 = vadd.xlane.f32.xlu2 %v4698_v60  ;;  %v1986_v15 = vsub.f32 %v4834_v51, %v1960_v0 }
 0x361   : > { %3849 = vpow2.f32 %v2003_v18  ;;  %v1958_v3 = vpop.xlane.xlu2 %1957  ;;  %v2007_v18 = vmul.f32 1.442695, %v1986_v15 }
 0x362   : > { %v1985_v37 = vsub.f32 %v4825_v56, %v1958_v3 }
 0x363   : > { %v2514_v48 = vpop.xlane.xlu0 %2513 }
 0x364   : > { %1971 = vmax.xlane.f32.xlu1 %v4880_v42  ;;  %v2005_v60 = vmul.f32 1.442695, %v1985_v37  ;;  %v4959_v37 = vpop.f32.mrf.mxu1 }
 0x366   : > { %2537 = vmax.xlane.f32.xlu0 %v4933_v11  ;;  %3851 = vpow2.f32 %v2005_v60 }
 0x367   : > { %v3850_v2 = vpop.eup %3849  ;;  %1481 = vadd.xlane.f32.xlu2 %v4762_v8  ;;  %3853 = vpow2.f32 %v2007_v18 }
 0x368   : > { %v2062_v34 = vpack.c.bf16 %v3850_v2, %v3848_v59 }
 0x36a   : > { %2106 = vmatmul.bf16.gmra.mxu3 %v2062_v34  ;;  %v2544_v34 = vsub.f32 %v4837_v63, %v2514_v48 }
 0x36c   : > { %2525 = vmax.xlane.f32.xlu1 %v4882_v19  ;;  %v4945_v8 = vpop.eup %3851 }
 0x36d   : > { %v3854_v56 = vpop.eup %3853 }
 0x36e   : > { %1467 = vadd.xlane.f32.xlu0 %v4652_v23  ;;  %v2063_v23 = vpack.c.bf16 %v3854_v56, %v4945_v8 }
 0x36f   : > { %1487 = vadd.xlane.f32.xlu2 %v4815_v61  ;;  %v4950_v61 = vpop.f32.mrf.mxu3 }
 0x374   : > { %v2638_v3 = vpop.permute.xlu1 %2637  ;;  %2527 = vmax.xlane.f32.xlu1 %v4890_v47 }
 0x375   : > { %2659 = vmatpush.bf16.msrb.mxu2 %v2638_v3  ;;  %3605 = vmatpush.bf16.msra.mxu3 %v2638_v3 }
 0x376   : > { %1473 = vadd.xlane.f32.xlu0 %v4675_v41  ;;  %v2636_v0 = vpop.permute.xlu0 %2635  ;;  %v2632_v41 = vpop.permute.xlu2 %2631 }
 0x377   : > { %1493 = vadd.xlane.f32.xlu2 %v4827_v17  ;;  %v4956_v17 = vpop.f32.mrf.mxu3 }
 0x378   : > { %6994 = vst [vmem:[#allocation28_spill] sm:$0xff] %v4956_v17 }
 0x379   : > { %2660 = vmatpush.bf16.msrb.mxu2 %v2636_v0  ;;  %3606 = vmatpush.bf16.msra.mxu3 %v2636_v0 }
 0x37a   : > { %2111 = vmatmul.bf16.gmra.mxu3 %v2063_v23 }
 0x37c   : > { %1979 = vmax.xlane.f32.xlu1 %v4910_v49 }
 0x37e   : > { %1479 = vadd.xlane.f32.xlu0 %v4764_v30  ;;  %v2634_v51 = vpop.permute.xlu0 %2633 }
 0x37f   : > { %2029 = vadd.xlane.f32.xlu2 %v4888_v44  ;;  %2661 = vmatpush.bf16.msrb.mxu2 %v2634_v51  ;;  %v4963_v30 = vpop.f32.mrf.mxu3 }
 0x380   : > { %3607 = vmatpush.bf16.msra.mxu3 %v2634_v51 }
 0x383   : > { %2662 = vmatpush.bf16.msrb.mxu2 %v2632_v41 }
 0x384   : > { %2535 = vmax.xlane.f32.xlu1 %v4926_v25  ;;  %3608 = vmatpush.bf16.msra.mxu3 %v2632_v41 }
 0x386   : > { %1485 = vadd.xlane.f32.xlu0 %v4781_v33  ;;  %v2561_v33 = vmul.f32 1.442695, %v2544_v34 }
 0x387   : > { %2035 = vadd.xlane.f32.xlu2 %v3850_v2  ;;  %v4967_v44 = vpop.f32.mrf.mxu3 }
 0x388   : > { %3855 = vpow2.f32 %v2561_v33 }
 0x38c   : > { %2541 = vmax.xlane.f32.xlu1 %v4959_v37 }
 0x38e   : > { %1491 = vadd.xlane.f32.xlu0 %v4823_v40 }
 0x38f   : > { %v4972_v60 = vpop.f32.mrf.mxu3 }
 0x394   : > { %1471 = vadd.xlane.f32.xlu1 %v4671_v29 }
 0x396   : > { %1497 = vadd.xlane.f32.xlu0 %v4862_v31 }
 0x397   : > { %v4981_v3 = vpop.f32.mrf.mxu3 }
 0x39c   : > { %1477 = vadd.xlane.f32.xlu1 %v4704_v36 }
 0x39e   : > { %2033 = vadd.xlane.f32.xlu0 %v3848_v59  ;;  %v4977_v59 = vpop.eup %3855 }
 0x39f   : > { %v2512_v2 = vpop.xlane.xlu1 %2511 }
 0x3a0   : > { %v2543_v15 = vsub.f32 %v4831_v45, %v2512_v2 }
 0x3a2   : > { %v2559_v40 = vmul.f32 1.442695, %v2543_v15  ;;  %v1966_v18 = vpop.xlane.xlu2 %1965 }
 0x3a3   : > { %v1989_v29 = vsub.f32 %v4852_v62, %v1966_v18 }
 0x3a4   : > { %3857 = vpow2.f32 %v2559_v40  ;;  %1483 = vadd.xlane.f32.xlu1 %v4778_v20 }
 0x3a5   : > { %v2013_v31 = vmul.f32 1.442695, %v1989_v29 }
 0x3a6   : > { %2039 = vadd.xlane.f32.xlu0 %v3854_v56 }
 0x3a7   : > { %3859 = vpow2.f32 %v2013_v31  ;;  %v1962_v63 = vpop.xlane.xlu1 %1961 }
 0x3a8   : > { %v1987_v36 = vsub.f32 %v4840_v5, %v1962_v63 }
 0x3a9   : > { %v1964_v48 = vpop.xlane.xlu0 %1963 }
 0x3aa   : > { %v4979_v45 = vpop.eup %3857  ;;  %v2009_v0 = vmul.f32 1.442695, %v1987_v36  ;;  %v1988_v23 = vsub.f32 %v4846_v16, %v1964_v48  ;;  %v1976_v51 = vpop.xlane.xlu2 %1975 }
 0x3ab   : > { %v2623_v62 = vpack.c.bf16 %v4977_v59, %v4979_v45  ;;  %v4988_v16 = vpop.f32.mrf.mxu3 }
 0x3ac   : > { %3861 = vpow2.f32 %v2009_v0  ;;  %v2011_v20 = vmul.f32 1.442695, %v1988_v23  ;;  %1489 = vadd.xlane.f32.xlu1 %v4813_v32 }
 0x3ad   : > { %v3860_v56 = vpop.eup %3859  ;;  %2663 = vmatmul.bf16.vlgmr.msrb.gmra.mxu2 %v2623_v62 }
 0x3ae   : > { %3863 = vpow2.f32 %v2011_v20  ;;  %2045 = vadd.xlane.f32.xlu0 %v3860_v56 }
 0x3af   : > { %v2516_v5 = vpop.xlane.xlu1 %2515 }
 0x3b0   : > { %v2545_v33 = vsub.f32 %v4844_v27, %v2516_v5 }
 0x3b1   : > { %v1970_v41 = vpop.xlane.xlu0 %1969 }
 0x3b2   : > { %v3862_v34 = vpop.eup %3861  ;;  %v2563_v40 = vmul.f32 1.442695, %v2545_v33  ;;  %v4991_v18 = vpop.xlane.xlu2 %1977 }
 0x3b3   : > { %2041 = vadd.xlane.f32.xlu2 %v3862_v34  ;;  %v4996_v36 = vpop.f32.mrf.mxu3 }
 0x3b4   : > { %v3864_v2 = vpop.eup %3863  ;;  %1495 = vadd.xlane.f32.xlu1 %v4864_v9  ;;  %3865 = vpow2.f32 %v2563_v40  ;;  %6995 = vst [vmem:[#allocation29_spill] sm:$0xff] %v4996_v36 }
 0x3b5   : > { %v2064_v15 = vpack.c.bf16 %v3864_v2, %v3862_v34 }
 0x3b7   : > { %2116 = vmatmul.bf16.gmra.mxu3 %v2064_v15  ;;  %v2518_v32 = vpop.xlane.xlu1 %2517 }
 0x3b8   : > { %v2546_v29 = vsub.f32 %v4849_v6, %v2518_v32 }
 0x3b9   : > { %v4994_v31 = vpop.xlane.xlu0 %2523 }
 0x3ba   : > { %v2565_v63 = vmul.f32 1.442695, %v2546_v29  ;;  %v5000_v48 = vpop.eup %3865  ;;  %v5002_v0 = vpop.xlane.xlu2 %2533  ;;  %v1994_v29 = vsub.f32 %v4896_v24, %v1976_v51 }
 0x3bc   : > { %3867 = vpow2.f32 %v2565_v63  ;;  %2031 = vadd.xlane.f32.xlu1 %v4884_v53  ;;  %v1991_v53 = vsub.f32 %v4874_v52, %v1970_v41  ;;  %v2023_v41 = vmul.f32 1.442695, %v1994_v29 }
 0x3be   : > { %v2017_v15 = vmul.f32 1.442695, %v1991_v53 }
 0x3bf   : > { %v1968_v27 = vpop.xlane.xlu1 %1967 }
 0x3c0   : > { %v1990_v9 = vsub.f32 %v4868_v54, %v1968_v27  ;;  %v5011_v54 = vpop.f32.mrf.mxu3 }
 0x3c1   : > { %v1974_v23 = vpop.xlane.xlu0 %1973 }
 0x3c2   : > { %v5004_v62 = vpop.eup %3867  ;;  %v2015_v6 = vmul.f32 1.442695, %v1990_v9  ;;  %v1993_v5 = vsub.f32 %v4886_v26, %v1974_v23  ;;  %v5016_v63 = vpop.xlane.xlu2 %2539 }
 0x3c3   : > { %v2624_v20 = vpack.c.bf16 %v5004_v62, %v5000_v48 }
 0x3c4   : > { %3869 = vpow2.f32 %v2015_v6  ;;  %2037 = vadd.xlane.f32.xlu1 %v4945_v8  ;;  %v2021_v33 = vmul.f32 1.442695, %v1993_v5 }
 0x3c5   : > { %2668 = vmatmul.bf16.gmra.mxu2 %v2624_v20 }
 0x3c6   : > { %3871 = vpow2.f32 %v2021_v33 }
 0x3c7   : > { %v2520_v34 = vpop.xlane.xlu1 %2519  ;;  %3873 = vpow2.f32 %v2017_v15 }
 0x3c8   : > { %v2547_v52 = vsub.f32 %v4858_v35, %v2520_v34  ;;  %v5019_v8 = vpop.f32.mrf.mxu3  ;;  %3875 = vpow2.f32 %v2023_v41  ;;  %v2549_v41 = vsub.f32 %v4876_v12, %v4994_v31 }
 0x3c9   : > { %v5013_v40 = vpop.xlane.xlu0 %2529 }
 0x3ca   : > { %v3870_v32 = vpop.eup %3869  ;;  %v2567_v23 = vmul.f32 1.442695, %v2547_v52  ;;  %v5027_v35 = vpop.xlane.xlu2 %1469 }
 0x3cb   : > { %2047 = vadd.xlane.f32.xlu2 %v3870_v32  ;;  %v2065_v26 = vpack.c.bf16 %v3870_v32, %v3860_v56  ;;  %v1995_v32 = vsub.f32 %v4903_v21, %v4991_v18  ;;  %v2571_v18 = vmul.f32 1.442695, %v2549_v41  ;;  %vm1600_vm14 = vweird.f32 %v5027_v35 }
 0x3cc   : > { %2043 = vadd.xlane.f32.xlu1 %v3864_v2  ;;  %v5024_v24 = vpop.eup %3871 }
 0x3cd   : > { %2121 = vmatmul.bf16.gmra.mxu3 %v2065_v26  ;;  %v3874_v20 = vpop.eup %3873  ;;  %v2025_v52 = vmul.f32 1.442695, %v1995_v32 }
 0x3ce   : > { %v3876_v5 = vpop.eup %3875 }
 0x3cf   : > { %v2522_v27 = vpop.xlane.xlu1 %2521 }
 0x3d0   : > { %v2548_v9 = vsub.f32 %v4872_v38, %v2522_v27  ;;  %v5029_v2 = vpop.f32.mrf.mxu3 }
 0x3d1   : > { %v5022_v6 = vpop.xlane.xlu0 %2531  ;;  %6996 = vst [vmem:[#allocation30_spill] sm:$0xff] %v5029_v2 }
 0x3d2   : > { %v2569_v51 = vmul.f32 1.442695, %v2548_v9  ;;  %v5042_v26 = vpop.xlane.xlu2 %1475 }
 0x3d3   : > { %2053 = vadd.xlane.f32.xlu2 %v5024_v24  ;;  %vm1645_vm3 = vweird.f32 %v5042_v26 }
 0x3d4   : > { %3877 = vpow2.f32 %v2569_v51  ;;  %2049 = vadd.xlane.f32.xlu1 %v3874_v20 }
 0x3d5   : > { %3879 = vpow2.f32 %v2567_v23 }
 0x3d7   : > { %v1972_v56 = vpop.xlane.xlu1 %1971 }
 0x3d8   : > { %v1992_v38 = vsub.f32 %v4880_v42, %v1972_v56  ;;  %v5049_v51 = vpop.f32.mrf.mxu3 }
 0x3d9   : > { %v5032_v53 = vpop.xlane.xlu0 %2537 }
 0x3da   : > { %v5034_v34 = vpop.eup %3877  ;;  %v2019_v33 = vmul.f32 1.442695, %v1992_v38 }
 0x3db   : > { %v5036_v15 = vpop.eup %3879 }
 0x3dc   : > { %3881 = vpow2.f32 %v2019_v33  ;;  %2055 = vadd.xlane.f32.xlu1 %v3876_v5  ;;  %v2625_v29 = vpack.c.bf16 %v5034_v34, %v5036_v15  ;;  %v5052_v33 = vpop.xlane.xlu2 %1481 }
 0x3dd   : > { %3883 = vpow2.f32 %v2025_v52  ;;  %vm1690_vm6 = vweird.f32 %v5052_v33 }
 0x3de   : > { %2673 = vmatmul.bf16.gmra.mxu2 %v2625_v29 }
 0x3df   : > { %v2526_v42 = vpop.xlane.xlu1 %2525 }
 0x3e0   : > { %v2550_v27 = vsub.f32 %v4882_v19, %v2526_v42  ;;  %v5061_v32 = vpop.f32.mrf.mxu3 }
 0x3e1   : > { %v5047_v9 = vpop.xlane.xlu0 %1467 }
 0x3e2   : > { %v3882_v23 = vpop.eup %3881  ;;  %v2573_v21 = vmul.f32 1.442695, %v2550_v27  ;;  %vm1585_vm9 = vweird.f32 %v5047_v9 }
 0x3e3   : > { %2051 = vadd.xlane.f32.xlu0 %v3882_v23  ;;  %v2066_v56 = vpack.c.bf16 %v3882_v23, %v3874_v20  ;;  %v5054_v12 = vpop.eup %3883 }
 0x3e4   : > { %2591 = vadd.xlane.f32.xlu1 %v4979_v45  ;;  %3885 = vpow2.f32 %v2573_v21  ;;  %v2552_v45 = vsub.f32 %v4898_v4, %v5013_v40  ;;  %v5072_v4 = vpop.xlane.xlu2 %1487 }
 0x3e5   : > { %3887 = vpow2.f32 %v2571_v18  ;;  %2126 = vmatmul.bf16.gmra.mxu3 %v2066_v56  ;;  %vm1735_vm10 = vweird.f32 %v5072_v4 }
 0x3e6   : > { %3889 = vrcp.f32 %v4679_v46  ;;  %v2577_v41 = vmul.f32 1.442695, %v2552_v45 }
 0x3e7   : > { %v2528_v38 = vpop.xlane.xlu1 %2527  ;;  %3891 = vrcp.f32 %v5027_v35 }
 0x3e8   : > { %v2551_v29 = vsub.f32 %v4890_v47, %v2528_v38  ;;  %3893 = vrcp.f32 %v5042_v26  ;;  %v5075_v47 = vpop.f32.mrf.mxu3 }
 0x3e9   : > { %v5056_v19 = vpop.xlane.xlu0 %1473  ;;  %6997 = vst [vmem:[#allocation31_spill] sm:$0xff] %v5075_v47  ;;  %3895 = vpow2.f32 %v2577_v41 }
 0x3ea   : > { %v5059_v31 = vpop.eup %3885  ;;  %v2575_v23 = vmul.f32 1.442695, %v2551_v29 }
 0x3eb   : > { %2057 = vadd.xlane.f32.xlu0 %v5054_v12  ;;  %v3888_v20 = vpop.eup %3887 }
 0x3ec   : > { %2597 = vadd.xlane.f32.xlu1 %v5004_v62  ;;  %v2626_v42 = vpack.c.bf16 %v5059_v31, %v3888_v20  ;;  %v5079_v21 = vpop.eup %3889  ;;  %v5106_v41 = vpop.xlane.xlu2 %1493 }
 0x3ed   : > { %6998 = vst [vmem:[#allocation32_spill] sm:$0xff] %v5079_v21  ;;  %v5082_v18 = vpop.eup %3891  ;;  %v1041_v38 = vmul.f32 %v5079_v21, %v4679_v46  ;;  %v1784_v2 = vand.u32 2147483647, %v5106_v41 }
 0x3ee   : > { %2678 = vmatmul.bf16.gmra.mxu2 %v2626_v42  ;;  %v5089_v29 = vpop.eup %3893  ;;  %vm1601_vm13 = vweird.f32 %v5082_v18 }
 0x3ef   : > { %v1980_v52 = vpop.xlane.xlu1 %1979  ;;  %vm1646_vm15 = vweird.f32 %v5089_v29  ;;  %vm5184_vm1 = vmor %vm1600_vm14, %vm1601_vm13  ;;  %vm1630_vm14 = vweird.f32 %v5056_v19 }
 0x3f0   : > { %v1996_v27 = vsub.f32 %v4910_v49, %v1980_v52  ;;  %v2067_v49 = vpack.c.bf16 %v3876_v5, %v5024_v24  ;;  %v3896_v24 = vpop.eup %3895  ;;  %v1596_v5 = vmul.f32 %v5082_v18, %v5027_v35  ;;  %vm5208_vm5 = vmor %vm1645_vm3, %vm1646_vm15 }
 0x3f1   : > { %v5077_v40 = vpop.xlane.xlu0 %1479 }
 0x3f2   : > { %v2027_v62 = vmul.f32 1.442695, %v1996_v27  ;;  %v5109_v27 = vpop.f32.mrf.mxu3 }
 0x3f3   : > { %2593 = vadd.xlane.f32.xlu0 %v4977_v59  ;;  %v2554_v59 = vsub.f32 %v4913_v57, %v5002_v0  ;;  %6999 = vst [vmem:[#allocation33_spill] sm:$0xff] %v5109_v27 }
 0x3f4   : > { %2603 = vadd.xlane.f32.xlu1 %v3888_v20  ;;  %3897 = vpow2.f32 %v2027_v62  ;;  %v2553_v20 = vsub.f32 %v4905_v50, %v5022_v6  ;;  %v1641_v50 = vmul.f32 %v5089_v29, %v5042_v26 }
 0x3f5   : > { %3899 = vpow2.f32 %v2575_v23  ;;  %2131 = vmatmul.bf16.gmra.mxu3 %v2067_v49  ;;  %v2581_v0 = vmul.f32 1.442695, %v2554_v59  ;;  %v2557_v49 = vsub.f32 %v4918_v13, %v5016_v63 }
 0x3f6   : > { %3901 = vrcp.f32 %v4741_v14  ;;  %v2579_v6 = vmul.f32 1.442695, %v2553_v20  ;;  %v1642_v20 = vsub.f32 1.0, %v1641_v50 }
 0x3f7   : > { %v2536_v56 = vpop.xlane.xlu1 %2535  ;;  %3903 = vrcp.f32 %v5052_v33 }
 0x3f8   : > { %v2555_v45 = vsub.f32 %v4926_v25, %v2536_v56  ;;  %v1042_v25 = vsub.f32 1.0, %v1041_v38  ;;  %3905 = vrcp.f32 %v4712_v1 }
 0x3f9   : > { %v5111_v23 = vpop.xlane.xlu0 %1485 }
 0x3fa   : > { %v5097_v42 = vpop.eup %3897  ;;  %v2583_v52 = vmul.f32 1.442695, %v2555_v45  ;;  %v1043_v45 = vmul.f32 %v5079_v21, %v1042_v25 }
 0x3fb   : > { %2599 = vadd.xlane.f32.xlu0 %v5036_v15  ;;  %v5100_v57 = vpop.eup %3899  ;;  %2059 = vadd.xlane.f32.xlu2 %v5097_v42  ;;  %v1597_v15 = vsub.f32 1.0, %v1596_v5 }
 0x3fc   : > { %2609 = vadd.xlane.f32.xlu1 %v3896_v24  ;;  %3907 = vpow2.f32 %v2583_v52  ;;  %v5113_v62 = vpop.eup %3901  ;;  %v2627_v56 = vpack.c.bf16 %v3896_v24, %v5100_v57 }
 0x3fd   : > { %3909 = vrcp.f32 %v4749_v58  ;;  %7000 = vst [vmem:[#allocation34_spill] sm:$0xff] %v5113_v62  ;;  %v5119_v59 = vpop.eup %3903  ;;  %v1598_v63 = vmul.f32 %v5082_v18, %v1597_v15  ;;  %v5133_v25 = vmul.f32 %v5113_v62, %v4741_v14  ;;  %v1643_v15 = vmul.f32 %v5089_v29, %v1642_v20  ;;  %v5157_v20 = vpop.f32.mrf.mxu3 }
 0x3fe   : > { %3911 = vrcp.f32 %v5047_v9  ;;  %2683 = vmatmul.bf16.gmra.mxu2 %v2627_v56  ;;  %v5124_v1 = vpop.eup %3905  ;;  %v2556_v56 = vsub.f32 %v4933_v11, %v5032_v53  ;;  %v1651_v53 = vand.u32 2147483648, %v5042_v26  ;;  %v5168_v14 = vpop.xlane.xlu2 %2029  ;;  %vm1691_vm7 = vweird.f32 %v5119_v59 }
 0x3ff   : > { %v2542_v38 = vpop.xlane.xlu1 %2541  ;;  %3913 = vpow2.f32 %v2581_v0  ;;  %7001 = vst [vmem:[#allocation35_spill] sm:$0xff] %v5124_v1  ;;  %v1686_v0 = vmul.f32 %v5119_v59, %v5052_v33  ;;  %v1599_v11 = vadd.f32 %v5082_v18, %v1598_v63  ;;  %vm5268_vm11 = vmor %vm1690_vm6, %vm1691_vm7 }
 0x400   : > { %v2558_v5 = vsub.f32 %v4959_v37, %v2542_v38  ;;  %3915 = vpow2.f32 %v2579_v6  ;;  %7002 = vst [vmem:[#allocation36_spill] sm:$0xff] %v5133_v25  ;;  %v2587_v37 = vmul.f32 1.442695, %v2557_v49  ;;  %v5142_v6 = vadd.f32 %v5079_v21, %v1043_v45 }
 0x401   : > { %3917 = vrcp.f32 %v5072_v4  ;;  %v1606_v38 = vand.u32 2147483648, %v5027_v35  ;;  %v1687_v52 = vsub.f32 1.0, %v1686_v0  ;;  %v2585_v1 = vmul.f32 1.442695, %v2556_v56 }
 0x402   : > { %v2589_v24 = vmul.f32 1.442695, %v2558_v5  ;;  %v5129_v58 = vpop.eup %3907  ;;  %3919 = vrcp.f32 %v5106_v41  ;;  %7004 = vst [vmem:[#allocation38_spill] sm:$0xff] %v5142_v6  ;;  %v2068_v5 = vpack.c.bf16 %v5097_v42, %v5054_v12  ;;  %v1644_v6 = vadd.f32 %v5089_v29, %v1643_v15  ;;  %v5178_v42 = vpop.xlane.xlu0 %1491 }
 0x403   : > { %2605 = vadd.xlane.f32.xlu0 %v5059_v31  ;;  %v5139_v50 = vpop.eup %3909  ;;  %2595 = vadd.xlane.f32.xlu2 %v5000_v48  ;;  %v1604_v31 = vand.u32 2147483647, %v5027_v35  ;;  %v1649_v48 = vand.u32 2147483647, %v5042_v26  ;;  %v1607_v15 = vor.u32 1.1754944e-38, %v1606_v38  ;;  %v1696_v56 = vand.u32 2147483648, %v5052_v33 }
 0x404   : > { %7003 = vst [vmem:[#allocation37_spill] sm:$0xff] %v5139_v50  ;;  %3921 = vpow2.f32 %v2589_v24  ;;  %2615 = vadd.xlane.f32.xlu1 %v5129_v58  ;;  %v5149_v49 = vpop.eup %3911  ;;  %v1652_v46 = vor.u32 1.1754944e-38, %v1651_v53  ;;  %v1688_v38 = vmul.f32 %v5119_v59, %v1687_v52  ;;  %v1636_v25 = vand.u32 2147483648, %v5056_v19 }
 0x405   : > { %3923 = vrcp.f32 %v5056_v19  ;;  %v5155_v45 = vpop.eup %3913  ;;  %v1581_v12 = vmul.f32 %v5149_v49, %v5047_v9  ;;  %2136 = vmatmul.bf16.gmra.mxu3 %v2068_v5  ;;  %vm5188_vm2 = vcmp.eq.f32.partialorder %v1604_v31, 8.507059e+37  ;;  %v1603_v5 = vsel %vm5184_vm1, %v5082_v18, %v1599_v11 }
 0x406   : > { %v5164_v24 = vpop.eup %3915  ;;  %3925 = vpow2.f32 %v2587_v37  ;;  %vm5199_vm4 = vcmp.eq.f32.partialorder %v1649_v48, 8.507059e+37  ;;  %v1694_v31 = vand.u32 2147483647, %v5052_v33  ;;  %v1648_v11 = vsel %vm5208_vm5, %v5089_v29, %v1644_v6 }
 0x407   : > { %v5170_v62 = vpop.xlane.xlu1 %1471  ;;  %v5172_v63 = vpop.eup %3917  ;;  %3927 = vrcp.f32 %v5077_v40  ;;  %v1582_v48 = vsub.f32 1.0, %v1581_v12  ;;  %v2628_v52 = vpack.c.bf16 %v5155_v45, %v5164_v24  ;;  %v1697_v35 = vor.u32 1.1754944e-38, %v1696_v56 }
 0x408   : > { %v5180_v37 = vpop.eup %3919  ;;  %v1731_v18 = vmul.f32 %v5172_v63, %v5072_v4  ;;  %3929 = vpow2.f32 %v2585_v1  ;;  %v1608_v29 = vsel %vm5188_vm2, %v1607_v15, %v1603_v5  ;;  %vm5232_vm8 = vcmp.eq.f32.partialorder %v1694_v31, 8.507059e+37 }
 0x409   : > { %v1776_v27 = vmul.f32 %v5180_v37, %v5106_v41  ;;  %v1591_v6 = vand.u32 2147483648, %v5047_v9  ;;  %v1689_v56 = vadd.f32 %v5119_v59, %v1688_v38  ;;  %3931 = vrcp.f32 %v5168_v14  ;;  %v5255_v38 = vpop.f32.mrf.mxu3 }
 0x40a   : > { %v5194_v13 = vpop.eup %3921  ;;  %v1732_v26 = vsub.f32 1.0, %v1731_v18  ;;  %v1653_v15 = vsel %vm5199_vm4, %v1652_v46, %v1648_v11  ;;  %v1583_v5 = vmul.f32 %v5149_v49, %v1582_v48  ;;  %v5251_v31 = vmul.f32 %v1608_v29, %v4950_v61  ;;  %7015 = vst [vmem:[#allocation39_spill] sm:$0xff] %v5255_v38  ;;  %v5260_v11 = vpop.xlane.xlu2 %2035 }
 0x40b   : > { %v5204_v50 = vpop.eup %3923  ;;  %2611 = vadd.xlane.f32.xlu0 %v5164_v24  ;;  %2601 = vadd.xlane.f32.xlu2 %v5034_v34  ;;  %v1589_v34 = vand.u32 2147483647, %v5047_v9  ;;  %v1741_v24 = vand.u32 2147483648, %v5072_v4  ;;  %v1739_v18 = vand.u32 2147483647, %v5072_v4  ;;  %v1777_v46 = vsub.f32 1.0, %v1776_v27  ;;  %v5278_v38 = vpop.xlane.xlu0 %1497 }
 0x40c   : > { %2621 = vadd.xlane.f32.xlu1 %v5194_v13  ;;  %v5225_v53 = vpop.eup %3925  ;;  %v1626_v12 = vmul.f32 %v5204_v50, %v5056_v19  ;;  %v1592_v21 = vor.u32 1.1754944e-38, %v1591_v6  ;;  %v1693_v33 = vsel %vm5268_vm11, %v5119_v59, %v1689_v56  ;;  %vm1586_vm13 = vweird.f32 %v5149_v49 }
 0x40d   : > { %v5253_v47 = vpop.eup %3927  ;;  %vm5272_vm12 = vcmp.eq.f32.partialorder %v1589_v34, 8.507059e+37  ;;  %v5276_v36 = vor.u32 1.1754944e-38, %v1741_v24  ;;  %v1733_v34 = vmul.f32 %v5172_v63, %v1732_v26  ;;  %v1584_v6 = vadd.f32 %v5149_v49, %v1583_v5  ;;  %vm5320_vm3 = vmor %vm1585_vm9, %vm1586_vm13 }
 0x40e   : > { %2688 = vmatmul.bf16.gmra.mxu2 %v2628_v52  ;;  %v5262_v48 = vpop.eup %3929  ;;  %v1627_v27 = vsub.f32 1.0, %v1626_v12  ;;  %v5281_v52 = vmul.f32 %v1653_v15, %v4967_v44  ;;  %v1671_v44 = vmul.f32 %v5253_v47, %v5077_v40  ;;  %vm1736_vm15 = vweird.f32 %v5172_v63 }
 0x40f   : > { %v5243_v0 = vpop.xlane.xlu1 %1477  ;;  %v5298_v59 = vpop.eup %3931  ;;  %vm5301_vm1 = vcmp.eq.f32.partialorder %v1739_v18, 8.507059e+37  ;;  %v5305_v56 = vor.u32 1.1754944e-38, %v1636_v25  ;;  %v1778_v26 = vmul.f32 %v5180_v37, %v1777_v46  ;;  %vm1780_vm2 = vweird.f32 %v5106_v41  ;;  %vm5353_vm6 = vmor %vm1735_vm10, %vm1736_vm15 }
 0x410   : > { %3933 = vrcp.f32 %v5243_v0  ;;  %v2630_v5 = vpack.c.bf16 %v5194_v13, %v5225_v53  ;;  %v1734_v25 = vadd.f32 %v5172_v63, %v1733_v34  ;;  %vm5325_vm4 = vcmp.eq.f32.partialorder %v1784_v2, 8.507059e+37 }
 0x411   : > { %3935 = vrcp.f32 %v5260_v11  ;;  %v1698_v13 = vsel %vm5232_vm8, %v1697_v35, %v1693_v33  ;;  %v1588_v9 = vsel %vm5320_vm3, %v5149_v49, %v1584_v6  ;;  %v1681_v24 = vand.u32 2147483648, %v5077_v40  ;;  %v5341_v17 = vpop.f32.mrf.mxu3 }
 0x412   : > { %3937 = vrcp.f32 %v5111_v23  ;;  %v2153_v34 = vand.u32 2147483648, %v5168_v14  ;;  %v1779_v2 = vadd.f32 %v5180_v37, %v1778_v26  ;;  %vm1781_vm5 = vweird.f32 %v5180_v37 }
 0x413   : > { %2617 = vadd.xlane.f32.xlu0 %v5262_v48  ;;  %2607 = vadd.xlane.f32.xlu2 %v5100_v57  ;;  %v1628_v57 = vmul.f32 %v5204_v50, %v1627_v27  ;;  %3939 = vrcp.f32 %v5178_v42  ;;  %v1672_v27 = vsub.f32 1.0, %v1671_v44  ;;  %v2143_v1 = vmul.f32 %v5298_v59, %v5168_v14  ;;  %vm5378_vm9 = vmor %vm1780_vm2, %vm1781_vm5  ;;  %v5388_v29 = vpop.xlane.xlu0 %2033 }
 0x414   : > { %897 = vadd.xlane.f32.xlu1 %v4629_v28  ;;  %v1786_v28 = vand.u32 2147483648, %v5106_v41  ;;  %vm1631_vm7 = vweird.f32 %v5204_v50  ;;  %v5362_v26 = vmul.f32 %v1698_v13, %v4988_v16  ;;  %vm1675_vm8 = vweird.f32 %v5077_v40 }
 0x415   : > { %2698 = vmatmul.bf16.vlgmr.msra.gmra.mxu3 %v2630_v5  ;;  %v5358_v6 = vadd.f32 %v5204_v50, %v1628_v57  ;;  %v1738_v5 = vsel %vm5353_vm6, %v5172_v63, %v1734_v25  ;;  %v1679_v4 = vand.u32 2147483647, %v5077_v40  ;;  %v1593_v57 = vsel %vm5272_vm12, %v1592_v21, %v1588_v9  ;;  %vm5398_vm10 = vmor %vm1630_vm14, %vm1631_vm7 }
 0x416   : > { %v5309_v15 = vpop.eup %3933  ;;  %v1787_v44 = vor.u32 1.1754944e-38, %v1786_v28  ;;  %v1673_v63 = vmul.f32 %v5253_v47, %v1672_v27  ;;  %v5383_v28 = vor.u32 1.1754944e-38, %v1681_v24  ;;  %v2151_v25 = vand.u32 2147483647, %v5168_v14 }
 0x417   : > { %v5330_v61 = vpop.xlane.xlu1 %1483  ;;  %v1656_v35 = vmul.f32 %v5309_v15, %v5243_v0  ;;  %v5347_v33 = vpop.eup %3935  ;;  %v1783_v24 = vsel %vm5378_vm9, %v5180_v37, %v1779_v2  ;;  %v2144_v13 = vsub.f32 1.0, %v2143_v1  ;;  %vm2147_vm11 = vweird.f32 %v5168_v14 }
 0x418   : > { %v5372_v18 = vpop.eup %3937  ;;  %v1726_v27 = vand.u32 2147483648, %v5111_v23  ;;  %v1743_v37 = vsel %vm5301_vm1, %v5276_v36, %v1738_v5  ;;  %vm5419_vm12 = vcmp.eq.f32.partialorder %v1679_v4, 8.507059e+37  ;;  %3941 = vrcp.f32 %v5388_v29 }
 0x419   : > { %v5392_v21 = vpop.eup %3939  ;;  %v1657_v9 = vsub.f32 1.0, %v1656_v35  ;;  %v1716_v1 = vmul.f32 %v5372_v18, %v5111_v23  ;;  %v2198_v35 = vand.u32 2147483648, %v5260_v11  ;;  %v2629_v49 = vpack.c.bf16 %v5262_v48, %v5129_v58 }
 0x41a   : > { %vm1676_vm13 = vweird.f32 %v5253_v47  ;;  %v1761_v36 = vmul.f32 %v5392_v21, %v5178_v42  ;;  %v1788_v12 = vsel %vm5325_vm4, %v1787_v44, %v1783_v24  ;;  %v7034_v5 = vand.u32 2147483647, %v5056_v19  ;;  %v5457_v44 = vpop.f32.mrf.mxu3 }
 0x41b   : > { %893 = vadd.xlane.f32.xlu0 %v4617_v22  ;;  %v5386_v22 = vor.u32 1.1754944e-38, %v2153_v34  ;;  %2613 = vadd.xlane.f32.xlu2 %v5155_v45  ;;  %v2188_v45 = vmul.f32 %v5347_v33, %v5260_v11  ;;  %v5414_v34 = vmul.f32 %v1593_v57, %v4942_v43  ;;  %v1674_v57 = vadd.f32 %v5253_v47, %v1673_v63  ;;  %vm5453_vm1 = vmor %vm1675_vm8, %vm1676_vm13 }
 0x41c   : > { %903 = vadd.xlane.f32.xlu1 %v4648_v7  ;;  %vm5439_vm14 = vcmp.eq.f32.partialorder %v7034_v5, 8.507059e+37  ;;  %v2145_v58 = vmul.f32 %v5298_v59, %v2144_v13  ;;  %3943 = vrcp.f32 %v5170_v62  ;;  %v1658_v16 = vmul.f32 %v5309_v15, %v1657_v9 }
 0x41d   : > { %v2189_v48 = vsub.f32 1.0, %v2188_v45  ;;  %vm2148_vm15 = vweird.f32 %v5298_v59  ;;  %v1724_v63 = vand.u32 2147483647, %v5111_v23  ;;  %v5448_v46 = vor.u32 1.1754944e-38, %v1726_v27 }
 0x41e   : > { %2693 = vmatmul.bf16.gmra.mxu2 %v2629_v49  ;;  %v1717_v24 = vsub.f32 1.0, %v1716_v1  ;;  %vm2192_vm2 = vweird.f32 %v5260_v11  ;;  %v2196_v13 = vand.u32 2147483647, %v5260_v11  ;;  %v5461_v45 = vor.u32 1.1754944e-38, %v2198_v35  ;;  %v5474_v49 = vpop.eup %3941  ;;  %vm5499_vm6 = vmor %vm2147_vm11, %vm2148_vm15 }
 0x41f   : > { %v5429_v43 = vpop.xlane.xlu1 %1489  ;;  %v1678_v40 = vsel %vm5453_vm1, %v5253_v47, %v1674_v57  ;;  %v1762_v27 = vsub.f32 1.0, %v1761_v36  ;;  %v5472_v1 = vmul.f32 %v1788_v12, %v5061_v32  ;;  %v5477_v35 = vadd.f32 %v5298_v59, %v2145_v58 }
 0x420   : > { %3945 = vrcp.f32 %v5429_v43  ;;  %vm1720_vm3 = vweird.f32 %v5111_v23  ;;  %v1659_v5 = vadd.f32 %v5309_v15, %v1658_v16  ;;  %vm1661_vm4 = vweird.f32 %v5309_v15 }
 0x421   : > { %3947 = vrcp.f32 %v5278_v38  ;;  %vm5483_vm5 = vcmp.eq.f32.partialorder %v2151_v25, 8.507059e+37  ;;  %v1769_v32 = vand.u32 2147483647, %v5178_v42  ;;  %v1666_v57 = vand.u32 2147483648, %v5243_v0  ;;  %v5607_v25 = vpop.xlane.xlu0 %2039 }
 0x422   : > { %v5491_v36 = vmul.f32 %v1743_v37, %v5019_v8  ;;  %v5493_v12 = vpop.eup %3943  ;;  %v1718_v58 = vmul.f32 %v5372_v18, %v1717_v24  ;;  %vm1721_vm7 = vweird.f32 %v5372_v18  ;;  %vm5505_vm8 = vcmp.eq.f32.partialorder %v2196_v13, 8.507059e+37  ;;  %v5577_v4 = vpop.f32.mrf.mxu3 }
 0x423   : > { %899 = vadd.xlane.f32.xlu0 %v4631_v39  ;;  %2619 = vadd.xlane.f32.xlu2 %v5225_v53  ;;  %v2190_v39 = vmul.f32 %v5347_v33, %v2189_v48  ;;  %v1771_v53 = vand.u32 2147483648, %v5178_v42  ;;  %vm1660_vm9 = vweird.f32 %v5243_v0  ;;  %v1664_v8 = vand.u32 2147483647, %v5243_v0 }
 0x424   : > { %7041 = vst [vmem:[#allocation40_spill] sm:$0xff] %v5491_v36  ;;  %vm2193_vm11 = vweird.f32 %v5347_v33  ;;  %v1763_v14 = vmul.f32 %v5392_v21, %v1762_v27  ;;  %vm5519_vm13 = vmor %vm1660_vm9, %vm1661_vm4  ;;  %v2173_v24 = vmul.f32 %v5474_v49, %v5388_v29  ;;  %v1683_v0 = vsel %vm5419_vm12, %v5383_v28, %v1678_v40 }
 0x425   : > { %v2150_v13 = vsel %vm5499_vm6, %v5298_v59, %v5477_v35  ;;  %vm5532_vm15 = vcmp.eq.f32.partialorder %v1724_v63, 8.507059e+37  ;;  %v2191_v9 = vadd.f32 %v5347_v33, %v2190_v39  ;;  %vm1765_vm1 = vweird.f32 %v5178_v42  ;;  %vm5567_vm6 = vmor %vm2192_vm2, %vm2193_vm11 }
 0x426   : > { %v5513_v16 = vpop.eup %3945  ;;  %v1663_v7 = vsel %vm5519_vm13, %v5309_v15, %v1659_v5  ;;  %vm5543_vm12 = vcmp.eq.f32.partialorder %v1769_v32, 8.507059e+37  ;;  %v1772_v2 = vor.u32 1.1754944e-38, %v1771_v53  ;;  %v1611_v59 = vmul.f32 %v5493_v12, %v5170_v62 }
 0x427   : > { %v5511_v37 = vpop.xlane.xlu1 %1495  ;;  %v5541_v36 = vpop.eup %3947  ;;  %v1667_v63 = vor.u32 1.1754944e-38, %v1666_v57  ;;  %v7052_v40 = vsel %vm5398_vm10, %v5204_v50, %v5358_v6  ;;  %v1719_v35 = vadd.f32 %v5372_v18, %v1718_v58  ;;  %vm1665_vm4 = vcmp.eq.f32.partialorder %v1664_v8, 8.507059e+37 }
 0x428   : > { %v1638_v15 = vsel %vm5439_vm14, %v5305_v56, %v7052_v40  ;;  %v1746_v39 = vmul.f32 %v5513_v16, %v5429_v43  ;;  %v5561_v5 = vmul.f32 %v1683_v0, %v4981_v3  ;;  %v1764_v50 = vadd.f32 %v5392_v21, %v1763_v14  ;;  %vm5587_vm14 = vmor %vm1720_vm3, %vm1721_vm7 }
 0x429   : > { %vm1766_vm10 = vweird.f32 %v5392_v21  ;;  %v2174_v56 = vsub.f32 1.0, %v2173_v24  ;;  %v1668_v6 = vsel %vm1665_vm4, %v1667_v63, %v1663_v7  ;;  %v2195_v3 = vsel %vm5567_vm6, %v5347_v33, %v2191_v9  ;;  %v5642_v63 = vpop.xlane.xlu2 %2041 }
 0x42a   : > { %v1621_v11 = vand.u32 2147483648, %v5170_v62  ;;  %v1806_v32 = vmul.f32 %v5541_v36, %v5278_v38  ;;  %3949 = vrcp.f32 %v5330_v61  ;;  %v1612_v7 = vsub.f32 1.0, %v1611_v59  ;;  %vm5603_vm2 = vmor %vm1765_vm1, %vm1766_vm10  ;;  %v5671_v41 = vpop.f32.mrf.mxu3 }
 0x42b   : > { %895 = vadd.xlane.f32.xlu2 %v4619_v10  ;;  %v1619_v33 = vand.u32 2147483647, %v5170_v62  ;;  %v1816_v9 = vand.u32 2147483648, %v5278_v38  ;;  %v5594_v53 = vmul.f32 %v1638_v15, %v4963_v30  ;;  %v1723_v57 = vsel %vm5587_vm14, %v5372_v18, %v1719_v35 }
 0x42c   : > { %v1747_v58 = vsub.f32 1.0, %v1746_v39  ;;  %v1669_v30 = vmul.f32 %v1668_v6, %v4972_v60  ;;  %v2155_v14 = vsel %vm5483_vm5, %v5386_v22, %v2150_v13  ;;  %v1768_v18 = vsel %vm5603_vm2, %v5392_v21, %v1764_v50 }
 0x42d   : > { %vm1615_vm3 = vweird.f32 %v5170_v62  ;;  %v2175_v42 = vmul.f32 %v5474_v49, %v2174_v56  ;;  %v2200_v19 = vsel %vm5505_vm8, %v5461_v45, %v2195_v3  ;;  %v5624_v24 = vor.u32 1.1754944e-38, %v1621_v11 }
 0x42e   : > { %v1807_v60 = vsub.f32 1.0, %v1806_v32  ;;  %v1814_v47 = vand.u32 2147483647, %v5278_v38  ;;  %v3668_v22 = vpack.i.bf16 %v5362_v26, %v5561_v5  ;;  %v1613_v21 = vmul.f32 %v5493_v12, %v1612_v7  ;;  %v5706_v7 = vpop.xlane.xlu0 %2045  ;;  %v7075_v26 = vld [vmem:[#allocation30_spill] sm:$0xff] }
 0x42f   : > { %v5609_v8 = vpop.xlane.xlu1 %2031  ;;  %v5630_v0 = vor.u32 1.1754944e-38, %v1816_v9  ;;  %v5633_v13 = vmul.f32 %v2155_v14, %v5157_v20  ;;  %v1728_v48 = vsel %vm5532_vm15, %v5448_v46, %v1723_v57  ;;  %vm1810_vm5 = vweird.f32 %v5278_v38 }
 0x430   : > { %3951 = vrcp.f32 %v5609_v8  ;;  %v5638_v45 = vpop.eup %3949  ;;  %v1748_v59 = vmul.f32 %v5513_v16, %v1747_v58  ;;  %v3663_v40 = vpack.i.bf16 %v1669_v30, %v5281_v52  ;;  %v1773_v15 = vsel %vm5543_vm12, %v1772_v2, %v1768_v18 }
 0x431   : > { %v5648_v20 = vmul.f32 %v2200_v19, %v5457_v44  ;;  %vm5650_vm7 = vcmp.eq.f32.partialorder %v1619_v33, 8.507059e+37  ;;  %v2176_v46 = vadd.f32 %v5474_v49, %v2175_v42  ;;  %vm2178_vm8 = vweird.f32 %v5474_v49 }
 0x432   : > { %v2183_v27 = vand.u32 2147483648, %v5388_v29  ;;  %3953 = vrcp.f32 %v5607_v25  ;;  %vm1616_vm9 = vweird.f32 %v5493_v12  ;;  %v1808_v52 = vmul.f32 %v5541_v36, %v1807_v60 }
 0x433   : > { %901 = vadd.xlane.f32.xlu2 %v4645_v55  ;;  %vm2177_vm11 = vweird.f32 %v5388_v29  ;;  %v2181_v44 = vand.u32 2147483647, %v5388_v29  ;;  %v1614_v2 = vadd.f32 %v5493_v12, %v1613_v21  ;;  %v1701_v39 = vmul.f32 %v5638_v45, %v5330_v61  ;;  %vm5699_vm12 = vmor %vm1615_vm3, %vm1616_vm9 }
 0x434   : > { %3955 = vrcp.f32 %v5642_v63  ;;  %v1774_v55 = vmul.f32 %v1773_v15, %v5049_v51  ;;  %vm5675_vm13 = vmor %vm2177_vm11, %vm2178_vm8  ;;  %v1749_v29 = vadd.f32 %v5513_v16, %v1748_v59  ;;  %vm1751_vm15 = vweird.f32 %v5513_v16 }
 0x435   : > { %3664 = vrot.lane.b32.xlu1 %v3663_v40, %s4077_s28  ;;  %3957 = vrcp.f32 %v5511_v37  ;;  %v7063_v51 = vpack.i.bf16 %v5251_v31, %v5414_v34  ;;  %vm1811_vm1 = vweird.f32 %v5541_v36  ;;  %v2180_v3 = vsel %vm5675_vm13, %v5474_v49, %v2176_v46 }
 0x436   : > { %v5664_v28 = vpop.eup %3951  ;;  %v2184_v11 = vor.u32 1.1754944e-38, %v2183_v27  ;;  %v1756_v32 = vand.u32 2147483648, %v5429_v43  ;;  %v1809_v31 = vadd.f32 %v5541_v36, %v1808_v52  ;;  %vm1750_vm4 = vweird.f32 %v5429_v43  ;;  %vm5737_vm2 = vmor %vm1810_vm5, %vm1811_vm1  ;;  %v7072_v52 = vld [vmem:[#allocation28_spill] sm:$0xff] }
 0x437   : > { %v2158_v56 = vmul.f32 %v5664_v28, %v5609_v8  ;;  %v5684_v6 = vpop.xlane.xlu1 %2037  ;;  %3654 = vrot.lane.b32.xlu0 %v7063_v51, %s4077_s28  ;;  %v1754_v34 = vand.u32 2147483647, %v5429_v43  ;;  %v1618_v9 = vsel %vm5699_vm12, %v5493_v12, %v1614_v2  ;;  %vm5713_vm6 = vcmp.eq.f32.partialorder %v1814_v47, 8.507059e+37  ;;  %vm5719_vm14 = vmor %vm1750_vm4, %vm1751_vm15  ;;  %v5752_v47 = vpop.f32.mrf.mxu2 }
 0x438   : > { %v5708_v33 = vpop.eup %3953  ;;  %vm2182_vm10 = vcmp.eq.f32.partialorder %v2181_v44, 8.507059e+37  ;;  %v1702_v57 = vsub.f32 1.0, %v1701_v39  ;;  %v5724_v43 = vmul.f32 %v1728_v48, %v5011_v54  ;;  %v1753_v58 = vsel %vm5719_vm14, %v5513_v16, %v1749_v29 }
 0x439   : > { %v2159_v49 = vsub.f32 1.0, %v2158_v56  ;;  %v3683_v30 = vpack.i.bf16 %v5472_v1, %v1774_v55  ;;  %v2185_v14 = vsel %vm2182_vm10, %v2184_v11, %v2180_v3  ;;  %vm1705_vm3 = vweird.f32 %v5330_v61 }
 0x43a   : > { %v5731_v18 = vpop.eup %3955  ;;  %v1709_v54 = vand.u32 2147483647, %v5330_v61  ;;  %v1711_v16 = vand.u32 2147483648, %v5330_v61  ;;  %v1757_v19 = vor.u32 1.1754944e-38, %v1756_v32  ;;  %3959 = vrcp.f32 %v5706_v7  ;;  %v5767_v27 = vpop.f32.mrf.mxu3 }
 0x43b   : > { %v2160_v12 = vmul.f32 %v5664_v28, %v2159_v49  ;;  %v5745_v1 = vpop.eup %3957  ;;  %v1813_v60 = vsel %vm5737_vm2, %v5541_v36, %v1809_v31  ;;  %v2218_v38 = vmul.f32 %v5708_v33, %v5607_v25  ;;  %vm1755_vm5 = vcmp.eq.f32.partialorder %v1754_v34, 8.507059e+37 }
 0x43c   : > { %v1623_v21 = vsel %vm5650_vm7, %v5624_v24, %v1618_v9  ;;  %v1703_v48 = vmul.f32 %v5638_v45, %v1702_v57  ;;  %3961 = vrcp.f32 %v5684_v6  ;;  %v2186_v36 = vmul.f32 %v2185_v14, %v5341_v17 }
 0x43d   : > { %3684 = vrot.lane.b32.xlu1 %v3683_v30, %s4077_s28  ;;  %v1758_v40 = vsel %vm1755_vm5, %v1757_v19, %v1753_v58  ;;  %v2233_v15 = vmul.f32 %v5731_v18, %v5642_v63  ;;  %v2161_v46 = vadd.f32 %v5664_v28, %v2160_v12  ;;  %vm2163_vm8 = vweird.f32 %v5664_v28 }
 0x43e   : > { %v5760_v59 = vpop.xlane.xlu2 %2047  ;;  %v1791_v17 = vmul.f32 %v5745_v1, %v5511_v37  ;;  %v2168_v35 = vand.u32 2147483648, %v5609_v8  ;;  %v1624_v44 = vmul.f32 %v1623_v21, %v7072_v52  ;;  %vm5781_vm7 = vcmp.eq.f32.partialorder %v1709_v54, 8.507059e+37 }
 0x43f   : > { %3963 = vrcp.f32 %v5760_v59  ;;  %v5770_v24 = vpop.xlane.xlu1 %2043  ;;  %3669 = vrot.lane.b32.xlu0 %v3668_v22, %s4077_s28  ;;  %v1712_v39 = vor.u32 1.1754944e-38, %v1711_v16  ;;  %vm2162_vm9 = vweird.f32 %v5609_v8  ;;  %v2166_v55 = vand.u32 2147483647, %v5609_v8  ;;  %v5835_v42 = vpop.f32.mrf.mxu2 }
 0x440   : > { %3965 = vrcp.f32 %v5770_v24  ;;  %v1759_v5 = vmul.f32 %v1758_v40, %v7075_v26  ;;  %v5788_v22 = vpop.eup %3959  ;;  %v1704_v50 = vadd.f32 %v5638_v45, %v1703_v48  ;;  %vm1706_vm11 = vweird.f32 %v5638_v45  ;;  %vm5795_vm13 = vmor %vm2162_vm9, %vm2163_vm8 }
 0x441   : > { %v2219_v29 = vsub.f32 1.0, %v2218_v38  ;;  %v2226_v56 = vand.u32 2147483647, %v5607_v25  ;;  %v2234_v3 = vsub.f32 1.0, %v2233_v15  ;;  %v2165_v8 = vsel %vm5795_vm13, %v5664_v28, %v2161_v46  ;;  %vm5816_vm15 = vmor %vm1705_vm3, %vm1706_vm11  ;;  %v7081_v15 = vld [vmem:[#allocation39_spill] sm:$0xff] }
 0x442   : > { %v3698_v11 = vpack.i.bf16 %v5648_v20, %v2186_v36  ;;  %v5806_v32 = vsel %vm5713_vm6, %v5630_v0, %v1813_v60  ;;  %v5808_v10 = vpop.eup %3961  ;;  %v1792_v31 = vsub.f32 1.0, %v1791_v17  ;;  %v2169_v34 = vor.u32 1.1754944e-38, %v2168_v35  ;;  %v7080_v20 = vld [vmem:[#allocation40_spill] sm:$0xff]  ;;  %v2119_v40 = vpop.f32.mrf.mxu3 }
 0x443   : > { %v3658_v49 = vpack.i.bf16 %v5594_v53, %v1624_v44  ;;  %v2271_v9 = vand.u32 2147483647, %v5706_v7  ;;  %v2263_v0 = vmul.f32 %v5788_v22, %v5706_v7  ;;  %vm2167_vm1 = vcmp.eq.f32.partialorder %v2166_v55, 8.507059e+37 }
 0x444   : > { %v3678_v62 = vpack.i.bf16 %v1759_v5, %v7080_v20  ;;  %v2273_v53 = vand.u32 2147483648, %v5706_v7  ;;  %v1708_v58 = vsel %vm5816_vm15, %v5638_v45, %v1704_v50  ;;  %v5829_v61 = vmul.f32 %v5708_v33, %v2219_v29 }
 0x445   : > { %v5812_v57 = vpop.eup %3963  ;;  %3699 = vrot.lane.b32.xlu1 %v3698_v11, %s4076_s27  ;;  %v2170_v30 = vsel %vm2167_vm1, %v2169_v34, %v2165_v8  ;;  %vm1795_vm12 = vweird.f32 %v5511_v37  ;;  %v1799_v14 = vand.u32 2147483647, %v5511_v37  ;;  %v2235_v54 = vmul.f32 %v5731_v18, %v2234_v3 }
 0x446   : > { %v3966_v23 = vpop.eup %3965  ;;  %v2278_v12 = vmul.f32 %v5812_v57, %v5760_v59  ;;  %v1793_v45 = vmul.f32 %v5745_v1, %v1792_v31  ;;  %v1801_v60 = vand.u32 2147483648, %v5511_v37  ;;  %v2203_v38 = vmul.f32 %v5808_v10, %v5684_v6  ;;  %v7088_v31 = vld [vmem:[#allocation29_spill] sm:$0xff] }
 0x447   : > { %v2248_v16 = vmul.f32 %v3966_v23, %v5770_v24  ;;  %v5839_v19 = vpop.xlane.xlu1 %2049  ;;  %3679 = vrot.lane.b32.xlu0 %v3678_v62, %s4077_s28  ;;  %vm2237_vm4 = vweird.f32 %v5642_v63  ;;  %v2264_v21 = vsub.f32 1.0, %v2263_v0  ;;  %v2241_v48 = vand.u32 2147483647, %v5642_v63 }
 0x448   : > { %v2171_v46 = vmul.f32 %v2170_v30, %v7081_v15  ;;  %vm2238_vm6 = vweird.f32 %v5731_v18  ;;  %v2279_v17 = vsub.f32 1.0, %v2278_v12  ;;  %v2258_v35 = vand.u32 2147483648, %v5770_v24  ;;  %v5897_v20 = vpop.f32.mrf.mxu2 }
 0x449   : > { %v2249_v36 = vsub.f32 1.0, %v2248_v16  ;;  %v1713_v52 = vsel %vm5781_vm7, %v1712_v39, %v1708_v58  ;;  %v2236_v44 = vadd.f32 %v5731_v18, %v2235_v54  ;;  %vm2253_vm10 = vweird.f32 %v3966_v23  ;;  %vm5865_vm5 = vmor %vm2237_vm4, %vm2238_vm6  ;;  %v7091_v54 = vld [vmem:[#allocation32_spill] sm:$0xff] }
 0x44a   : > { %v2256_v26 = vand.u32 2147483647, %v5770_v24  ;;  %vm2267_vm14 = vweird.f32 %v5706_v7  ;;  %v1794_v5 = vadd.f32 %v5745_v1, %v1793_v45  ;;  %vm1796_vm2 = vweird.f32 %v5745_v1  ;;  %v7102_v7 = vld [vmem:[#allocation22_spill] sm:$0xff] }
 0x44b   : > { %v2250_v55 = vmul.f32 %v3966_v23, %v2249_v36  ;;  %v2204_v50 = vsub.f32 1.0, %v2203_v38  ;;  %v2243_v29 = vand.u32 2147483648, %v5642_v63  ;;  %3659 = vrot.lane.b32.xlu2 %v3658_v49, %s4077_s28  ;;  %vm2223_vm3 = vweird.f32 %v5708_v33  ;;  %vm5888_vm13 = vmor %vm1795_vm12, %vm1796_vm2 }
 0x44c   : > { %vm2252_vm8 = vweird.f32 %v5770_v24  ;;  %v3693_v51 = vpack.i.bf16 %v2171_v46, %v5633_v13  ;;  %v2265_v3 = vmul.f32 %v5788_v22, %v2264_v21  ;;  %vm5872_vm7 = vcmp.eq.f32.partialorder %v1799_v14, 8.507059e+37  ;;  %v7115_v46 = vld [vmem:[#allocation20_spill] sm:$0xff] }
 0x44d   : > { %v2251_v39 = vadd.f32 %v3966_v23, %v2250_v55  ;;  %vm5877_vm9 = vmor %vm2252_vm8, %vm2253_vm10  ;;  %v2259_v63 = vor.u32 1.1754944e-38, %v2258_v35  ;;  %v1714_v34 = vmul.f32 %v1713_v52, %v7088_v31  ;;  %v2280_v49 = vmul.f32 %v5812_v57, %v2279_v17  ;;  %v7096_v52 = vld [vmem:[#allocation31_spill] sm:$0xff] }
 0x44e   : > { %vm2222_vm11 = vweird.f32 %v5607_v25  ;;  %v1802_v24 = vor.u32 1.1754944e-38, %v1801_v60  ;;  %v2240_v28 = vsel %vm5865_vm5, %v5731_v18, %v2236_v44  ;;  %vm2257_vm15 = vcmp.eq.f32.partialorder %v2256_v26, 8.507059e+37 }
 0x44f   : > { %v2255_v0 = vsel %vm5877_vm9, %v3966_v23, %v2251_v39  ;;  %v5899_v62 = vpop.xlane.xlu1 %2055  ;;  %3694 = vrot.lane.b32.xlu0 %v3693_v51, %s4076_s27  ;;  %v1798_v37 = vsel %vm5888_vm13, %v5745_v1, %v1794_v5  ;;  %v2205_v58 = vmul.f32 %v5808_v10, %v2204_v50  ;;  %v2244_v12 = vor.u32 1.1754944e-38, %v2243_v29  ;;  %vm5965_vm9 = vmor %vm2222_vm11, %vm2223_vm3  ;;  %v7101_v29 = vld [vmem:[#allocation33_spill] sm:$0xff] }
 0x450   : > { %v2260_v30 = vsel %vm2257_vm15, %v2259_v63, %v2255_v0  ;;  %vm2242_vm1 = vcmp.eq.f32.partialorder %v2241_v48, 8.507059e+37  ;;  %v2122_v14 = vpop.f32.mrf.mxu3  ;;  %v2266_v23 = vadd.f32 %v5788_v22, %v2265_v3  ;;  %vm2268_vm12 = vweird.f32 %v5788_v22  ;;  %v5981_v8 = vpop.f32.mrf.mxu2 }
 0x451   : > { %v2261_v18 = vmul.f32 %v2260_v30, %v2119_v40  ;;  %vm1046_vm4 = vweird.f32 %v7091_v54  ;;  %v2245_v16 = vsel %vm2242_vm1, %v2244_v12, %v2240_v28  ;;  %v3673_v45 = vpack.i.bf16 %v5724_v43, %v1714_v34  ;;  %vm5922_vm2 = vmor %vm2267_vm14, %vm2268_vm12  ;;  %v7108_v12 = vld [vmem:[#allocation35_spill] sm:$0xff] }
 0x452   : > { %v2281_v60 = vadd.f32 %v5812_v57, %v2280_v49  ;;  %vm2283_vm6 = vweird.f32 %v5812_v57  ;;  %v2221_v1 = vadd.f32 %v5708_v33, %v5829_v61  ;;  %v2246_v38 = vmul.f32 %v2245_v16, %v5767_v27  ;;  %v7112_v16 = vld [vmem:[#allocation34_spill] sm:$0xff] }
 0x453   : > { %v2288_v21 = vand.u32 2147483648, %v5760_v59  ;;  %v1803_v48 = vsel %vm5872_vm7, %v1802_v24, %v1798_v37  ;;  %v2206_v36 = vadd.f32 %v5808_v10, %v2205_v58  ;;  %vm2208_vm10 = vweird.f32 %v5808_v10  ;;  %3674 = vrot.lane.b32.xlu2 %v3673_v45, %s4077_s28  ;;  %v7107_v58 = vld [vmem:[#allocation13_spill] sm:$0xff] }
 0x454   : > { %vm2282_vm5 = vweird.f32 %v5760_v59  ;;  %v2286_v27 = vand.u32 2147483647, %v5760_v59  ;;  %vm2207_vm8 = vweird.f32 %v5684_v6  ;;  %v2213_v61 = vand.u32 2147483648, %v5684_v6 }
 0x455   : > { %v3708_v40 = vpack.i.bf16 %v2261_v18, %v2246_v38  ;;  %v2270_v15 = vsel %vm5922_vm2, %v5788_v22, %v2266_v23  ;;  %vm5936_vm14 = vmor %vm2282_vm5, %vm2283_vm6  ;;  %v2211_v17 = vand.u32 2147483647, %v5684_v6  ;;  %3967 = vrcp.f32 %v5839_v19 }
 0x456   : > { %v5942_v59 = vpop.xlane.xlu0 %2051  ;;  %v2285_v35 = vsel %vm5936_vm14, %v5812_v57, %v2281_v60  ;;  %v1804_v44 = vmul.f32 %v1803_v48, %v7096_v52  ;;  %v2228_v22 = vand.u32 2147483648, %v5607_v25  ;;  %vm5951_vm7 = vmor %vm2207_vm8, %vm2208_vm10  ;;  %v2274_v6 = vor.u32 1.1754944e-38, %v2273_v53  ;;  %v5972_v53 = vpop.xlane.xlu2 %2053 }
 0x457   : > { %3969 = vrcp.f32 %v5942_v59  ;;  %v5958_v26 = vpop.xlane.xlu1 %2591  ;;  %3709 = vrot.lane.b32.xlu0 %v3708_v40, %s4076_s27  ;;  %v2289_v57 = vor.u32 1.1754944e-38, %v2288_v21  ;;  %v2210_v50 = vsel %vm5951_vm7, %v5808_v10, %v2206_v36  ;;  %vm2272_vm13 = vcmp.eq.f32.partialorder %v2271_v9, 8.507059e+37  ;;  %v7103_v9 = vld [vmem:[#allocation37_spill] sm:$0xff] }
 0x458   : > { %vm2287_vm15 = vcmp.eq.f32.partialorder %v2286_v27, 8.507059e+37  ;;  %v1819_v2 = vmul.f32 %v5806_v32, %v7101_v29  ;;  %v2225_v39 = vsel %vm5965_vm9, %v5708_v33, %v2221_v1  ;;  %v2214_v51 = vor.u32 1.1754944e-38, %v2213_v61  ;;  %v2124_v11 = vpop.f32.mrf.mxu3  ;;  %v7104_v33 = vld [vmem:[#allocation8_spill] sm:$0xff]  ;;  %v7116_v29 = vld [vmem:[#allocation6_spill] sm:$0xff] }
 0x459   : > { %v2275_v3 = vsel %vm2272_vm13, %v2274_v6, %v2270_v15  ;;  %v2290_v63 = vsel %vm2287_vm15, %v2289_v57, %v2285_v35  ;;  %vm2212_vm3 = vcmp.eq.f32.partialorder %v2211_v17, 8.507059e+37  ;;  %v1146_v49 = vmul.f32 %v7103_v9, %v7102_v7 }
 0x45a   : > { %v2276_v10 = vmul.f32 %v2275_v3, %v2122_v14  ;;  %v2291_v31 = vmul.f32 %v2290_v63, %v2124_v11  ;;  %v3688_v34 = vpack.i.bf16 %v1819_v2, %v1804_v44  ;;  %v2229_v13 = vor.u32 1.1754944e-38, %v2228_v22  ;;  %v7109_v14 = vld [vmem:[#allocation38_spill] sm:$0xff]  ;;  %v7117_v2 = vld [vmem:[#allocation9_spill] sm:$0xff] }
 0x45b   : > { %3971 = vrcp.f32 %v5972_v53  ;;  %v2215_v32 = vsel %vm2212_vm3, %v2214_v51, %v2210_v50  ;;  %v5986_v24 = vpop.eup %3967  ;;  %vm1045_vm11 = vweird.f32 %v7104_v33  ;;  %vm2227_vm1 = vcmp.eq.f32.partialorder %v2226_v56, 8.507059e+37  ;;  %v7110_v56 = vld [vmem:[#allocation36_spill] sm:$0xff] }
 0x45c   : > { %v3713_v28 = vpack.i.bf16 %v2291_v31, %v2276_v10  ;;  %3689 = vrot.lane.b32.xlu2 %v3688_v34, %s4077_s28  ;;  %vm5996_vm12 = vmor %vm1045_vm11, %vm1046_vm4  ;;  %v1086_v30 = vmul.f32 %v7108_v12, %v7107_v58  ;;  %3973 = vrcp.f32 %v5958_v26  ;;  %v2230_v18 = vsel %vm2227_vm1, %v2229_v13, %v2225_v39 }
 0x45d   : > { %v5992_v0 = vpop.eup %3969  ;;  %v1048_v25 = vsel %vm5996_vm12, %v7091_v54, %v7109_v14  ;;  %v7111_v23 = vsub.f32 1.0, %v7110_v56  ;;  %v2216_v1 = vmul.f32 %v2215_v32, %v5577_v4  ;;  %v7113_v38 = vand.u32 2147483647, %v7104_v33 }
 0x45e   : > { %3714 = vrot.lane.b32.xlu1 %v3713_v28, %s4076_s27  ;;  %v6011_v60 = vpop.xlane.xlu0 %2057  ;;  %v7114_v21 = vand.u32 2147483648, %v7104_v33  ;;  %v1147_v36 = vsub.f32 1.0, %v1146_v49  ;;  %v2293_v54 = vmul.f32 %v5986_v24, %v5839_v19  ;;  %3975 = vrcp.f32 %v5899_v62 }
 0x45f   : > { %v1133_v45 = vmul.f32 %v7112_v16, %v7111_v23  ;;  %vm1050_vm4 = vcmp.eq.f32.partialorder %v7113_v38, 8.507059e+37  ;;  %v6018_v43 = vpop.xlane.xlu1 %2597  ;;  %v2308_v27 = vmul.f32 %v5992_v0, %v5942_v59  ;;  %v2231_v61 = vmul.f32 %v2230_v18, %v5671_v41 }
 0x460   : > { %v1052_v48 = vor.u32 1.1754944e-38, %v7114_v21  ;;  %v1087_v15 = vsub.f32 1.0, %v1086_v30  ;;  %v1139_v17 = vand.u32 2147483647, %v7115_v46  ;;  %vm1136_vm6 = vweird.f32 %v7112_v16 }
 0x461   : > { %v6026_v4 = vpop.eup %3971  ;;  %v6029_v35 = vpop.f32.mrf.mxu2  ;;  %v1134_v52 = vadd.f32 %v7112_v16, %v1133_v45  ;;  %v1141_v44 = vand.u32 2147483648, %v7115_v46  ;;  %v3703_v22 = vpack.i.bf16 %v2231_v61, %v2216_v1  ;;  %vm1135_vm10 = vweird.f32 %v7115_v46 }
 0x462   : > { %v1053_v40 = vsel %vm1050_vm4, %v1052_v48, %v1048_v25  ;;  %v6034_v55 = vpop.eup %3973  ;;  %v1156_v41 = vand.u32 2147483648, %v7102_v7  ;;  %v1148_v6 = vmul.f32 %v7103_v9, %v1147_v36  ;;  %v2323_v57 = vmul.f32 %v6026_v4, %v5972_v53  ;;  %vm6049_vm2 = vmor %vm1135_vm10, %vm1136_vm6 }
 0x463   : > { %v2294_v5 = vsub.f32 1.0, %v2293_v54  ;;  %v2309_v50 = vsub.f32 1.0, %v2308_v27  ;;  %3977 = vrcp.f32 %v7116_v29  ;;  %v6044_v39 = vmul.f32 %v1053_v40, %v7117_v2 }
 0x464   : > { %3704 = vrot.lane.b32.xlu2 %v3703_v22, %s4076_s27  ;;  %v6047_v51 = vmul.f32 %v7108_v12, %v1087_v15  ;;  %vm6053_vm5 = vcmp.eq.f32.partialorder %v1139_v17, 8.507059e+37  ;;  %v6057_v63 = vpop.eup %3975  ;;  %v1142_v10 = vor.u32 1.1754944e-38, %v1141_v44  ;;  %v1154_v31 = vand.u32 2147483647, %v7102_v7 }
 0x465   : > { %v2705_v34 = vmul.f32 %v6034_v55, %v5958_v26  ;;  %v1138_v13 = vsel %vm6049_vm2, %v7112_v16, %v1134_v52  ;;  %v6067_v32 = vor.u32 1.1754944e-38, %v1156_v41  ;;  %v2301_v28 = vand.u32 2147483647, %v5839_v19 }
 0x466   : > { %v6062_v49 = vpop.xlane.xlu0 %2593  ;;  %v2303_v37 = vand.u32 2147483648, %v5839_v19  ;;  %v6075_v30 = vadd.f32 %v7103_v9, %v1148_v6  ;;  %v2324_v18 = vsub.f32 1.0, %v2323_v57  ;;  %v2295_v14 = vmul.f32 %v5986_v24, %v2294_v5 }
 0x467   : > { %3979 = vrcp.f32 %v6062_v49  ;;  %v6070_v33 = vpop.xlane.xlu1 %2603  ;;  %v2310_v25 = vmul.f32 %v5992_v0, %v2309_v50  ;;  %v2338_v56 = vmul.f32 %v6057_v63, %v5899_v62  ;;  %v2333_v23 = vand.u32 2147483648, %v5972_v53 }
 0x468   : > { %3981 = vrcp.f32 %v6070_v33  ;;  %v6085_v16 = vsel %vm6053_vm5, %v1142_v10, %v1138_v13  ;;  %v2706_v45 = vsub.f32 1.0, %v2705_v34  ;;  %vm2297_vm8 = vweird.f32 %v5839_v19  ;;  %v2127_v48 = vpop.f32.mrf.mxu3 }
 0x469   : > { %3983 = vrcp.f32 %v6018_v43  ;;  %v6089_v1 = vpop.f32.mrf.mxu2  ;;  %v2331_v38 = vand.u32 2147483647, %v5972_v53  ;;  %v6092_v21 = vpop.eup %3977  ;;  %vm2298_vm14 = vweird.f32 %v5986_v24  ;;  %vm6095_vm7 = vcmp.eq.f32.partialorder %v2301_v28, 8.507059e+37 }
 0x46a   : > { %v2304_v54 = vor.u32 1.1754944e-38, %v2303_v37  ;;  %vm2327_vm9 = vweird.f32 %v5972_v53  ;;  %v2348_v27 = vand.u32 2147483648, %v5899_v62  ;;  %v2296_v61 = vadd.f32 %v5986_v24, %v2295_v14  ;;  %vm6118_vm15 = vmor %vm2297_vm8, %vm2298_vm14 }
 0x46b   : > { %v2311_v40 = vadd.f32 %v5992_v0, %v2310_v25  ;;  %vm2313_vm13 = vweird.f32 %v5992_v0  ;;  %v2325_v15 = vmul.f32 %v6026_v4, %v2324_v18  ;;  %v2339_v17 = vsub.f32 1.0, %v2338_v56 }
 0x46c   : > { %v2316_v52 = vand.u32 2147483647, %v5942_v59  ;;  %v2318_v44 = vand.u32 2147483648, %v5942_v59  ;;  %v6109_v22 = vor.u32 1.1754944e-38, %v2333_v23  ;;  %v2707_v41 = vmul.f32 %v6034_v55, %v2706_v45 }
 0x46d   : > { %v6105_v46 = vpop.eup %3979  ;;  %vm2312_vm3 = vweird.f32 %v5942_v59  ;;  %vm2328_vm11 = vweird.f32 %v6026_v4  ;;  %3985 = vrcp.f32 %v6011_v60  ;;  %vm2342_vm12 = vweird.f32 %v5899_v62 }
 0x46e   : > { %v2720_v6 = vmul.f32 %v6105_v46, %v6062_v49  ;;  %v6122_v5 = vpop.xlane.xlu0 %2599  ;;  %v6126_v50 = vpop.eup %3981  ;;  %vm6133_vm1 = vmor %vm2312_vm3, %vm2313_vm13  ;;  %v2346_v3 = vand.u32 2147483647, %v5899_v62  ;;  %v6139_v11 = vor.u32 1.1754944e-38, %v2348_v27  ;;  %v2300_v34 = vsel %vm6118_vm15, %v5986_v24, %v2296_v61 }
 0x46f   : > { %v6129_v2 = vpop.xlane.xlu2 %2059  ;;  %v6141_v59 = vpop.eup %3983  ;;  %v2315_v13 = vsel %vm6133_vm1, %v5992_v0, %v2311_v40  ;;  %v2326_v28 = vadd.f32 %v6026_v4, %v2325_v15  ;;  %vm6150_vm4 = vcmp.eq.f32.partialorder %v2331_v38, 8.507059e+37  ;;  %vm2709_vm6 = vweird.f32 %v5958_v26  ;;  %vm6177_vm8 = vmor %vm2327_vm9, %vm2328_vm11 }
 0x470   : > { %v2721_v10 = vsub.f32 1.0, %v2720_v6  ;;  %vm2317_vm10 = vcmp.eq.f32.partialorder %v2316_v52, 8.507059e+37  ;;  %v2319_v18 = vor.u32 1.1754944e-38, %v2318_v44  ;;  %v2340_v14 = vmul.f32 %v6057_v63, %v2339_v17  ;;  %v2129_v38 = vpop.f32.mrf.mxu3 }
 0x471   : > { %v2708_v25 = vadd.f32 %v6034_v55, %v2707_v41  ;;  %vm2710_vm2 = vweird.f32 %v6034_v55  ;;  %v2795_v0 = vmul.f32 %v6126_v50, %v6070_v33  ;;  %v2713_v56 = vand.u32 2147483647, %v5958_v26  ;;  %v6171_v52 = vpop.f32.mrf.mxu2 }
 0x472   : > { %v2722_v24 = vmul.f32 %v6105_v46, %v2721_v10  ;;  %v2750_v23 = vmul.f32 %v6141_v59, %v6018_v43  ;;  %v2305_v45 = vsel %vm6095_vm7, %v2304_v54, %v2300_v34  ;;  %v2320_v27 = vsel %vm2317_vm10, %v2319_v18, %v2315_v13  ;;  %vm6188_vm7 = vmor %vm2709_vm6, %vm2710_vm2  ;;  %v6225_v18 = vpop.xlane.xlu1 %2609 }
 0x473   : > { %vm6166_vm5 = vcmp.eq.f32.partialorder %v2346_v3, 8.507059e+37  ;;  %v2715_v40 = vand.u32 2147483648, %v5958_v26  ;;  %v2306_v15 = vmul.f32 %v2305_v45, %v2127_v48  ;;  %v2321_v17 = vmul.f32 %v2320_v27, %v2129_v38  ;;  %v6182_v36 = vpop.eup %3985 }
 0x474   : > { %vm2343_vm14 = vweird.f32 %v6057_v63  ;;  %v2723_v54 = vadd.f32 %v6105_v46, %v2722_v24  ;;  %vm2725_vm13 = vweird.f32 %v6105_v46  ;;  %v2330_v53 = vsel %vm6177_vm8, %v6026_v4, %v2326_v28 }
 0x475   : > { %v2341_v41 = vadd.f32 %v6057_v63, %v2340_v14  ;;  %v2712_v6 = vsel %vm6188_vm7, %v6034_v55, %v2708_v25  ;;  %v2730_v26 = vand.u32 2147483648, %v6062_v49  ;;  %v2796_v57 = vsub.f32 1.0, %v2795_v0  ;;  %vm6213_vm15 = vmor %vm2342_vm12, %vm2343_vm14 }
 0x476   : > { %v3718_v19 = vpack.i.bf16 %v2321_v17, %v2306_v15  ;;  %v6202_v3 = vpop.xlane.xlu0 %2605  ;;  %v2751_v10 = vsub.f32 1.0, %v2750_v23  ;;  %vm2724_vm9 = vweird.f32 %v6062_v49  ;;  %v2728_v34 = vand.u32 2147483647, %v6062_v49 }
 0x477   : > { %v6206_v13 = vpop.xlane.xlu2 %2595  ;;  %3987 = vrcp.f32 %v6202_v3  ;;  %vm2714_vm3 = vcmp.eq.f32.partialorder %v2713_v56, 8.507059e+37  ;;  %v2716_v55 = vor.u32 1.1754944e-38, %v2715_v40  ;;  %v2353_v28 = vmul.f32 %v6182_v36, %v6011_v60  ;;  %vm6221_vm11 = vmor %vm2724_vm9, %vm2725_vm13 }
 0x478   : > { %3719 = vrot.lane.b32.xlu2 %v3718_v19, %s4076_s27  ;;  %3989 = vrcp.f32 %v6206_v13  ;;  %vm2754_vm1 = vweird.f32 %v6018_v43  ;;  %v2727_v62 = vsel %vm6221_vm11, %v6105_v46, %v2723_v54  ;;  %v2335_v14 = vsel %vm6150_vm4, %v6109_v22, %v2330_v53  ;;  %v2132_v46 = vpop.f32.mrf.mxu3 }
 0x479   : > { %v2345_v25 = vsel %vm6213_vm15, %v6057_v63, %v2341_v41  ;;  %v2758_v24 = vand.u32 2147483647, %v6018_v43  ;;  %v2731_v0 = vor.u32 1.1754944e-38, %v2730_v26  ;;  %v2797_v56 = vmul.f32 %v6126_v50, %v2796_v57  ;;  %v6244_v22 = vpop.f32.mrf.mxu2 }
 0x47a   : > { %v2717_v23 = vsel %vm2714_vm3, %v2716_v55, %v2712_v6  ;;  %v2752_v45 = vmul.f32 %v6141_v59, %v2751_v10  ;;  %v2760_v38 = vand.u32 2147483648, %v6018_v43  ;;  %vm2729_vm12 = vcmp.eq.f32.partialorder %v2728_v34, 8.507059e+37 }
 0x47b   : > { %3991 = vrcp.f32 %v6225_v18  ;;  %v2354_v37 = vsub.f32 1.0, %v2353_v28  ;;  %v2732_v27 = vsel %vm2729_vm12, %v2731_v0, %v2727_v62  ;;  %v2350_v63 = vsel %vm6166_vm5, %v6139_v11, %v2345_v25 }
 0x47c   : > { %v2363_v40 = vand.u32 2147483648, %v6011_v60  ;;  %v2803_v17 = vand.u32 2147483647, %v6070_v33  ;;  %v2805_v44 = vand.u32 2147483648, %v6070_v33  ;;  %v2718_v48 = vmul.f32 %v2717_v23, %v5752_v47 }
 0x47d   : > { %v3988_v15 = vpop.eup %3987  ;;  %v2733_v54 = vmul.f32 %v2732_v27, %v5835_v42  ;;  %3993 = vrcp.f32 %v6122_v5  ;;  %v2798_v41 = vadd.f32 %v6126_v50, %v2797_v56  ;;  %vm2800_vm4 = vweird.f32 %v6126_v50 }
 0x47e   : > { %v6254_v53 = vpop.eup %3989  ;;  %v2810_v11 = vmul.f32 %v3988_v15, %v6202_v3  ;;  %v6261_v61 = vadd.f32 %v6141_v59, %v2752_v45  ;;  %vm2755_vm6 = vweird.f32 %v6141_v59  ;;  %vm2799_vm10 = vweird.f32 %v6070_v33  ;;  %v6283_v33 = vpop.xlane.xlu0 %2611 }
 0x47f   : > { %v2735_v47 = vmul.f32 %v6254_v53, %v6206_v13  ;;  %v3723_v6 = vpack.i.bf16 %v2733_v54, %v2718_v48  ;;  %v6266_v42 = vpop.xlane.xlu2 %2601  ;;  %v2355_v57 = vmul.f32 %v6182_v36, %v2354_v37  ;;  %vm6273_vm2 = vmor %vm2799_vm10, %vm2800_vm4  ;;  %vm6277_vm5 = vcmp.eq.f32.partialorder %v2803_v17, 8.507059e+37 }
 0x480   : > { %v2811_v26 = vsub.f32 1.0, %v2810_v11  ;;  %3995 = vrcp.f32 %v6266_v42  ;;  %v2806_v4 = vor.u32 1.1754944e-38, %v2805_v44  ;;  %v2820_v28 = vand.u32 2147483648, %v6202_v3  ;;  %vm6289_vm8 = vmor %vm2754_vm1, %vm2755_vm6  ;;  %v2134_v45 = vpop.f32.mrf.mxu3 }
 0x481   : > { %v6271_v19 = vpop.eup %3991  ;;  %v2736_v55 = vsub.f32 1.0, %v2735_v47  ;;  %3724 = vrot.lane.b32.xlu2 %v3723_v6, %s4075_s26  ;;  %vm6293_vm14 = vcmp.eq.f32.partialorder %v2758_v24, 8.507059e+37  ;;  %v2802_v25 = vsel %vm6273_vm2, %v6126_v50, %v2798_v41  ;;  %vm2815_vm7 = vweird.f32 %v3988_v15 }
 0x482   : > { %v2812_v0 = vmul.f32 %v3988_v15, %v2811_v26  ;;  %v2818_v56 = vand.u32 2147483647, %v6202_v3  ;;  %v2757_v23 = vsel %vm6289_vm8, %v6141_v59, %v6261_v61  ;;  %3997 = vrcp.f32 %v6129_v2 }
 0x483   : > { %v2737_v24 = vmul.f32 %v6254_v53, %v2736_v55  ;;  %vm2814_vm13 = vweird.f32 %v6202_v3  ;;  %v6308_v37 = vpop.eup %3993  ;;  %v2840_v50 = vmul.f32 %v6271_v19, %v6225_v18  ;;  %v2336_v27 = vmul.f32 %v2335_v14, %v2132_v46  ;;  %v6320_v14 = vpop.f32.mrf.mxu2 }
 0x484   : > { %v2813_v17 = vadd.f32 %v3988_v15, %v2812_v0  ;;  %v2351_v44 = vmul.f32 %v2350_v63, %v2134_v45  ;;  %v2807_v48 = vsel %vm6277_vm5, %v2806_v4, %v2802_v25  ;;  %vm2740_vm9 = vweird.f32 %v6254_v53  ;;  %vm2816_vm15 = vmor %vm2814_vm13, %vm2815_vm7  ;;  %v6345_v55 = vpop.xlane.xlu1 %2615 }
 0x485   : > { %v2738_v59 = vadd.f32 %v6254_v53, %v2737_v24  ;;  %v2821_v54 = vor.u32 1.1754944e-38, %v2820_v28  ;;  %v2745_v41 = vand.u32 2147483648, %v6206_v13  ;;  %vm2819_vm3 = vcmp.eq.f32.partialorder %v2818_v56, 8.507059e+37 }
 0x486   : > { %v6317_v3 = vpop.eup %3995  ;;  %v2817_v11 = vsel %vm2816_vm15, %v3988_v15, %v2813_v17  ;;  %v3728_v61 = vpack.i.bf16 %v2351_v44, %v2336_v27  ;;  %v2765_v46 = vmul.f32 %v6308_v37, %v6122_v5  ;;  %vm2739_vm11 = vweird.f32 %v6206_v13  ;;  %v6355_v0 = vpop.xlane.xlu0 %2617 }
 0x487   : > { %v2743_v63 = vand.u32 2147483647, %v6206_v13  ;;  %v2822_v47 = vsel %vm2819_vm3, %v2821_v54, %v2817_v11  ;;  %v6326_v6 = vpop.xlane.xlu2 %2607  ;;  %v2841_v26 = vsub.f32 1.0, %v2840_v50  ;;  %v2808_v10 = vmul.f32 %v2807_v48, %v6171_v52  ;;  %vm6331_vm1 = vmor %vm2739_vm11, %vm2740_vm9 }
 0x488   : > { %v2823_v34 = vmul.f32 %v2822_v47, %v6244_v22  ;;  %3729 = vrot.lane.b32.xlu0 %v3728_v61, %s4076_s27  ;;  %3999 = vrcp.f32 %v6326_v6  ;;  %v6338_v4 = vpop.eup %3997  ;;  %v2761_v13 = vor.u32 1.1754944e-38, %v2760_v38  ;;  %v2742_v52 = vsel %vm6331_vm1, %v6254_v53, %v2738_v59 }
 0x489   : > { %v2780_v28 = vmul.f32 %v6317_v3, %v6266_v42  ;;  %vm2358_vm12 = vweird.f32 %v6182_v36  ;;  %v2746_v22 = vor.u32 1.1754944e-38, %v2745_v41  ;;  %4001 = vrcp.f32 %v6283_v33 }
 0x48a   : > { %v3743_v49 = vpack.i.bf16 %v2823_v34, %v2808_v10  ;;  %v6352_v25 = vadd.f32 %v6182_v36, %v2355_v57  ;;  %v2766_v43 = vsub.f32 1.0, %v2765_v46  ;;  %v2775_v38 = vand.u32 2147483648, %v6122_v5 }
 0x48b   : > { %vm2744_vm4 = vcmp.eq.f32.partialorder %v2743_v63, 8.507059e+37  ;;  %v2762_v53 = vsel %vm6293_vm14, %v2761_v13, %v2757_v23  ;;  %vm2357_vm6 = vweird.f32 %v6011_v60  ;;  %v2361_v56 = vand.u32 2147483647, %v6011_v60  ;;  %v2686_v47 = vpop.f32.mrf.mxu2 }
 0x48c   : > { %v2842_v24 = vmul.f32 %v6271_v19, %v2841_v26  ;;  %3744 = vrot.lane.b32.xlu2 %v3743_v49, %s4075_s26  ;;  %v2747_v45 = vsel %vm2744_vm4, %v2746_v22, %v2742_v52  ;;  %v2773_v57 = vand.u32 2147483647, %v6122_v5  ;;  %v2781_v50 = vsub.f32 1.0, %v2780_v28  ;;  %vm6374_vm2 = vmor %vm2357_vm6, %vm2358_vm12  ;;  %v6412_v49 = vpop.xlane.xlu1 %2621 }
 0x48d   : > { %v6366_v27 = vor.u32 1.1754944e-38, %v2363_v40  ;;  %v2848_v17 = vand.u32 2147483647, %v6225_v18  ;;  %v2368_v23 = vmul.f32 %v6338_v4, %v6129_v2  ;;  %vm2769_vm10 = vweird.f32 %v6122_v5 }
 0x48e   : > { %v4000_v62 = vpop.eup %3999  ;;  %v2850_v48 = vand.u32 2147483648, %v6225_v18  ;;  %v2748_v59 = vmul.f32 %v2747_v45, %v5897_v20  ;;  %v2763_v40 = vmul.f32 %v2762_v53, %v5981_v8  ;;  %v2767_v54 = vmul.f32 %v6308_v37, %v2766_v43 }
 0x48f   : > { %v6382_v41 = vor.u32 1.1754944e-38, %v2775_v38  ;;  %v2825_v11 = vmul.f32 %v4000_v62, %v6326_v6  ;;  %v2360_v61 = vsel %vm6374_vm2, %v6182_v36, %v6352_v25  ;;  %v6389_v46 = vpop.xlane.xlu2 %2613  ;;  %v6391_v63 = vpop.eup %4001  ;;  %v2843_v20 = vadd.f32 %v6271_v19, %v2842_v24 }
 0x490   : > { %vm2845_vm5 = vweird.f32 %v6271_v19  ;;  %v3733_v8 = vpack.i.bf16 %v2763_v40, %v2748_v59  ;;  %4003 = vrcp.f32 %v6389_v46  ;;  %v2782_v26 = vmul.f32 %v6317_v3, %v2781_v50  ;;  %v6414_v38 = vpop.f32.mrf.mxu3 }
 0x491   : > { %v2826_v10 = vsub.f32 1.0, %v2825_v11  ;;  %vm2844_vm8 = vweird.f32 %v6225_v18  ;;  %vm6398_vm14 = vcmp.eq.f32.partialorder %v2848_v17, 8.507059e+37  ;;  %vm1151_vm7 = vweird.f32 %v7103_v9  ;;  %v6435_v17 = vpop.xlane.xlu0 %893 }
 0x492   : > { %v2369_v34 = vsub.f32 1.0, %v2368_v23  ;;  %vm2770_vm13 = vweird.f32 %v6308_v37  ;;  %v2835_v13 = vand.u32 2147483648, %v6326_v6  ;;  %v2851_v52 = vor.u32 1.1754944e-38, %v2850_v48  ;;  %3734 = vrot.lane.b32.xlu0 %v3733_v8, %s4075_s26  ;;  %vm6421_vm3 = vmor %vm2844_vm8, %vm2845_vm5 }
 0x493   : > { %vm6406_vm9 = vcmp.eq.f32.partialorder %v2773_v57, 8.507059e+37  ;;  %v2855_v22 = vmul.f32 %v6391_v63, %v6283_v33  ;;  %v2827_v43 = vmul.f32 %v4000_v62, %v2826_v10  ;;  %vm2830_vm15 = vweird.f32 %v4000_v62  ;;  %vm6447_vm5 = vmor %vm2769_vm10, %vm2770_vm13 }
 0x494   : > { %v2833_v53 = vand.u32 2147483647, %v6326_v6  ;;  %vm1150_vm11 = vweird.f32 %v7102_v7  ;;  %v2768_v45 = vadd.f32 %v6308_v37, %v2767_v54  ;;  %4005 = vrcp.f32 %v6345_v55 }
 0x495   : > { %vm2784_vm1 = vweird.f32 %v6266_v42  ;;  %v2847_v57 = vsel %vm6421_vm3, %v6271_v19, %v2843_v20  ;;  %v2783_v50 = vadd.f32 %v6317_v3, %v2782_v26  ;;  %vm2785_vm12 = vweird.f32 %v6317_v3  ;;  %vm6493_vm13 = vmor %vm1150_vm11, %vm1151_vm7 }
 0x496   : > { %vm2829_vm4 = vweird.f32 %v6326_v6  ;;  %v2828_v18 = vadd.f32 %v4000_v62, %v2827_v43  ;;  %v6437_v23 = vpop.eup %4003  ;;  %v2788_v48 = vand.u32 2147483647, %v6266_v42  ;;  %v2790_v59 = vand.u32 2147483648, %v6266_v42  ;;  %v6478_v43 = vpop.f32.mrf.mxu2 }
 0x497   : > { %4007 = vrcp.f32 %v6412_v49  ;;  %vm2831_vm6 = vmor %vm2829_vm4, %vm2830_vm15  ;;  %v2836_v19 = vor.u32 1.1754944e-38, %v2835_v13  ;;  %v2856_v40 = vsub.f32 1.0, %v2855_v22  ;;  %vm2834_vm8 = vcmp.eq.f32.partialorder %v2833_v53, 8.507059e+37  ;;  %v6452_v20 = vpop.xlane.xlu2 %2619 }
 0x498   : > { %v2832_v54 = vsel %vm2831_vm6, %v4000_v62, %v2828_v18  ;;  %v2370_v11 = vmul.f32 %v6338_v4, %v2369_v34  ;;  %vm6458_vm15 = vmor %vm2784_vm1, %vm2785_vm12  ;;  %v2852_v26 = vsel %vm6398_vm14, %v2851_v52, %v2847_v57  ;;  %v2870_v62 = vmul.f32 %v6437_v23, %v6389_v46  ;;  %v2139_v18 = vpop.f32.mrf.mxu3 }
 0x499   : > { %v2837_v5 = vsel %vm2834_vm8, %v2836_v19, %v2832_v54  ;;  %4009 = vrcp.f32 %v6435_v17  ;;  %v2772_v10 = vsel %vm6447_vm5, %v6308_v37, %v2768_v45  ;;  %v2787_v42 = vsel %vm6458_vm15, %v6317_v3, %v2783_v50 }
 0x49a   : > { %v2838_v34 = vmul.f32 %v2837_v5, %v6320_v14  ;;  %v2853_v13 = vmul.f32 %v2852_v26, %v2686_v47  ;;  %v6474_v22 = vpop.eup %4005  ;;  %vm2789_vm10 = vcmp.eq.f32.partialorder %v2788_v48, 8.507059e+37  ;;  %v2791_v15 = vor.u32 1.1754944e-38, %v2790_v59 }
 0x49b   : > { %vm2373_vm14 = vweird.f32 %v6338_v4  ;;  %v2376_v52 = vand.u32 2147483647, %v6129_v2  ;;  %v2371_v37 = vadd.f32 %v6338_v4, %v2370_v11  ;;  %v2378_v24 = vand.u32 2147483648, %v6129_v2 }
 0x49c   : > { %v3748_v53 = vpack.i.bf16 %v2853_v13, %v2838_v34  ;;  %v2857_v3 = vmul.f32 %v6391_v63, %v2856_v40  ;;  %v2871_v14 = vsub.f32 1.0, %v2870_v62  ;;  %v2777_v47 = vsel %vm6406_vm9, %v6382_v41, %v2772_v10 }
 0x49d   : > { %v6483_v45 = vpop.eup %4007  ;;  %v2792_v57 = vsel %vm2789_vm10, %v2791_v15, %v2787_v42  ;;  %4011 = vrcp.f32 %v6452_v20  ;;  %vm2362_vm3 = vcmp.eq.f32.partialorder %v2361_v56, 8.507059e+37  ;;  %vm2372_vm1 = vweird.f32 %v6129_v2 }
 0x49e   : > { %v2778_v28 = vmul.f32 %v2777_v47, %v6029_v35  ;;  %v2793_v41 = vmul.f32 %v2792_v57, %v6089_v1  ;;  %3749 = vrot.lane.b32.xlu0 %v3748_v53, %s4075_s26  ;;  %vm6507_vm7 = vcmp.eq.f32.partialorder %v1154_v31, 8.507059e+37  ;;  %v6513_v60 = vmul.f32 %v6474_v22, %v6345_v55  ;;  %vm6523_vm9 = vmor %vm2372_vm1, %vm2373_vm14 }
 0x49f   : > { %v6503_v48 = vpop.eup %4009  ;;  %v2365_v35 = vsel %vm2362_vm3, %v6366_v27, %v2360_v61  ;;  %vm6527_vm11 = vcmp.eq.f32.partialorder %v2376_v52, 8.507059e+37  ;;  %v1153_v31 = vsel %vm6493_vm13, %v7103_v9, %v6075_v30  ;;  %v2930_v2 = vmul.f32 %v6483_v45, %v6412_v49  ;;  %v6541_v56 = vpop.xlane.xlu2 %895 }
 0x4a0   : > { %4013 = vrcp.f32 %v6355_v0  ;;  %v2375_v36 = vsel %vm6523_vm9, %v6338_v4, %v2371_v37  ;;  %v3738_v25 = vpack.i.bf16 %v2793_v41, %v2778_v28  ;;  %v2379_v27 = vor.u32 1.1754944e-38, %v2378_v24  ;;  %v6550_v30 = vpop.xlane.xlu0 %899  ;;  %v7172_v24 = vld [vmem:[#allocation17_spill] sm:$0xff] }
 0x4a1   : > { %v2858_v44 = vadd.f32 %v6391_v63, %v2857_v3  ;;  %v2872_v61 = vmul.f32 %v6437_v23, %v2871_v14  ;;  %vm2875_vm2 = vweird.f32 %v6437_v23  ;;  %v1161_v9 = vmul.f32 %v6503_v48, %v6435_v17  ;;  %v2699_v14 = vpop.f32.mrf.mxu3 }
 0x4a2   : > { %vm2860_vm12 = vweird.f32 %v6391_v63  ;;  %3739 = vrot.lane.b32.xlu1 %v3738_v25, %s4075_s26  ;;  %v2878_v4 = vand.u32 2147483647, %v6389_v46  ;;  %v2880_v19 = vand.u32 2147483648, %v6389_v46  ;;  %v2380_v40 = vsel %vm6527_vm11, %v2379_v27, %v2375_v36 }
 0x4a3   : > { %v6554_v6 = vpop.eup %4011  ;;  %v2865_v54 = vand.u32 2147483648, %v6283_v33  ;;  %v2873_v11 = vadd.f32 %v6437_v23, %v2872_v61  ;;  %vm2874_vm4 = vweird.f32 %v6389_v46  ;;  %v2381_v8 = vmul.f32 %v2380_v40, %v2139_v18  ;;  %v2691_v46 = vpop.f32.mrf.mxu2 }
 0x4a4   : > { %vm2859_vm6 = vweird.f32 %v6283_v33  ;;  %v2863_v5 = vand.u32 2147483647, %v6283_v33  ;;  %v2915_v26 = vmul.f32 %v6554_v6, %v6452_v20  ;;  %vm2876_vm5 = vmor %vm2874_vm4, %vm2875_vm2  ;;  %v2366_v62 = vmul.f32 %v2365_v35, %v6414_v38 }
 0x4a5   : > { %vm6570_vm8 = vmor %vm2859_vm6, %vm2860_vm12  ;;  %v2877_v42 = vsel %vm2876_vm5, %v6437_v23, %v2873_v11  ;;  %v2881_v34 = vor.u32 1.1754944e-38, %v2880_v19  ;;  %4015 = vrcp.f32 %v6541_v56  ;;  %v1162_v13 = vsub.f32 1.0, %v1161_v9 }
 0x4a6   : > { %v6576_v33 = vpop.eup %4013  ;;  %v2862_v15 = vsel %vm6570_vm8, %v6391_v63, %v2858_v44  ;;  %v2916_v38 = vsub.f32 1.0, %v2915_v26  ;;  %vm2879_vm15 = vcmp.eq.f32.partialorder %v2878_v4, 8.507059e+37  ;;  %v2931_v52 = vsub.f32 1.0, %v2930_v2 }
 0x4a7   : > { %v2866_v53 = vor.u32 1.1754944e-38, %v2865_v54  ;;  %v2882_v37 = vsel %vm2879_vm15, %v2881_v34, %v2877_v42  ;;  %v6583_v3 = vmul.f32 %v6085_v16, %v7172_v24  ;;  %v3753_v23 = vpack.i.bf16 %v2381_v8, %v2366_v62  ;;  %v6586_v57 = vpop.xlane.xlu2 %901 }
 0x4a8   : > { %vm2864_vm10 = vcmp.eq.f32.partialorder %v2863_v5, 8.507059e+37  ;;  %v2917_v47 = vmul.f32 %v6554_v6, %v2916_v38  ;;  %v1158_v63 = vsel %vm6507_vm7, %v6067_v32, %v1153_v31  ;;  %v2886_v50 = vsub.f32 1.0, %v6513_v60  ;;  %v7173_v31 = vld [vmem:[#allocation19_spill] sm:$0xff] }
 0x4a9   : > { %v2900_v18 = vmul.f32 %v6576_v33, %v6355_v0  ;;  %v2867_v28 = vsel %vm2864_vm10, %v2866_v53, %v2862_v15  ;;  %vm2920_vm14 = vweird.f32 %v6554_v6  ;;  %v1163_v16 = vmul.f32 %v6503_v48, %v1162_v13  ;;  %v6599_v7 = vpop.permute.xlu0 %3654  ;;  %v2701_v38 = vpop.f32.mrf.mxu3 }
 0x4aa   : > { %v2883_v41 = vmul.f32 %v2882_v37, %v2691_v46  ;;  %v2918_v35 = vadd.f32 %v6554_v6, %v2917_v47  ;;  %v2925_v1 = vand.u32 2147483648, %v6452_v20  ;;  %3754 = vrot.lane.b32.xlu1 %v3753_v23, %s4076_s27  ;;  %vm2919_vm13 = vweird.f32 %v6452_v20  ;;  %v6640_v46 = vpop.xlane.xlu1 %897  ;;  %v7189_v23 = vld [vmem:[#allocation23_spill] sm:$0xff] }
 0x4ab   : > { %v6601_v32 = vpop.eup %4015  ;;  %v2923_v59 = vand.u32 2147483647, %v6452_v20  ;;  %v2932_v60 = vmul.f32 %v6483_v45, %v2931_v52  ;;  %v6607_v2 = vmul.f32 %v1158_v63, %v7173_v31  ;;  %vm1165_vm3 = vweird.f32 %v6435_v17  ;;  %vm6614_vm1 = vmor %vm2919_vm13, %vm2920_vm14  ;;  %v2694_v11 = vpop.f32.mrf.mxu2 }
 0x4ac   : > { %v1169_v36 = vand.u32 2147483647, %v6435_v17  ;;  %v2868_v25 = vmul.f32 %v2867_v28, %v6478_v43  ;;  %v1176_v20 = vmul.f32 %v6601_v32, %v6541_v56  ;;  %v2901_v44 = vsub.f32 1.0, %v2900_v18 }
 0x4ad   : > { %vm1166_vm7 = vweird.f32 %v6503_v48  ;;  %v2922_v61 = vsel %vm6614_vm1, %v6554_v6, %v2918_v35  ;;  %v2887_v9 = vmul.f32 %v6474_v22, %v2886_v50  ;;  %v6626_v43 = vadd.f32 %v6503_v48, %v1163_v16 }
 0x4ae   : > { %v3758_v4 = vpack.i.bf16 %v2883_v41, %v2868_v25  ;;  %v2926_v19 = vor.u32 1.1754944e-38, %v2925_v1  ;;  %v2933_v40 = vadd.f32 %v6483_v45, %v2932_v60  ;;  %vm2924_vm9 = vcmp.eq.f32.partialorder %v2923_v59, 8.507059e+37  ;;  %vm6646_vm4 = vmor %vm1165_vm3, %vm1166_vm7  ;;  %v7192_v60 = vld [vmem:[#allocation15_spill] sm:$0xff] }
 0x4af   : > { %v1177_v54 = vsub.f32 1.0, %v1176_v20  ;;  %vm2934_vm11 = vweird.f32 %v6412_v49  ;;  %vm2935_vm2 = vweird.f32 %v6483_v45  ;;  %v1171_v8 = vand.u32 2147483648, %v6435_v17  ;;  %v6638_v10 = vpop.permute.xlu2 %3659 }
 0x4b0   : > { %v2927_v5 = vsel %vm2924_vm9, %v2926_v19, %v2922_v61  ;;  %vm6632_vm12 = vmor %vm2934_vm11, %vm2935_vm2  ;;  %v2938_v26 = vand.u32 2147483647, %v6412_v49  ;;  %v2940_v62 = vand.u32 2147483648, %v6412_v49  ;;  %v2888_v34 = vadd.f32 %v6474_v22, %v2887_v9 }
 0x4b1   : > { %vm2890_vm6 = vweird.f32 %v6474_v22  ;;  %v2937_v49 = vsel %vm6632_vm12, %v6483_v45, %v2933_v40  ;;  %4017 = vrcp.f32 %v6586_v57  ;;  %v1168_v13 = vsel %vm6646_vm4, %v6503_v48, %v6626_v43  ;;  %v6674_v50 = vpop.permute.xlu0 %3669  ;;  %v7195_v40 = vld [vmem:[#allocation11_spill] sm:$0xff] }
 0x4b2   : > { %vm2889_vm5 = vweird.f32 %v6345_v55  ;;  %v2895_v15 = vand.u32 2147483648, %v6345_v55  ;;  %v2941_v52 = vor.u32 1.1754944e-38, %v2940_v62  ;;  %3759 = vrot.lane.b32.xlu1 %v3758_v4, %s4075_s26  ;;  %v2928_v53 = vmul.f32 %v2927_v5, %v2699_v14  ;;  %v7186_v4 = vld [vmem:[#allocation10_spill] sm:$0xff]  ;;  %v6714_v6 = vpop.xlane.xlu1 %903 }
 0x4b3   : > { %v1178_v37 = vmul.f32 %v6601_v32, %v1177_v54  ;;  %vm2939_vm8 = vcmp.eq.f32.partialorder %v2938_v26, 8.507059e+37  ;;  %v2902_v45 = vmul.f32 %v6576_v33, %v2901_v44  ;;  %vm1180_vm15 = vweird.f32 %v6541_v56  ;;  %vm6669_vm10 = vmor %vm2889_vm5, %vm2890_vm6  ;;  %v2696_v61 = vpop.f32.mrf.mxu2 }
 0x4b4   : > { %v1186_v24 = vand.u32 2147483648, %v6541_v56  ;;  %v2893_v47 = vand.u32 2147483647, %v6345_v55  ;;  %v2942_v63 = vsel %vm2939_vm8, %v2941_v52, %v2937_v49  ;;  %vm1181_vm14 = vweird.f32 %v6601_v32 }
 0x4b5   : > { %v2892_v14 = vsel %vm6669_vm10, %v6474_v22, %v2888_v34  ;;  %v2943_v18 = vmul.f32 %v2942_v63, %v2701_v38  ;;  %vm2904_vm13 = vweird.f32 %v6355_v0  ;;  %vm6681_vm3 = vcmp.eq.f32.partialorder %v1169_v36, 8.507059e+37  ;;  %vm6709_vm11 = vmor %vm1180_vm15, %vm1181_vm14  ;;  %v7190_v63 = vld [vmem:[#allocation21_spill] sm:$0xff] }
 0x4b6   : > { %v2903_v16 = vadd.f32 %v6576_v33, %v2902_v45  ;;  %vm2905_vm1 = vweird.f32 %v6576_v33  ;;  %v2908_v55 = vand.u32 2147483647, %v6355_v0  ;;  %v2910_v41 = vand.u32 2147483648, %v6355_v0 }
 0x4b7   : > { %v4018_v35 = vpop.eup %4017  ;;  %v1179_v1 = vadd.f32 %v6601_v32, %v1178_v37  ;;  %v2896_v59 = vor.u32 1.1754944e-38, %v2895_v15  ;;  %v3768_v22 = vpack.i.bf16 %v2943_v18, %v2928_v53  ;;  %vm6690_vm7 = vmor %vm2904_vm13, %vm2905_vm1  ;;  %v3662_v31 = vunpack.i.h.bf16 %v6638_v10  ;;  %v3675_v27 = vpop.permute.xlu2 %3674 }
 0x4b8   : > { %v1184_v36 = vand.u32 2147483647, %v6541_v56  ;;  %vm2894_vm9 = vcmp.eq.f32.partialorder %v2893_v47, 8.507059e+37  ;;  %v1221_v25 = vmul.f32 %v4018_v35, %v6586_v57  ;;  %v2907_v0 = vsel %vm6690_vm7, %v6576_v33, %v2903_v16  ;;  %v7191_v16 = vld [vmem:[#allocation26_spill] sm:$0xff] }
 0x4b9   : > { %v1187_v20 = vor.u32 1.1754944e-38, %v1186_v24  ;;  %v2897_v44 = vsel %vm2894_vm9, %v2896_v59, %v2892_v14  ;;  %v2911_v9 = vor.u32 1.1754944e-38, %v2910_v41  ;;  %3769 = vrot.lane.b32.xlu0 %v3768_v22, %s4075_s26  ;;  %v6703_v19 = vsel %vm695_vm0, %v7186_v4, %v3662_v31  ;;  %v3680_v45 = vpop.permute.xlu0 %3679 }
 0x4ba   : > { %v2898_v33 = vmul.f32 %v2897_v44, %v2694_v11  ;;  %v1222_v54 = vsub.f32 1.0, %v1221_v25  ;;  %vm2909_vm2 = vcmp.eq.f32.partialorder %v2908_v55, 8.507059e+37  ;;  %v3661_v5 = vunpack.i.l.bf16 %v6638_v10 }
 0x4bb   : > { %v1183_v26 = vsel %vm6709_vm11, %v6601_v32, %v1179_v1  ;;  %v1229_v62 = vand.u32 2147483647, %v6586_v57  ;;  %v1231_v34 = vand.u32 2147483648, %v6586_v57  ;;  %v2912_v56 = vsel %vm2909_vm2, %v2911_v9, %v2907_v0  ;;  %v7193_v0 = vld [vmem:[#allocation18_spill] sm:$0xff] }
 0x4bc   : > { %v1223_v49 = vmul.f32 %v4018_v35, %v1222_v54  ;;  %vm1226_vm12 = vweird.f32 %v4018_v35  ;;  %v2913_v15 = vmul.f32 %v2912_v56, %v2696_v61  ;;  %v6723_v11 = vsel %vm695_vm0, %v6044_v39, %v3661_v5 }
 0x4bd   : > { %v1172_v10 = vor.u32 1.1754944e-38, %v1171_v8  ;;  %vm1185_vm6 = vcmp.eq.f32.partialorder %v1184_v36, 8.507059e+37  ;;  %vm1225_vm5 = vweird.f32 %v6586_v57  ;;  %v3677_v38 = vunpack.i.h.bf16 %v3675_v27 }
 0x4be   : > { %v1188_v32 = vsel %vm1185_vm6, %v1187_v20, %v1183_v26  ;;  %v1224_v52 = vadd.f32 %v4018_v35, %v1223_v49  ;;  %v3763_v53 = vpack.i.bf16 %v2913_v15, %v2898_v33  ;;  %v3676_v37 = vunpack.i.l.bf16 %v3675_v27  ;;  %vm1227_vm15 = vmor %vm1225_vm5, %vm1226_vm12  ;;  %v7194_v27 = vld [vmem:[#allocation12_spill] sm:$0xff] }
 0x4bf   : > { %vm1091_vm8 = vweird.f32 %v7108_v12  ;;  %v1173_v39 = vsel %vm6681_vm3, %v1172_v10, %v1168_v13  ;;  %v1232_v17 = vor.u32 1.1754944e-38, %v1231_v34  ;;  %v6738_v57 = vsel %vm695_vm0, %v6607_v2, %v3677_v38  ;;  %v6747_v48 = vpop.permute.xlu2 %3689 }
 0x4c0   : > { %v1089_v8 = vadd.f32 %v7108_v12, %v6047_v51  ;;  %v1228_v24 = vsel %vm1227_vm15, %v4018_v35, %v1224_v52  ;;  %vm1230_vm10 = vcmp.eq.f32.partialorder %v1229_v62, 8.507059e+37  ;;  %3764 = vrot.lane.b32.xlu2 %v3763_v53, %s4075_s26  ;;  %v6745_v42 = vsel %vm695_vm0, %v6583_v3, %v3676_v37  ;;  %v3665_v3 = vpop.permute.xlu1 %3664 }
 0x4c1   : > { %v1096_v43 = vand.u32 2147483648, %v7107_v58  ;;  %v1233_v13 = vsel %vm1230_vm10, %v1232_v17, %v1228_v24  ;;  %v1189_v47 = vmul.f32 %v1188_v32, %v7189_v23  ;;  %v3682_v2 = vunpack.i.h.bf16 %v3680_v45 }
 0x4c2   : > { %vm1090_vm4 = vweird.f32 %v7107_v58  ;;  %v1094_v51 = vand.u32 2147483647, %v7107_v58  ;;  %v1174_v14 = vmul.f32 %v1173_v39, %v7190_v63  ;;  %v3681_v18 = vunpack.i.l.bf16 %v3680_v45  ;;  %v7196_v63 = vld [vmem:[#allocation5_spill] sm:$0xff] }
 0x4c3   : > { %vm1092_vm14 = vmor %vm1090_vm4, %vm1091_vm8  ;;  %v3147_v28 = vsel %vm695_vm0, %v1189_v47, %v3682_v2  ;;  %v1234_v55 = vmul.f32 %v1233_v13, %v7191_v16  ;;  %v3691_v41 = vunpack.i.l.bf16 %v6747_v48  ;;  %v1011_v58 = vmul.f32 %v6092_v21, %v7116_v29 }
 0x4c4   : > { %v1093_v35 = vsel %vm1092_vm14, %v7108_v12, %v1089_v8  ;;  %v3146_v1 = vsel %vm695_vm0, %v1174_v14, %v3681_v18  ;;  %v1097_v59 = vor.u32 1.1754944e-38, %v1096_v43  ;;  %4019 = vrcp.f32 %v7192_v60 }
 0x4c5   : > { %v6764_v22 = vsel %vm695_vm0, %v1234_v55, %v3691_v41  ;;  %vm1095_vm13 = vcmp.eq.f32.partialorder %v1094_v51, 8.507059e+37  ;;  %v3667_v31 = vunpack.i.h.bf16 %v3665_v3  ;;  %v3666_v36 = vunpack.i.l.bf16 %v3665_v3  ;;  %v7197_v55 = vld [vmem:[#allocation7_spill] sm:$0xff] }
 0x4c6   : > { %v1098_v25 = vsel %vm1095_vm13, %v1097_v59, %v1093_v35  ;;  %4021 = vrcp.f32 %v7193_v0  ;;  %v1012_v44 = vsub.f32 1.0, %v1011_v58  ;;  %vm3152_vm3 = vcmask 523264  }
 0x4c7   : > { %v1099_v20 = vmul.f32 %v1098_v25, %v7194_v27  ;;  %v3705_v12 = vpop.permute.xlu2 %3704  ;;  %v3140_v33 = vsel %vm695_vm0, %v7195_v40, %v3666_v36  ;;  %vm1016_vm1 = vweird.f32 %v6092_v21  ;;  %v1021_v10 = vand.u32 2147483648, %v7116_v29 }
 0x4c8   : > { %v3707_v61 = vunpack.i.h.bf16 %v3705_v12  ;;  %v3706_v9 = vunpack.i.l.bf16 %v3705_v12  ;;  %v1013_v34 = vmul.f32 %v6092_v21, %v1012_v44  ;;  %vm1015_vm7 = vweird.f32 %v7116_v29 }
 0x4c9   : > { %v3141_v4 = vsel %vm695_vm0, %v1099_v20, %v3667_v31  ;;  %v1019_v38 = vand.u32 2147483647, %v7116_v29  ;;  %vm1017_vm9 = vmor %vm1015_vm7, %vm1016_vm1  ;;  %v1022_v17 = vor.u32 1.1754944e-38, %v1021_v10  ;;  %v3695_v29 = vpop.permute.xlu0 %3694  ;;  %v3657_v47 = vunpack.i.h.bf16 %v6599_v7 }
 0x4ca   : > { %v6773_v54 = vsel %vm3152_vm3, %v3141_v4, %v3707_v61  ;;  %v6776_v5 = vsel %vm3152_vm3, %v3140_v33, %v3706_v9  ;;  %v6778_v26 = vpop.eup %4019  ;;  %v1014_v15 = vadd.f32 %v6092_v21, %v1013_v34  ;;  %v3656_v2 = vunpack.i.l.bf16 %v6599_v7 }
 0x4cb   : > { %v1116_v56 = vmul.f32 %v6778_v26, %v7192_v60  ;;  %vm1020_vm11 = vcmp.eq.f32.partialorder %v1019_v38, 8.507059e+37  ;;  %v3696_v51 = vunpack.i.l.bf16 %v3695_v29  ;;  %vm1121_vm2 = vweird.f32 %v6778_v26  ;;  %v7201_v38 = vld [vmem:[#allocation14_spill] sm:$0xff] }
 0x4cc   : > { %v6780_v62 = vpop.eup %4021  ;;  %v1018_v39 = vsel %vm1017_vm9, %v6092_v21, %v1014_v15  ;;  %v3697_v21 = vunpack.i.h.bf16 %v3695_v29  ;;  %vm3169_vm6 = vcmask 785408   ;;  %v3137_v7 = vsel %vm695_vm0, %v7197_v55, %v3657_v47  ;;  %v7200_v15 = vld [vmem:[#allocation16_spill] sm:$0xff] }
 0x4cd   : > { %v1101_v49 = vmul.f32 %v6780_v62, %v7193_v0  ;;  %v1117_v32 = vsub.f32 1.0, %v1116_v56  ;;  %v1023_v13 = vsel %vm1020_vm11, %v1022_v17, %v1018_v39  ;;  %vm1106_vm12 = vweird.f32 %v6780_v62 }
 0x4ce   : > { %v1024_v14 = vmul.f32 %v1023_v13, %v7196_v63  ;;  %vm1105_vm5 = vweird.f32 %v7193_v0  ;;  %v1109_v58 = vand.u32 2147483647, %v7193_v0  ;;  %v3154_v31 = vsel %vm3152_vm3, %v3137_v7, %v3697_v21  ;;  %v6849_v13 = vpop.permute.xlu1 %3684 }
 0x4cf   : > { %v1102_v53 = vsub.f32 1.0, %v1101_v49  ;;  %v1118_v43 = vmul.f32 %v6778_v26, %v1117_v32  ;;  %v1126_v36 = vand.u32 2147483648, %v7192_v60  ;;  %vm6818_vm8 = vmor %vm1105_vm5, %vm1106_vm12  ;;  %vm1120_vm15 = vweird.f32 %v7192_v60 }
 0x4d0   : > { %v3136_v41 = vsel %vm695_vm0, %v1024_v14, %v3656_v2  ;;  %v1124_v20 = vand.u32 2147483647, %v7192_v60  ;;  %vm1122_vm10 = vmor %vm1120_vm15, %vm1121_vm2  ;;  %vm1110_vm4 = vcmp.eq.f32.partialorder %v1109_v58, 8.507059e+37  ;;  %v3672_v34 = vunpack.i.h.bf16 %v6674_v50 }
 0x4d1   : > { %v1103_v23 = vmul.f32 %v6780_v62, %v1102_v53  ;;  %v1119_v18 = vadd.f32 %v6778_v26, %v1118_v43  ;;  %v3153_v59 = vsel %vm3152_vm3, %v3136_v41, %v3696_v51  ;;  %v3710_v4 = vpop.permute.xlu0 %3709  ;;  %v1127_v40 = vor.u32 1.1754944e-38, %v1126_v36 }
 0x4d2   : > { %v3720_v52 = vpop.permute.xlu2 %3719  ;;  %vm1125_vm14 = vcmp.eq.f32.partialorder %v1124_v20, 8.507059e+37  ;;  %v3671_v60 = vunpack.i.l.bf16 %v6674_v50  ;;  %v3711_v49 = vunpack.i.l.bf16 %v3710_v4  ;;  %4023 = vrcp.f32 %v6640_v46 }
 0x4d3   : > { %v3722_v37 = vunpack.i.h.bf16 %v3720_v52  ;;  %v3721_v45 = vunpack.i.l.bf16 %v3720_v52  ;;  %v1104_v3 = vadd.f32 %v6780_v62, %v1103_v23  ;;  %v1123_v9 = vsel %vm1122_vm10, %v6778_v26, %v1119_v18 }
 0x4d4   : > { %v1128_v56 = vsel %vm1125_vm14, %v1127_v40, %v1123_v9  ;;  %4025 = vrcp.f32 %v6550_v30  ;;  %vm1195_vm7 = vweird.f32 %v6640_v46  ;;  %vm1210_vm11 = vweird.f32 %v6550_v30 }
 0x4d5   : > { %v6795_v8 = vsel %vm3152_vm3, %v3146_v1, %v3721_v45  ;;  %v6798_v24 = vsel %vm3152_vm3, %v3147_v28, %v3722_v37  ;;  %v1111_v28 = vand.u32 2147483648, %v7193_v0  ;;  %v1108_v12 = vsel %vm6818_vm8, %v6780_v62, %v1104_v3 }
 0x4d6   : > { %v3712_v62 = vunpack.i.h.bf16 %v3710_v4  ;;  %v1129_v10 = vmul.f32 %v1128_v56, %v7200_v15  ;;  %v3700_v21 = vpop.permute.xlu1 %3699  ;;  %4027 = vrcp.f32 %v6714_v6  ;;  %v1214_v40 = vand.u32 2147483647, %v6550_v30  ;;  %v7208_v4 = vld [vmem:[#allocation27_spill] sm:$0xff] }
 0x4d7   : > { %v1112_v61 = vor.u32 1.1754944e-38, %v1111_v28  ;;  %v3702_v14 = vunpack.i.h.bf16 %v3700_v21  ;;  %v3701_v18 = vunpack.i.l.bf16 %v3700_v21  ;;  %v7206_v21 = vld [vmem:[#allocation24_spill] sm:$0xff]  ;;  %vm1240_vm15 = vweird.f32 %v6714_v6 }
 0x4d8   : > { %v3143_v26 = vsel %vm695_vm0, %v1129_v10, %v3672_v34  ;;  %v4024_v47 = vpop.eup %4023  ;;  %vm1215_vm5 = vcmp.eq.f32.partialorder %v1214_v40, 8.507059e+37 }
 0x4d9   : > { %v1113_v33 = vsel %vm1110_vm4, %v1112_v61, %v1108_v12  ;;  %v3160_v17 = vsel %vm3152_vm3, %v3143_v26, %v3712_v62  ;;  %v1191_v51 = vmul.f32 %v4024_v47, %v6640_v46  ;;  %v3156_v41 = vsel %vm3152_vm3, %v6703_v19, %v3702_v14 }
 0x4da   : > { %v1114_v32 = vmul.f32 %v1113_v33, %v7201_v38  ;;  %v4026_v2 = vpop.eup %4025  ;;  %vm1196_vm13 = vweird.f32 %v4024_v47  ;;  %v1199_v19 = vand.u32 2147483647, %v6640_v46 }
 0x4db   : > { %v3725_v16 = vpop.permute.xlu2 %3724  ;;  %v1206_v63 = vmul.f32 %v4026_v2, %v6550_v30  ;;  %v1192_v55 = vsub.f32 1.0, %v1191_v51  ;;  %vm1211_vm1 = vweird.f32 %v4026_v2  ;;  %vm6871_vm9 = vmor %vm1195_vm7, %vm1196_vm13 }
 0x4dc   : > { %v3727_v35 = vunpack.i.h.bf16 %v3725_v16  ;;  %v3726_v1 = vunpack.i.l.bf16 %v3725_v16  ;;  %v3142_v53 = vsel %vm695_vm0, %v1114_v32, %v3671_v60  ;;  %v6869_v9 = vpop.eup %4027  ;;  %vm6877_vm2 = vmor %vm1210_vm11, %vm1211_vm1  ;;  %vm1200_vm12 = vcmp.eq.f32.partialorder %v1199_v19, 8.507059e+37 }
 0x4dd   : > { %v3159_v39 = vsel %vm3152_vm3, %v3142_v53, %v3711_v49  ;;  %v1207_v7 = vsub.f32 1.0, %v1206_v63  ;;  %v1236_v38 = vmul.f32 %v6869_v9, %v6714_v6  ;;  %v7207_v63 = vld [vmem:[#allocation25_spill] sm:$0xff]  ;;  %vm1241_vm8 = vweird.f32 %v6869_v9 }
 0x4de   : > { %v3170_v27 = vsel %vm3169_vm6, %v3153_v59, %v3726_v1  ;;  %v3171_v0 = vsel %vm3169_vm6, %v3154_v31, %v3727_v35  ;;  %v3155_v35 = vsel %vm3152_vm3, %v6723_v11, %v3701_v18  ;;  %v1193_v31 = vmul.f32 %v4024_v47, %v1192_v55  ;;  %v3715_v25 = vpop.permute.xlu1 %3714  ;;  %vm1242_vm10 = vmor %vm1240_vm15, %vm1241_vm8 }
 0x4df   : > { %v3542_v44 = vpack.c.bf16 %v3171_v0, %v3170_v27  ;;  %v1208_v36 = vmul.f32 %v4026_v2, %v1207_v7  ;;  %v3717_v27 = vunpack.i.h.bf16 %v3715_v25  ;;  %v3716_v0 = vunpack.i.l.bf16 %v3715_v25 }
 0x4e0   : > { %v1194_v20 = vadd.f32 %v4024_v47, %v1193_v31  ;;  %v1201_v11 = vand.u32 2147483648, %v6640_v46 }
 0x4e1   : > { %3543 = vst [vmem:[%s6825_s6] sm:$0xff] %v3542_v44   ;;  %v1209_v12 = vadd.f32 %v4026_v2, %v1208_v36  ;;  %v1216_v44 = vand.u32 2147483648, %v6550_v30  ;;  %v3162_v46 = vsel %vm3152_vm3, %v6738_v57, %v3717_v27  ;;  %v3161_v56 = vsel %vm3152_vm3, %v6745_v42, %v3716_v0 }
 0x4e2   : > { %v1198_v62 = vsel %vm6871_vm9, %v4024_v47, %v1194_v20  ;;  %v1202_v10 = vor.u32 1.1754944e-38, %v1201_v11  ;;  %v3692_v11 = vunpack.i.h.bf16 %v6747_v48 }
 0x4e3   : > { %v1213_v49 = vsel %vm6877_vm2, %v4026_v2, %v1209_v12  ;;  %v1217_v32 = vor.u32 1.1754944e-38, %v1216_v44 }
 0x4e4   : > { %v1203_v53 = vsel %vm1200_vm12, %v1202_v10, %v1198_v62 }
 0x4e5   : > { %v1204_v51 = vmul.f32 %v1203_v53, %v7206_v21 }
 0x4e6   : > { %v3745_v52 = vpop.permute.xlu2 %3744 }
 0x4e7   : > { %v3747_v37 = vunpack.i.h.bf16 %v3745_v52  ;;  %v3746_v45 = vunpack.i.l.bf16 %v3745_v52 }
 0x4e9   : > { %v3176_v50 = vsel %vm3169_vm6, %v3159_v39, %v3746_v45  ;;  %v3177_v43 = vsel %vm3169_vm6, %v3160_v17, %v3747_v37  ;;  %v1218_v37 = vsel %vm1215_vm5, %v1217_v32, %v1213_v49  ;;  %v3687_v45 = vunpack.i.h.bf16 %v6849_v13 }
 0x4ea   : > { %v3557_v29 = vpack.c.bf16 %v3177_v43, %v3176_v50  ;;  %v3686_v39 = vunpack.i.l.bf16 %v6849_v13  ;;  %v1237_v43 = vsub.f32 1.0, %v1236_v38  ;;  %v1219_v14 = vmul.f32 %v1218_v37, %v7207_v63 }
 0x4ec   : > { %3588 = vst [vmem:[%s6825_s6 + $0x18] sm:$0xff] %v3557_v29   ;;  %v3148_v13 = vsel %vm695_vm0, %v1204_v51, %v3686_v39 }
 0x4fa   : > { %v6853_v23 = vpop.permute.xlu0 %3729 }
 0x4fb   : > { %v3732_v29 = vunpack.i.h.bf16 %v6853_v23  ;;  %v3731_v47 = vunpack.i.l.bf16 %v6853_v23 }
 0x4fd   : > { %v3165_v23 = vsel %vm3152_vm3, %v3148_v13, %v3731_v47 }
 0x504   : > { %v3735_v3 = vpop.permute.xlu0 %3734 }
 0x505   : > { %v3737_v28 = vunpack.i.h.bf16 %v3735_v3  ;;  %v3736_v16 = vunpack.i.l.bf16 %v3735_v3 }
 0x507   : > { %v3173_v1 = vsel %vm3169_vm6, %v3156_v41, %v3737_v28  ;;  %v3172_v58 = vsel %vm3169_vm6, %v3155_v35, %v3736_v16 }
 0x508   : > { %v3547_v59 = vpack.c.bf16 %v3173_v1, %v3172_v58  ;;  %v1246_v58 = vand.u32 2147483648, %v6714_v6 }
 0x50a   : > { %3586 = vst [vmem:[%s6825_s6 + $0x8] sm:$0xff] %v3547_v59   ;;  %v1244_v59 = vand.u32 2147483647, %v6714_v6  ;;  %v1247_v25 = vor.u32 1.1754944e-38, %v1246_v58 }
 0x50c   : > { %vm1245_vm4 = vcmp.eq.f32.partialorder %v1244_v59, 8.507059e+37 }
 0x510   : > { %v3750_v61 = vpop.permute.xlu0 %3749 }
 0x511   : > { %v3752_v33 = vunpack.i.h.bf16 %v3750_v61  ;;  %v3751_v34 = vunpack.i.l.bf16 %v3750_v61 }
 0x513   : > { %v3179_v30 = vsel %vm3169_vm6, %v3162_v46, %v3752_v33  ;;  %v3178_v15 = vsel %vm3169_vm6, %v3161_v56, %v3751_v34 }
 0x514   : > { %v3740_v57 = vpop.permute.xlu1 %3739  ;;  %v3562_v52 = vpack.c.bf16 %v3179_v30, %v3178_v15 }
 0x515   : > { %v3742_v42 = vunpack.i.h.bf16 %v3740_v57  ;;  %v3741_v26 = vunpack.i.l.bf16 %v3740_v57 }
 0x516   : > { %3589 = vst [vmem:[%s6825_s6 + $0x20] sm:$0xff] %v3562_v52  }
 0x517   : > { %v3175_v17 = vsel %vm3169_vm6, %v6773_v54, %v3742_v42  ;;  %v3174_v50 = vsel %vm3169_vm6, %v6776_v5, %v3741_v26  ;;  %v3149_v54 = vsel %vm695_vm0, %v1219_v14, %v3687_v45  ;;  %v1238_v5 = vmul.f32 %v6869_v9, %v1237_v43 }
 0x518   : > { %v3552_v2 = vpack.c.bf16 %v3175_v17, %v3174_v50  ;;  %v3166_v16 = vsel %vm3152_vm3, %v3149_v54, %v3732_v29 }
 0x519   : > { %v1239_v1 = vadd.f32 %v6869_v9, %v1238_v5 }
 0x51a   : > { %3587 = vst [vmem:[%s6825_s6 + $0x10] sm:$0xff] %v3552_v2   ;;  %v3765_v18 = vpop.permute.xlu2 %3764 }
 0x51b   : > { %v3767_v3 = vunpack.i.h.bf16 %v3765_v18  ;;  %v3766_v28 = vunpack.i.l.bf16 %v3765_v18  ;;  %v1243_v31 = vsel %vm1242_vm10, %v6869_v9, %v1239_v1 }
 0x51c   : > { %v3755_v55 = vpop.permute.xlu1 %3754  ;;  %v1248_v20 = vsel %vm1245_vm4, %v1247_v25, %v1243_v31 }
 0x51d   : > { %v3182_v7 = vsel %vm3169_vm6, %v3165_v23, %v3766_v28  ;;  %v3183_v41 = vsel %vm3169_vm6, %v3166_v16, %v3767_v3  ;;  %v3757_v44 = vunpack.i.h.bf16 %v3755_v55  ;;  %v3756_v61 = vunpack.i.l.bf16 %v3755_v55 }
 0x51e   : > { %v3572_v35 = vpack.c.bf16 %v3183_v41, %v3182_v7  ;;  %v1249_v9 = vmul.f32 %v1248_v20, %v7208_v4 }
 0x520   : > { %3591 = vst [vmem:[%s6825_s6 + $0x30] sm:$0xff] %v3572_v35   ;;  %v3151_v33 = vsel %vm695_vm0, %v1249_v9, %v3692_v11 }
 0x521   : > { %v3168_v46 = vsel %vm3152_vm3, %v3151_v33, %v3757_v44 }
 0x524   : > { %v3760_v36 = vpop.permute.xlu1 %3759 }
 0x525   : > { %v3762_v27 = vunpack.i.h.bf16 %v3760_v36  ;;  %v3761_v0 = vunpack.i.l.bf16 %v3760_v36 }
 0x527   : > { %v3180_v12 = vsel %vm3169_vm6, %v6795_v8, %v3761_v0  ;;  %v3181_v19 = vsel %vm3169_vm6, %v6798_v24, %v3762_v27  ;;  %v3167_v8 = vsel %vm3152_vm3, %v6764_v22, %v3756_v61 }
 0x528   : > { %v3567_v6 = vpack.c.bf16 %v3181_v19, %v3180_v12 }
 0x52a   : > { %3590 = vst [vmem:[%s6825_s6 + $0x28] sm:$0xff] %v3567_v6  }
 0x52b   : > { %v3770_v40 = vpop.permute.xlu0 %3769 }
 0x52c   : > { %v3772_v34 = vunpack.i.h.bf16 %v3770_v40  ;;  %v3771_v60 = vunpack.i.l.bf16 %v3770_v40 }
 0x52e   : > { %v3185_v24 = vsel %vm3169_vm6, %v3168_v46, %v3772_v34  ;;  %v3184_v48 = vsel %vm3169_vm6, %v3167_v8, %v3771_v60 }
 0x52f   : > { %v3577_v56 = vpack.c.bf16 %v3185_v24, %v3184_v48 }
 0x531   : > { %3592 = vst [vmem:[%s6825_s6 + $0x38] sm:$0xff] %v3577_v56  }
 0x532 PF: > { %s13_s16 = sadd.s32 1, %s4073_s16   ;;  %s7209_s12 = smov %s4061_s13 }
 0x533   : > { %p10_p10 = scmp.ge.s32.totalorder %s13_s16, 4   ;;  %s7210_s13 = smov %s4137_s21 }
 0x534   : > { %s7211_s14 = smov %s4069_s15  ;;  %s7212_s15 = smov %s7214_s17 }
 0x535   :  { %12 = sbr.rel (!%p10_p10) target bundleno = 3 (0x3), region = 206 }

// kernel: block_forward.8
= control target key start
LH: loop header
LB: loop body
LE: loop exit
PB: predicated region body
PF: predicated region fallthrough
CT: control target
= control target key end

     0   :  { %s4220_s18 = smov 0   ;;  %s6989_s0 = inlined_call_operand.vmem [shape: f32[256,128], index: 0, kind: input, shape index: {}]   ;;  %s6990_s1 = inlined_call_operand.vmem [shape: f32[1,128], index: 1, kind: input, shape index: {}]   ;;  %s6991_s2 = inlined_call_operand.vmem [shape: f32[1,128], index: 2, kind: input, shape index: {}]   ;;  %s6992_s3 = inlined_call_operand.vmem [shape: bf16[128,512], index: 3, kind: input, shape index: {}]   ;;  %s6993_s4 = inlined_call_operand.vmem [shape: f32[1,512], index: 4, kind: input, shape index: {}]   ;;  %s6994_s5 = inlined_call_operand.vmem [shape: bf16[256,512], index: 5, kind: output, shape index: {}]  }
   0x1 LB: > { %s3701_s19 = sadd.s32 4294967295, %s4186_s18   ;;  %p3705_p0 = scmp.ge.s32.totalorder %s4186_s18, 1  ;;  %s4186_s18 = sphi %s4220_s18, %s15_s18  }
   0x2   : > { %p188_p1 = scmp.lt.s32.totalorder %s4186_s18, 3 }
   0x4   : > { %p189_p2 = pnand %p3705_p0, %p188_p1 }
   0x6   : > { %192 = sbr.rel (%p189_p2) target bundleno = 1106 (0x452), region = 40 }
   0xb   : > { %s3706_s20 = sshll.u32 %s3701_s19, 4  ;;  %v4188_v7 = vmov 128.0   ;;  %v3825_v50 = vld [vmem:[%s6992_s3 + $0xe0] sm:$0xf]  ;;  %v3872_v51 = vld [vmem:[%s6992_s3 + $0xec] sm:$0xf0] }
   0xc   : > { %p218_p3 = scmp.lt.s32.totalorder %s3706_s20, 31  ;;  %3886 = vrcp.f32 %v4188_v7  ;;  %v3870_v52 = vld [vmem:[%s6992_s3 + $0xe4] sm:$0xf]  ;;  %v3826_v53 = vor.u32 %v3872_v51, %v3825_v50  ;;  %v3827_v54 = vld [vmem:[%s6992_s3 + $0xf0] sm:$0xf0] }
   0xd   : > { %v3833_v55 = vld [vmem:[%s6992_s3 + $0xe8] sm:$0xf]  ;;  %v3873_v56 = vld [vmem:[%s6992_s3 + $0xf4] sm:$0xf0]  ;;  %v3830_v57 = vor.u32 %v3870_v52, %v3827_v54  ;;  %v3871_v59 = vld [vmem:[%s6992_s3 + $0xec] sm:$0xf] }
   0xe   : > { %s7043_s20 = smov (!%p218_p3, %s3706_s20), 31  ;;  %v3834_v58 = vor.u32 %v3873_v56, %v3833_v55  ;;  %v3835_v60 = vld [vmem:[%s6992_s3 + $0xf8] sm:$0xf0]  ;;  %823 = vmatpush.bf16.msra.mxu0 %v3826_v53  ;;  %v3809_v62 = vld [vmem:[%s6992_s3 + $0xc0] sm:$0xf] }
   0xf   : > { %s3707_s21 = sshll.u32 %s7043_s20, 3  ;;  %v3838_v61 = vor.u32 %v3871_v59, %v3835_v60  ;;  %872 = vmatpush.bf16.msra.mxu1 %v3830_v57  ;;  %v3868_v63 = vld [vmem:[%s6992_s3 + $0xcc] sm:$0xf0]  ;;  %v3867_v7 = vld [vmem:[%s6992_s3 + $0xcc] sm:$0xf]  ;;  %s3841_s26 = sshll.u32 %s7043_s20, 4 }
  0x10   : > { %s4234_s24 = scalar_lea.vmem %s6989_s0, %s3707_s21  ;;  %921 = vmatpush.bf16.msra.mxu2 %v3834_v58  ;;  %v3761_v50 = vld [vmem:[%s6992_s3 + $0x60] sm:$0xf]  ;;  %v3856_v51 = vld [vmem:[%s6992_s3 + $0x6c] sm:$0xf0]  ;;  %v3854_v52 = vld [vmem:[%s6992_s3 + $0x64] sm:$0xf]  ;;  %s4954_s28 = scalar_lea.vmem %s6994_s5, %s3841_s26 }
  0x11   : > { %v232_v0 = vld [vmem:[%s4234_s24 + $0x10] sm:$0xff]  ;;  %v230_v1 = vld [vmem:[%s4234_s24] sm:$0xff]  ;;  %v233_v3 = vld [vmem:[%s4234_s24 + $0x18] sm:$0xff]  ;;  %970 = vmatpush.bf16.msra.mxu3 %v3838_v61  ;;  %v3762_v53 = vor.u32 %v3856_v51, %v3761_v50 }
  0x12   : > { %250 = vadd.xlane.f32.xlu1 %v232_v0  ;;  %246 = vadd.xlane.f32.xlu0 %v230_v1  ;;  %v234_v2 = vld [vmem:[%s4234_s24 + $0x20] sm:$0xff]  ;;  %v231_v4 = vld [vmem:[%s4234_s24 + $0x8] sm:$0xff]  ;;  %v236_v6 = vld [vmem:[%s4234_s24 + $0x30] sm:$0xff]  ;;  %v3887_v8 = vpop.eup %3886 }
  0x13   : > { %254 = vadd.xlane.f32.xlu2 %v234_v2  ;;  %v235_v5 = vld [vmem:[%s4234_s24 + $0x28] sm:$0xff]  ;;  %v279_v9 = vmul.f32 128.0, %v3887_v8  ;;  %vm283_vm0 = vweird.f32 %v3887_v8  ;;  %v4259_v28 = vld [vmem:[%s4234_s24 + $0x38] sm:$0xff]  ;;  %v4274_v36 = vld [vmem:[%s4234_s24 + $0x40] sm:$0xff] }
  0x14   : > { %v4285_v42 = vld [vmem:[%s4234_s24 + $0x58] sm:$0xff]  ;;  %v4288_v43 = vld [vmem:[%s4234_s24 + $0x48] sm:$0xff]  ;;  %v4297_v46 = vld [vmem:[%s4234_s24 + $0x60] sm:$0xff] }
  0x15   : > { %v280_v10 = vsub.f32 1.0, %v279_v9  ;;  %v4300_v47 = vld [vmem:[%s4234_s24 + $0x50] sm:$0xff]  ;;  %v4305_v48 = vld [vmem:[%s4234_s24 + $0x68] sm:$0xff]  ;;  %v3857_v56 = vld [vmem:[%s6992_s3 + $0x74] sm:$0xf0] }
  0x16   : > { %v4309_v49 = vld [vmem:[%s4234_s24 + $0x70] sm:$0xff]  ;;  %v3769_v55 = vld [vmem:[%s6992_s3 + $0x68] sm:$0xf]  ;;  %v3855_v59 = vld [vmem:[%s6992_s3 + $0x6c] sm:$0xf] }
  0x17   : > { %v281_v11 = vmul.f32 %v3887_v8, %v280_v10  ;;  %v3793_v10 = vld [vmem:[%s6992_s3 + $0xa0] sm:$0xf]  ;;  %v3763_v54 = vld [vmem:[%s6992_s3 + $0x70] sm:$0xf0]  ;;  %v3770_v58 = vor.u32 %v3857_v56, %v3769_v55  ;;  %v3771_v60 = vld [vmem:[%s6992_s3 + $0x78] sm:$0xf0] }
  0x18   : > { %v3766_v57 = vor.u32 %v3854_v52, %v3763_v54  ;;  %v3774_v61 = vor.u32 %v3855_v59, %v3771_v60  ;;  %v3723_v50 = vld [vmem:[%s6992_s3 + $0x18] sm:$0xf0] }
  0x19   : > { %v282_v12 = vadd.f32 %v3887_v8, %v281_v11  ;;  %v3864_v11 = vld [vmem:[%s6992_s3 + $0xac] sm:$0xf0] }
  0x1a   : > { %252 = vadd.xlane.f32.xlu1 %v233_v3  ;;  %248 = vadd.xlane.f32.xlu0 %v231_v4 }
  0x1b   : > { %256 = vadd.xlane.f32.xlu2 %v235_v5  ;;  %v4243_v13 = vsel %vm283_vm0, %v3887_v8, %v282_v12  ;;  %v3819_v8 = vld [vmem:[%s6992_s3 + $0xd8] sm:$0xf0]  ;;  %v3862_v12 = vld [vmem:[%s6992_s3 + $0xa4] sm:$0xf] }
  0x1c   : > { %v3822_v9 = vor.u32 %v3867_v7, %v3819_v8  ;;  %v3851_v7 = vld [vmem:[%s6992_s3 + $0x4c] sm:$0xf]  ;;  %v3755_v8 = vld [vmem:[%s6992_s3 + $0x58] sm:$0xf0] }
  0x1e   : > { %971 = vmatpush.bf16.msra.mxu3 %v3822_v9  ;;  %v3758_v9 = vor.u32 %v3851_v7, %v3755_v8 }
  0x23   : > { %258 = vadd.xlane.f32.xlu2 %v236_v6 }
  0x85   : > { %v251_v14 = vpop.xlane.xlu1 %250  ;;  %v247_v15 = vpop.xlane.xlu0 %246 }
  0x86   : > { %v285_v16 = vmul.f32 %v4243_v13, %v247_v15  ;;  %v255_v18 = vpop.xlane.xlu2 %254  ;;  %v287_v27 = vmul.f32 %v4243_v13, %v251_v14  ;;  %v3794_v14 = vor.u32 %v3864_v11, %v3793_v10  ;;  %v3795_v15 = vld [vmem:[%s6992_s3 + $0xb0] sm:$0xf0]  ;;  %v3729_v10 = vld [vmem:[%s6992_s3 + $0x20] sm:$0xf]  ;;  %v3848_v11 = vld [vmem:[%s6992_s3 + $0x2c] sm:$0xf0] }
  0x87   : > { %v289_v26 = vmul.f32 %v4243_v13, %v255_v18  ;;  %v3865_v18 = vld [vmem:[%s6992_s3 + $0xb4] sm:$0xf0] }
  0x88   : > { %v4246_v17 = vsub.f32 %v230_v1, %v285_v16  ;;  %v4268_v33 = vsub.f32 %v232_v0, %v287_v27  ;;  %v3866_v0 = vld [vmem:[%s6992_s3 + $0xc4] sm:$0xf]  ;;  %v3810_v1 = vor.u32 %v3868_v63, %v3809_v62  ;;  %v3801_v16 = vld [vmem:[%s6992_s3 + $0xa8] sm:$0xf]  ;;  %v3860_v27 = vld [vmem:[%s6992_s3 + $0x8c] sm:$0xf0] }
  0x89   : > { %v4266_v32 = vsub.f32 %v234_v2, %v289_v26  ;;  %v3811_v2 = vld [vmem:[%s6992_s3 + $0xd0] sm:$0xf0]  ;;  %v3777_v26 = vld [vmem:[%s6992_s3 + $0x80] sm:$0xf]  ;;  %v3852_v63 = vld [vmem:[%s6992_s3 + $0x4c] sm:$0xf0] }
  0x8a   : > { %v317_v19 = vmul.f32 %v4246_v17, %v4246_v17  ;;  %v319_v37 = vmul.f32 %v4268_v33, %v4268_v33  ;;  %824 = vmatpush.bf16.msra.mxu0 %v3810_v1  ;;  %v3745_v62 = vld [vmem:[%s6992_s3 + $0x40] sm:$0xf] }
  0x8b   : > { %v321_v34 = vmul.f32 %v4266_v32, %v4266_v32  ;;  %v3746_v1 = vor.u32 %v3852_v63, %v3745_v62 }
  0x8c   : > { %333 = vadd.xlane.f32.xlu0 %v317_v19  ;;  %v3798_v19 = vor.u32 %v3862_v12, %v3795_v15  ;;  %v3846_v12 = vld [vmem:[%s6992_s3 + $0x24] sm:$0xf]  ;;  %v3730_v15 = vor.u32 %v3848_v11, %v3729_v10 }
  0x8d   : > { %v253_v20 = vpop.xlane.xlu1 %252  ;;  %v249_v21 = vpop.xlane.xlu0 %248 }
  0x8e   : > { %v288_v22 = vmul.f32 %v4243_v13, %v253_v20  ;;  %v286_v23 = vmul.f32 %v4243_v13, %v249_v21  ;;  %v257_v31 = vpop.xlane.xlu2 %256  ;;  %v3802_v20 = vor.u32 %v3865_v18, %v3801_v16  ;;  %v3863_v21 = vld [vmem:[%s6992_s3 + $0xac] sm:$0xf]  ;;  %825 = vmatpush.bf16.msra.mxu0 %v3794_v14  ;;  %v3731_v16 = vld [vmem:[%s6992_s3 + $0x30] sm:$0xf0]  ;;  %v3737_v18 = vld [vmem:[%s6992_s3 + $0x28] sm:$0xf] }
  0x8f   : > { %v290_v35 = vmul.f32 %v4243_v13, %v257_v31  ;;  %v3779_v31 = vld [vmem:[%s6992_s3 + $0x90] sm:$0xf0] }
  0x90   : > { %v4252_v24 = vsub.f32 %v233_v3, %v288_v22  ;;  %v4254_v25 = vsub.f32 %v231_v4, %v286_v23  ;;  %v3817_v3 = vld [vmem:[%s6992_s3 + $0xc8] sm:$0xf]  ;;  %v3869_v4 = vld [vmem:[%s6992_s3 + $0xd4] sm:$0xf0]  ;;  %v3803_v22 = vld [vmem:[%s6992_s3 + $0xb8] sm:$0xf0] }
  0x91   : > { %v4279_v38 = vsub.f32 %v235_v5, %v290_v35  ;;  %v3814_v5 = vor.u32 %v3866_v0, %v3811_v2  ;;  %v3806_v23 = vor.u32 %v3863_v21, %v3803_v22  ;;  %v3861_v35 = vld [vmem:[%s6992_s3 + $0x94] sm:$0xf0]  ;;  %v3850_v0 = vld [vmem:[%s6992_s3 + $0x44] sm:$0xf]  ;;  %v3747_v2 = vld [vmem:[%s6992_s3 + $0x50] sm:$0xf0] }
  0x92   : > { %v320_v29 = vmul.f32 %v4252_v24, %v4252_v24  ;;  %v318_v30 = vmul.f32 %v4254_v25, %v4254_v25  ;;  %v3849_v21 = vld [vmem:[%s6992_s3 + $0x34] sm:$0xf0]  ;;  %v3847_v22 = vld [vmem:[%s6992_s3 + $0x2c] sm:$0xf] }
  0x93   : > { %v322_v40 = vmul.f32 %v4279_v38, %v4279_v38  ;;  %873 = vmatpush.bf16.msra.mxu1 %v3814_v5  ;;  %972 = vmatpush.bf16.msra.mxu3 %v3806_v23  ;;  %v3750_v5 = vor.u32 %v3850_v0, %v3747_v2  ;;  %v3739_v23 = vld [vmem:[%s6992_s3 + $0x38] sm:$0xf0] }
  0x94   : > { %339 = vadd.xlane.f32.xlu2 %v320_v29  ;;  %260 = vadd.xlane.f32.xlu0 %v4259_v28  ;;  %v3858_v29 = vld [vmem:[%s6992_s3 + $0x84] sm:$0xf] }
  0x95   : > { %335 = vadd.xlane.f32.xlu1 %v318_v30  ;;  %v3778_v30 = vor.u32 %v3860_v27, %v3777_v26  ;;  %v3738_v26 = vor.u32 %v3849_v21, %v3737_v18  ;;  %v3742_v27 = vor.u32 %v3847_v22, %v3739_v23 }
  0x96   : > { %v259_v39 = vpop.xlane.xlu2 %258 }
  0x97   : > { %v291_v41 = vmul.f32 %v4243_v13, %v259_v39  ;;  %874 = vmatpush.bf16.msra.mxu1 %v3798_v19  ;;  %826 = vmatpush.bf16.msra.mxu0 %v3778_v30  ;;  %v3713_v30 = vld [vmem:[%s6992_s3] sm:$0xf] }
  0x99   : > { %v4291_v44 = vsub.f32 %v236_v6, %v291_v41  ;;  %v3818_v6 = vor.u32 %v3869_v4, %v3817_v3  ;;  %v3787_v41 = vld [vmem:[%s6992_s3 + $0x98] sm:$0xf0]  ;;  %v3753_v3 = vld [vmem:[%s6992_s3 + $0x48] sm:$0xf]  ;;  %v3853_v4 = vld [vmem:[%s6992_s3 + $0x54] sm:$0xf0] }
  0x9b   : > { %v323_v45 = vmul.f32 %v4291_v44, %v4291_v44  ;;  %922 = vmatpush.bf16.msra.mxu2 %v3818_v6  ;;  %827 = vmatpush.bf16.msra.mxu0 %v3762_v53  ;;  %v3754_v6 = vor.u32 %v3853_v4, %v3753_v3 }
  0x9c   : > { %341 = vadd.xlane.f32.xlu2 %v321_v34  ;;  %262 = vadd.xlane.f32.xlu0 %v4274_v36  ;;  %v3785_v34 = vld [vmem:[%s6992_s3 + $0x88] sm:$0xf] }
  0x9d   : > { %337 = vadd.xlane.f32.xlu1 %v319_v37  ;;  %v3782_v37 = vor.u32 %v3858_v29, %v3779_v31  ;;  %v3786_v39 = vor.u32 %v3861_v35, %v3785_v34  ;;  %v3844_v31 = vld [vmem:[%s6992_s3 + $0xc] sm:$0xf0]  ;;  %v3842_v35 = vld [vmem:[%s6992_s3 + $0x4] sm:$0xf] }
  0x9e   : > { %v3714_v34 = vor.u32 %v3844_v31, %v3713_v30 }
  0x9f   : > { %923 = vmatpush.bf16.msra.mxu2 %v3802_v20  ;;  %875 = vmatpush.bf16.msra.mxu1 %v3782_v37  ;;  %v3734_v20 = vor.u32 %v3846_v12, %v3731_v16  ;;  %v3715_v37 = vld [vmem:[%s6992_s3 + $0x10] sm:$0xf0] }
  0xa0   : > { %828 = vmatpush.bf16.msra.mxu0 %v3746_v1 }
  0xa3   : > { %924 = vmatpush.bf16.msra.mxu2 %v3786_v39  ;;  %876 = vmatpush.bf16.msra.mxu1 %v3766_v57  ;;  %v3721_v39 = vld [vmem:[%s6992_s3 + $0x8] sm:$0xf] }
  0xa4   : > { %268 = vadd.xlane.f32.xlu2 %v4285_v42  ;;  %343 = vadd.xlane.f32.xlu0 %v322_v40  ;;  %v3859_v40 = vld [vmem:[%s6992_s3 + $0x8c] sm:$0xf] }
  0xa5   : > { %264 = vadd.xlane.f32.xlu1 %v4288_v43  ;;  %829 = vmatpush.bf16.msra.mxu0 %v3730_v15 }
  0xa7   : > { %925 = vmatpush.bf16.msra.mxu2 %v3770_v58  ;;  %877 = vmatpush.bf16.msra.mxu1 %v3750_v5 }
  0xa9   : > { %830 = vmatpush.bf16.msra.mxu0 %v3714_v34 }
  0xab   : > { %926 = vmatpush.bf16.msra.mxu2 %v3754_v6  ;;  %878 = vmatpush.bf16.msra.mxu1 %v3734_v20 }
  0xac   : > { %270 = vadd.xlane.f32.xlu2 %v4297_v46  ;;  %345 = vadd.xlane.f32.xlu0 %v323_v45  ;;  %v3790_v45 = vor.u32 %v3859_v40, %v3787_v41  ;;  %v3718_v40 = vor.u32 %v3842_v35, %v3715_v37  ;;  %v3845_v41 = vld [vmem:[%s6992_s3 + $0x14] sm:$0xf0] }
  0xad   : > { %266 = vadd.xlane.f32.xlu1 %v4300_v47  ;;  %v3722_v51 = vor.u32 %v3845_v41, %v3721_v39 }
  0xae   : > { %973 = vmatpush.bf16.msra.mxu3 %v3790_v45  ;;  %v3843_v45 = vld [vmem:[%s6992_s3 + $0xc] sm:$0xf] }
  0xaf   : > { %927 = vmatpush.bf16.msra.mxu2 %v3738_v26  ;;  %v3726_v52 = vor.u32 %v3843_v45, %v3723_v50  ;;  %879 = vmatpush.bf16.msra.mxu1 %v3718_v40 }
  0xb2   : > { %974 = vmatpush.bf16.msra.mxu3 %v3774_v61 }
  0xb3   : > { %928 = vmatpush.bf16.msra.mxu2 %v3722_v51 }
  0xb4   : > { %272 = vadd.xlane.f32.xlu0 %v4305_v48 }
  0xb6   : > { %975 = vmatpush.bf16.msra.mxu3 %v3758_v9 }
  0xba   : > { %976 = vmatpush.bf16.msra.mxu3 %v3742_v27 }
  0xbc   : > { %274 = vadd.xlane.f32.xlu0 %v4309_v49 }
  0xbe   : > { %977 = vmatpush.bf16.msra.mxu3 %v3726_v52 }
  0xff   : > { %v334_v14 = vpop.xlane.xlu0 %333 }
 0x100   : > { %v365_v19 = vmul.f32 %v334_v14, %v4243_v13 }
 0x102   : > { %v381_v29 = vadd.f32 1e-05, %v365_v19 }
 0x104   : > { %3888 = vrsqrt.f32 %v381_v29  ;;  %vm403_vm2 = vweird.f32 %v381_v29 }
 0x107   : > { %v340_v53 = vpop.xlane.xlu2 %339  ;;  %v261_v54 = vpop.xlane.xlu0 %260 }
 0x108   : > { %v368_v55 = vmul.f32 %v340_v53, %v4243_v13  ;;  %v336_v56 = vpop.xlane.xlu1 %335  ;;  %v292_v57 = vmul.f32 %v4243_v13, %v261_v54  ;;  %v4564_v54 = vld [vmem:[%s4234_s24 + $0x78] sm:$0xff] }
 0x109   : > { %v366_v58 = vmul.f32 %v336_v56, %v4243_v13 }
 0x10a   : > { %v3889_v59 = vpop.eup %3888  ;;  %v4508_v60 = vadd.f32 1e-05, %v368_v55  ;;  %v4511_v61 = vsub.f32 %v4259_v28, %v292_v57 }
 0x10b   : > { %v398_v62 = vmul.f32 %v3889_v59, %v381_v29  ;;  %v382_v63 = vadd.f32 1e-05, %v366_v58  ;;  %vm404_vm1 = vweird.f32 %v3889_v59 }
 0x10c   : > { %3890 = vrsqrt.f32 %v4508_v60  ;;  %v324_v0 = vmul.f32 %v4511_v61, %v4511_v61  ;;  %vm4533_vm4 = vmor %vm403_vm2, %vm404_vm1  ;;  %vm433_vm9 = vweird.f32 %v4508_v60 }
 0x10d   : > { %v399_v1 = vmul.f32 %v3889_v59, %v398_v62  ;;  %3892 = vrsqrt.f32 %v382_v63  ;;  %vm413_vm3 = vweird.f32 %v382_v63 }
 0x10e   : > { %347 = vadd.xlane.f32.xlu1 %v324_v0 }
 0x10f   : > { %v400_v2 = vmul.f32 0.5, %v399_v1  ;;  %v342_v3 = vpop.xlane.xlu2 %341  ;;  %v263_v4 = vpop.xlane.xlu0 %262  ;;  %v4578_v1 = vld [vmem:[%s6991_s2] ss:$0 sm:$0xff] }
 0x110   : > { %v338_v5 = vpop.xlane.xlu1 %337  ;;  %v293_v6 = vmul.f32 %v4243_v13, %v263_v4  ;;  %v369_v11 = vmul.f32 %v342_v3, %v4243_v13 }
 0x111   : > { %v401_v7 = vsub.f32 1.5, %v400_v2  ;;  %v367_v28 = vmul.f32 %v338_v5, %v4243_v13 }
 0x112   : > { %v4518_v8 = vpop.eup %3890  ;;  %v4521_v9 = vsub.f32 %v4274_v36, %v293_v6  ;;  %v4531_v36 = vadd.f32 1e-05, %v369_v11 }
 0x113   : > { %v3893_v10 = vpop.eup %3892  ;;  %v4524_v12 = vadd.f32 1e-05, %v367_v28  ;;  %v402_v15 = vmul.f32 %v3889_v59, %v401_v7  ;;  %v428_v16 = vmul.f32 %v4518_v8, %v4508_v60  ;;  %vm434_vm10 = vweird.f32 %v4518_v8 }
 0x114   : > { %v408_v14 = vmul.f32 %v3893_v10, %v382_v63  ;;  %v325_v19 = vmul.f32 %v4521_v9, %v4521_v9  ;;  %vm414_vm5 = vweird.f32 %v3893_v10  ;;  %vm4606_vm12 = vmor %vm433_vm9, %vm434_vm10  ;;  %vm443_vm15 = vweird.f32 %v4531_v36 }
 0x115   : > { %3894 = vrsqrt.f32 %v4524_v12  ;;  %v406_v29 = vsel %vm4533_vm4, %v3889_v59, %v402_v15  ;;  %v429_v31 = vmul.f32 %v4518_v8, %v428_v16  ;;  %vm415_vm6 = vmor %vm413_vm3, %vm414_vm5  ;;  %vm423_vm7 = vweird.f32 %v4524_v12 }
 0x116   : > { %v409_v18 = vmul.f32 %v3893_v10, %v408_v14  ;;  %349 = vadd.xlane.f32.xlu1 %v325_v19  ;;  %3896 = vrsqrt.f32 %v4531_v36  ;;  %v557_v45 = vmul.f32 %v406_v29, %v4246_v17 }
 0x117   : > { %v269_v20 = vpop.xlane.xlu2 %268  ;;  %v344_v21 = vpop.xlane.xlu0 %343  ;;  %v430_v52 = vmul.f32 0.5, %v429_v31 }
 0x118   : > { %v410_v23 = vmul.f32 0.5, %v409_v18  ;;  %v296_v26 = vmul.f32 %v4243_v13, %v269_v20  ;;  %v265_v27 = vpop.xlane.xlu1 %264  ;;  %v370_v30 = vmul.f32 %v344_v21, %v4243_v13 }
 0x119   : > { %v294_v34 = vmul.f32 %v4243_v13, %v265_v27  ;;  %v431_v2 = vsub.f32 1.5, %v430_v52 }
 0x11a   : > { %v411_v35 = vsub.f32 1.5, %v410_v23  ;;  %v4544_v37 = vsub.f32 %v4285_v42, %v296_v26  ;;  %v4546_v39 = vadd.f32 1e-05, %v370_v30  ;;  %v4559_v42 = vld [vmem:[%s6990_s1] ss:$0 sm:$0xff] }
 0x11b   : > { %v3895_v40 = vpop.eup %3894  ;;  %v4551_v41 = vsub.f32 %v4288_v43, %v294_v34  ;;  %v577_v0 = vmul.f32 %v4559_v42, %v557_v45  ;;  %v432_v60 = vmul.f32 %v4518_v8, %v431_v2 }
 0x11c   : > { %v412_v50 = vmul.f32 %v3893_v10, %v411_v35  ;;  %v418_v51 = vmul.f32 %v3895_v40, %v4524_v12  ;;  %3898 = vrsqrt.f32 %v4546_v39  ;;  %v328_v53 = vmul.f32 %v4544_v37, %v4544_v37 }
 0x11d   : > { %v326_v17 = vmul.f32 %v4551_v41, %v4551_v41  ;;  %vm424_vm8 = vweird.f32 %v3895_v40  ;;  %v597_v15 = vadd.f32 %v4578_v1, %v577_v0  ;;  %v436_v26 = vsel %vm4606_vm12, %v4518_v8, %v432_v60 }
 0x11e   : > { %v416_v43 = vsel %vm415_vm6, %v3893_v10, %v412_v50  ;;  %v419_v55 = vmul.f32 %v3895_v40, %v418_v51  ;;  %355 = vadd.xlane.f32.xlu0 %v328_v53  ;;  %276 = vadd.xlane.f32.xlu1 %v4564_v54  ;;  %vm4595_vm11 = vmor %vm423_vm7, %vm424_vm8  ;;  %v560_v34 = vmul.f32 %v436_v26, %v4252_v24  ;;  %vm453_vm13 = vweird.f32 %v4546_v39 }
 0x11f   : > { %v558_v56 = vmul.f32 %v416_v43, %v4254_v25  ;;  %v271_v57 = vpop.xlane.xlu2 %270  ;;  %v4569_v58 = vpop.xlane.xlu0 %345  ;;  %351 = vadd.xlane.f32.xlu2 %v326_v17 }
 0x120   : > { %v420_v59 = vmul.f32 0.5, %v419_v55  ;;  %v297_v62 = vmul.f32 %v4243_v13, %v271_v57  ;;  %v267_v63 = vpop.xlane.xlu1 %266  ;;  %v4580_v25 = vpop.eup %3896 }
 0x121   : > { %v295_v3 = vmul.f32 %v4243_v13, %v267_v63  ;;  %v578_v4 = vmul.f32 %v4559_v42, %v558_v56  ;;  %v438_v16 = vmul.f32 %v4580_v25, %v4531_v36  ;;  %vm444_vm0 = vweird.f32 %v4580_v25 }
 0x122   : > { %v3899_v5 = vpop.eup %3898  ;;  %v421_v6 = vsub.f32 1.5, %v420_v59  ;;  %v4585_v7 = vsub.f32 %v4297_v46, %v297_v62  ;;  %vm445_vm2 = vmor %vm443_vm15, %vm444_vm0 }
 0x123   : > { %v448_v28 = vmul.f32 %v3899_v5, %v4546_v39  ;;  %v4591_v10 = vsub.f32 %v4300_v47, %v295_v3  ;;  %v598_v46 = vadd.f32 %v4578_v1, %v578_v4  ;;  %v439_v27 = vmul.f32 %v4580_v25, %v438_v16 }
 0x124   : > { %v422_v11 = vmul.f32 %v3895_v40, %v421_v6  ;;  %v329_v19 = vmul.f32 %v4585_v7, %v4585_v7  ;;  %vm454_vm14 = vweird.f32 %v3899_v5 }
 0x125   : > { %v327_v47 = vmul.f32 %v4591_v10, %v4591_v10  ;;  %v613_v12 = vpack.c.bf16 %v598_v46, %v597_v15  ;;  %v449_v21 = vmul.f32 %v3899_v5, %v448_v28  ;;  %vm455_vm1 = vmor %vm453_vm13, %vm454_vm14 }
 0x126   : > { %v426_v20 = vsel %vm4595_vm11, %v3895_v40, %v422_v11  ;;  %357 = vadd.xlane.f32.xlu1 %v329_v19  ;;  %v440_v40 = vmul.f32 0.5, %v439_v27 }
 0x127   : > { %v273_v22 = vpop.xlane.xlu0 %272  ;;  %353 = vadd.xlane.f32.xlu2 %v327_v47  ;;  %831 = vmatmul.bf16.vlgmr.msra.gmra.mxu0 %v613_v12  ;;  %v559_v30 = vmul.f32 %v426_v20, %v4268_v33  ;;  %v450_v31 = vmul.f32 0.5, %v449_v21  ;;  %v580_v33 = vmul.f32 %v4559_v42, %v560_v34 }
 0x128   : > { %v298_v23 = vmul.f32 %v4243_v13, %v273_v22  ;;  %880 = vmatmul.bf16.vlgmr.msra.gmra.mxu1 %v613_v12  ;;  %929 = vmatmul.bf16.vlgmr.msra.gmra.mxu2 %v613_v12  ;;  %v441_v52 = vsub.f32 1.5, %v440_v40 }
 0x129   : > { %978 = vmatmul.bf16.vlgmr.msra.gmra.mxu3 %v613_v12  ;;  %v579_v8 = vmul.f32 %v4559_v42, %v559_v30  ;;  %v451_v45 = vsub.f32 1.5, %v450_v31  ;;  %v600_v43 = vadd.f32 %v4578_v1, %v580_v33 }
 0x12a   : > { %v4621_v29 = vsub.f32 %v4305_v48, %v298_v23  ;;  %v442_v17 = vmul.f32 %v4580_v25, %v441_v52 }
 0x12b   : > { %v599_v24 = vadd.f32 %v4578_v1, %v579_v8  ;;  %v452_v53 = vmul.f32 %v3899_v5, %v451_v45 }
 0x12c   : > { %v330_v35 = vmul.f32 %v4621_v29, %v4621_v29  ;;  %v446_v56 = vsel %vm445_vm2, %v4580_v25, %v442_v17  ;;  %v371_v25 = vmul.f32 %v4569_v58, %v4243_v13 }
 0x12d   : > { %v614_v39 = vpack.c.bf16 %v600_v43, %v599_v24  ;;  %v561_v57 = vmul.f32 %v446_v56, %v4266_v32 }
 0x12f   : > { %v275_v50 = vpop.xlane.xlu0 %274  ;;  %359 = vadd.xlane.f32.xlu2 %v330_v35  ;;  %v581_v62 = vmul.f32 %v4559_v42, %v561_v57 }
 0x130   : > { %v299_v51 = vmul.f32 %v4243_v13, %v275_v50 }
 0x131   : > { %v601_v0 = vadd.f32 %v4578_v1, %v581_v62 }
 0x132   : > { %v4631_v48 = vsub.f32 %v4309_v49, %v299_v51  ;;  %v456_v49 = vsel %vm455_vm1, %v3899_v5, %v452_v53 }
 0x133   : > { %v562_v36 = vmul.f32 %v456_v49, %v4279_v38  ;;  %v387_v38 = vadd.f32 1e-05, %v371_v25  ;;  %v653_v49 = vld [vmem:[%s6993_s4] sm:$0xf] }
 0x134   : > { %v331_v55 = vmul.f32 %v4631_v48, %v4631_v48 }
 0x135   : > { %v582_v59 = vmul.f32 %v4559_v42, %v562_v36  ;;  %3900 = vrsqrt.f32 %v387_v38  ;;  %vm463_vm3 = vweird.f32 %v387_v38 }
 0x136   : > { %361 = vadd.xlane.f32.xlu0 %v331_v55 }
 0x137   : > { %836 = vmatmul.bf16.gmra.mxu0 %v614_v39  ;;  %v602_v63 = vadd.f32 %v4578_v1, %v582_v59  ;;  %v4690_v59 = vperm.slane %v653_v49, 0 }
 0x138   : > { %885 = vmatmul.bf16.gmra.mxu1 %v614_v39  ;;  %934 = vmatmul.bf16.gmra.mxu2 %v614_v39 }
 0x139   : > { %983 = vmatmul.bf16.gmra.mxu3 %v614_v39  ;;  %v615_v2 = vpack.c.bf16 %v602_v63, %v601_v0 }
 0x13b   : > { %v3901_v3 = vpop.eup %3900 }
 0x13c   : > { %v458_v32 = vmul.f32 %v3901_v3, %v387_v38  ;;  %vm464_vm4 = vweird.f32 %v3901_v3 }
 0x13d   : > { %vm465_vm5 = vmor %vm463_vm3, %vm464_vm4 }
 0x13e   : > { %v459_v5 = vmul.f32 %v3901_v3, %v458_v32 }
 0x140   : > { %v460_v11 = vmul.f32 0.5, %v459_v5 }
 0x142   : > { %v461_v14 = vsub.f32 1.5, %v460_v11 }
 0x144   : > { %v462_v16 = vmul.f32 %v3901_v3, %v461_v14 }
 0x146   : > { %v466_v12 = vsel %vm465_vm5, %v3901_v3, %v462_v16 }
 0x147   : > { %841 = vmatmul.bf16.gmra.mxu0 %v615_v2  ;;  %v563_v31 = vmul.f32 %v466_v12, %v4291_v44 }
 0x148   : > { %890 = vmatmul.bf16.gmra.mxu1 %v615_v2  ;;  %939 = vmatmul.bf16.gmra.mxu2 %v615_v2 }
 0x149   : > { %988 = vmatmul.bf16.gmra.mxu3 %v615_v2  ;;  %v583_v51 = vmul.f32 %v4559_v42, %v563_v31  ;;  %v4696_v2 = vperm.slane %v653_v49, 1 }
 0x14b   : > { %v603_v53 = vadd.f32 %v4578_v1, %v583_v51 }
 0x181   : > { %v348_v4 = vpop.xlane.xlu1 %347 }
 0x182   : > { %v372_v6 = vmul.f32 %v348_v4, %v4243_v13 }
 0x184   : > { %v388_v28 = vadd.f32 1e-05, %v372_v6 }
 0x186   : > { %3902 = vrsqrt.f32 %v388_v28  ;;  %vm473_vm7 = vweird.f32 %v388_v28 }
 0x189   : > { %v350_v15 = vpop.xlane.xlu1 %349 }
 0x18a   : > { %v373_v58 = vmul.f32 %v350_v15, %v4243_v13 }
 0x18c   : > { %v3903_v46 = vpop.eup %3902  ;;  %v4651_v19 = vadd.f32 1e-05, %v373_v58 }
 0x18d   : > { %v468_v60 = vmul.f32 %v3903_v46, %v388_v28  ;;  %vm474_vm6 = vweird.f32 %v3903_v46 }
 0x18e   : > { %vm475_vm8 = vmor %vm473_vm7, %vm474_vm6  ;;  %3904 = vrsqrt.f32 %v4651_v19  ;;  %vm483_vm9 = vweird.f32 %v4651_v19 }
 0x18f   : > { %v469_v47 = vmul.f32 %v3903_v46, %v468_v60 }
 0x191   : > { %v470_v18 = vmul.f32 0.5, %v469_v47  ;;  %v356_v20 = vpop.xlane.xlu0 %355  ;;  %v277_v23 = vpop.xlane.xlu1 %276 }
 0x192   : > { %v352_v22 = vpop.xlane.xlu2 %351  ;;  %v376_v26 = vmul.f32 %v356_v20, %v4243_v13  ;;  %v300_v30 = vmul.f32 %v4243_v13, %v277_v23  ;;  %v4720_v20 = vperm.slane %v653_v49, 2 }
 0x193   : > { %v471_v21 = vsub.f32 1.5, %v470_v18  ;;  %v374_v27 = vmul.f32 %v352_v22, %v4243_v13 }
 0x194   : > { %v4657_v35 = vadd.f32 1e-05, %v376_v26  ;;  %v4663_v8 = vsub.f32 %v4564_v54, %v300_v30  ;;  %v4672_v52 = vpop.eup %3904 }
 0x195   : > { %v472_v34 = vmul.f32 %v3903_v46, %v471_v21  ;;  %v4660_v40 = vadd.f32 1e-05, %v374_v27  ;;  %v478_v55 = vmul.f32 %v4672_v52, %v4651_v19  ;;  %vm484_vm10 = vweird.f32 %v4672_v52 }
 0x196   : > { %7004 = vst [vmem:[#allocation2_spill] sm:$0xff] %v4663_v8  ;;  %3906 = vrsqrt.f32 %v4657_v35  ;;  %v332_v44 = vmul.f32 %v4663_v8, %v4663_v8  ;;  %vm513_vm12 = vweird.f32 %v4657_v35  ;;  %vm4740_vm15 = vmor %vm483_vm9, %vm484_vm10 }
 0x197   : > { %v476_v45 = vsel %vm475_vm8, %v3903_v46, %v472_v34  ;;  %3908 = vrsqrt.f32 %v4660_v40  ;;  %v479_v62 = vmul.f32 %v4672_v52, %v478_v55  ;;  %vm493_vm11 = vweird.f32 %v4660_v40 }
 0x198   : > { %v564_v50 = vmul.f32 %v476_v45, %v4511_v61  ;;  %363 = vadd.xlane.f32.xlu1 %v332_v44 }
 0x199   : > { %v358_v56 = vpop.xlane.xlu1 %357  ;;  %v480_v6 = vmul.f32 0.5, %v479_v62 }
 0x19a   : > { %v584_v33 = vmul.f32 %v4559_v42, %v564_v50  ;;  %v354_v24 = vpop.xlane.xlu2 %353  ;;  %v377_v0 = vmul.f32 %v358_v56, %v4243_v13 }
 0x19b   : > { %v375_v17 = vmul.f32 %v354_v24, %v4243_v13  ;;  %v481_v16 = vsub.f32 1.5, %v480_v6 }
 0x19c   : > { %v604_v54 = vadd.f32 %v4578_v1, %v584_v33  ;;  %v4676_v61 = vpop.eup %3906  ;;  %v4702_v28 = vadd.f32 1e-05, %v377_v0 }
 0x19d   : > { %v4678_v43 = vpop.eup %3908  ;;  %v508_v57 = vmul.f32 %v4676_v61, %v4657_v35  ;;  %v4693_v63 = vadd.f32 1e-05, %v375_v17  ;;  %v482_v27 = vmul.f32 %v4672_v52, %v481_v16  ;;  %vm514_vm13 = vweird.f32 %v4676_v61 }
 0x19e   : > { %v616_v39 = vpack.c.bf16 %v604_v54, %v603_v53  ;;  %v488_v36 = vmul.f32 %v4678_v43, %v4660_v40  ;;  %vm494_vm14 = vweird.f32 %v4678_v43  ;;  %vm4747_vm0 = vmor %vm513_vm12, %vm514_vm13  ;;  %v4760_v54 = vperm.slane %v653_v49, 3 }
 0x19f   : > { %v509_v3 = vmul.f32 %v4676_v61, %v508_v57  ;;  %3910 = vrsqrt.f32 %v4693_v63  ;;  %vm4753_vm1 = vmor %vm493_vm11, %vm494_vm14  ;;  %v486_v53 = vsel %vm4740_vm15, %v4672_v52, %v482_v27  ;;  %vm503_vm8 = vweird.f32 %v4693_v63 }
 0x1a0   : > { %846 = vmatmul.bf16.gmra.mxu0 %v616_v39  ;;  %895 = vmatmul.bf16.gmra.mxu1 %v616_v39  ;;  %v489_v38 = vmul.f32 %v4678_v43, %v488_v36  ;;  %3912 = vrsqrt.f32 %v4702_v28  ;;  %v565_v52 = vmul.f32 %v486_v53, %v4521_v9 }
 0x1a1   : > { %944 = vmatmul.bf16.gmra.mxu2 %v616_v39  ;;  %993 = vmatmul.bf16.gmra.mxu3 %v616_v39  ;;  %v510_v46 = vmul.f32 0.5, %v509_v3 }
 0x1a2   : > { %v360_v32 = vpop.xlane.xlu2 %359  ;;  %v490_v15 = vmul.f32 0.5, %v489_v38 }
 0x1a3   : > { %v378_v14 = vmul.f32 %v360_v32, %v4243_v13  ;;  %v511_v22 = vsub.f32 1.5, %v510_v46 }
 0x1a4   : > { %v832_v25 = vpop.f32.mrf.mxu0  ;;  %v491_v21 = vsub.f32 1.5, %v490_v15 }
 0x1a5   : > { %v833_v4 = vadd.f32 %v832_v25, %v4690_v59  ;;  %v881_v5 = vpop.f32.mrf.mxu1  ;;  %v4714_v18 = vpop.eup %3910  ;;  %v4718_v12 = vadd.f32 1e-05, %v378_v14  ;;  %v512_v51 = vmul.f32 %v4676_v61, %v511_v22  ;;  %v6995_v22 = vmov 1.0  }
 0x1a6   : > { %v882_v11 = vadd.f32 %v881_v5, %v4696_v2  ;;  %v498_v30 = vmul.f32 %v4714_v18, %v4693_v63  ;;  %v4734_v50 = vpop.eup %3912  ;;  %v492_v35 = vmul.f32 %v4678_v43, %v491_v21  ;;  %vm504_vm9 = vweird.f32 %v4714_v18 }
 0x1a7   : > { %v4706_v60 = vmul.f32 0.70710677, %v833_v4  ;;  %3914 = vrsqrt.f32 %v4718_v12  ;;  %v518_v17 = vmul.f32 %v4734_v50, %v4702_v28  ;;  %v516_v49 = vsel %vm4747_vm0, %v4676_v61, %v512_v51  ;;  %vm4885_vm0 = vmor %vm503_vm8, %vm504_vm9 }
 0x1a8   : > { %v4709_v58 = vmul.f32 0.70710677, %v882_v11  ;;  %v499_v55 = vmul.f32 %v4714_v18, %v498_v30  ;;  %v496_v56 = vsel %vm4753_vm1, %v4678_v43, %v492_v35  ;;  %v4789_v38 = vmul.f32 0.5, %v833_v4 }
 0x1a9   : > { %v4712_v47 = vand.u32 2147483647, %v4706_v60  ;;  %v519_v43 = vmul.f32 %v4734_v50, %v518_v17  ;;  %v4792_v61 = vmul.f32 %v496_v56, %v4551_v41  ;;  %v4795_v3 = vmul.f32 %v516_v49, %v4544_v37 }
 0x1aa   : > { %v4724_v26 = vand.u32 2147483647, %v4709_v58  ;;  %v4786_v25 = vmul.f32 0.5, %v499_v55  ;;  %v4797_v32 = vmul.f32 0.5, %v882_v11  ;;  %vm1147_vm2 = vcmp.lt.f32.partialorder %v4706_v60, 0.0 }
 0x1ab   : > { %v1339_v23 = vmul.f32 0.3275911, %v4712_v47  ;;  %v930_v45 = vpop.f32.mrf.mxu2  ;;  %v3003_v6 = vsub.f32 0.0, %v4712_v47  ;;  %v4810_v37 = vmul.f32 %v4559_v42, %v565_v52  ;;  %v4813_v16 = vmul.f32 0.5, %v519_v43 }
 0x1ac   : > { %v1340_v34 = vmul.f32 0.3275911, %v4724_v26  ;;  %v4758_v19 = vadd.f32 %v930_v45, %v4720_v20  ;;  %v979_v40 = vpop.f32.mrf.mxu3  ;;  %v501_v46 = vsub.f32 1.5, %v4786_v25  ;;  %v834_v24 = vpop.f32.mrf.mxu0  ;;  %vm1148_vm10 = vcmp.lt.f32.partialorder %v4709_v58, 0.0 }
 0x1ad   : > { %v1403_v31 = vadd.f32 1.0, %v1339_v23  ;;  %v4777_v36 = vpop.eup %3914  ;;  %v4784_v62 = vadd.f32 %v979_v40, %v4760_v54  ;;  %v4817_v23 = vsel %vm1147_vm2, -1.0, %v6995_v22  ;;  %v3067_v45 = vmul.f32 %v3003_v6, %v4712_v47 }
 0x1ae   : > { %v4768_v39 = vadd.f32 1.0, %v1340_v34  ;;  %v4781_v57 = vmul.f32 0.70710677, %v4758_v19  ;;  %v528_v5 = vmul.f32 %v4777_v36, %v4718_v12  ;;  %v3004_v49 = vsub.f32 0.0, %v4724_v26 }
 0x1af   : > { %3916 = vrcp.f32 %v1403_v31  ;;  %v1476_v15 = vand.u32 2147483647, %v1403_v31  ;;  %v4807_v41 = vmul.f32 0.70710677, %v4784_v62  ;;  %v1478_v21 = vand.u32 2147483648, %v1403_v31 }
 0x1b0   : > { %3918 = vrcp.f32 %v4768_v39  ;;  %v4804_v14 = vand.u32 2147483647, %v4781_v57  ;;  %v529_v34 = vmul.f32 %v4777_v36, %v528_v5  ;;  %vm1472_vm4 = vweird.f32 %v1403_v31 }
 0x1b1   : > { %v4825_v35 = vand.u32 2147483647, %v4807_v41  ;;  %vm1477_vm5 = vcmp.eq.f32.partialorder %v1476_v15, 8.507059e+37  ;;  %v1479_v53 = vor.u32 1.1754944e-38, %v1478_v21  ;;  %v1491_v55 = vand.u32 2147483647, %v4768_v39 }
 0x1b2   : > { %v1341_v60 = vmul.f32 0.3275911, %v4804_v14  ;;  %v1493_v17 = vand.u32 2147483648, %v4768_v39  ;;  %v4838_v52 = vadd.f32 %v834_v24, %v4690_v59  ;;  %vm1487_vm11 = vweird.f32 %v4768_v39  ;;  %v883_v24 = vpop.f32.mrf.mxu1 }
 0x1b3   : > { %v1342_v56 = vmul.f32 0.3275911, %v4825_v35  ;;  %v3131_v5 = vmul.f32 1.442695, %v3067_v45  ;;  %vm1492_vm13 = vcmp.eq.f32.partialorder %v1491_v55, 8.507059e+37  ;;  %v4860_v45 = vmul.f32 %v4714_v18, %v501_v46 }
 0x1b4   : > { %v4822_v44 = vadd.f32 1.0, %v1341_v60  ;;  %v1494_v6 = vor.u32 1.1754944e-38, %v1493_v17 }
 0x1b5   : > { %v3917_v0 = vpop.eup %3916  ;;  %v4842_v43 = vadd.f32 1.0, %v1342_v56 }
 0x1b6   : > { %v1468_v9 = vmul.f32 %v3917_v0, %v1403_v31  ;;  %v3919_v11 = vpop.eup %3918  ;;  %vm1473_vm3 = vweird.f32 %v3917_v0  ;;  %3920 = vrcp.f32 %v4822_v44  ;;  %v1506_v55 = vand.u32 2147483647, %v4822_v44 }
 0x1b7   : > { %v1483_v30 = vmul.f32 %v3919_v11, %v4768_v39  ;;  %vm1474_vm6 = vmor %vm1472_vm4, %vm1473_vm3  ;;  %vm1488_vm7 = vweird.f32 %v3919_v11  ;;  %3922 = vrcp.f32 %v4842_v43  ;;  %v1508_v56 = vand.u32 2147483648, %v4822_v44 }
 0x1b8   : > { %v1469_v4 = vsub.f32 1.0, %v1468_v9  ;;  %v4844_v9 = vmul.f32 0.5, %v529_v34  ;;  %vm1489_vm12 = vmor %vm1487_vm11, %vm1488_vm7  ;;  %v4857_v34 = vmul.f32 0.70710677, %v4838_v52  ;;  %3924 = vpow2.f32 %v3131_v5 }
 0x1b9   : > { %v1484_v33 = vsub.f32 1.0, %v1483_v30  ;;  %v3068_v30 = vmul.f32 %v3004_v49, %v4724_v26  ;;  %vm1502_vm15 = vweird.f32 %v4822_v44  ;;  %vm1507_vm1 = vcmp.eq.f32.partialorder %v1506_v55, 8.507059e+37 }
 0x1ba   : > { %v1470_v27 = vmul.f32 %v3917_v0, %v1469_v4  ;;  %v3005_v4 = vsub.f32 0.0, %v4804_v14  ;;  %v4871_v49 = vand.u32 2147483647, %v4857_v34  ;;  %v1523_v58 = vand.u32 2147483648, %v4842_v43 }
 0x1bb   : > { %v1485_v47 = vmul.f32 %v3919_v11, %v1484_v33  ;;  %vm1517_vm4 = vweird.f32 %v4842_v43  ;;  %vm1149_vm7 = vcmp.lt.f32.partialorder %v4781_v57, 0.0 }
 0x1bc   : > { %v1471_v51 = vadd.f32 %v3917_v0, %v1470_v27  ;;  %v3921_v60 = vpop.eup %3920  ;;  %v4851_v27 = vsel %vm1148_vm10, -1.0, %v6995_v22  ;;  %v3069_v26 = vmul.f32 %v3005_v4, %v4804_v14  ;;  %v1343_v4 = vmul.f32 0.3275911, %v4871_v49 }
 0x1bd   : > { %v1498_v33 = vmul.f32 %v3921_v60, %v4822_v44  ;;  %vm1503_vm14 = vweird.f32 %v3921_v60 }
 0x1be   : > { %v1475_v40 = vsel %vm1474_vm6, %v3917_v0, %v1471_v51  ;;  %v1486_v0 = vadd.f32 %v3919_v11, %v1485_v47  ;;  %v3133_v47 = vmul.f32 1.442695, %v3068_v30  ;;  %v3135_v14 = vmul.f32 1.442695, %v3069_v26  ;;  %vm1504_vm2 = vmor %vm1502_vm15, %vm1503_vm14 }
 0x1bf   : > { %v4833_v31 = vsel %vm1477_vm5, %v1479_v53, %v1475_v40  ;;  %v1499_v46 = vsub.f32 1.0, %v1498_v33  ;;  %v1521_v26 = vand.u32 2147483647, %v4842_v43  ;;  %v7016_v30 = vsub.f32 1.5, %v4844_v9 }
 0x1c0   : > { %v2427_v25 = vmul.f32 1.0614054, %v4833_v31  ;;  %v1490_v21 = vsel %vm1489_vm12, %v3919_v11, %v1486_v0  ;;  %v3923_v0 = vpop.eup %3922  ;;  %vm1150_vm12 = vcmp.lt.f32.partialorder %v4807_v41, 0.0 }
 0x1c1   : > { %v4853_v39 = vsel %vm1492_vm13, %v1494_v6, %v1490_v21  ;;  %v1500_v21 = vmul.f32 %v3921_v60, %v1499_v46  ;;  %v1513_v5 = vmul.f32 %v3923_v0, %v4842_v43  ;;  %vm1518_vm3 = vweird.f32 %v3923_v0 }
 0x1c2   : > { %v2491_v15 = vadd.f32 -1.4531521, %v2427_v25  ;;  %v2428_v51 = vmul.f32 1.0614054, %v4853_v39  ;;  %v4874_v25 = vadd.f32 %v883_v24, %v4696_v2  ;;  %v1509_v24 = vor.u32 1.1754944e-38, %v1508_v56  ;;  %vm1519_vm5 = vmor %vm1517_vm4, %vm1518_vm3 }
 0x1c3   : > { %v1501_v33 = vadd.f32 %v3921_v60, %v1500_v21  ;;  %v1514_v44 = vsub.f32 1.0, %v1513_v5  ;;  %vm1522_vm6 = vcmp.eq.f32.partialorder %v1521_v26, 8.507059e+37 }
 0x1c4   : > { %v2555_v11 = vmul.f32 %v2491_v15, %v4833_v31  ;;  %v2492_v40 = vadd.f32 -1.4531521, %v2428_v51 }
 0x1c5   : > { %v1505_v53 = vsel %vm1504_vm2, %v3921_v60, %v1501_v33  ;;  %v4905_v60 = vmul.f32 0.70710677, %v4874_v25  ;;  %vm1151_vm2 = vcmp.lt.f32.partialorder %v4857_v34, 0.0 }
 0x1c6   : > { %v2619_v17 = vadd.f32 1.4214138, %v2555_v11  ;;  %v2556_v15 = vmul.f32 %v2492_v40, %v4853_v39  ;;  %v3925_v40 = vpop.eup %3924  ;;  %v4895_v22 = vsel %vm1507_vm1, %v1509_v24, %v1505_v53  ;;  %v3006_v24 = vsub.f32 0.0, %v4825_v35 }
 0x1c7   : > { %v2429_v21 = vmul.f32 1.0614054, %v4895_v22 }
 0x1c8   : > { %v2683_v6 = vmul.f32 %v2619_v17, %v4833_v31  ;;  %v2620_v51 = vadd.f32 1.4214138, %v2556_v15  ;;  %v4890_v17 = vadd.f32 1.0, %v1343_v4 }
 0x1ca   : > { %v2747_v11 = vadd.f32 -0.28449672, %v2683_v6  ;;  %v2684_v63 = vmul.f32 %v2620_v51, %v4853_v39  ;;  %v1515_v6 = vmul.f32 %v3923_v0, %v1514_v44  ;;  %3926 = vrcp.f32 %v4890_v17 }
 0x1cb   : > { %3928 = vpow2.f32 %v3133_v47  ;;  %v1524_v51 = vor.u32 1.1754944e-38, %v1523_v58  ;;  %v586_v58 = vmul.f32 %v4559_v42, %v4792_v61  ;;  %vm1532_vm9 = vweird.f32 %v4890_v17 }
 0x1cc   : > { %v2811_v46 = vmul.f32 %v2747_v11, %v4833_v31  ;;  %v2748_v15 = vadd.f32 -0.28449672, %v2684_v63  ;;  %v1516_v5 = vadd.f32 %v3923_v0, %v1515_v6  ;;  %v2493_v11 = vadd.f32 -1.4531521, %v2429_v21 }
 0x1cd   : > { %3930 = vpow2.f32 %v3135_v14 }
 0x1ce   : > { %v2875_v56 = vadd.f32 0.2548296, %v2811_v46  ;;  %v2812_v4 = vmul.f32 %v2748_v15, %v4853_v39  ;;  %v1520_v33 = vsel %vm1519_vm5, %v3923_v0, %v1516_v5  ;;  %v2557_v46 = vmul.f32 %v2493_v11, %v4895_v22 }
 0x1cf   : > { %v4911_v43 = vsel %vm1522_vm6, %v1524_v51, %v1520_v33  ;;  %v3070_v5 = vmul.f32 %v3006_v24, %v4825_v35 }
 0x1d0   : > { %v2939_v53 = vmul.f32 %v2875_v56, %v4833_v31  ;;  %v2876_v47 = vadd.f32 0.2548296, %v2812_v4  ;;  %v3927_v63 = vpop.eup %3926  ;;  %v2430_v6 = vmul.f32 1.0614054, %v4911_v43  ;;  %v1536_v31 = vand.u32 2147483647, %v4890_v17 }
 0x1d1   : > { %v4916_v56 = vand.u32 2147483647, %v4905_v60  ;;  %v2621_v26 = vadd.f32 1.4214138, %v2557_v46  ;;  %v3929_v15 = vpop.eup %3928  ;;  %vm1533_vm8 = vweird.f32 %v3927_v63  ;;  %v3137_v8 = vmul.f32 1.442695, %v3070_v5 }
 0x1d2   : > { %v3259_v44 = vmul.f32 %v3925_v40, %v2939_v53  ;;  %v2940_v14 = vmul.f32 %v2876_v47, %v4853_v39  ;;  %v1528_v40 = vmul.f32 %v3927_v63, %v4890_v17  ;;  %v2494_v21 = vadd.f32 -1.4531521, %v2430_v6  ;;  %vm1534_vm10 = vmor %vm1532_vm9, %vm1533_vm8 }
 0x1d3   : > { %v1538_v53 = vand.u32 2147483648, %v4890_v17  ;;  %v1344_v4 = vmul.f32 0.3275911, %v4916_v56  ;;  %v2685_v42 = vmul.f32 %v2621_v26, %v4895_v22  ;;  %v3931_v39 = vpop.eup %3930  ;;  %v606_v47 = vadd.f32 %v4578_v1, %v586_v58 }
 0x1d4   : > { %v3323_v0 = vsub.f32 1.0, %v3259_v44  ;;  %v3260_v51 = vmul.f32 %v3929_v15, %v2940_v14  ;;  %v1529_v61 = vsub.f32 1.0, %v1528_v40  ;;  %v2558_v33 = vmul.f32 %v2494_v21, %v4911_v43  ;;  %v932_v21 = vpop.f32.mrf.mxu2 }
 0x1d5   : > { %v4929_v44 = vadd.f32 1.0, %v1344_v4  ;;  %v2749_v24 = vadd.f32 -0.28449672, %v2685_v42  ;;  %v605_v26 = vadd.f32 %v4578_v1, %v4810_v37  ;;  %vm1537_vm11 = vcmp.eq.f32.partialorder %v1536_v31, 8.507059e+37 }
 0x1d6   : > { %v3387_v11 = vmul.f32 %v3323_v0, %v4817_v23  ;;  %v3324_v35 = vsub.f32 1.0, %v3260_v51  ;;  %v1530_v6 = vmul.f32 %v3927_v63, %v1529_v61  ;;  %v2622_v55 = vadd.f32 1.4214138, %v2558_v33 }
 0x1d7   : > { %3932 = vrcp.f32 %v4929_v44  ;;  %v2813_v0 = vmul.f32 %v2749_v24, %v4895_v22  ;;  %v1539_v15 = vor.u32 1.1754944e-38, %v1538_v53  ;;  %v3007_v1 = vsub.f32 0.0, %v4871_v49 }
 0x1d8   : > { %v3451_v46 = vadd.f32 1.0, %v3387_v11  ;;  %v3388_v23 = vmul.f32 %v3324_v35, %v4851_v27  ;;  %v1531_v14 = vadd.f32 %v3927_v63, %v1530_v6  ;;  %v2686_v40 = vmul.f32 %v2622_v55, %v4911_v43  ;;  %v981_v11 = vpop.f32.mrf.mxu3 }
 0x1d9   : > { %v2877_v5 = vadd.f32 0.2548296, %v2813_v0  ;;  %v617_v27 = vpack.c.bf16 %v606_v47, %v605_v26  ;;  %3934 = vpow2.f32 %v3137_v8  ;;  %v4949_v31 = vadd.f32 %v932_v21, %v4720_v20 }
 0x1da   : > { %v3515_v58 = vmul.f32 %v3451_v46, %v4789_v38  ;;  %v3452_v17 = vadd.f32 1.0, %v3388_v23  ;;  %v1535_v4 = vsel %vm1534_vm10, %v3927_v63, %v1531_v14  ;;  %v2750_v51 = vadd.f32 -0.28449672, %v2686_v40 }
 0x1db   : > { %v4942_v42 = vsel %vm1537_vm11, %v1539_v15, %v1535_v4  ;;  %v2941_v37 = vmul.f32 %v2877_v5, %v4895_v22  ;;  %851 = vmatmul.bf16.gmra.mxu0 %v617_v27  ;;  %900 = vmatmul.bf16.gmra.mxu1 %v617_v27  ;;  %v1021_v8 = vmul.f32 0.5, %v4758_v19  ;;  %v7013_v53 = vmov 1.0  }
 0x1dc   : > { %v3516_v38 = vmul.f32 %v3452_v17, %v4797_v32  ;;  %v2431_v55 = vmul.f32 1.0614054, %v4942_v42  ;;  %v1213_v32 = vsel %vm1149_vm7, -1.0, %v7013_v53  ;;  %v2814_v22 = vmul.f32 %v2750_v51, %v4911_v43  ;;  %949 = vmatmul.bf16.gmra.mxu2 %v617_v27  ;;  %998 = vmatmul.bf16.gmra.mxu3 %v617_v27 }
 0x1dd   : > { %v3933_v63 = vpop.eup %3932  ;;  %v4962_v61 = vadd.f32 %v981_v11, %v4760_v54  ;;  %v3261_v47 = vmul.f32 %v3931_v39, %v2941_v37  ;;  %v3071_v19 = vmul.f32 %v3007_v1, %v4871_v49  ;;  %v4968_v57 = vmul.f32 0.70710677, %v4949_v31 }
 0x1de   : > { %v3579_v33 = vpack.c.bf16 %v3516_v38, %v3515_v58  ;;  %v2495_v46 = vadd.f32 -1.4531521, %v2431_v55  ;;  %v1543_v35 = vmul.f32 %v3933_v63, %v4929_v44  ;;  %v2878_v24 = vadd.f32 0.2548296, %v2814_v22 }
 0x1df   : > { %v3325_v6 = vsub.f32 1.0, %v3261_v47  ;;  %v1553_v14 = vand.u32 2147483648, %v4929_v44  ;;  %v3935_v26 = vpop.eup %3934  ;;  %v1551_v58 = vand.u32 2147483647, %v4929_v44  ;;  %v4976_v40 = vand.u32 2147483647, %v4968_v57 }
 0x1e0   : > { %3611 = vst [vmem:[%s4954_s28] sm:$0xff] %v3579_v33  ;;  %v2559_v23 = vmul.f32 %v2495_v46, %v4942_v42  ;;  %v1544_v0 = vsub.f32 1.0, %v1543_v35  ;;  %v2942_v39 = vmul.f32 %v2878_v24, %v4911_v43  ;;  %v4979_v49 = vmul.f32 0.70710677, %v4962_v61  ;;  %v837_v46 = vpop.f32.mrf.mxu0 }
 0x1e1   : > { %v3389_v15 = vmul.f32 %v3325_v6, %v1213_v32  ;;  %vm1548_vm13 = vweird.f32 %v3933_v63  ;;  %v3139_v4 = vmul.f32 1.442695, %v3071_v19  ;;  %v3008_v27 = vsub.f32 0.0, %v4916_v56 }
 0x1e2   : > { %v2623_v21 = vadd.f32 1.4214138, %v2559_v23  ;;  %v1545_v17 = vmul.f32 %v3933_v63, %v1544_v0  ;;  %v3262_v5 = vmul.f32 %v3935_v26, %v2942_v39  ;;  %v1345_v11 = vmul.f32 0.3275911, %v4976_v40 }
 0x1e3   : > { %vm1547_vm14 = vweird.f32 %v4929_v44  ;;  %v1554_v1 = vor.u32 1.1754944e-38, %v1553_v14  ;;  %v3453_v38 = vadd.f32 1.0, %v3389_v15  ;;  %v4988_v32 = vand.u32 2147483647, %v4979_v49 }
 0x1e4   : > { %v2687_v43 = vmul.f32 %v2623_v21, %v4942_v42  ;;  %v1546_v51 = vadd.f32 %v3933_v63, %v1545_v17  ;;  %v3326_v37 = vsub.f32 1.0, %v3262_v5  ;;  %vm1549_vm15 = vmor %vm1547_vm14, %vm1548_vm13  ;;  %v4985_v55 = vadd.f32 1.0, %v1345_v11 }
 0x1e5   : > { %v1214_v22 = vsel %vm1150_vm12, -1.0, %v7013_v53  ;;  %vm1552_vm1 = vcmp.eq.f32.partialorder %v1551_v58, 8.507059e+37  ;;  %v3072_v44 = vmul.f32 %v3008_v27, %v4916_v56  ;;  %v1022_v19 = vmul.f32 0.5, %v4784_v62 }
 0x1e6   : > { %v2751_v33 = vadd.f32 -0.28449672, %v2687_v43  ;;  %v1550_v47 = vsel %vm1549_vm15, %v3933_v63, %v1546_v51  ;;  %v3390_v35 = vmul.f32 %v3326_v37, %v1214_v22  ;;  %3936 = vrcp.f32 %v4985_v55  ;;  %v886_v43 = vpop.f32.mrf.mxu1 }
 0x1e7   : > { %v4993_v24 = vsel %vm1552_vm1, %v1554_v1, %v1550_v47  ;;  %3938 = vpow2.f32 %v3139_v4  ;;  %v3517_v41 = vmul.f32 %v3453_v38, %v1021_v8  ;;  %v1346_v63 = vmul.f32 0.3275911, %v4988_v32 }
 0x1e8   : > { %v2815_v6 = vmul.f32 %v2751_v33, %v4942_v42  ;;  %v2432_v23 = vmul.f32 1.0614054, %v4993_v24  ;;  %v3454_v0 = vadd.f32 1.0, %v3390_v35  ;;  %v5002_v14 = vadd.f32 %v837_v46, %v4690_v59 }
 0x1e9   : > { %v7014_v56 = vsel %vm4885_vm0, %v4714_v18, %v4860_v45  ;;  %v7015_v62 = vsub.f32 1.5, %v4813_v16  ;;  %v3141_v21 = vmul.f32 1.442695, %v3072_v44  ;;  %v5018_v17 = vadd.f32 1.0, %v1346_v63 }
 0x1ea   : > { %v5010_v26 = vmul.f32 %v7014_v56, %v4591_v10  ;;  %v2879_v8 = vadd.f32 0.2548296, %v2815_v6  ;;  %v2496_v58 = vadd.f32 -1.4531521, %v2432_v23  ;;  %v3518_v15 = vmul.f32 %v3454_v0, %v1022_v19 }
 0x1eb   : > { %v5015_v39 = vmul.f32 %v4734_v50, %v7015_v62  ;;  %v5023_v18 = vmul.f32 %v4777_v36, %v7016_v30  ;;  %vm1152_vm0 = vcmp.lt.f32.partialorder %v4905_v60, 0.0  ;;  %v5029_v4 = vmul.f32 0.5, %v4838_v52 }
 0x1ec   : > { %v2943_v10 = vmul.f32 %v2879_v8, %v4942_v42  ;;  %v2560_v16 = vmul.f32 %v2496_v58, %v4993_v24  ;;  %v3937_v45 = vpop.eup %3936  ;;  %v3580_v5 = vpack.c.bf16 %v3518_v15, %v3517_v41  ;;  %3940 = vrcp.f32 %v5018_v17 }
 0x1ed   : > { %v5033_v34 = vmul.f32 0.70710677, %v5002_v14  ;;  %v3939_v9 = vpop.eup %3938  ;;  %v1215_v27 = vsel %vm1151_vm2, -1.0, %v7013_v53  ;;  %v5037_v11 = vmul.f32 0.5, %v4874_v25  ;;  %v1558_v60 = vmul.f32 %v3937_v45, %v4985_v55 }
 0x1ee   : > { %v2624_v42 = vadd.f32 1.4214138, %v2560_v16  ;;  %3612 = vst [vmem:[%s4954_s28 + $0x8] sm:$0xff] %v3580_v5  ;;  %v3263_v51 = vmul.f32 %v3939_v9, %v2943_v10  ;;  %v5042_v52 = vsel %vm1152_vm0, -1.0, %v7013_v53  ;;  %3942 = vpow2.f32 %v3141_v21 }
 0x1ef   : > { %vm1153_vm3 = vcmp.lt.f32.partialorder %v4968_v57, 0.0  ;;  %v5047_v38 = vmul.f32 0.5, %v4949_v31  ;;  %v1559_v37 = vsub.f32 1.0, %v1558_v60  ;;  %v5050_v25 = vmul.f32 0.5, %v4962_v61 }
 0x1f0   : > { %v2688_v1 = vmul.f32 %v2624_v42, %v4993_v24  ;;  %v1566_v22 = vand.u32 2147483647, %v4985_v55  ;;  %v1568_v33 = vand.u32 2147483648, %v4985_v55  ;;  %v5055_v47 = vand.u32 2147483647, %v5033_v34 }
 0x1f1   : > { %v5058_v46 = vadd.f32 %v886_v43, %v4696_v2  ;;  %v5061_v35 = vsel %vm1153_vm3, -1.0, %v7013_v53  ;;  %v1560_v31 = vmul.f32 %v3937_v45, %v1559_v37  ;;  %vm1563_vm4 = vweird.f32 %v3937_v45  ;;  %v935_v43 = vpop.f32.mrf.mxu2 }
 0x1f2   : > { %v2752_v57 = vadd.f32 -0.28449672, %v2688_v1  ;;  %v3941_v44 = vpop.eup %3940  ;;  %v3327_v19 = vsub.f32 1.0, %v3263_v51  ;;  %vm1562_vm5 = vweird.f32 %v4985_v55  ;;  %v3009_v61 = vsub.f32 0.0, %v4976_v40 }
 0x1f3   : > { %v1347_v6 = vmul.f32 0.3275911, %v5055_v47  ;;  %v1561_v41 = vadd.f32 %v3937_v45, %v1560_v31  ;;  %v1573_v0 = vmul.f32 %v3941_v44, %v5018_v17  ;;  %v3010_v63 = vsub.f32 0.0, %v4988_v32  ;;  %vm1564_vm6 = vmor %vm1562_vm5, %vm1563_vm4 }
 0x1f4   : > { %v2816_v23 = vmul.f32 %v2752_v57, %v4993_v24  ;;  %v3943_v56 = vpop.eup %3942  ;;  %vm1567_vm7 = vcmp.eq.f32.partialorder %v1566_v22, 8.507059e+37  ;;  %v1569_v62 = vor.u32 1.1754944e-38, %v1568_v33  ;;  %v5072_v58 = vmul.f32 0.70710677, %v5058_v46 }
 0x1f5   : > { %v5069_v8 = vadd.f32 1.0, %v1347_v6  ;;  %v1565_v15 = vsel %vm1564_vm6, %v3937_v45, %v1561_v41  ;;  %v1574_v21 = vsub.f32 1.0, %v1573_v0  ;;  %v1581_v30 = vand.u32 2147483647, %v5018_v17 }
 0x1f6   : > { %v2880_v55 = vadd.f32 0.2548296, %v2816_v23  ;;  %v3391_v10 = vmul.f32 %v3327_v19, %v1215_v27  ;;  %v5075_v16 = vsel %vm1567_vm7, %v1569_v62, %v1565_v15  ;;  %v1583_v5 = vand.u32 2147483648, %v5018_v17 }
 0x1f7   : > { %3944 = vrcp.f32 %v5069_v8  ;;  %v2433_v42 = vmul.f32 1.0614054, %v5075_v16  ;;  %v1575_v60 = vmul.f32 %v3941_v44, %v1574_v21  ;;  %vm1578_vm8 = vweird.f32 %v3941_v44 }
 0x1f8   : > { %v2944_v9 = vmul.f32 %v2880_v55, %v4993_v24  ;;  %v3073_v51 = vmul.f32 %v3009_v61, %v4976_v40  ;;  %vm1154_vm9 = vcmp.lt.f32.partialorder %v4979_v49, 0.0  ;;  %v3074_v45 = vmul.f32 %v3010_v63, %v4988_v32 }
 0x1f9   : > { %v5085_v27 = vand.u32 2147483647, %v5072_v58  ;;  %v2497_v37 = vadd.f32 -1.4531521, %v2433_v42  ;;  %v1576_v22 = vadd.f32 %v3941_v44, %v1575_v60  ;;  %vm1577_vm10 = vweird.f32 %v5018_v17 }
 0x1fa   : > { %v3264_v1 = vmul.f32 %v3943_v56, %v2944_v9  ;;  %v3455_v24 = vadd.f32 1.0, %v3391_v10  ;;  %vm1579_vm11 = vmor %vm1577_vm10, %vm1578_vm8  ;;  %v1584_v33 = vor.u32 1.1754944e-38, %v1583_v5  ;;  %v5090_v31 = vadd.f32 %v935_v43, %v4720_v20  ;;  %v984_v43 = vpop.f32.mrf.mxu3 }
 0x1fb   : > { %v1348_v57 = vmul.f32 0.3275911, %v5085_v27  ;;  %v2561_v19 = vmul.f32 %v2497_v37, %v5075_v16  ;;  %v1580_v32 = vsel %vm1579_vm11, %v3941_v44, %v1576_v22  ;;  %vm1582_vm12 = vcmp.eq.f32.partialorder %v1581_v30, 8.507059e+37 }
 0x1fc   : > { %v3328_v40 = vsub.f32 1.0, %v3264_v1  ;;  %v3143_v6 = vmul.f32 1.442695, %v3073_v51  ;;  %v5096_v23 = vsel %vm1154_vm9, -1.0, %v7013_v53  ;;  %v5098_v17 = vsel %vm1582_vm12, %v1584_v33, %v1580_v32 }
 0x1fd   : > { %v3945_v61 = vpop.eup %3944  ;;  %v5100_v41 = vadd.f32 1.0, %v1348_v57  ;;  %v2625_v63 = vadd.f32 1.4214138, %v2561_v19  ;;  %v2434_v56 = vmul.f32 1.0614054, %v5098_v17  ;;  %v3519_v44 = vmul.f32 %v3455_v24, %v5029_v4 }
 0x1fe   : > { %v3392_v0 = vmul.f32 %v3328_v40, %v5042_v52  ;;  %v1588_v62 = vmul.f32 %v3945_v61, %v5069_v8  ;;  %v3145_v55 = vmul.f32 1.442695, %v3074_v45  ;;  %v5108_v49 = vmul.f32 0.70710677, %v5090_v31 }
 0x1ff   : > { %3946 = vrcp.f32 %v5100_v41  ;;  %v2689_v21 = vmul.f32 %v2625_v63, %v5075_v16  ;;  %v2498_v30 = vadd.f32 -1.4531521, %v2434_v56  ;;  %vm1593_vm13 = vweird.f32 %v3945_v61 }
 0x200   : > { %v3456_v15 = vadd.f32 1.0, %v3392_v0  ;;  %v1589_v10 = vsub.f32 1.0, %v1588_v62  ;;  %3948 = vpow2.f32 %v3143_v6  ;;  %v1596_v52 = vand.u32 2147483647, %v5069_v8 }
 0x201   : > { %v1598_v5 = vand.u32 2147483648, %v5069_v8  ;;  %v2753_v4 = vadd.f32 -0.28449672, %v2689_v21  ;;  %v2562_v42 = vmul.f32 %v2498_v30, %v5098_v17  ;;  %3950 = vpow2.f32 %v3145_v55 }
 0x202   : > { %v3520_v9 = vmul.f32 %v3456_v15, %v5037_v11  ;;  %v1590_v60 = vmul.f32 %v3945_v61, %v1589_v10  ;;  %vm1592_vm14 = vweird.f32 %v5069_v8  ;;  %v3011_v51 = vsub.f32 0.0, %v5055_v47 }
 0x203   : > { %v5118_v45 = vand.u32 2147483647, %v5108_v49  ;;  %v2817_v37 = vmul.f32 %v2753_v4, %v5075_v16  ;;  %v2626_v22 = vadd.f32 1.4214138, %v2562_v42  ;;  %vm1594_vm15 = vmor %vm1592_vm14, %vm1593_vm13  ;;  %vm1597_vm1 = vcmp.eq.f32.partialorder %v1596_v52, 8.507059e+37 }
 0x204   : > { %v3581_v1 = vpack.c.bf16 %v3520_v9, %v3519_v44  ;;  %v1591_v24 = vadd.f32 %v3945_v61, %v1590_v60  ;;  %v1599_v33 = vor.u32 1.1754944e-38, %v1598_v5  ;;  %v5124_v40 = vadd.f32 %v984_v43, %v4760_v54 }
 0x205   : > { %v3947_v11 = vpop.eup %3946  ;;  %v1349_v57 = vmul.f32 0.3275911, %v5118_v45  ;;  %v2881_v8 = vadd.f32 0.2548296, %v2817_v37  ;;  %v2690_v19 = vmul.f32 %v2626_v22, %v5098_v17  ;;  %v3075_v56 = vmul.f32 %v3011_v51, %v5055_v47  ;;  %v839_v37 = vpop.f32.mrf.mxu0 }
 0x206   : > { %3613 = vst [vmem:[%s4954_s28 + $0x10] sm:$0xff] %v3581_v1  ;;  %v1595_v32 = vsel %vm1594_vm15, %v3945_v61, %v1591_v24  ;;  %v1603_v6 = vmul.f32 %v3947_v11, %v5100_v41  ;;  %v3949_v0 = vpop.eup %3948  ;;  %v1611_v62 = vand.u32 2147483647, %v5100_v41  ;;  %vm1608_vm2 = vweird.f32 %v3947_v11 }
 0x207   : > { %v5129_v63 = vsel %vm1597_vm1, %v1599_v33, %v1595_v32  ;;  %v5133_v44 = vadd.f32 1.0, %v1349_v57  ;;  %v2945_v55 = vmul.f32 %v2881_v8, %v5075_v16  ;;  %v2754_v15 = vadd.f32 -0.28449672, %v2690_v19  ;;  %v3951_v10 = vpop.eup %3950 }
 0x208   : > { %v2435_v21 = vmul.f32 1.0614054, %v5129_v63  ;;  %v1604_v30 = vsub.f32 1.0, %v1603_v6  ;;  %v1613_v61 = vand.u32 2147483648, %v5100_v41  ;;  %v5140_v52 = vmul.f32 0.70710677, %v5124_v40 }
 0x209   : > { %3952 = vrcp.f32 %v5133_v44  ;;  %v3265_v47 = vmul.f32 %v3949_v0, %v2945_v55  ;;  %v2818_v5 = vmul.f32 %v2754_v15, %v5098_v17  ;;  %v5144_v16 = vmul.f32 0.5, %v5002_v14 }
 0x20a   : > { %v2499_v9 = vadd.f32 -1.4531521, %v2435_v21  ;;  %v1605_v4 = vmul.f32 %v3947_v11, %v1604_v30  ;;  %vm1155_vm0 = vcmp.lt.f32.partialorder %v5033_v34, 0.0  ;;  %v3147_v42 = vmul.f32 1.442695, %v3075_v56 }
 0x20b   : > { %vm1607_vm3 = vweird.f32 %v5100_v41  ;;  %v3329_v60 = vsub.f32 1.0, %v3265_v47  ;;  %v2882_v43 = vadd.f32 0.2548296, %v2818_v5  ;;  %vm1612_vm5 = vcmp.eq.f32.partialorder %v1611_v62, 8.507059e+37 }
 0x20c   : > { %v2563_v51 = vmul.f32 %v2499_v9, %v5129_v63  ;;  %v1606_v1 = vadd.f32 %v3947_v11, %v1605_v4  ;;  %vm1609_vm4 = vmor %vm1607_vm3, %vm1608_vm2  ;;  %v1614_v22 = vor.u32 1.1754944e-38, %v1613_v61  ;;  %v3012_v24 = vsub.f32 0.0, %v5085_v27 }
 0x20d   : > { %v5152_v14 = vand.u32 2147483647, %v5140_v52  ;;  %v3393_v33 = vmul.f32 %v3329_v60, %v5061_v35  ;;  %v2946_v57 = vmul.f32 %v2882_v43, %v5098_v17  ;;  %v5159_v32 = vsel %vm1155_vm0, -1.0, %v7013_v53 }
 0x20e   : > { %v2627_v41 = vadd.f32 1.4214138, %v2563_v51  ;;  %v1610_v8 = vsel %vm1609_vm4, %v3947_v11, %v1606_v1  ;;  %v5165_v56 = vadd.f32 %v839_v37, %v4690_v59  ;;  %v5169_v17 = vmul.f32 0.5, %v5058_v46 }
 0x20f   : > { %v3953_v19 = vpop.eup %3952  ;;  %v5161_v6 = vsel %vm1612_vm5, %v1614_v22, %v1610_v8  ;;  %v1350_v0 = vmul.f32 0.3275911, %v5152_v14  ;;  %v3266_v62 = vmul.f32 %v3951_v10, %v2946_v57  ;;  %3954 = vpow2.f32 %v3147_v42 }
 0x210   : > { %v2691_v35 = vmul.f32 %v2627_v41, %v5129_v63  ;;  %v2436_v11 = vmul.f32 1.0614054, %v5161_v6  ;;  %v3076_v34 = vmul.f32 %v3012_v24, %v5085_v27  ;;  %v1618_v55 = vmul.f32 %v3953_v19, %v5133_v44 }
 0x211   : > { %v5174_v15 = vadd.f32 1.0, %v1350_v0  ;;  %v3457_v21 = vadd.f32 1.0, %v3393_v33  ;;  %v3330_v30 = vsub.f32 1.0, %v3266_v62  ;;  %vm1156_vm6 = vcmp.lt.f32.partialorder %v5072_v58, 0.0 }
 0x212   : > { %v2755_v61 = vadd.f32 -0.28449672, %v2691_v35  ;;  %v2500_v47 = vadd.f32 -1.4531521, %v2436_v11  ;;  %v1619_v10 = vsub.f32 1.0, %v1618_v55  ;;  %v3013_v5 = vsub.f32 0.0, %v5118_v45  ;;  %v888_v35 = vpop.f32.mrf.mxu1 }
 0x213   : > { %3956 = vrcp.f32 %v5174_v15  ;;  %v5180_v46 = vmul.f32 0.70710677, %v5165_v56  ;;  %v3394_v27 = vmul.f32 %v3330_v30, %v5096_v23  ;;  %v1628_v42 = vand.u32 2147483648, %v5133_v44 }
 0x214   : > { %v2819_v9 = vmul.f32 %v2755_v61, %v5129_v63  ;;  %v2564_v4 = vmul.f32 %v2500_v47, %v5161_v6  ;;  %v3149_v60 = vmul.f32 1.442695, %v3076_v34  ;;  %v1620_v43 = vmul.f32 %v3953_v19, %v1619_v10 }
 0x215   : > { %vm1623_vm7 = vweird.f32 %v3953_v19  ;;  %v1626_v51 = vand.u32 2147483647, %v5133_v44  ;;  %v3521_v1 = vmul.f32 %v3457_v21, %v5047_v38  ;;  %v3458_v37 = vadd.f32 1.0, %v3394_v27  ;;  %v3955_v33 = vpop.eup %3954 }
 0x216   : > { %v2883_v22 = vadd.f32 0.2548296, %v2819_v9  ;;  %v2628_v24 = vadd.f32 1.4214138, %v2564_v4  ;;  %v1621_v57 = vadd.f32 %v3953_v19, %v1620_v43  ;;  %vm1622_vm8 = vweird.f32 %v5133_v44 }
 0x217   : > { %v3077_v23 = vmul.f32 %v3013_v5, %v5118_v45  ;;  %v5191_v41 = vand.u32 2147483647, %v5180_v46  ;;  %v3522_v8 = vmul.f32 %v3458_v37, %v5050_v25  ;;  %vm1624_vm9 = vmor %vm1622_vm8, %vm1623_vm7  ;;  %v1629_v38 = vor.u32 1.1754944e-38, %v1628_v42 }
 0x218   : > { %v2947_v0 = vmul.f32 %v2883_v22, %v5129_v63  ;;  %v2692_v62 = vmul.f32 %v2628_v24, %v5161_v6  ;;  %3958 = vpow2.f32 %v3149_v60  ;;  %v1625_v34 = vsel %vm1624_vm9, %v3953_v19, %v1621_v57 }
 0x219   : > { %v3957_v11 = vpop.eup %3956  ;;  %vm1627_vm10 = vcmp.eq.f32.partialorder %v1626_v51, 8.507059e+37  ;;  %v1351_v44 = vmul.f32 0.3275911, %v5191_v41  ;;  %v3582_v45 = vpack.c.bf16 %v3522_v8, %v3521_v1  ;;  %v5204_v47 = vadd.f32 %v888_v35, %v4696_v2  ;;  %v5220_v1 = vld [vmem:[%s6990_s1] ss:$0 sm:$0xff] }
 0x21a   : > { %v3267_v55 = vmul.f32 %v3955_v33, %v2947_v0  ;;  %v2756_v21 = vadd.f32 -0.28449672, %v2692_v62  ;;  %v5197_v30 = vsel %vm1627_vm10, %v1629_v38, %v1625_v34  ;;  %v1633_v63 = vmul.f32 %v3957_v11, %v5174_v15 }
 0x21b   : > { %v2437_v25 = vmul.f32 1.0614054, %v5197_v30  ;;  %v5201_v61 = vadd.f32 1.0, %v1351_v44  ;;  %3614 = vst [vmem:[%s4954_s28 + $0x18] sm:$0xff] %v3582_v45  ;;  %v3151_v5 = vmul.f32 1.442695, %v3077_v23  ;;  %vm533_vm11 = vweird.f32 %v4718_v12 }
 0x21c   : > { %v3331_v10 = vsub.f32 1.0, %v3267_v55  ;;  %v2820_v19 = vmul.f32 %v2756_v21, %v5161_v6  ;;  %v3014_v27 = vsub.f32 0.0, %v5152_v14  ;;  %v1634_v4 = vsub.f32 1.0, %v1633_v63  ;;  %v937_v55 = vpop.f32.mrf.mxu2 }
 0x21d   : > { %v2501_v9 = vadd.f32 -1.4531521, %v2437_v25  ;;  %v1641_v42 = vand.u32 2147483647, %v5174_v15  ;;  %3960 = vrcp.f32 %v5201_v61  ;;  %vm534_vm12 = vweird.f32 %v4777_v36 }
 0x21e   : > { %v1220_v60 = vsel %vm1156_vm6, -1.0, %v7013_v53  ;;  %v2884_v43 = vadd.f32 0.2548296, %v2820_v19  ;;  %v1643_v51 = vand.u32 2147483648, %v5174_v15  ;;  %v587_v37 = vmul.f32 %v5220_v1, %v5010_v26  ;;  %v3959_v22 = vpop.eup %3958  ;;  %vm5265_vm4 = vmor %vm533_vm11, %vm534_vm12 }
 0x21f   : > { %vm523_vm13 = vweird.f32 %v4702_v28  ;;  %vm524_vm14 = vweird.f32 %v4734_v50  ;;  %v2565_v24 = vmul.f32 %v2501_v9, %v5197_v30  ;;  %v1635_v58 = vmul.f32 %v3957_v11, %v1634_v4 }
 0x220   : > { %vm1638_vm15 = vweird.f32 %v3957_v11  ;;  %v5228_v33 = vmul.f32 0.70710677, %v5204_v47  ;;  %v3395_v57 = vmul.f32 %v3331_v10, %v5159_v32  ;;  %v2948_v23 = vmul.f32 %v2884_v43, %v5161_v6  ;;  %vm5275_vm5 = vmor %vm523_vm13, %vm524_vm14 }
 0x221   : > { %3962 = vpow2.f32 %v3151_v5  ;;  %v3078_v8 = vmul.f32 %v3014_v27, %v5152_v14  ;;  %v2629_v26 = vadd.f32 1.4214138, %v2565_v24  ;;  %v1636_v0 = vadd.f32 %v3957_v11, %v1635_v58 }
 0x222   : > { %vm1637_vm1 = vweird.f32 %v5174_v15  ;;  %vm1642_vm2 = vcmp.eq.f32.partialorder %v1641_v42, 8.507059e+37  ;;  %v3268_v62 = vmul.f32 %v3959_v22, %v2948_v23  ;;  %v1644_v38 = vor.u32 1.1754944e-38, %v1643_v51  ;;  %v5244_v15 = vld [vmem:[%s6991_s2] ss:$0 sm:$0xff] }
 0x223   : > { %vm1639_vm0 = vmor %vm1637_vm1, %vm1638_vm15  ;;  %v1656_v35 = vand.u32 2147483647, %v5201_v61  ;;  %v5236_v34 = vand.u32 2147483647, %v5228_v33  ;;  %v3961_v44 = vpop.eup %3960  ;;  %v2693_v32 = vmul.f32 %v2629_v26, %v5197_v30  ;;  %v588_v14 = vmul.f32 %v5220_v1, %v4795_v3 }
 0x224   : > { %v1640_v6 = vsel %vm1639_vm0, %v3957_v11, %v1636_v0  ;;  %v607_v45 = vadd.f32 %v5244_v15, %v587_v37  ;;  %v3459_v21 = vadd.f32 1.0, %v3395_v57  ;;  %v3332_v25 = vsub.f32 1.0, %v3268_v62 }
 0x225   : > { %v5247_v63 = vsel %vm1642_vm2, %v1644_v38, %v1640_v6  ;;  %v1648_v10 = vmul.f32 %v3961_v44, %v5201_v61  ;;  %v2757_v19 = vadd.f32 -0.28449672, %v2693_v32  ;;  %v1352_v5 = vmul.f32 0.3275911, %v5236_v34 }
 0x226   : > { %v2438_v11 = vmul.f32 1.0614054, %v5247_v63  ;;  %v608_v3 = vadd.f32 %v5244_v15, %v588_v14  ;;  %v3396_v9 = vmul.f32 %v3332_v25, %v1220_v60  ;;  %v1658_v42 = vand.u32 2147483648, %v5201_v61 }
 0x227   : > { %v3963_v27 = vpop.eup %3962  ;;  %v1649_v4 = vsub.f32 1.0, %v1648_v10  ;;  %v5255_v43 = vadd.f32 %v937_v55, %v4720_v20  ;;  %v2821_v51 = vmul.f32 %v2757_v19, %v5197_v30  ;;  %v5258_v22 = vadd.f32 1.0, %v1352_v5  ;;  %v986_v10 = vpop.f32.mrf.mxu3 }
 0x228   : > { %v2502_v37 = vadd.f32 -1.4531521, %v2438_v11  ;;  %v618_v24 = vpack.c.bf16 %v608_v3, %v607_v45  ;;  %v3523_v58 = vmul.f32 %v3459_v21, %v5144_v16  ;;  %v3460_v57 = vadd.f32 1.0, %v3396_v9 }
 0x229   : > { %v1650_v23 = vmul.f32 %v3961_v44, %v1649_v4  ;;  %vm1653_vm3 = vweird.f32 %v3961_v44  ;;  %v2885_v26 = vadd.f32 0.2548296, %v2821_v51  ;;  %v3153_v62 = vmul.f32 1.442695, %v3078_v8 }
 0x22a   : > { %v2566_v0 = vmul.f32 %v2502_v37, %v5247_v63  ;;  %3964 = vrcp.f32 %v5258_v22  ;;  %856 = vmatmul.bf16.gmra.mxu0 %v618_v24  ;;  %905 = vmatmul.bf16.gmra.mxu1 %v618_v24  ;;  %v3524_v12 = vmul.f32 %v3460_v57, %v5169_v17  ;;  %vm1652_vm6 = vweird.f32 %v5201_v61 }
 0x22b   : > { %v1651_v38 = vadd.f32 %v3961_v44, %v1650_v23  ;;  %v3015_v32 = vsub.f32 0.0, %v5191_v41  ;;  %954 = vmatmul.bf16.gmra.mxu2 %v618_v24  ;;  %1003 = vmatmul.bf16.gmra.mxu3 %v618_v24  ;;  %v2949_v8 = vmul.f32 %v2885_v26, %v5197_v30  ;;  %vm1654_vm7 = vmor %vm1652_vm6, %vm1653_vm3  ;;  %v1659_v28 = vor.u32 1.1754944e-38, %v1658_v42 }
 0x22c   : > { %v2630_v6 = vadd.f32 1.4214138, %v2566_v0  ;;  %v5285_v14 = vmul.f32 0.70710677, %v5255_v43  ;;  %v536_v17 = vsel %vm5265_vm4, %v4777_v36, %v5023_v18  ;;  %v3583_v61 = vpack.c.bf16 %v3524_v12, %v3523_v58  ;;  %v842_v58 = vpop.f32.mrf.mxu0 }
 0x22d   : > { %v1655_v45 = vsel %vm1654_vm7, %v3961_v44, %v1651_v38  ;;  %vm1657_vm8 = vcmp.eq.f32.partialorder %v1656_v35, 8.507059e+37  ;;  %v526_v30 = vsel %vm5275_vm5, %v4734_v50, %v5015_v39  ;;  %v3269_v55 = vmul.f32 %v3963_v27, %v2949_v8 }
 0x22e   : > { %v2694_v21 = vmul.f32 %v2630_v6, %v5247_v63  ;;  %v5296_v25 = vsel %vm1657_vm8, %v1659_v28, %v1655_v45  ;;  %3615 = vst [vmem:[%s4954_s28 + $0x20] sm:$0xff] %v3583_v61  ;;  %vm1157_vm9 = vcmp.lt.f32.partialorder %v5108_v49, 0.0  ;;  %v3079_v36 = vmul.f32 %v3015_v32, %v5191_v41 }
 0x22f   : > { %v2439_v19 = vmul.f32 1.0614054, %v5296_v25  ;;  %v1289_v18 = vand.u32 2147483647, %v5285_v14  ;;  %v5304_v44 = vmul.f32 %v536_v17, %v4621_v29  ;;  %v1029_v11 = vmul.f32 0.5, %v5090_v31 }
 0x230   : > { %v3965_v35 = vpop.eup %3964  ;;  %v2758_v5 = vadd.f32 -0.28449672, %v2694_v21  ;;  %3966 = vpow2.f32 %v3153_v62  ;;  %v5309_v49 = vadd.f32 %v986_v10, %v4760_v54  ;;  %v1221_v4 = vsel %vm1157_vm9, -1.0, %v7013_v53 }
 0x231   : > { %v2503_v3 = vadd.f32 -1.4531521, %v2439_v19  ;;  %v1663_v27 = vmul.f32 %v3965_v35, %v5258_v22  ;;  %v1353_v9 = vmul.f32 0.3275911, %v1289_v18  ;;  %v3333_v41 = vsub.f32 1.0, %v3269_v55 }
 0x232   : > { %v1030_v42 = vmul.f32 0.5, %v5124_v40  ;;  %v2822_v51 = vmul.f32 %v2758_v5, %v5247_v63  ;;  %v3155_v37 = vmul.f32 1.442695, %v3079_v36  ;;  %vm1668_vm10 = vweird.f32 %v3965_v35 }
 0x233   : > { %v2567_v29 = vmul.f32 %v2503_v3, %v5296_v25  ;;  %v1664_v31 = vsub.f32 1.0, %v1663_v27  ;;  %v5315_v24 = vadd.f32 1.0, %v1353_v9  ;;  %v1671_v23 = vand.u32 2147483647, %v5258_v22 }
 0x234   : > { %v2886_v57 = vadd.f32 0.2548296, %v2822_v51  ;;  %v1673_v60 = vand.u32 2147483648, %v5258_v22  ;;  %v5321_v40 = vmul.f32 0.70710677, %v5309_v49  ;;  %v3397_v12 = vmul.f32 %v3333_v41, %v1221_v4 }
 0x235   : > { %v2631_v26 = vadd.f32 1.4214138, %v2567_v29  ;;  %v1665_v0 = vmul.f32 %v3965_v35, %v1664_v31  ;;  %3968 = vrcp.f32 %v5315_v24  ;;  %vm1158_vm11 = vcmp.lt.f32.partialorder %v5140_v52, 0.0 }
 0x236   : > { %v3967_v62 = vpop.eup %3966  ;;  %v2950_v38 = vmul.f32 %v2886_v57, %v5247_v63  ;;  %v5326_v32 = vadd.f32 %v842_v58, %v4690_v59  ;;  %3970 = vpow2.f32 %v3155_v37  ;;  %vm1667_vm12 = vweird.f32 %v5258_v22 }
 0x237   : > { %v2695_v8 = vmul.f32 %v2631_v26, %v5296_v25  ;;  %v1666_v6 = vadd.f32 %v3965_v35, %v1665_v0  ;;  %vm1669_vm13 = vmor %vm1667_vm12, %vm1668_vm10  ;;  %vm1672_vm14 = vcmp.eq.f32.partialorder %v1671_v23, 8.507059e+37  ;;  %v1674_v17 = vor.u32 1.1754944e-38, %v1673_v60 }
 0x238   : > { %v3270_v28 = vmul.f32 %v3967_v62, %v2950_v38  ;;  %v3016_v61 = vsub.f32 0.0, %v5236_v34  ;;  %v3017_v21 = vsub.f32 0.0, %v1289_v18  ;;  %v5333_v63 = vand.u32 2147483647, %v5321_v40 }
 0x239   : > { %v2759_v45 = vadd.f32 -0.28449672, %v2695_v8  ;;  %v1670_v55 = vsel %vm1669_vm13, %v3965_v35, %v1666_v6  ;;  %v3461_v10 = vadd.f32 1.0, %v3397_v12  ;;  %v5338_v5 = vmul.f32 0.70710677, %v5326_v32 }
 0x23a   : > { %v3334_v19 = vsub.f32 1.0, %v3270_v28  ;;  %v5335_v36 = vsel %vm1672_vm14, %v1674_v17, %v1670_v55  ;;  %v1222_v3 = vsel %vm1158_vm11, -1.0, %v7013_v53  ;;  %v1354_v9 = vmul.f32 0.3275911, %v5333_v63 }
 0x23b   : > { %v3969_v22 = vpop.eup %3968  ;;  %v2823_v27 = vmul.f32 %v2759_v45, %v5296_v25  ;;  %v2440_v35 = vmul.f32 1.0614054, %v5335_v36  ;;  %v5347_v41 = vmul.f32 0.5, %v5165_v56  ;;  %v3080_v51 = vmul.f32 %v3016_v61, %v5236_v34 }
 0x23c   : > { %v3398_v4 = vmul.f32 %v3334_v19, %v1222_v3  ;;  %v1678_v29 = vmul.f32 %v3969_v22, %v5315_v24  ;;  %v3971_v37 = vpop.eup %3970  ;;  %v3081_v57 = vmul.f32 %v3017_v21, %v1289_v18  ;;  %v5351_v52 = vadd.f32 1.0, %v1354_v9 }
 0x23d   : > { %v2887_v31 = vadd.f32 0.2548296, %v2823_v27  ;;  %v2504_v58 = vadd.f32 -1.4531521, %v2440_v35  ;;  %v3525_v23 = vmul.f32 %v3461_v10, %v1029_v11  ;;  %v5354_v0 = vand.u32 2147483647, %v5338_v5  ;;  %v891_v11 = vpop.f32.mrf.mxu1 }
 0x23e   : > { %v3462_v60 = vadd.f32 1.0, %v3398_v4  ;;  %v1679_v26 = vsub.f32 1.0, %v1678_v29  ;;  %v1688_v34 = vand.u32 2147483648, %v5315_v24  ;;  %3972 = vrcp.f32 %v5351_v52 }
 0x23f   : > { %v2951_v62 = vmul.f32 %v2887_v31, %v5296_v25  ;;  %v2568_v56 = vmul.f32 %v2504_v58, %v5335_v36  ;;  %vm1683_vm15 = vweird.f32 %v3969_v22  ;;  %v1686_v18 = vand.u32 2147483647, %v5315_v24 }
 0x240   : > { %v3526_v12 = vmul.f32 %v3462_v60, %v1030_v42  ;;  %v1680_v38 = vmul.f32 %v3969_v22, %v1679_v26  ;;  %vm1159_vm1 = vcmp.lt.f32.partialorder %v5180_v46, 0.0  ;;  %v1355_v28 = vmul.f32 0.3275911, %v5354_v0 }
 0x241   : > { %v3271_v8 = vmul.f32 %v3971_v37, %v2951_v62  ;;  %v2632_v6 = vadd.f32 1.4214138, %v2568_v56  ;;  %v3157_v17 = vmul.f32 1.442695, %v3080_v51  ;;  %vm1682_vm2 = vweird.f32 %v5315_v24 }
 0x242   : > { %v3584_v25 = vpack.c.bf16 %v3526_v12, %v3525_v23  ;;  %v1681_v61 = vadd.f32 %v3969_v22, %v1680_v38  ;;  %vm1684_vm0 = vmor %vm1682_vm2, %vm1683_vm15  ;;  %v1689_v42 = vor.u32 1.1754944e-38, %v1688_v34  ;;  %v5365_v55 = vadd.f32 1.0, %v1355_v28 }
 0x243   : > { %v2696_v45 = vmul.f32 %v2632_v6, %v5335_v36  ;;  %v5368_v21 = vadd.f32 %v891_v11, %v4696_v2  ;;  %vm1160_vm3 = vcmp.lt.f32.partialorder %v5228_v33, 0.0  ;;  %vm1687_vm4 = vcmp.eq.f32.partialorder %v1686_v18, 8.507059e+37 }
 0x244   : > { %3616 = vst [vmem:[%s4954_s28 + $0x28] sm:$0xff] %v3584_v25  ;;  %v1685_v10 = vsel %vm1684_vm0, %v3969_v22, %v1681_v61  ;;  %v3159_v19 = vmul.f32 1.442695, %v3081_v57  ;;  %v3973_v3 = vpop.eup %3972  ;;  %v3335_v27 = vsub.f32 1.0, %v3271_v8  ;;  %3974 = vrcp.f32 %v5365_v55 }
 0x245   : > { %v2760_v35 = vadd.f32 -0.28449672, %v2696_v45  ;;  %v5372_v9 = vsel %vm1687_vm4, %v1689_v42, %v1685_v10  ;;  %v1223_v24 = vsel %vm1159_vm1, -1.0, %v7013_v53  ;;  %3976 = vpow2.f32 %v3157_v17 }
 0x246   : > { %v2441_v4 = vmul.f32 1.0614054, %v5372_v9  ;;  %v1693_v51 = vmul.f32 %v3973_v3, %v5351_v52  ;;  %v5381_v22 = vmul.f32 0.5, %v5204_v47  ;;  %v1701_v37 = vand.u32 2147483647, %v5351_v52 }
 0x247   : > { %v2824_v29 = vmul.f32 %v2760_v35, %v5335_v36  ;;  %v5386_v31 = vmul.f32 0.70710677, %v5368_v21  ;;  %v1224_v46 = vsel %vm1160_vm3, -1.0, %v7013_v53  ;;  %v1703_v23 = vand.u32 2147483648, %v5351_v52 }
 0x248   : > { %v2505_v58 = vadd.f32 -1.4531521, %v2441_v4  ;;  %v1694_v57 = vsub.f32 1.0, %v1693_v51  ;;  %v3399_v60 = vmul.f32 %v3335_v27, %v1223_v24  ;;  %v5393_v47 = vmul.f32 0.5, %v5255_v43  ;;  %v940_v43 = vpop.f32.mrf.mxu2 }
 0x249   : > { %v2888_v26 = vadd.f32 0.2548296, %v2824_v29  ;;  %3978 = vpow2.f32 %v3159_v19  ;;  %vm1698_vm6 = vweird.f32 %v3973_v3  ;;  %v3018_v34 = vsub.f32 0.0, %v5333_v63 }
 0x24a   : > { %v2569_v62 = vmul.f32 %v2505_v58, %v5372_v9  ;;  %v1695_v56 = vmul.f32 %v3973_v3, %v1694_v57  ;;  %v3975_v12 = vpop.eup %3974  ;;  %vm1697_vm7 = vweird.f32 %v5351_v52  ;;  %vm5399_vm8 = vcmp.eq.f32.partialorder %v1701_v37, 8.507059e+37 }
 0x24b   : > { %v2952_v33 = vmul.f32 %v2888_v26, %v5335_v36  ;;  %v5404_v18 = vand.u32 2147483647, %v5386_v31  ;;  %v3977_v11 = vpop.eup %3976  ;;  %vm1161_vm9 = vcmp.lt.f32.partialorder %v5285_v14, 0.0  ;;  %v1704_v28 = vor.u32 1.1754944e-38, %v1703_v23  ;;  %vm1699_vm10 = vmor %vm1697_vm7, %vm1698_vm6 }
 0x24c   : > { %v2633_v8 = vadd.f32 1.4214138, %v2569_v62  ;;  %v1696_v6 = vadd.f32 %v3973_v3, %v1695_v56  ;;  %v1708_v25 = vmul.f32 %v3975_v12, %v5365_v55  ;;  %v3463_v17 = vadd.f32 1.0, %v3399_v60 }
 0x24d   : > { %v3272_v36 = vmul.f32 %v3977_v11, %v2952_v33  ;;  %v1716_v52 = vand.u32 2147483647, %v5365_v55  ;;  %v1356_v61 = vmul.f32 0.3275911, %v5404_v18  ;;  %v5413_v19 = vadd.f32 %v940_v43, %v4720_v20 }
 0x24e   : > { %v2697_v45 = vmul.f32 %v2633_v8, %v5372_v9  ;;  %v1700_v42 = vsel %vm1699_vm10, %v3973_v3, %v1696_v6  ;;  %v1709_v10 = vsub.f32 1.0, %v1708_v25  ;;  %v1718_v4 = vand.u32 2147483648, %v5365_v55  ;;  %v989_v3 = vpop.f32.mrf.mxu3 }
 0x24f   : > { %v3979_v27 = vpop.eup %3978  ;;  %v3336_v35 = vsub.f32 1.0, %v3272_v36  ;;  %v5417_v24 = vsel %vm5399_vm8, %v1704_v28, %v1700_v42  ;;  %v5420_v51 = vadd.f32 1.0, %v1356_v61  ;;  %vm1713_vm11 = vweird.f32 %v3975_v12 }
 0x250   : > { %v2761_v29 = vadd.f32 -0.28449672, %v2697_v45  ;;  %v2442_v37 = vmul.f32 1.0614054, %v5417_v24  ;;  %v1710_v58 = vmul.f32 %v3975_v12, %v1709_v10  ;;  %v3082_v23 = vmul.f32 %v3018_v34, %v5333_v63 }
 0x251   : > { %v3400_v57 = vmul.f32 %v3336_v35, %v1224_v46  ;;  %vm1712_vm12 = vweird.f32 %v5365_v55  ;;  %3980 = vrcp.f32 %v5420_v51  ;;  %v5428_v56 = vmul.f32 0.70710677, %v5413_v19 }
 0x252   : > { %v2825_v60 = vmul.f32 %v2761_v29, %v5372_v9  ;;  %v2506_v26 = vadd.f32 -1.4531521, %v2442_v37  ;;  %v1711_v62 = vadd.f32 %v3975_v12, %v1710_v58  ;;  %v3527_v33 = vmul.f32 %v3463_v17, %v5347_v41  ;;  %vm1714_vm13 = vmor %vm1712_vm12, %vm1713_vm11 }
 0x253   : > { %v3464_v38 = vadd.f32 1.0, %v3400_v57  ;;  %v1719_v43 = vor.u32 1.1754944e-38, %v1718_v4  ;;  %v5432_v46 = vadd.f32 %v989_v3, %v4760_v54  ;;  %vm1717_vm14 = vcmp.eq.f32.partialorder %v1716_v52, 8.507059e+37 }
 0x254   : > { %v2889_v63 = vadd.f32 0.2548296, %v2825_v60  ;;  %v2570_v55 = vmul.f32 %v2506_v26, %v5417_v24  ;;  %v1715_v34 = vsel %vm1714_vm13, %v3975_v12, %v1711_v62  ;;  %v3161_v8 = vmul.f32 1.442695, %v3082_v23 }
 0x255   : > { %v3528_v11 = vmul.f32 %v3464_v38, %v5381_v22  ;;  %v5436_v6 = vsel %vm1717_vm14, %v1719_v43, %v1715_v34  ;;  %v3019_v28 = vsub.f32 0.0, %v5354_v0  ;;  %v5442_v36 = vand.u32 2147483647, %v5428_v56 }
 0x256   : > { %v2953_v41 = vmul.f32 %v2889_v63, %v5372_v9  ;;  %v2634_v25 = vadd.f32 1.4214138, %v2570_v55  ;;  %v2443_v17 = vmul.f32 1.0614054, %v5436_v6  ;;  %v1225_v22 = vsel %vm1161_vm9, -1.0, %v7013_v53 }
 0x257   : > { %v3981_v61 = vpop.eup %3980  ;;  %v3585_v45 = vpack.c.bf16 %v3528_v11, %v3527_v33  ;;  %v5448_v12 = vmul.f32 0.5, %v5309_v49  ;;  %v5451_v52 = vmul.f32 0.70710677, %v5432_v46  ;;  %3982 = vpow2.f32 %v3161_v8 }
 0x258   : > { %v3273_v42 = vmul.f32 %v3979_v27, %v2953_v41  ;;  %v2698_v9 = vmul.f32 %v2634_v25, %v5417_v24  ;;  %v2507_v10 = vadd.f32 -1.4531521, %v2443_v17  ;;  %v1723_v35 = vmul.f32 %v3981_v61, %v5420_v51  ;;  %v844_v17 = vpop.f32.mrf.mxu0 }
 0x259   : > { %3617 = vst [vmem:[%s4954_s28 + $0x30] sm:$0xff] %v3585_v45  ;;  %v5457_v4 = vmul.f32 0.5, %v5326_v32  ;;  %v3083_v14 = vmul.f32 %v3019_v28, %v5354_v0  ;;  %v1357_v29 = vmul.f32 0.3275911, %v5442_v36  ;;  %v1731_v27 = vand.u32 2147483647, %v5420_v51 }
 0x25a   : > { %v2762_v49 = vadd.f32 -0.28449672, %v2698_v9  ;;  %v2571_v37 = vmul.f32 %v2507_v10, %v5436_v6  ;;  %v1724_v58 = vsub.f32 1.0, %v1723_v35  ;;  %v3337_v3 = vsub.f32 1.0, %v3273_v42 }
 0x25b   : > { %v1733_v57 = vand.u32 2147483648, %v5420_v51  ;;  %v5464_v23 = vadd.f32 1.0, %v1357_v29  ;;  %v5467_v60 = vand.u32 2147483647, %v5451_v52  ;;  %vm1728_vm15 = vweird.f32 %v3981_v61 }
 0x25c   : > { %v2826_v32 = vmul.f32 %v2762_v49, %v5417_v24  ;;  %v2635_v26 = vadd.f32 1.4214138, %v2571_v37  ;;  %v1725_v0 = vmul.f32 %v3981_v61, %v1724_v58  ;;  %vm1162_vm1 = vcmp.lt.f32.partialorder %v5321_v40, 0.0 }
 0x25d   : > { %v3163_v62 = vmul.f32 1.442695, %v3083_v14  ;;  %v3020_v33 = vsub.f32 0.0, %v5404_v18  ;;  %3984 = vrcp.f32 %v5464_v23  ;;  %vm1727_vm2 = vweird.f32 %v5420_v51  ;;  %v3983_v55 = vpop.eup %3982 }
 0x25e   : > { %v2890_v38 = vadd.f32 0.2548296, %v2826_v32  ;;  %v2699_v43 = vmul.f32 %v2635_v26, %v5436_v6  ;;  %v1726_v63 = vadd.f32 %v3981_v61, %v1725_v0  ;;  %v3401_v34 = vmul.f32 %v3337_v3, %v1225_v22  ;;  %vm1729_vm3 = vmor %vm1727_vm2, %vm1728_vm15 }
 0x25f   : > { %vm1163_vm0 = vcmp.lt.f32.partialorder %v5338_v5, 0.0  ;;  %v1734_v11 = vor.u32 1.1754944e-38, %v1733_v57  ;;  %v1358_v8 = vmul.f32 0.3275911, %v5467_v60  ;;  %vm1732_vm4 = vcmp.eq.f32.partialorder %v1731_v27, 8.507059e+37 }
 0x260   : > { %v2954_v28 = vmul.f32 %v2890_v38, %v5417_v24  ;;  %v2763_v41 = vadd.f32 -0.28449672, %v2699_v43  ;;  %v1730_v25 = vsel %vm1729_vm3, %v3981_v61, %v1726_v63  ;;  %3986 = vpow2.f32 %v3163_v62 }
 0x261   : > { %v5478_v45 = vsel %vm1732_vm4, %v1734_v11, %v1730_v25  ;;  %v3084_v42 = vmul.f32 %v3020_v33, %v5404_v18  ;;  %v5481_v51 = vadd.f32 1.0, %v1358_v8  ;;  %v1226_v22 = vsel %vm1162_vm1, -1.0, %v7013_v53  ;;  %v893_v11 = vpop.f32.mrf.mxu1 }
 0x262   : > { %v3274_v9 = vmul.f32 %v3983_v55, %v2954_v28  ;;  %v2827_v10 = vmul.f32 %v2763_v41, %v5436_v6  ;;  %v2444_v24 = vmul.f32 1.0614054, %v5478_v45  ;;  %v3465_v61 = vadd.f32 1.0, %v3401_v34 }
 0x263   : > { %v3985_v35 = vpop.eup %3984  ;;  %v1227_v14 = vsel %vm1163_vm0, -1.0, %v7013_v53  ;;  %3988 = vrcp.f32 %v5481_v51  ;;  %v5493_v18 = vadd.f32 %v844_v17, %v4690_v59  ;;  %v5497_v58 = vmul.f32 0.5, %v5368_v21 }
 0x264   : > { %v3338_v29 = vsub.f32 1.0, %v3274_v9  ;;  %v2891_v49 = vadd.f32 0.2548296, %v2827_v10  ;;  %v2508_v40 = vadd.f32 -1.4531521, %v2444_v24  ;;  %v1738_v37 = vmul.f32 %v3985_v35, %v5464_v23 }
 0x265   : > { %v3165_v27 = vmul.f32 1.442695, %v3084_v42  ;;  %v1748_v3 = vand.u32 2147483648, %v5464_v23  ;;  %v3021_v57 = vsub.f32 0.0, %v5442_v36  ;;  %vm1164_vm6 = vcmp.lt.f32.partialorder %v5386_v31, 0.0 }
 0x266   : > { %v3402_v5 = vmul.f32 %v3338_v29, %v1226_v22  ;;  %v2955_v32 = vmul.f32 %v2891_v49, %v5436_v6  ;;  %v2572_v26 = vmul.f32 %v2508_v40, %v5478_v45  ;;  %v1739_v0 = vsub.f32 1.0, %v1738_v37  ;;  %v3987_v62 = vpop.eup %3986 }
 0x267   : > { %v3529_v33 = vmul.f32 %v3465_v61, %v5393_v47  ;;  %vm1743_vm7 = vweird.f32 %v3985_v35  ;;  %v1746_v21 = vand.u32 2147483647, %v5464_v23  ;;  %v5507_v38 = vmul.f32 0.70710677, %v5493_v18 }
 0x268   : > { %v3466_v43 = vadd.f32 1.0, %v3402_v5  ;;  %v3275_v63 = vmul.f32 %v3987_v62, %v2955_v32  ;;  %v2636_v55 = vadd.f32 1.4214138, %v2572_v26  ;;  %v1740_v34 = vmul.f32 %v3985_v35, %v1739_v0 }
 0x269   : > { %v3989_v6 = vpop.eup %3988  ;;  %3990 = vpow2.f32 %v3165_v27  ;;  %vm1742_vm8 = vweird.f32 %v5464_v23  ;;  %v3085_v8 = vmul.f32 %v3021_v57, %v5442_v36  ;;  %v5512_v28 = vand.u32 2147483647, %v5507_v38 }
 0x26a   : > { %v3530_v47 = vmul.f32 %v3466_v43, %v5448_v12  ;;  %v2700_v41 = vmul.f32 %v2636_v55, %v5478_v45  ;;  %v1741_v25 = vadd.f32 %v3985_v35, %v1740_v34  ;;  %v1749_v17 = vor.u32 1.1754944e-38, %v1748_v3  ;;  %vm1744_vm9 = vmor %vm1742_vm8, %vm1743_vm7 }
 0x26b   : > { %v3339_v42 = vsub.f32 1.0, %v3275_v63  ;;  %v1753_v22 = vmul.f32 %v3989_v6, %v5481_v51  ;;  %v1359_v9 = vmul.f32 0.3275911, %v5512_v28  ;;  %v5520_v23 = vadd.f32 %v893_v11, %v4696_v2 }
 0x26c   : > { %v3586_v36 = vpack.c.bf16 %v3530_v47, %v3529_v33  ;;  %v2764_v10 = vadd.f32 -0.28449672, %v2700_v41  ;;  %v1745_v24 = vsel %vm1744_vm9, %v3985_v35, %v1741_v25  ;;  %vm1747_vm10 = vcmp.eq.f32.partialorder %v1746_v21, 8.507059e+37 }
 0x26d   : > { %v5522_v12 = vsel %vm1747_vm10, %v1749_v17, %v1745_v24  ;;  %v1754_v61 = vsub.f32 1.0, %v1753_v22  ;;  %v1761_v29 = vand.u32 2147483647, %v5481_v51  ;;  %v5525_v49 = vadd.f32 1.0, %v1359_v9  ;;  %v942_v17 = vpop.f32.mrf.mxu2 }
 0x26e   : > { %3618 = vst [vmem:[%s4954_s28 + $0x38] sm:$0xff] %v3586_v36  ;;  %v2828_v40 = vmul.f32 %v2764_v10, %v5478_v45  ;;  %v2445_v37 = vmul.f32 1.0614054, %v5522_v12  ;;  %vm1758_vm11 = vweird.f32 %v3989_v6  ;;  %v1763_v27 = vand.u32 2147483648, %v5481_v51 }
 0x26f   : > { %v3991_v3 = vpop.eup %3990  ;;  %v3403_v57 = vmul.f32 %v3339_v42, %v1227_v14  ;;  %v1755_v5 = vmul.f32 %v3989_v6, %v1754_v61  ;;  %3992 = vrcp.f32 %v5525_v49  ;;  %v5533_v35 = vmul.f32 0.70710677, %v5520_v23 }
 0x270   : > { %v569_v32 = vmul.f32 %v526_v30, %v4585_v7  ;;  %v2892_v26 = vadd.f32 0.2548296, %v2828_v40  ;;  %v2509_v0 = vadd.f32 -1.4531521, %v2445_v37  ;;  %v3167_v62 = vmul.f32 1.442695, %v3085_v8 }
 0x271   : > { %v1228_v14 = vsel %vm1164_vm6, -1.0, %v7013_v53  ;;  %v1756_v33 = vadd.f32 %v3989_v6, %v1755_v5  ;;  %vm1757_vm12 = vweird.f32 %v5481_v51  ;;  %v3022_v21 = vsub.f32 0.0, %v5467_v60 }
 0x272   : > { %v2956_v43 = vmul.f32 %v2892_v26, %v5478_v45  ;;  %v2573_v16 = vmul.f32 %v2509_v0, %v5522_v12  ;;  %vm1759_vm13 = vmor %vm1757_vm12, %vm1758_vm11  ;;  %vm1762_vm5 = vcmp.eq.f32.partialorder %v1761_v29, 8.507059e+37  ;;  %v1764_v7 = vor.u32 1.1754944e-38, %v1763_v27 }
 0x273   : > { %v3467_v50 = vadd.f32 1.0, %v3403_v57  ;;  %v1760_v39 = vsel %vm1759_vm13, %v3989_v6, %v1756_v33  ;;  %v5550_v30 = vand.u32 2147483647, %v5533_v35  ;;  %v590_v31 = vmul.f32 %v5220_v1, %v5304_v44 }
 0x274   : > { %v3276_v63 = vmul.f32 %v3991_v3, %v2956_v43  ;;  %v2637_v51 = vadd.f32 1.4214138, %v2573_v16  ;;  %3994 = vpow2.f32 %v3167_v62  ;;  %v5554_v55 = vsel %vm1762_vm5, %v1764_v7, %v1760_v39 }
 0x275   : > { %v3993_v45 = vpop.eup %3992  ;;  %v2446_v34 = vmul.f32 1.0614054, %v5554_v55  ;;  %v3086_v11 = vmul.f32 %v3022_v21, %v5467_v60  ;;  %v1360_v8 = vmul.f32 0.3275911, %v5550_v30  ;;  %v589_v6 = vmul.f32 %v5220_v1, %v569_v32 }
 0x276   : > { %v3340_v47 = vsub.f32 1.0, %v3276_v63  ;;  %v2701_v41 = vmul.f32 %v2637_v51, %v5522_v12  ;;  %v1768_v25 = vmul.f32 %v3993_v45, %v5525_v49  ;;  %v1776_v44 = vand.u32 2147483647, %v5525_v49 }
 0x277   : > { %v3531_v42 = vmul.f32 %v3467_v50, %v5457_v4  ;;  %v2510_v22 = vadd.f32 -1.4531521, %v2446_v34  ;;  %v5564_v9 = vadd.f32 1.0, %v1360_v8  ;;  %v610_v36 = vadd.f32 %v5244_v15, %v590_v31  ;;  %v991_v34 = vpop.f32.mrf.mxu3 }
 0x278   : > { %v3404_v60 = vmul.f32 %v3340_v47, %v1228_v14  ;;  %v2765_v10 = vadd.f32 -0.28449672, %v2701_v41  ;;  %v1769_v24 = vsub.f32 1.0, %v1768_v25  ;;  %v1778_v1 = vand.u32 2147483648, %v5525_v49 }
 0x279   : > { %v2574_v61 = vmul.f32 %v2510_v22, %v5554_v55  ;;  %3996 = vrcp.f32 %v5564_v9  ;;  %v609_v29 = vadd.f32 %v5244_v15, %v589_v6  ;;  %v5572_v40 = vadd.f32 %v942_v17, %v4720_v20 }
 0x27a   : > { %v3995_v4 = vpop.eup %3994  ;;  %v3468_v37 = vadd.f32 1.0, %v3404_v60  ;;  %v2829_v27 = vmul.f32 %v2765_v10, %v5522_v12  ;;  %v1770_v3 = vmul.f32 %v3993_v45, %v1769_v24  ;;  %vm1773_vm14 = vweird.f32 %v3993_v45 }
 0x27b   : > { %vm1165_vm15 = vcmp.lt.f32.partialorder %v5428_v56, 0.0  ;;  %v2638_v57 = vadd.f32 1.4214138, %v2574_v61  ;;  %v3169_v5 = vmul.f32 1.442695, %v3086_v11  ;;  %v619_v32 = vpack.c.bf16 %v610_v36, %v609_v29 }
 0x27c   : > { %v3532_v26 = vmul.f32 %v3468_v37, %v5497_v58  ;;  %v2893_v0 = vadd.f32 0.2548296, %v2829_v27  ;;  %v1771_v62 = vadd.f32 %v3993_v45, %v1770_v3  ;;  %vm1772_vm1 = vweird.f32 %v5525_v49 }
 0x27d   : > { %v2702_v15 = vmul.f32 %v2638_v57, %v5554_v55  ;;  %vm1774_vm2 = vmor %vm1772_vm1, %vm1773_vm14  ;;  %v1779_v14 = vor.u32 1.1754944e-38, %v1778_v1  ;;  %v3023_v33 = vsub.f32 0.0, %v5512_v28  ;;  %861 = vmatmul.bf16.gmra.mxu0 %v619_v32  ;;  %910 = vmatmul.bf16.gmra.mxu1 %v619_v32  ;;  %v5581_v21 = vmul.f32 0.70710677, %v5572_v40 }
 0x27e   : > { %v3587_v43 = vpack.c.bf16 %v3532_v26, %v3531_v42  ;;  %v2957_v16 = vmul.f32 %v2893_v0, %v5522_v12  ;;  %v1775_v58 = vsel %vm1774_vm2, %v3993_v45, %v1771_v62  ;;  %vm1777_vm0 = vcmp.eq.f32.partialorder %v1776_v44, 8.507059e+37  ;;  %959 = vmatmul.bf16.gmra.mxu2 %v619_v32  ;;  %1008 = vmatmul.bf16.gmra.mxu3 %v619_v32 }
 0x27f   : > { %v3997_v49 = vpop.eup %3996  ;;  %v2766_v7 = vadd.f32 -0.28449672, %v2702_v15  ;;  %v5584_v50 = vsel %vm1777_vm0, %v1779_v14, %v1775_v58  ;;  %v5587_v39 = vand.u32 2147483647, %v5581_v21  ;;  %3998 = vpow2.f32 %v3169_v5 }
 0x280   : > { %3619 = vst [vmem:[%s4954_s28 + $0x40] sm:$0xff] %v3587_v43  ;;  %v3277_v31 = vmul.f32 %v3995_v4, %v2957_v16  ;;  %v2447_v63 = vmul.f32 1.0614054, %v5584_v50  ;;  %v1783_v51 = vmul.f32 %v3997_v49, %v5564_v9  ;;  %v1229_v12 = vsel %vm1165_vm15, -1.0, %v7013_v53 }
 0x281   : > { %v2830_v45 = vmul.f32 %v2766_v7, %v5554_v55  ;;  %v1361_v11 = vmul.f32 0.3275911, %v5587_v39  ;;  %v3087_v47 = vmul.f32 %v3023_v33, %v5512_v28  ;;  %v1793_v44 = vand.u32 2147483648, %v5564_v9 }
 0x282   : > { %v3341_v8 = vsub.f32 1.0, %v3277_v31  ;;  %v2511_v6 = vadd.f32 -1.4531521, %v2447_v63  ;;  %v1784_v41 = vsub.f32 1.0, %v1783_v51  ;;  %v5602_v42 = vadd.f32 %v991_v34, %v4760_v54 }
 0x283   : > { %v2894_v25 = vadd.f32 0.2548296, %v2830_v45  ;;  %v5599_v17 = vadd.f32 1.0, %v1361_v11  ;;  %vm1788_vm3 = vweird.f32 %v3997_v49  ;;  %v1791_v36 = vand.u32 2147483647, %v5564_v9 }
 0x284   : > { %v2575_v56 = vmul.f32 %v2511_v6, %v5584_v50  ;;  %v1785_v22 = vmul.f32 %v3997_v49, %v1784_v41  ;;  %v3405_v60 = vmul.f32 %v3341_v8, %v1229_v12  ;;  %vm1166_vm4 = vcmp.lt.f32.partialorder %v5451_v52, 0.0 }
 0x285   : > { %v2958_v10 = vmul.f32 %v2894_v25, %v5554_v55  ;;  %4000 = vrcp.f32 %v5599_v17  ;;  %v3999_v28 = vpop.eup %3998  ;;  %vm1787_vm6 = vweird.f32 %v5564_v9  ;;  %v3171_v29 = vmul.f32 1.442695, %v3087_v47 }
 0x286   : > { %v2639_v24 = vadd.f32 1.4214138, %v2575_v56  ;;  %v1786_v1 = vadd.f32 %v3997_v49, %v1785_v22  ;;  %vm1789_vm7 = vmor %vm1787_vm6, %vm1788_vm3  ;;  %v1794_v4 = vor.u32 1.1754944e-38, %v1793_v44  ;;  %v5611_v37 = vmul.f32 0.70710677, %v5602_v42  ;;  %v362_v44 = vpop.xlane.xlu0 %361 }
 0x287   : > { %v3278_v61 = vmul.f32 %v3999_v28, %v2958_v10  ;;  %vm1792_vm8 = vcmp.eq.f32.partialorder %v1791_v36, 8.507059e+37  ;;  %v3469_v55 = vadd.f32 1.0, %v3405_v60  ;;  %v3024_v32 = vsub.f32 0.0, %v5550_v30 }
 0x288   : > { %v2703_v27 = vmul.f32 %v2639_v24, %v5584_v50  ;;  %v1790_v3 = vsel %vm1789_vm7, %v3997_v49, %v1786_v1  ;;  %v1230_v9 = vsel %vm1166_vm4, -1.0, %v7013_v53  ;;  %v1037_v15 = vmul.f32 0.5, %v5413_v19 }
 0x289   : > { %v3342_v57 = vsub.f32 1.0, %v3278_v61  ;;  %v1795_v5 = vsel %vm1792_vm8, %v1794_v4, %v1790_v3  ;;  %4002 = vpow2.f32 %v3171_v29  ;;  %v5620_v33 = vand.u32 2147483647, %v5611_v37 }
 0x28a   : > { %v2767_v26 = vadd.f32 -0.28449672, %v2703_v27  ;;  %v2448_v0 = vmul.f32 1.0614054, %v1795_v5  ;;  %v1038_v43 = vmul.f32 0.5, %v5432_v46  ;;  %v3533_v7 = vmul.f32 %v3469_v55, %v1037_v15 }
 0x28b   : > { %v4001_v62 = vpop.eup %4000  ;;  %v3406_v14 = vmul.f32 %v3342_v57, %v1230_v9  ;;  %v3088_v31 = vmul.f32 %v3024_v32, %v5550_v30  ;;  %v1362_v63 = vmul.f32 0.3275911, %v5620_v33  ;;  %v1806_v45 = vand.u32 2147483647, %v5599_v17 }
 0x28c   : > { %v2831_v16 = vmul.f32 %v2767_v26, %v5584_v50  ;;  %v2512_v58 = vadd.f32 -1.4531521, %v2448_v0  ;;  %v1798_v49 = vmul.f32 %v4001_v62, %v5599_v17  ;;  %v1808_v46 = vand.u32 2147483648, %v5599_v17 }
 0x28d   : > { %v3470_v52 = vadd.f32 1.0, %v3406_v14  ;;  %v1426_v11 = vadd.f32 1.0, %v1362_v63  ;;  %vm1803_vm9 = vweird.f32 %v4001_v62  ;;  %v3173_v30 = vmul.f32 1.442695, %v3088_v31 }
 0x28e   : > { %v2895_v51 = vadd.f32 0.2548296, %v2831_v16  ;;  %v2576_v19 = vmul.f32 %v2512_v58, %v1795_v5  ;;  %v1799_v34 = vsub.f32 1.0, %v1798_v49  ;;  %vm1802_vm10 = vweird.f32 %v5599_v17 }
 0x28f   : > { %v3534_v12 = vmul.f32 %v3470_v52, %v1038_v43  ;;  %v4003_v41 = vpop.eup %4002  ;;  %4004 = vrcp.f32 %v1426_v11  ;;  %vm1804_vm11 = vmor %vm1802_vm10, %vm1803_vm9  ;;  %v1809_v60 = vor.u32 1.1754944e-38, %v1808_v46  ;;  %vm1807_vm12 = vcmp.eq.f32.partialorder %v1806_v45, 8.507059e+37  ;;  %v847_v45 = vpop.f32.mrf.mxu0 }
 0x290   : > { %v2959_v8 = vmul.f32 %v2895_v51, %v5584_v50  ;;  %v2640_v6 = vadd.f32 1.4214138, %v2576_v19  ;;  %v1800_v47 = vmul.f32 %v4001_v62, %v1799_v34  ;;  %v379_v50 = vmul.f32 %v362_v44, %v4243_v13  ;;  %v364_v44 = vpop.xlane.xlu1 %363 }
 0x291   : > { %v3588_v25 = vpack.c.bf16 %v3534_v12, %v3533_v7  ;;  %4006 = vpow2.f32 %v3173_v30  ;;  %vm1167_vm13 = vcmp.lt.f32.partialorder %v5507_v38, 0.0  ;;  %v3025_v27 = vsub.f32 0.0, %v5587_v39 }
 0x292   : > { %v3279_v56 = vmul.f32 %v4003_v41, %v2959_v8  ;;  %v2704_v22 = vmul.f32 %v2640_v6, %v1795_v5  ;;  %v1801_v36 = vadd.f32 %v4001_v62, %v1800_v47  ;;  %v5635_v57 = vadd.f32 1e-05, %v379_v50 }
 0x293   : > { %3620 = vst [vmem:[%s4954_s28 + $0x48] sm:$0xff] %v3588_v25  ;;  %v1231_v32 = vsel %vm1167_vm13, -1.0, %v7013_v53  ;;  %vm1168_vm5 = vcmp.lt.f32.partialorder %v5533_v35, 0.0  ;;  %v3089_v38 = vmul.f32 %v3025_v27, %v5587_v39  ;;  %v1821_v14 = vand.u32 2147483647, %v1426_v11 }
 0x294   : > { %v2768_v10 = vadd.f32 -0.28449672, %v2704_v22  ;;  %v1805_v28 = vsel %vm1804_vm11, %v4001_v62, %v1801_v36  ;;  %v3343_v1 = vsub.f32 1.0, %v3279_v56  ;;  %v1823_v43 = vand.u32 2147483648, %v1426_v11 }
 0x295   : > { %v1810_v24 = vsel %vm1807_vm12, %v1809_v60, %v1805_v28  ;;  %v4005_v4 = vpop.eup %4004  ;;  %4008 = vrsqrt.f32 %v5635_v57  ;;  %vm1817_vm15 = vweird.f32 %v1426_v11  ;;  %v1039_v63 = vmul.f32 0.5, %v5493_v18 }
 0x296   : > { %v2832_v61 = vmul.f32 %v2768_v10, %v1795_v5  ;;  %v2449_v29 = vmul.f32 1.0614054, %v1810_v24  ;;  %v1813_v55 = vmul.f32 %v4005_v4, %v1426_v11  ;;  %v3407_v9 = vmul.f32 %v3343_v1, %v1231_v32 }
 0x297   : > { %v4007_v15 = vpop.eup %4006  ;;  %vm1818_vm14 = vweird.f32 %v4005_v4  ;;  %v1232_v51 = vsel %vm1168_vm5, -1.0, %v7013_v53  ;;  %v3175_v35 = vmul.f32 1.442695, %v3089_v38  ;;  %v1824_v39 = vor.u32 1.1754944e-38, %v1823_v43 }
 0x298   : > { %v2896_v3 = vadd.f32 0.2548296, %v2832_v61  ;;  %v2513_v17 = vadd.f32 -1.4531521, %v2449_v29  ;;  %v1814_v62 = vsub.f32 1.0, %v1813_v55  ;;  %v3471_v7 = vadd.f32 1.0, %v3407_v9  ;;  %vm1819_vm1 = vmor %vm1817_vm15, %vm1818_vm14 }
 0x299   : > { %vm1822_vm2 = vcmp.eq.f32.partialorder %v1821_v14, 8.507059e+37  ;;  %v1040_v46 = vmul.f32 0.5, %v5520_v23  ;;  %v3026_v11 = vsub.f32 0.0, %v5620_v33  ;;  %v5646_v6 = vadd.f32 %v847_v45, %v4690_v59 }
 0x29a   : > { %v2960_v26 = vmul.f32 %v2896_v3, %v1795_v5  ;;  %v2577_v0 = vmul.f32 %v2513_v17, %v1810_v24  ;;  %v1815_v49 = vmul.f32 %v4005_v4, %v1814_v62  ;;  %v3535_v47 = vmul.f32 %v3471_v7, %v1039_v63 }
 0x29b   : > { %v5648_v30 = vpop.eup %4008  ;;  %4010 = vpow2.f32 %v3175_v35  ;;  %v5651_v56 = vmul.f32 0.70710677, %v5646_v6  ;;  %v3090_v60 = vmul.f32 %v3026_v11, %v5620_v33  ;;  %v380_v61 = vmul.f32 %v364_v44, %v4243_v13 }
 0x29c   : > { %v3280_v16 = vmul.f32 %v4007_v15, %v2960_v26  ;;  %v2641_v58 = vadd.f32 1.4214138, %v2577_v0  ;;  %v1816_v5 = vadd.f32 %v4005_v4, %v1815_v49  ;;  %v538_v33 = vmul.f32 %v5648_v30, %v5635_v57 }
 0x29d   : > { %v5655_v10 = vand.u32 2147483647, %v5651_v56  ;;  %v3177_v3 = vmul.f32 1.442695, %v3090_v60  ;;  %v5660_v9 = vadd.f32 1e-05, %v380_v61  ;;  %vm543_vm4 = vweird.f32 %v5635_v57 }
 0x29e   : > { %v3344_v52 = vsub.f32 1.0, %v3280_v16  ;;  %v2705_v31 = vmul.f32 %v2641_v58, %v1810_v24  ;;  %v1820_v12 = vsel %vm1819_vm1, %v4005_v4, %v1816_v5  ;;  %vm1169_vm0 = vcmp.lt.f32.partialorder %v5581_v21, 0.0 }
 0x29f   : > { %v1825_v8 = vsel %vm1822_vm2, %v1824_v39, %v1820_v12  ;;  %v1363_v29 = vmul.f32 0.3275911, %v5655_v10  ;;  %v539_v0 = vmul.f32 %v5648_v30, %v538_v33  ;;  %v1233_v38 = vsel %vm1169_vm0, -1.0, %v7013_v53  ;;  %v896_v39 = vpop.f32.mrf.mxu1  ;;  %v945_v33 = vpop.f32.mrf.mxu2 }
 0x2a0   : > { %v3408_v19 = vmul.f32 %v3344_v52, %v1232_v51  ;;  %v2769_v34 = vadd.f32 -0.28449672, %v2705_v31  ;;  %v2450_v25 = vmul.f32 1.0614054, %v1825_v8  ;;  %vm1170_vm3 = vcmp.lt.f32.partialorder %v5611_v37, 0.0 }
 0x2a1   : > { %v4011_v27 = vpop.eup %4010  ;;  %v1427_v17 = vadd.f32 1.0, %v1363_v29  ;;  %v540_v49 = vmul.f32 0.5, %v539_v0  ;;  %v5676_v45 = vadd.f32 %v896_v39, %v4696_v2  ;;  %v1041_v37 = vmul.f32 0.5, %v5572_v40 }
 0x2a2   : > { %v3472_v18 = vadd.f32 1.0, %v3408_v19  ;;  %v2833_v41 = vmul.f32 %v2769_v34, %v1810_v24  ;;  %v2514_v36 = vadd.f32 -1.4531521, %v2450_v25  ;;  %v1234_v34 = vsel %vm1170_vm3, -1.0, %v7013_v53 }
 0x2a3   : > { %4012 = vrcp.f32 %v1427_v17  ;;  %v1836_v31 = vand.u32 2147483647, %v1427_v17  ;;  %v1838_v5 = vand.u32 2147483648, %v1427_v17  ;;  %v541_v19 = vsub.f32 1.5, %v540_v49 }
 0x2a4   : > { %v3536_v22 = vmul.f32 %v3472_v18, %v1040_v46  ;;  %v2897_v23 = vadd.f32 0.2548296, %v2833_v41  ;;  %v2578_v1 = vmul.f32 %v2514_v36, %v1825_v8  ;;  %4014 = vpow2.f32 %v3177_v3 }
 0x2a5   : > { %4016 = vrsqrt.f32 %v5660_v9  ;;  %vm1832_vm7 = vweird.f32 %v1427_v17  ;;  %vm544_vm8 = vweird.f32 %v5648_v30  ;;  %v1042_v11 = vmul.f32 0.5, %v5602_v42 }
 0x2a6   : > { %v3589_v28 = vpack.c.bf16 %v3536_v22, %v3535_v47  ;;  %v2961_v50 = vmul.f32 %v2897_v23, %v1810_v24  ;;  %v2642_v4 = vadd.f32 1.4214138, %v2578_v1  ;;  %v1839_v47 = vor.u32 1.1754944e-38, %v1838_v5  ;;  %vm545_vm11 = vmor %vm543_vm4, %vm544_vm8 }
 0x2a7   : > { %v5682_v18 = vmul.f32 0.70710677, %v5676_v45  ;;  %vm1837_vm10 = vcmp.eq.f32.partialorder %v1836_v31, 8.507059e+37  ;;  %v542_v22 = vmul.f32 %v5648_v30, %v541_v19  ;;  %vm553_vm13 = vweird.f32 %v5660_v9 }
 0x2a8   : > { %3621 = vst [vmem:[%s4954_s28 + $0x50] sm:$0xff] %v3589_v28  ;;  %v3281_v55 = vmul.f32 %v4011_v27, %v2961_v50  ;;  %v2706_v32 = vmul.f32 %v2642_v4, %v1825_v8  ;;  %v3027_v28 = vsub.f32 0.0, %v5655_v10  ;;  %vm1171_vm15 = vcmp.lt.f32.partialorder %v5651_v56, 0.0 }
 0x2a9   : > { %v4013_v15 = vpop.eup %4012  ;;  %v1300_v36 = vand.u32 2147483647, %v5682_v18  ;;  %v546_v29 = vsel %vm545_vm11, %v5648_v30, %v542_v22  ;;  %v7025_v22 = vld [vmem:[#allocation2_spill] sm:$0xff]  ;;  %vm1172_vm2 = vcmp.lt.f32.partialorder %v5682_v18, 0.0 }
 0x2aa   : > { %v2770_v26 = vadd.f32 -0.28449672, %v2706_v32  ;;  %v3345_v13 = vsub.f32 1.0, %v3281_v55  ;;  %v1828_v16 = vmul.f32 %v4013_v15, %v1427_v17  ;;  %v4015_v58 = vpop.eup %4014  ;;  %vm1833_vm6 = vweird.f32 %v4013_v15 }
 0x2ab   : > { %v5668_v7 = vpop.eup %4016  ;;  %vm1834_vm9 = vmor %vm1832_vm7, %vm1833_vm6  ;;  %v1364_v50 = vmul.f32 0.3275911, %v1300_v36  ;;  %v3091_v17 = vmul.f32 %v3027_v28, %v5655_v10  ;;  %v571_v55 = vmul.f32 %v546_v29, %v4631_v48  ;;  %v5703_v10 = vld [vmem:[%s6990_s1] ss:$0 sm:$0xff] }
 0x2ac   : > { %v2834_v24 = vmul.f32 %v2770_v26, %v1825_v8  ;;  %v3409_v14 = vmul.f32 %v3345_v13, %v1233_v38  ;;  %v1829_v52 = vsub.f32 1.0, %v1828_v16  ;;  %v548_v12 = vmul.f32 %v5668_v7, %v5660_v9  ;;  %v994_v26 = vpop.f32.mrf.mxu3  ;;  %v5727_v9 = vld [vmem:[%s6991_s2] ss:$0 sm:$0xff] }
 0x2ad   : > { %v1428_v27 = vadd.f32 1.0, %v1364_v50  ;;  %v5698_v0 = vadd.f32 %v994_v26, %v4760_v54  ;;  %v3179_v30 = vmul.f32 1.442695, %v3091_v17  ;;  %v591_v48 = vmul.f32 %v5703_v10, %v571_v55 }
 0x2ae   : > { %v2898_v62 = vadd.f32 0.2548296, %v2834_v24  ;;  %v3473_v63 = vadd.f32 1.0, %v3409_v14  ;;  %v1830_v35 = vmul.f32 %v4013_v15, %v1829_v52  ;;  %v549_v40 = vmul.f32 %v5668_v7, %v548_v12 }
 0x2af   : > { %4018 = vrcp.f32 %v1428_v27  ;;  %v5695_v24 = vadd.f32 %v945_v33, %v4720_v20  ;;  %vm554_vm12 = vweird.f32 %v5668_v7  ;;  %v5712_v16 = vmul.f32 0.70710677, %v5698_v0 }
 0x2b0   : > { %v2962_v43 = vmul.f32 %v2898_v62, %v1825_v8  ;;  %v1831_v8 = vadd.f32 %v4013_v15, %v1830_v35  ;;  %v3537_v41 = vmul.f32 %v3473_v63, %v1041_v37  ;;  %v550_v4 = vmul.f32 0.5, %v549_v40  ;;  %v849_v62 = vpop.f32.mrf.mxu0  ;;  %vm5720_vm5 = vmor %vm553_vm13, %vm554_vm12 }
 0x2b1   : > { %4020 = vpow2.f32 %v3179_v30  ;;  %v3028_v52 = vsub.f32 0.0, %v1300_v36  ;;  %v1302_v5 = vand.u32 2147483647, %v5712_v16  ;;  %v1851_v39 = vand.u32 2147483647, %v1428_v27 }
 0x2b2   : > { %v3282_v21 = vmul.f32 %v4015_v58, %v2962_v43  ;;  %v1835_v44 = vsel %vm1834_vm9, %v4013_v15, %v1831_v8  ;;  %v551_v32 = vsub.f32 1.5, %v550_v4  ;;  %v5709_v43 = vmul.f32 0.70710677, %v5695_v24 }
 0x2b3   : > { %v1840_v23 = vsel %vm1837_vm10, %v1839_v47, %v1835_v44  ;;  %v5730_v19 = vadd.f32 %v5727_v9, %v591_v48  ;;  %v1853_v12 = vand.u32 2147483648, %v1428_v27  ;;  %vm1847_vm1 = vweird.f32 %v1428_v27 }
 0x2b4   : > { %v3346_v51 = vsub.f32 1.0, %v3282_v21  ;;  %v2451_v60 = vmul.f32 1.0614054, %v1840_v23  ;;  %v552_v14 = vmul.f32 %v5668_v7, %v551_v32  ;;  %v5716_v21 = vadd.f32 %v849_v62, %v4690_v59 }
 0x2b5   : > { %v4019_v38 = vpop.eup %4018  ;;  %v1301_v31 = vand.u32 2147483647, %v5709_v43  ;;  %vm1852_vm3 = vcmp.eq.f32.partialorder %v1851_v39, 8.507059e+37  ;;  %v3030_v4 = vsub.f32 0.0, %v1302_v5 }
 0x2b6   : > { %v3410_v46 = vmul.f32 %v3346_v51, %v1234_v34  ;;  %v2515_v61 = vadd.f32 -1.4531521, %v2451_v60  ;;  %v1843_v49 = vmul.f32 %v4019_v38, %v1428_v27  ;;  %v556_v34 = vsel %vm5720_vm5, %v5668_v7, %v552_v14 }
 0x2b7   : > { %v1365_v37 = vmul.f32 0.3275911, %v1301_v31  ;;  %vm1848_vm14 = vweird.f32 %v4019_v38  ;;  %v5736_v47 = vmul.f32 0.70710677, %v5716_v21  ;;  %v572_v40 = vmul.f32 %v556_v34, %v7025_v22  ;;  %v4021_v60 = vpop.eup %4020 }
 0x2b8   : > { %v3474_v25 = vadd.f32 1.0, %v3410_v46  ;;  %v2579_v3 = vmul.f32 %v2515_v61, %v1840_v23  ;;  %v1844_v35 = vsub.f32 1.0, %v1843_v49  ;;  %v1366_v46 = vmul.f32 0.3275911, %v1302_v5  ;;  %vm1849_vm0 = vmor %vm1847_vm1, %vm1848_vm14 }
 0x2b9   : > { %v3029_v7 = vsub.f32 0.0, %v1301_v31  ;;  %v5747_v28 = vand.u32 2147483647, %v5736_v47  ;;  %v1235_v27 = vsel %vm1171_vm15, -1.0, %v7013_v53  ;;  %v592_v30 = vmul.f32 %v5703_v10, %v572_v40 }
 0x2ba   : > { %v3538_v42 = vmul.f32 %v3474_v25, %v1042_v11  ;;  %v2643_v57 = vadd.f32 1.4214138, %v2579_v3  ;;  %v1845_v11 = vmul.f32 %v4019_v38, %v1844_v35  ;;  %v5739_v25 = vadd.f32 1.0, %v1365_v37 }
 0x2bb   : > { %v5741_v44 = vadd.f32 1.0, %v1366_v46  ;;  %v5759_v3 = vmul.f32 0.5, %v5676_v45  ;;  %v3093_v55 = vmul.f32 %v3029_v7, %v1301_v31  ;;  %v1367_v26 = vmul.f32 0.3275911, %v5747_v28 }
 0x2bc   : > { %v3590_v1 = vpack.c.bf16 %v3538_v42, %v3537_v41  ;;  %v2707_v13 = vmul.f32 %v2643_v57, %v1840_v23  ;;  %v3092_v41 = vmul.f32 %v3028_v52, %v1300_v36  ;;  %v1846_v42 = vadd.f32 %v4019_v38, %v1845_v11  ;;  %v898_v57 = vpop.f32.mrf.mxu1 }
 0x2bd   : > { %4022 = vrcp.f32 %v5739_v25  ;;  %v1866_v32 = vand.u32 2147483647, %v5739_v25  ;;  %v1868_v33 = vand.u32 2147483648, %v5739_v25  ;;  %v5771_v45 = vmul.f32 0.5, %v5695_v24 }
 0x2be   : > { %3622 = vst [vmem:[%s4954_s28 + $0x58] sm:$0xff] %v3590_v1  ;;  %v2771_v15 = vadd.f32 -0.28449672, %v2707_v13  ;;  %v1850_v50 = vsel %vm1849_vm0, %v4019_v38, %v1846_v42  ;;  %4024 = vrcp.f32 %v5741_v44  ;;  %v5751_v1 = vmul.f32 0.5, %v5646_v6 }
 0x2bf   : > { %v3181_v29 = vmul.f32 1.442695, %v3092_v41  ;;  %v5765_v6 = vsel %vm1172_vm2, -1.0, %v7013_v53  ;;  %v5774_v48 = vadd.f32 1.0, %v1367_v26  ;;  %v5777_v18 = vadd.f32 %v898_v57, %v4696_v2 }
 0x2c0   : > { %v2835_v58 = vmul.f32 %v2771_v15, %v1840_v23  ;;  %v3094_v15 = vmul.f32 %v3030_v4, %v1302_v5  ;;  %vm1862_vm4 = vweird.f32 %v5739_v25  ;;  %v3183_v49 = vmul.f32 1.442695, %v3093_v55 }
 0x2c1   : > { %4026 = vpow2.f32 %v3181_v29  ;;  %vm5782_vm6 = vcmp.eq.f32.partialorder %v1866_v32, 8.507059e+37  ;;  %v1869_v10 = vor.u32 1.1754944e-38, %v1868_v33  ;;  %vm1877_vm7 = vweird.f32 %v5741_v44 }
 0x2c2   : > { %v2899_v51 = vadd.f32 0.2548296, %v2835_v58  ;;  %4028 = vrcp.f32 %v5774_v48  ;;  %v1881_v35 = vand.u32 2147483647, %v5741_v44  ;;  %v5791_v39 = vmul.f32 0.70710677, %v5777_v18 }
 0x2c3   : > { %v4023_v62 = vpop.eup %4022  ;;  %v612_v34 = vadd.f32 %v5727_v9, %v592_v30  ;;  %v1883_v46 = vand.u32 2147483648, %v5741_v44  ;;  %4030 = vpow2.f32 %v3183_v49  ;;  %v3185_v42 = vmul.f32 1.442695, %v3094_v15 }
 0x2c4   : > { %v2963_v8 = vmul.f32 %v2899_v51, %v1840_v23  ;;  %v1854_v23 = vor.u32 1.1754944e-38, %v1853_v12  ;;  %v4025_v38 = vpop.eup %4024  ;;  %v1858_v58 = vmul.f32 %v4023_v62, %v5739_v25  ;;  %vm1863_vm8 = vweird.f32 %v4023_v62 }
 0x2c5   : > { %v1873_v52 = vmul.f32 %v4025_v38, %v5741_v44  ;;  %vm1878_vm9 = vweird.f32 %v4025_v38  ;;  %v5797_v41 = vand.u32 2147483647, %v5791_v39  ;;  %v620_v7 = vpack.c.bf16 %v612_v34, %v5730_v19  ;;  %vm1864_vm10 = vmor %vm1862_vm4, %vm1863_vm8 }
 0x2c6   : > { %v3283_v36 = vmul.f32 %v4021_v60, %v2963_v8  ;;  %v5753_v61 = vsel %vm1852_vm3, %v1854_v23, %v1850_v50  ;;  %v1859_v63 = vsub.f32 1.0, %v1858_v58  ;;  %vm5802_vm11 = vcmp.eq.f32.partialorder %v1881_v35, 8.507059e+37  ;;  %vm1879_vm12 = vmor %vm1877_vm7, %vm1878_vm9 }
 0x2c7   : > { %v2452_v17 = vmul.f32 1.0614054, %v5753_v61  ;;  %v1874_v51 = vsub.f32 1.0, %v1873_v52  ;;  %v4027_v8 = vpop.eup %4026  ;;  %v1368_v50 = vmul.f32 0.3275911, %v5797_v41  ;;  %866 = vmatmul.bf16.gmra.mxu0 %v620_v7  ;;  %915 = vmatmul.bf16.gmra.mxu1 %v620_v7  ;;  %v3031_v55 = vsub.f32 0.0, %v5747_v28 }
 0x2c8   : > { %v3347_v56 = vsub.f32 1.0, %v3283_v36  ;;  %v1860_v37 = vmul.f32 %v4023_v62, %v1859_v63  ;;  %v4029_v60 = vpop.eup %4028  ;;  %964 = vmatmul.bf16.gmra.mxu2 %v620_v7  ;;  %1013 = vmatmul.bf16.gmra.mxu3 %v620_v7  ;;  %v1898_v15 = vand.u32 2147483648, %v5774_v48  ;;  %vm1892_vm5 = vweird.f32 %v5774_v48  ;;  %v996_v7 = vpop.f32.mrf.mxu3 }
 0x2c9   : > { %v2516_v13 = vadd.f32 -1.4531521, %v2452_v17  ;;  %v1875_v11 = vmul.f32 %v4025_v38, %v1874_v51  ;;  %v1888_v19 = vmul.f32 %v4029_v60, %v5774_v48  ;;  %v5816_v57 = vadd.f32 1.0, %v1368_v50 }
 0x2ca   : > { %v3411_v31 = vmul.f32 %v3347_v56, %v1235_v27  ;;  %v1861_v40 = vadd.f32 %v4023_v62, %v1860_v37  ;;  %v1884_v27 = vor.u32 1.1754944e-38, %v1883_v46  ;;  %v947_v56 = vpop.f32.mrf.mxu2  ;;  %vm1893_vm13 = vweird.f32 %v4029_v60 }
 0x2cb   : > { %v2580_v14 = vmul.f32 %v2516_v13, %v5753_v61  ;;  %v1876_v23 = vadd.f32 %v4025_v38, %v1875_v11  ;;  %v1889_v26 = vsub.f32 1.0, %v1888_v19  ;;  %v5823_v13 = vpop.eup %4030  ;;  %4032 = vrcp.f32 %v5816_v57  ;;  %vm1894_vm14 = vmor %vm1892_vm5, %vm1893_vm13 }
 0x2cc   : > { %v3475_v9 = vadd.f32 1.0, %v3411_v31  ;;  %v1865_v4 = vsel %vm1864_vm10, %v4023_v62, %v1861_v40  ;;  %v1896_v62 = vand.u32 2147483647, %v5774_v48  ;;  %4034 = vpow2.f32 %v3185_v42 }
 0x2cd   : > { %v2644_v5 = vadd.f32 1.4214138, %v2580_v14  ;;  %v5813_v25 = vsel %vm5782_vm6, %v1869_v10, %v1865_v4  ;;  %v1880_v17 = vsel %vm1879_vm12, %v4025_v38, %v1876_v23  ;;  %v1890_v58 = vmul.f32 %v4029_v60, %v1889_v26 }
 0x2ce   : > { %v2453_v44 = vmul.f32 1.0614054, %v5813_v25  ;;  %v5821_v33 = vsel %vm5802_vm11, %v1884_v27, %v1880_v17  ;;  %v3539_v49 = vmul.f32 %v3475_v9, %v5751_v1  ;;  %v5832_v10 = vadd.f32 %v947_v56, %v4720_v20 }
 0x2cf   : > { %v2708_v12 = vmul.f32 %v2644_v5, %v5753_v61  ;;  %v2454_v30 = vmul.f32 1.0614054, %v5821_v33  ;;  %v1891_v5 = vadd.f32 %v4029_v60, %v1890_v58  ;;  %v3095_v51 = vmul.f32 %v3031_v55, %v5747_v28 }
 0x2d0   : > { %v2517_v14 = vadd.f32 -1.4531521, %v2453_v44  ;;  %v5839_v35 = vmul.f32 0.70710677, %v5832_v10  ;;  %vm1173_vm15 = vcmp.lt.f32.partialorder %v5709_v43, 0.0  ;;  %vm1897_vm1 = vcmp.eq.f32.partialorder %v1896_v62, 8.507059e+37 }
 0x2d1   : > { %v2772_v22 = vadd.f32 -0.28449672, %v2708_v12  ;;  %v2518_v24 = vadd.f32 -1.4531521, %v2454_v30  ;;  %v1895_v12 = vsel %vm1894_vm14, %v4029_v60, %v1891_v5  ;;  %v4033_v37 = vpop.eup %4032  ;;  %vm1174_vm2 = vcmp.lt.f32.partialorder %v5712_v16, 0.0 }
 0x2d2   : > { %v2581_v31 = vmul.f32 %v2517_v14, %v5813_v25  ;;  %v5847_v11 = vand.u32 2147483647, %v5839_v35  ;;  %v1903_v42 = vmul.f32 %v4033_v37, %v5816_v57  ;;  %v4035_v60 = vpop.eup %4034  ;;  %v1911_v23 = vand.u32 2147483647, %v5816_v57 }
 0x2d3   : > { %v2836_v29 = vmul.f32 %v2772_v22, %v5753_v61  ;;  %v2582_v63 = vmul.f32 %v2518_v24, %v5821_v33  ;;  %v1913_v36 = vand.u32 2147483648, %v5816_v57  ;;  %vm1908_vm0 = vweird.f32 %v4033_v37 }
 0x2d4   : > { %v2645_v34 = vadd.f32 1.4214138, %v2581_v31  ;;  %v1369_v50 = vmul.f32 0.3275911, %v5847_v11  ;;  %v5860_v55 = vadd.f32 %v996_v7, %v4760_v54  ;;  %v3187_v62 = vmul.f32 1.442695, %v3095_v51 }
 0x2d5   : > { %v2900_v32 = vadd.f32 0.2548296, %v2836_v29  ;;  %v2646_v46 = vadd.f32 1.4214138, %v2582_v63  ;;  %vm1907_vm3 = vweird.f32 %v5816_v57  ;;  %vm1912_vm6 = vcmp.eq.f32.partialorder %v1911_v23, 8.507059e+37 }
 0x2d6   : > { %v2709_v22 = vmul.f32 %v2645_v34, %v5813_v25  ;;  %v5857_v17 = vadd.f32 1.0, %v1369_v50  ;;  %vm1909_vm4 = vmor %vm1907_vm3, %vm1908_vm0  ;;  %v5874_v57 = vmul.f32 0.70710677, %v5860_v55  ;;  %vm1175_vm11 = vcmp.lt.f32.partialorder %v5736_v47, 0.0 }
 0x2d7   : > { %v2964_v38 = vmul.f32 %v2900_v32, %v5753_v61  ;;  %v1899_v61 = vor.u32 1.1754944e-38, %v1898_v15  ;;  %v2710_v9 = vmul.f32 %v2646_v46, %v5821_v33  ;;  %vm1176_vm12 = vcmp.lt.f32.partialorder %v5791_v39, 0.0 }
 0x2d8   : > { %v2773_v4 = vadd.f32 -0.28449672, %v2709_v22  ;;  %4036 = vrcp.f32 %v5857_v17  ;;  %v1926_v16 = vand.u32 2147483647, %v5857_v17  ;;  %vm1922_vm8 = vweird.f32 %v5857_v17 }
 0x2d9   : > { %v3284_v52 = vmul.f32 %v4027_v8, %v2964_v38  ;;  %v5843_v48 = vsel %vm1897_vm1, %v1899_v61, %v1895_v12  ;;  %v3032_v8 = vsub.f32 0.0, %v5797_v41  ;;  %v2774_v19 = vadd.f32 -0.28449672, %v2710_v9 }
 0x2da   : > { %v2455_v40 = vmul.f32 1.0614054, %v5843_v48  ;;  %v2837_v44 = vmul.f32 %v2773_v4, %v5813_v25  ;;  %v1046_v61 = vmul.f32 0.5, %v5698_v0  ;;  %4038 = vpow2.f32 %v3187_v62 }
 0x2db   : > { %v3348_v1 = vsub.f32 1.0, %v3284_v52  ;;  %v2838_v30 = vmul.f32 %v2774_v19, %v5821_v33  ;;  %v3096_v52 = vmul.f32 %v3032_v8, %v5797_v41  ;;  %v5889_v8 = vand.u32 2147483647, %v5874_v57 }
 0x2dc   : > { %v2519_v27 = vadd.f32 -1.4531521, %v2455_v40  ;;  %v2901_v38 = vadd.f32 0.2548296, %v2837_v44  ;;  %v3033_v40 = vsub.f32 0.0, %v5847_v11  ;;  %vm1927_vm10 = vcmp.eq.f32.partialorder %v1926_v16, 8.507059e+37 }
 0x2dd   : > { %v3412_v28 = vmul.f32 %v3348_v1, %v5765_v6  ;;  %v1904_v6 = vsub.f32 1.0, %v1903_v42  ;;  %v2902_v24 = vadd.f32 0.2548296, %v2838_v30  ;;  %v3189_v43 = vmul.f32 1.442695, %v3096_v52 }
 0x2de   : > { %v2583_v26 = vmul.f32 %v2519_v27, %v5843_v48  ;;  %v2965_v31 = vmul.f32 %v2901_v38, %v5813_v25  ;;  %v1238_v25 = vsel %vm1174_vm2, -1.0, %v7013_v53  ;;  %v1370_v42 = vmul.f32 0.3275911, %v5889_v8 }
 0x2df   : > { %v3476_v29 = vadd.f32 1.0, %v3412_v28  ;;  %v1905_v56 = vmul.f32 %v4033_v37, %v1904_v6  ;;  %v2966_v51 = vmul.f32 %v2902_v24, %v5821_v33  ;;  %vm1177_vm1 = vcmp.lt.f32.partialorder %v5839_v35, 0.0 }
 0x2e0   : > { %v2647_v14 = vadd.f32 1.4214138, %v2583_v26  ;;  %v3285_v41 = vmul.f32 %v5823_v13, %v2965_v31  ;;  %v5898_v4 = vadd.f32 1.0, %v1370_v42  ;;  %vm1178_vm2 = vcmp.lt.f32.partialorder %v5874_v57, 0.0 }
 0x2e1   : > { %v3540_v32 = vmul.f32 %v3476_v29, %v5759_v3  ;;  %v1906_v58 = vadd.f32 %v4033_v37, %v1905_v56  ;;  %v1914_v3 = vor.u32 1.1754944e-38, %v1913_v36  ;;  %v3286_v46 = vmul.f32 %v4035_v60, %v2966_v51  ;;  %v852_v36 = vpop.f32.mrf.mxu0 }
 0x2e2   : > { %v2711_v5 = vmul.f32 %v2647_v14, %v5843_v48  ;;  %v3349_v0 = vsub.f32 1.0, %v3285_v41  ;;  %v1928_v29 = vand.u32 2147483648, %v5857_v17  ;;  %4040 = vrcp.f32 %v5898_v4 }
 0x2e3   : > { %v3591_v15 = vpack.c.bf16 %v3540_v32, %v3539_v49  ;;  %v1910_v63 = vsel %vm1909_vm4, %v4033_v37, %v1906_v58  ;;  %v1237_v49 = vsel %vm1173_vm15, -1.0, %v7013_v53  ;;  %v4037_v37 = vpop.eup %4036  ;;  %v3350_v22 = vsub.f32 1.0, %v3286_v46 }
 0x2e4   : > { %v5881_v1 = vsel %vm1912_vm6, %v1914_v3, %v1910_v63  ;;  %v2775_v34 = vadd.f32 -0.28449672, %v2711_v5  ;;  %v1918_v13 = vmul.f32 %v4037_v37, %v5857_v17  ;;  %v3413_v7 = vmul.f32 %v3349_v0, %v1237_v49  ;;  %v4039_v44 = vpop.eup %4038  ;;  %v901_v3 = vpop.f32.mrf.mxu1 }
 0x2e5   : > { %3623 = vst [vmem:[%s4954_s28 + $0x60] sm:$0xff] %v3591_v15  ;;  %v2456_v12 = vmul.f32 1.0614054, %v5881_v1  ;;  %v3414_v50 = vmul.f32 %v3350_v22, %v1238_v25  ;;  %vm1923_vm7 = vweird.f32 %v4037_v37  ;;  %v5904_v56 = vadd.f32 %v852_v36, %v4690_v59 }
 0x2e6   : > { %v2839_v33 = vmul.f32 %v2775_v34, %v5843_v48  ;;  %v1919_v23 = vsub.f32 1.0, %v1918_v13  ;;  %v3477_v27 = vadd.f32 1.0, %v3413_v7  ;;  %vm1924_vm9 = vmor %vm1922_vm8, %vm1923_vm7  ;;  %v3097_v58 = vmul.f32 %v3033_v40, %v5847_v11 }
 0x2e7   : > { %v2520_v28 = vadd.f32 -1.4531521, %v2456_v12  ;;  %v3478_v26 = vadd.f32 1.0, %v3414_v50  ;;  %4042 = vpow2.f32 %v3189_v43  ;;  %v5916_v49 = vmul.f32 0.70710677, %v5904_v56 }
 0x2e8   : > { %v2903_v60 = vadd.f32 0.2548296, %v2839_v33  ;;  %v1920_v32 = vmul.f32 %v4037_v37, %v1919_v23  ;;  %v3541_v30 = vmul.f32 %v3477_v27, %v5771_v45  ;;  %v3191_v11 = vmul.f32 1.442695, %v3097_v58  ;;  %v950_v27 = vpop.f32.mrf.mxu2 }
 0x2e9   : > { %v2584_v9 = vmul.f32 %v2520_v28, %v5881_v1  ;;  %v3542_v14 = vmul.f32 %v3478_v26, %v1046_v61  ;;  %v4041_v61 = vpop.eup %4040  ;;  %v5920_v51 = vadd.f32 %v901_v3, %v4696_v2  ;;  %v1047_v41 = vmul.f32 0.5, %v5716_v21 }
 0x2ea   : > { %v2967_v6 = vmul.f32 %v2903_v60, %v5843_v48  ;;  %v1921_v38 = vadd.f32 %v4037_v37, %v1920_v32  ;;  %v1929_v48 = vor.u32 1.1754944e-38, %v1928_v29  ;;  %v1933_v34 = vmul.f32 %v4041_v61, %v5898_v4 }
 0x2eb   : > { %v2648_v19 = vadd.f32 1.4214138, %v2584_v9  ;;  %v3592_v52 = vpack.c.bf16 %v3542_v14, %v3541_v30  ;;  %v1239_v12 = vsel %vm1175_vm11, -1.0, %v7013_v53  ;;  %v5928_v46 = vand.u32 2147483647, %v5916_v49  ;;  %v999_v30 = vpop.f32.mrf.mxu3 }
 0x2ec   : > { %v3287_v62 = vmul.f32 %v4039_v44, %v2967_v6  ;;  %v1925_v17 = vsel %vm1924_vm9, %v4037_v37, %v1921_v38  ;;  %v1941_v37 = vand.u32 2147483647, %v5898_v4  ;;  %v1934_v28 = vsub.f32 1.0, %v1933_v34 }
 0x2ed   : > { %v2712_v15 = vmul.f32 %v2648_v19, %v5881_v1  ;;  %v5911_v45 = vsel %vm1927_vm10, %v1929_v48, %v1925_v17  ;;  %3624 = vst [vmem:[%s4954_s28 + $0x68] sm:$0xff] %v3592_v52  ;;  %v4043_v21 = vpop.eup %4042  ;;  %4044 = vpow2.f32 %v3191_v11  ;;  %v1943_v13 = vand.u32 2147483648, %v5898_v4 }
 0x2ee   : > { %v3351_v31 = vsub.f32 1.0, %v3287_v62  ;;  %v2457_v63 = vmul.f32 1.0614054, %v5911_v45  ;;  %v1371_v22 = vmul.f32 0.3275911, %v5928_v46  ;;  %v1935_v7 = vmul.f32 %v4041_v61, %v1934_v28 }
 0x2ef   : > { %v2776_v24 = vadd.f32 -0.28449672, %v2712_v15  ;;  %v5935_v16 = vmul.f32 0.70710677, %v5920_v51  ;;  %vm1938_vm13 = vweird.f32 %v4041_v61  ;;  %vm1937_vm5 = vweird.f32 %v5898_v4 }
 0x2f0   : > { %v2521_v25 = vadd.f32 -1.4531521, %v2457_v63  ;;  %v3415_v43 = vmul.f32 %v3351_v31, %v1239_v12  ;;  %v5939_v60 = vadd.f32 1.0, %v1371_v22  ;;  %v1936_v29 = vadd.f32 %v4041_v61, %v1935_v7  ;;  %vm1939_vm14 = vmor %vm1937_vm5, %vm1938_vm13 }
 0x2f1   : > { %v2840_v5 = vmul.f32 %v2776_v24, %v5881_v1  ;;  %v5942_v9 = vand.u32 2147483647, %v5935_v16  ;;  %v1048_v6 = vmul.f32 0.5, %v5777_v18  ;;  %v1240_v19 = vsel %vm1176_vm12, -1.0, %v7013_v53 }
 0x2f2   : > { %v2585_v33 = vmul.f32 %v2521_v25, %v5911_v45  ;;  %v3479_v23 = vadd.f32 1.0, %v3415_v43  ;;  %v1944_v4 = vor.u32 1.1754944e-38, %v1943_v13  ;;  %4046 = vrcp.f32 %v5939_v60 }
 0x2f3   : > { %v2904_v47 = vadd.f32 0.2548296, %v2840_v5  ;;  %v1940_v26 = vsel %vm1939_vm14, %v4041_v61, %v1936_v29  ;;  %vm1942_vm15 = vcmp.eq.f32.partialorder %v1941_v37, 8.507059e+37  ;;  %v4045_v62 = vpop.eup %4044  ;;  %v1372_v18 = vmul.f32 0.3275911, %v5942_v9 }
 0x2f4   : > { %v2649_v42 = vadd.f32 1.4214138, %v2585_v33  ;;  %v5950_v15 = vsel %vm1942_vm15, %v1944_v4, %v1940_v26  ;;  %v5955_v14 = vadd.f32 %v950_v27, %v4720_v20  ;;  %v3543_v39 = vmul.f32 %v3479_v23, %v1047_v41 }
 0x2f5   : > { %v2968_v0 = vmul.f32 %v2904_v47, %v5881_v1  ;;  %v3034_v1 = vsub.f32 0.0, %v5889_v8  ;;  %v2458_v24 = vmul.f32 1.0614054, %v5950_v15  ;;  %v5960_v17 = vmul.f32 0.5, %v5832_v10 }
 0x2f6   : > { %v2713_v50 = vmul.f32 %v2649_v42, %v5911_v45  ;;  %v5962_v3 = vadd.f32 1.0, %v1372_v18  ;;  %v5965_v52 = vadd.f32 %v999_v30, %v4760_v54  ;;  %v5971_v10 = vmul.f32 0.70710677, %v5955_v14 }
 0x2f7   : > { %v3288_v40 = vmul.f32 %v4043_v21, %v2968_v0  ;;  %v3098_v38 = vmul.f32 %v3034_v1, %v5889_v8  ;;  %v2522_v5 = vadd.f32 -1.4531521, %v2458_v24  ;;  %v1241_v35 = vsel %vm1177_vm1, -1.0, %v7013_v53 }
 0x2f8   : > { %v2777_v44 = vadd.f32 -0.28449672, %v2713_v50  ;;  %v4047_v63 = vpop.eup %4046  ;;  %4048 = vrcp.f32 %v5962_v3  ;;  %v5978_v34 = vmul.f32 0.5, %v5860_v55  ;;  %v3035_v12 = vsub.f32 0.0, %v5928_v46 }
 0x2f9   : > { %v3352_v36 = vsub.f32 1.0, %v3288_v40  ;;  %v3193_v61 = vmul.f32 1.442695, %v3098_v38  ;;  %v2586_v47 = vmul.f32 %v2522_v5, %v5950_v15  ;;  %v1948_v25 = vmul.f32 %v4047_v63, %v5939_v60 }
 0x2fa   : > { %v2841_v58 = vmul.f32 %v2777_v44, %v5911_v45  ;;  %v5982_v37 = vmul.f32 0.70710677, %v5965_v52  ;;  %v1956_v33 = vand.u32 2147483647, %v5939_v60  ;;  %v5989_v28 = vsel %vm1178_vm2, -1.0, %v7013_v53 }
 0x2fb   : > { %v3416_v32 = vmul.f32 %v3352_v36, %v1240_v19  ;;  %v2650_v43 = vadd.f32 1.4214138, %v2586_v47  ;;  %v1949_v0 = vsub.f32 1.0, %v1948_v25  ;;  %v1958_v21 = vand.u32 2147483648, %v5939_v60 }
 0x2fc   : > { %v2905_v31 = vadd.f32 0.2548296, %v2841_v58  ;;  %v1309_v55 = vand.u32 2147483647, %v5971_v10  ;;  %4050 = vpow2.f32 %v3193_v61  ;;  %vm1953_vm0 = vweird.f32 %v4047_v63 }
 0x2fd   : > { %v3480_v48 = vadd.f32 1.0, %v3416_v32  ;;  %v2714_v13 = vmul.f32 %v2650_v43, %v5950_v15  ;;  %v1950_v22 = vmul.f32 %v4047_v63, %v1949_v0  ;;  %vm1952_vm3 = vweird.f32 %v5939_v60  ;;  %v854_v32 = vpop.f32.mrf.mxu0 }
 0x2fe   : > { %v2969_v41 = vmul.f32 %v2905_v31, %v5911_v45  ;;  %v4049_v40 = vpop.eup %4048  ;;  %v3099_v42 = vmul.f32 %v3035_v12, %v5928_v46  ;;  %v1373_v7 = vmul.f32 0.3275911, %v1309_v55  ;;  %v5997_v1 = vand.u32 2147483647, %v5982_v37  ;;  %vm1954_vm6 = vmor %vm1952_vm3, %vm1953_vm0 }
 0x2ff   : > { %v3544_v8 = vmul.f32 %v3480_v48, %v1048_v6  ;;  %v2778_v57 = vadd.f32 -0.28449672, %v2714_v13  ;;  %v1951_v23 = vadd.f32 %v4047_v63, %v1950_v22  ;;  %vm1957_vm4 = vcmp.eq.f32.partialorder %v1956_v33, 8.507059e+37 }
 0x300   : > { %v3289_v45 = vmul.f32 %v4045_v62, %v2969_v41  ;;  %v1963_v36 = vmul.f32 %v4049_v40, %v5962_v3  ;;  %v1959_v29 = vor.u32 1.1754944e-38, %v1958_v21  ;;  %v6000_v27 = vadd.f32 1.0, %v1373_v7 }
 0x301   : > { %v3593_v11 = vpack.c.bf16 %v3544_v8, %v3543_v39  ;;  %v1374_v6 = vmul.f32 0.3275911, %v5997_v1  ;;  %v2842_v60 = vmul.f32 %v2778_v57, %v5950_v15  ;;  %v1955_v19 = vsel %vm1954_vm6, %v4047_v63, %v1951_v23 }
 0x302   : > { %v3353_v50 = vsub.f32 1.0, %v3289_v45  ;;  %v1964_v46 = vsub.f32 1.0, %v1963_v36  ;;  %v3036_v4 = vsub.f32 0.0, %v5942_v9  ;;  %v6005_v44 = vsel %vm1957_vm4, %v1959_v29, %v1955_v19  ;;  %v4051_v62 = vpop.eup %4050  ;;  %v903_v19 = vpop.f32.mrf.mxu1 }
 0x303   : > { %3625 = vst [vmem:[%s4954_s28 + $0x70] sm:$0xff] %v3593_v11  ;;  %v1971_v26 = vand.u32 2147483647, %v5962_v3  ;;  %v1973_v30 = vand.u32 2147483648, %v5962_v3  ;;  %4052 = vrcp.f32 %v6000_v27  ;;  %v2906_v38 = vadd.f32 0.2548296, %v2842_v60 }
 0x304   : > { %v2459_v18 = vmul.f32 1.0614054, %v6005_v44  ;;  %v1965_v39 = vmul.f32 %v4049_v40, %v1964_v46  ;;  %vm1968_vm7 = vweird.f32 %v4049_v40  ;;  %v3417_v48 = vmul.f32 %v3353_v50, %v1241_v35 }
 0x305   : > { %v3195_v58 = vmul.f32 1.442695, %v3099_v42  ;;  %v6011_v24 = vadd.f32 1.0, %v1374_v6  ;;  %v6014_v8 = vadd.f32 %v854_v32, %v4690_v59  ;;  %v2970_v31 = vmul.f32 %v2906_v38, %v5950_v15 }
 0x306   : > { %v2523_v5 = vadd.f32 -1.4531521, %v2459_v18  ;;  %v1966_v63 = vadd.f32 %v4049_v40, %v1965_v39  ;;  %vm1967_vm8 = vweird.f32 %v5962_v3  ;;  %vm1972_vm10 = vcmp.eq.f32.partialorder %v1971_v26, 8.507059e+37 }
 0x307   : > { %vm1969_vm9 = vmor %vm1967_vm8, %vm1968_vm7  ;;  %v1974_v61 = vor.u32 1.1754944e-38, %v1973_v30  ;;  %v3100_v11 = vmul.f32 %v3036_v4, %v5942_v9  ;;  %v3037_v41 = vsub.f32 0.0, %v1309_v55  ;;  %v3290_v47 = vmul.f32 %v4051_v62, %v2970_v31 }
 0x308   : > { %v2587_v25 = vmul.f32 %v2523_v5, %v6005_v44  ;;  %v1970_v35 = vsel %vm1969_vm9, %v4049_v40, %v1966_v63  ;;  %4054 = vrcp.f32 %v6011_v24  ;;  %v3481_v43 = vadd.f32 1.0, %v3417_v48 }
 0x309   : > { %v4053_v12 = vpop.eup %4052  ;;  %4056 = vpow2.f32 %v3195_v58  ;;  %v6021_v15 = vsel %vm1972_vm10, %v1974_v61, %v1970_v35  ;;  %v1986_v0 = vand.u32 2147483647, %v6000_v27  ;;  %v3354_v3 = vsub.f32 1.0, %v3290_v47 }
 0x30a   : > { %v2651_v33 = vadd.f32 1.4214138, %v2587_v25  ;;  %v2460_v45 = vmul.f32 1.0614054, %v6021_v15  ;;  %v1978_v9 = vmul.f32 %v4053_v12, %v6000_v27  ;;  %v3197_v21 = vmul.f32 1.442695, %v3100_v11 }
 0x30b   : > { %vm1982_vm11 = vweird.f32 %v6000_v27  ;;  %v1988_v13 = vand.u32 2147483648, %v6000_v27  ;;  %v3101_v22 = vmul.f32 %v3037_v41, %v1309_v55  ;;  %v3418_v40 = vmul.f32 %v3354_v3, %v5989_v28 }
 0x30c   : > { %v2715_v42 = vmul.f32 %v2651_v33, %v6005_v44  ;;  %v2524_v7 = vadd.f32 -1.4531521, %v2460_v45  ;;  %v1979_v57 = vsub.f32 1.0, %v1978_v9  ;;  %v3545_v23 = vmul.f32 %v3481_v43, %v5960_v17 }
 0x30d   : > { %vm1983_vm12 = vweird.f32 %v4053_v12  ;;  %vm6031_vm13 = vcmp.eq.f32.partialorder %v1986_v0, 8.507059e+37  ;;  %v6036_v50 = vmul.f32 0.70710677, %v6014_v8  ;;  %v3482_v6 = vadd.f32 1.0, %v3418_v40 }
 0x30e   : > { %v4055_v29 = vpop.eup %4054  ;;  %vm1179_vm5 = vcmp.lt.f32.partialorder %v5916_v49, 0.0  ;;  %v2779_v55 = vadd.f32 -0.28449672, %v2715_v42  ;;  %v2588_v28 = vmul.f32 %v2524_v7, %v6021_v15  ;;  %v1980_v60 = vmul.f32 %v4053_v12, %v1979_v57  ;;  %vm1984_vm15 = vmor %vm1982_vm11, %vm1983_vm12 }
 0x30f   : > { %v4057_v46 = vpop.eup %4056  ;;  %v1989_v4 = vor.u32 1.1754944e-38, %v1988_v13  ;;  %v1993_v17 = vmul.f32 %v4055_v29, %v6011_v24  ;;  %v2001_v32 = vand.u32 2147483647, %v6011_v24  ;;  %v6043_v26 = vand.u32 2147483647, %v6036_v50 }
 0x310   : > { %v3546_v30 = vmul.f32 %v3482_v6, %v5978_v34  ;;  %v2843_v62 = vmul.f32 %v2779_v55, %v6005_v44  ;;  %vm1180_vm14 = vcmp.lt.f32.partialorder %v5935_v16, 0.0  ;;  %v2652_v38 = vadd.f32 1.4214138, %v2588_v28 }
 0x311   : > { %v1981_v18 = vadd.f32 %v4053_v12, %v1980_v60  ;;  %v1994_v39 = vsub.f32 1.0, %v1993_v17  ;;  %v2003_v48 = vand.u32 2147483648, %v6011_v24  ;;  %v1375_v58 = vmul.f32 0.3275911, %v6043_v26 }
 0x312   : > { %v6054_v31 = vadd.f32 %v903_v19, %v4696_v2  ;;  %v3594_v34 = vpack.c.bf16 %v3546_v30, %v3545_v23  ;;  %v2907_v5 = vadd.f32 0.2548296, %v2843_v62  ;;  %v2716_v63 = vmul.f32 %v2652_v38, %v6021_v15 }
 0x313   : > { %v1985_v61 = vsel %vm1984_vm15, %v4053_v12, %v1981_v18  ;;  %v1995_v41 = vmul.f32 %v4055_v29, %v1994_v39  ;;  %vm1998_vm1 = vweird.f32 %v4055_v29  ;;  %v6061_v27 = vadd.f32 1.0, %v1375_v58 }
 0x314   : > { %v6059_v11 = vsel %vm6031_vm13, %v1989_v4, %v1985_v61  ;;  %3626 = vst [vmem:[%s4954_s28 + $0x78] sm:$0xff] %v3594_v34  ;;  %v2971_v47 = vmul.f32 %v2907_v5, %v6005_v44  ;;  %v2780_v25 = vadd.f32 -0.28449672, %v2716_v63  ;;  %4058 = vpow2.f32 %v3197_v21 }
 0x315   : > { %v2461_v35 = vmul.f32 1.0614054, %v6059_v11  ;;  %v1996_v43 = vadd.f32 %v4055_v29, %v1995_v41  ;;  %vm1997_vm2 = vweird.f32 %v6011_v24  ;;  %v3038_v12 = vsub.f32 0.0, %v5997_v1  ;;  %v1001_v41 = vpop.f32.mrf.mxu3 }
 0x316   : > { %4060 = vrcp.f32 %v6061_v27  ;;  %v3291_v0 = vmul.f32 %v4057_v46, %v2971_v47  ;;  %v2844_v3 = vmul.f32 %v2780_v25, %v6021_v15  ;;  %vm1999_vm0 = vmor %vm1997_vm2, %vm1998_vm1  ;;  %v2004_v45 = vor.u32 1.1754944e-38, %v2003_v48 }
 0x317   : > { %v2525_v33 = vadd.f32 -1.4531521, %v2461_v35  ;;  %v3199_v9 = vmul.f32 1.442695, %v3101_v22  ;;  %v2000_v13 = vsel %vm1999_vm0, %v4055_v29, %v1996_v43  ;;  %vm2002_vm3 = vcmp.eq.f32.partialorder %v2001_v32, 8.507059e+37 }
 0x318   : > { %v6071_v44 = vmul.f32 0.70710677, %v6054_v31  ;;  %v3355_v21 = vsub.f32 1.0, %v3291_v0  ;;  %v2908_v40 = vadd.f32 0.2548296, %v2844_v3  ;;  %v6074_v42 = vsel %vm2002_vm3, %v2004_v45, %v2000_v13 }
 0x319   : > { %v2589_v24 = vmul.f32 %v2525_v33, %v6059_v11  ;;  %v1051_v7 = vmul.f32 0.5, %v5904_v56  ;;  %v1243_v57 = vsel %vm1179_vm5, -1.0, %v7013_v53  ;;  %v2462_v23 = vmul.f32 1.0614054, %v6074_v42 }
 0x31a   : > { %v3102_v22 = vmul.f32 %v3038_v12, %v5997_v1  ;;  %v4059_v36 = vpop.eup %4058  ;;  %v3419_v29 = vmul.f32 %v3355_v21, %v1243_v57  ;;  %v1052_v6 = vmul.f32 0.5, %v5920_v51  ;;  %v2972_v55 = vmul.f32 %v2908_v40, %v6021_v15  ;;  %v952_v1 = vpop.f32.mrf.mxu2 }
 0x31b   : > { %v2653_v28 = vadd.f32 1.4214138, %v2589_v24  ;;  %v1244_v56 = vsel %vm1180_vm14, -1.0, %v7013_v53  ;;  %v6088_v19 = vmul.f32 0.5, %v5955_v14  ;;  %v2526_v49 = vadd.f32 -1.4531521, %v2462_v23 }
 0x31c   : > { %v4061_v60 = vpop.eup %4060  ;;  %v6091_v46 = vand.u32 2147483647, %v6071_v44  ;;  %v3292_v4 = vmul.f32 %v4059_v36, %v2972_v55  ;;  %vm1181_vm4 = vcmp.lt.f32.partialorder %v5971_v10, 0.0  ;;  %4062 = vpow2.f32 %v3199_v9 }
 0x31d   : > { %v2717_v51 = vmul.f32 %v2653_v28, %v6059_v11  ;;  %vm1182_vm6 = vcmp.lt.f32.partialorder %v5982_v37, 0.0  ;;  %v2008_v15 = vmul.f32 %v4061_v60, %v6061_v27  ;;  %v3483_v16 = vadd.f32 1.0, %v3419_v29 }
 0x31e   : > { %v2590_v17 = vmul.f32 %v2526_v49, %v6074_v42  ;;  %v3201_v14 = vmul.f32 1.442695, %v3102_v22  ;;  %v1376_v32 = vmul.f32 0.3275911, %v6091_v46  ;;  %v3356_v30 = vsub.f32 1.0, %v3292_v4 }
 0x31f   : > { %v2781_v62 = vadd.f32 -0.28449672, %v2717_v51  ;;  %v2009_v38 = vsub.f32 1.0, %v2008_v15  ;;  %v6100_v18 = vadd.f32 %v952_v1, %v4720_v20  ;;  %v2016_v48 = vand.u32 2147483647, %v6061_v27 }
 0x320   : > { %v2654_v39 = vadd.f32 1.4214138, %v2590_v17  ;;  %v2018_v58 = vand.u32 2147483648, %v6061_v27  ;;  %v6104_v34 = vadd.f32 1.0, %v1376_v32  ;;  %v3420_v5 = vmul.f32 %v3356_v30, %v1244_v56 }
 0x321   : > { %v2845_v63 = vmul.f32 %v2781_v62, %v6059_v11  ;;  %v2010_v61 = vmul.f32 %v4061_v60, %v2009_v38  ;;  %vm2013_vm7 = vweird.f32 %v4061_v60  ;;  %v3547_v47 = vmul.f32 %v3483_v16, %v1051_v7 }
 0x322   : > { %v2718_v25 = vmul.f32 %v2654_v39, %v6074_v42  ;;  %vm2012_vm8 = vweird.f32 %v6061_v27  ;;  %4064 = vrcp.f32 %v6104_v34  ;;  %v4063_v35 = vpop.eup %4062  ;;  %v3484_v43 = vadd.f32 1.0, %v3420_v5  ;;  %v857_v39 = vpop.f32.mrf.mxu0 }
 0x323   : > { %v2909_v12 = vadd.f32 0.2548296, %v2845_v63  ;;  %v2011_v0 = vadd.f32 %v4061_v60, %v2010_v61  ;;  %v6111_v3 = vmul.f32 0.70710677, %v6100_v18  ;;  %4066 = vpow2.f32 %v3201_v14  ;;  %vm2014_vm9 = vmor %vm2012_vm8, %vm2013_vm7 }
 0x324   : > { %v2782_v33 = vadd.f32 -0.28449672, %v2718_v25  ;;  %v2019_v45 = vor.u32 1.1754944e-38, %v2018_v58  ;;  %v6114_v9 = vadd.f32 %v1001_v41, %v4760_v54  ;;  %v3548_v13 = vmul.f32 %v3484_v43, %v1052_v6 }
 0x325   : > { %v2973_v21 = vmul.f32 %v2909_v12, %v6059_v11  ;;  %v2015_v27 = vsel %vm2014_vm9, %v4061_v60, %v2011_v0  ;;  %vm2017_vm10 = vcmp.eq.f32.partialorder %v2016_v48, 8.507059e+37  ;;  %v1054_v40 = vmul.f32 0.5, %v5965_v52 }
 0x326   : > { %v2846_v24 = vmul.f32 %v2782_v33, %v6074_v42  ;;  %v6119_v7 = vsel %vm2017_vm10, %v2019_v45, %v2015_v27  ;;  %v3039_v57 = vsub.f32 0.0, %v6043_v26  ;;  %v3595_v23 = vpack.c.bf16 %v3548_v13, %v3547_v47 }
 0x327   : > { %v3293_v22 = vmul.f32 %v4063_v35, %v2973_v21  ;;  %v2463_v36 = vmul.f32 1.0614054, %v6119_v7  ;;  %v6124_v29 = vand.u32 2147483647, %v6111_v3  ;;  %v1245_v11 = vsel %vm1181_vm4, -1.0, %v7013_v53 }
 0x328   : > { %v4065_v6 = vpop.eup %4064  ;;  %v1246_v52 = vsel %vm1182_vm6, -1.0, %v7013_v53  ;;  %v2910_v55 = vadd.f32 0.2548296, %v2846_v24  ;;  %v6133_v28 = vmul.f32 0.70710677, %v6114_v9  ;;  %3627 = vst [vmem:[%s4954_s28 + $0x80] sm:$0xff] %v3595_v23  ;;  %v3103_v37 = vmul.f32 %v3039_v57, %v6043_v26 }
 0x329   : > { %v3357_v60 = vsub.f32 1.0, %v3293_v22  ;;  %v6137_v56 = vmul.f32 0.5, %v6014_v8  ;;  %v2527_v49 = vadd.f32 -1.4531521, %v2463_v36  ;;  %v2023_v1 = vmul.f32 %v4065_v6, %v6104_v34  ;;  %v4067_v4 = vpop.eup %4066 }
 0x32a   : > { %v2974_v10 = vmul.f32 %v2910_v55, %v6074_v42  ;;  %vm1183_vm11 = vcmp.lt.f32.partialorder %v6036_v50, 0.0  ;;  %v1377_v51 = vmul.f32 0.3275911, %v6124_v29  ;;  %v3040_v14 = vsub.f32 0.0, %v6091_v46  ;;  %v906_v55 = vpop.f32.mrf.mxu1 }
 0x32b   : > { %v3421_v15 = vmul.f32 %v3357_v60, %v1245_v11  ;;  %v2591_v16 = vmul.f32 %v2527_v49, %v6119_v7  ;;  %v2024_v17 = vsub.f32 1.0, %v2023_v1  ;;  %v2033_v32 = vand.u32 2147483648, %v6104_v34 }
 0x32c   : > { %v3294_v8 = vmul.f32 %v4067_v4, %v2974_v10  ;;  %v6147_v30 = vadd.f32 1.0, %v1377_v51  ;;  %v6150_v62 = vand.u32 2147483647, %v6133_v28  ;;  %vm2028_vm12 = vweird.f32 %v4065_v6 }
 0x32d   : > { %v2655_v42 = vadd.f32 1.4214138, %v2591_v16  ;;  %v2025_v38 = vmul.f32 %v4065_v6, %v2024_v17  ;;  %v2031_v26 = vand.u32 2147483647, %v6104_v34  ;;  %v3485_v48 = vadd.f32 1.0, %v3421_v15 }
 0x32e   : > { %v3358_v58 = vsub.f32 1.0, %v3294_v8  ;;  %v3203_v5 = vmul.f32 1.442695, %v3103_v37  ;;  %4068 = vrcp.f32 %v6147_v30  ;;  %vm2027_vm13 = vweird.f32 %v6104_v34 }
 0x32f   : > { %v2719_v63 = vmul.f32 %v2655_v42, %v6119_v7  ;;  %v2026_v61 = vadd.f32 %v4065_v6, %v2025_v38  ;;  %v3104_v41 = vmul.f32 %v3040_v14, %v6091_v46  ;;  %vm2029_vm5 = vmor %vm2027_vm13, %vm2028_vm12  ;;  %v2034_v25 = vor.u32 1.1754944e-38, %v2033_v32 }
 0x330   : > { %v3422_v47 = vmul.f32 %v3358_v58, %v1246_v52  ;;  %v1378_v35 = vmul.f32 0.3275911, %v6150_v62  ;;  %v6159_v43 = vadd.f32 %v857_v39, %v4690_v59  ;;  %v6164_v12 = vsel %vm1183_vm11, -1.0, %v7013_v53 }
 0x331   : > { %v2783_v0 = vadd.f32 -0.28449672, %v2719_v63  ;;  %v2030_v33 = vsel %vm2029_vm5, %v4065_v6, %v2026_v61  ;;  %vm2032_vm14 = vcmp.eq.f32.partialorder %v2031_v26, 8.507059e+37  ;;  %v3549_v34 = vmul.f32 %v3485_v48, %v6088_v19 }
 0x332   : > { %v3486_v45 = vadd.f32 1.0, %v3422_v47  ;;  %v6167_v46 = vsel %vm2032_vm14, %v2034_v25, %v2030_v33  ;;  %v6169_v13 = vadd.f32 1.0, %v1378_v35  ;;  %4070 = vpow2.f32 %v3203_v5 }
 0x333   : > { %v2847_v21 = vmul.f32 %v2783_v0, %v6119_v7  ;;  %vm1184_vm15 = vcmp.lt.f32.partialorder %v6071_v44, 0.0  ;;  %v2464_v27 = vmul.f32 1.0614054, %v6167_v46  ;;  %v3205_v57 = vmul.f32 1.442695, %v3104_v41 }
 0x334   : > { %v4069_v50 = vpop.eup %4068  ;;  %v3550_v24 = vmul.f32 %v3486_v45, %v1054_v40  ;;  %4072 = vrcp.f32 %v6169_v13  ;;  %v6176_v19 = vmul.f32 0.70710677, %v6159_v43  ;;  %v6179_v22 = vmul.f32 0.5, %v6054_v31 }
 0x335   : > { %v2911_v23 = vadd.f32 0.2548296, %v2847_v21  ;;  %v2528_v36 = vadd.f32 -1.4531521, %v2464_v27  ;;  %v2038_v6 = vmul.f32 %v4069_v50, %v6147_v30  ;;  %v6183_v44 = vsel %vm1184_vm15, -1.0, %v7013_v53 }
 0x336   : > { %v3596_v11 = vpack.c.bf16 %v3550_v24, %v3549_v34  ;;  %v6186_v40 = vmul.f32 0.5, %v6100_v18  ;;  %v6189_v52 = vmul.f32 0.5, %v6114_v9  ;;  %vm1185_vm1 = vcmp.lt.f32.partialorder %v6111_v3, 0.0  ;;  %v955_v24 = vpop.f32.mrf.mxu2 }
 0x337   : > { %v2975_v60 = vmul.f32 %v2911_v23, %v6119_v7  ;;  %v2592_v49 = vmul.f32 %v2528_v36, %v6167_v46  ;;  %v2039_v31 = vsub.f32 1.0, %v2038_v6  ;;  %4074 = vpow2.f32 %v3205_v57 }
 0x338   : > { %3628 = vst [vmem:[%s4954_s28 + $0x88] sm:$0xff] %v3596_v11  ;;  %v2046_v1 = vand.u32 2147483647, %v6147_v30  ;;  %v2048_v4 = vand.u32 2147483648, %v6147_v30  ;;  %v6198_v18 = vand.u32 2147483647, %v6176_v19  ;;  %v4071_v10 = vpop.eup %4070  ;;  %vm2043_vm2 = vweird.f32 %v4069_v50 }
 0x339   : > { %v2656_v9 = vadd.f32 1.4214138, %v2592_v49  ;;  %v2040_v37 = vmul.f32 %v4069_v50, %v2039_v31  ;;  %v6201_v7 = vadd.f32 %v906_v55, %v4696_v2  ;;  %v3295_v15 = vmul.f32 %v4071_v10, %v2975_v60 }
 0x33a   : > { %v4073_v51 = vpop.eup %4072  ;;  %v3041_v16 = vsub.f32 0.0, %v6124_v29  ;;  %vm1186_vm0 = vcmp.lt.f32.partialorder %v6133_v28, 0.0  ;;  %v1379_v17 = vmul.f32 0.3275911, %v6198_v18  ;;  %vm2042_vm3 = vweird.f32 %v6147_v30 }
 0x33b   : > { %v2720_v14 = vmul.f32 %v2656_v9, %v6167_v46  ;;  %v2041_v8 = vadd.f32 %v4069_v50, %v2040_v37  ;;  %v2053_v32 = vmul.f32 %v4073_v51, %v6169_v13  ;;  %vm2044_vm4 = vmor %vm2042_vm3, %vm2043_vm2  ;;  %vm2047_vm6 = vcmp.eq.f32.partialorder %v2046_v1, 8.507059e+37 }
 0x33c   : > { %v2049_v42 = vor.u32 1.1754944e-38, %v2048_v4  ;;  %v2061_v38 = vand.u32 2147483647, %v6169_v13  ;;  %v6210_v26 = vadd.f32 1.0, %v1379_v17  ;;  %v2063_v5 = vand.u32 2147483648, %v6169_v13 }
 0x33d   : > { %v2784_v39 = vadd.f32 -0.28449672, %v2720_v14  ;;  %v2045_v48 = vsel %vm2044_vm4, %v4069_v50, %v2041_v8  ;;  %v2054_v58 = vsub.f32 1.0, %v2053_v32  ;;  %v4075_v63 = vpop.eup %4074  ;;  %v3359_v61 = vsub.f32 1.0, %v3295_v15 }
 0x33e   : > { %v6213_v41 = vsel %vm2047_vm6, %v2049_v42, %v2045_v48  ;;  %4076 = vrcp.f32 %v6210_v26  ;;  %v6217_v30 = vmul.f32 0.70710677, %v6201_v7  ;;  %vm2058_vm7 = vweird.f32 %v4073_v51 }
 0x33f   : > { %v2848_v47 = vmul.f32 %v2784_v39, %v6167_v46  ;;  %v2465_v25 = vmul.f32 1.0614054, %v6213_v41  ;;  %v2055_v35 = vmul.f32 %v4073_v51, %v2054_v58  ;;  %v6224_v0 = vsel %vm1185_vm1, -1.0, %v7013_v53 }
 0x340   : > { %v3105_v33 = vmul.f32 %v3041_v16, %v6124_v29  ;;  %v6230_v34 = vsel %vm1186_vm0, -1.0, %v7013_v53  ;;  %v6233_v45 = vmul.f32 0.5, %v6159_v43  ;;  %vm2057_vm8 = vweird.f32 %v6169_v13 }
 0x341   : > { %v2912_v21 = vadd.f32 0.2548296, %v2848_v47  ;;  %v2529_v27 = vadd.f32 -1.4531521, %v2465_v25  ;;  %v2056_v50 = vadd.f32 %v4073_v51, %v2055_v35  ;;  %v3423_v3 = vmul.f32 %v3359_v61, %v6164_v12  ;;  %vm2059_vm9 = vmor %vm2057_vm8, %vm2058_vm7 }
 0x342   : > { %v2064_v57 = vor.u32 1.1754944e-38, %v2063_v5  ;;  %v3042_v29 = vsub.f32 0.0, %v6150_v62  ;;  %v6239_v23 = vand.u32 2147483647, %v6217_v30  ;;  %vm2062_vm10 = vcmp.eq.f32.partialorder %v2061_v38, 8.507059e+37  ;;  %v1004_v38 = vpop.f32.mrf.mxu3 }
 0x343   : > { %v2976_v28 = vmul.f32 %v2912_v21, %v6167_v46  ;;  %v2593_v43 = vmul.f32 %v2529_v27, %v6213_v41  ;;  %v2060_v36 = vsel %vm2059_vm9, %v4073_v51, %v2056_v50  ;;  %v3207_v11 = vmul.f32 1.442695, %v3105_v33 }
 0x344   : > { %v4077_v6 = vpop.eup %4076  ;;  %v6243_v55 = vsel %vm2062_vm10, %v2064_v57, %v2060_v36  ;;  %v1380_v13 = vmul.f32 0.3275911, %v6239_v23  ;;  %v6247_v12 = vadd.f32 %v955_v24, %v4720_v20  ;;  %v3487_v46 = vadd.f32 1.0, %v3423_v3 }
 0x345   : > { %v3296_v60 = vmul.f32 %v4075_v63, %v2976_v28  ;;  %v2657_v49 = vadd.f32 1.4214138, %v2593_v43  ;;  %v2466_v31 = vmul.f32 1.0614054, %v6243_v55  ;;  %v2068_v1 = vmul.f32 %v4077_v6, %v6210_v26 }
 0x346   : > { %v3106_v4 = vmul.f32 %v3042_v29, %v6150_v62  ;;  %v2076_v10 = vand.u32 2147483647, %v6210_v26  ;;  %v6253_v9 = vadd.f32 1.0, %v1380_v13  ;;  %vm2073_vm11 = vweird.f32 %v4077_v6 }
 0x347   : > { %v3360_v37 = vsub.f32 1.0, %v3296_v60  ;;  %v2721_v51 = vmul.f32 %v2657_v49, %v6213_v41  ;;  %v2530_v15 = vadd.f32 -1.4531521, %v2466_v31  ;;  %v2069_v16 = vsub.f32 1.0, %v2068_v1 }
 0x348   : > { %v2078_v17 = vand.u32 2147483648, %v6210_v26  ;;  %4078 = vrcp.f32 %v6253_v9  ;;  %v6259_v14 = vmul.f32 0.70710677, %v6247_v12  ;;  %v3551_v39 = vmul.f32 %v3487_v46, %v6137_v56 }
 0x349   : > { %v3424_v8 = vmul.f32 %v3360_v37, %v6183_v44  ;;  %v2785_v62 = vadd.f32 -0.28449672, %v2721_v51  ;;  %v2594_v32 = vmul.f32 %v2530_v15, %v6243_v55  ;;  %v2070_v42 = vmul.f32 %v4077_v6, %v2069_v16 }
 0x34a   : > { %4080 = vpow2.f32 %v3207_v11  ;;  %v3209_v48 = vmul.f32 1.442695, %v3106_v4  ;;  %vm2072_vm12 = vweird.f32 %v6210_v26  ;;  %vm2077_vm5 = vcmp.eq.f32.partialorder %v2076_v10, 8.507059e+37 }
 0x34b   : > { %v3488_v58 = vadd.f32 1.0, %v3424_v8  ;;  %v2849_v5 = vmul.f32 %v2785_v62, %v6213_v41  ;;  %v2658_v63 = vadd.f32 1.4214138, %v2594_v32  ;;  %v2071_v61 = vadd.f32 %v4077_v6, %v2070_v42  ;;  %vm2074_vm13 = vmor %vm2072_vm12, %vm2073_vm11 }
 0x34c   : > { %v2079_v44 = vor.u32 1.1754944e-38, %v2078_v17  ;;  %v6268_v47 = vand.u32 2147483647, %v6259_v14  ;;  %v6271_v25 = vadd.f32 %v1004_v38, %v4760_v54  ;;  %vm1187_vm14 = vcmp.lt.f32.partialorder %v6176_v19, 0.0 }
 0x34d   : > { %v3552_v56 = vmul.f32 %v3488_v58, %v6179_v22  ;;  %v2913_v35 = vadd.f32 0.2548296, %v2849_v5  ;;  %v2722_v26 = vmul.f32 %v2658_v63, %v6243_v55  ;;  %v2075_v33 = vsel %vm2074_vm13, %v4077_v6, %v2071_v61  ;;  %v859_v63 = vpop.f32.mrf.mxu0 }
 0x34e   : > { %v4079_v21 = vpop.eup %4078  ;;  %v6276_v27 = vsel %vm2077_vm5, %v2079_v44, %v2075_v33  ;;  %v3043_v50 = vsub.f32 0.0, %v6198_v18  ;;  %v1381_v24 = vmul.f32 0.3275911, %v6268_v47  ;;  %4082 = vpow2.f32 %v3209_v48 }
 0x34f   : > { %v3597_v3 = vpack.c.bf16 %v3552_v56, %v3551_v39  ;;  %v2977_v57 = vmul.f32 %v2913_v35, %v6213_v41  ;;  %v2786_v29 = vadd.f32 -0.28449672, %v2722_v26  ;;  %v2467_v22 = vmul.f32 1.0614054, %v6276_v27 }
 0x350   : > { %v4081_v28 = vpop.eup %4080  ;;  %v2083_v43 = vmul.f32 %v4079_v21, %v6253_v9  ;;  %v6283_v36 = vadd.f32 1.0, %v1381_v24  ;;  %v6286_v6 = vmul.f32 0.70710677, %v6271_v25  ;;  %v6293_v41 = vsel %vm1187_vm14, -1.0, %v7013_v53 }
 0x351   : > { %3629 = vst [vmem:[%s4954_s28 + $0x90] sm:$0xff] %v3597_v3  ;;  %v3297_v11 = vmul.f32 %v4081_v28, %v2977_v57  ;;  %v2850_v13 = vmul.f32 %v2786_v29, %v6243_v55  ;;  %v2531_v60 = vadd.f32 -1.4531521, %v2467_v22  ;;  %v3107_v49 = vmul.f32 %v3043_v50, %v6198_v18  ;;  %v908_v22 = vpop.f32.mrf.mxu1 }
 0x352   : > { %v2084_v31 = vsub.f32 1.0, %v2083_v43  ;;  %v3044_v1 = vsub.f32 0.0, %v6239_v23  ;;  %4084 = vrcp.f32 %v6283_v36  ;;  %v2093_v37 = vand.u32 2147483648, %v6253_v9 }
 0x353   : > { %v3361_v46 = vsub.f32 1.0, %v3297_v11  ;;  %v2914_v4 = vadd.f32 0.2548296, %v2850_v13  ;;  %v2595_v10 = vmul.f32 %v2531_v60, %v6276_v27  ;;  %vm2088_vm15 = vweird.f32 %v4079_v21 }
 0x354   : > { %v2085_v51 = vmul.f32 %v4079_v21, %v2084_v31  ;;  %v2091_v19 = vand.u32 2147483647, %v6253_v9  ;;  %v6302_v15 = vand.u32 2147483647, %v6286_v6  ;;  %v6307_v8 = vmul.f32 0.5, %v6201_v7  ;;  %v4083_v62 = vpop.eup %4082 }
 0x355   : > { %v3425_v18 = vmul.f32 %v3361_v46, %v6224_v0  ;;  %v2978_v16 = vmul.f32 %v2914_v4, %v6243_v55  ;;  %v2659_v17 = vadd.f32 1.4214138, %v2595_v10  ;;  %vm2087_vm1 = vweird.f32 %v6253_v9 }
 0x356   : > { %v2086_v32 = vadd.f32 %v4079_v21, %v2085_v51  ;;  %v3108_v42 = vmul.f32 %v3044_v1, %v6239_v23  ;;  %v1382_v38 = vmul.f32 0.3275911, %v6302_v15  ;;  %v3211_v58 = vmul.f32 1.442695, %v3107_v49  ;;  %vm2089_vm2 = vmor %vm2087_vm1, %vm2088_vm15 }
 0x357   : > { %v3298_v39 = vmul.f32 %v4083_v62, %v2978_v16  ;;  %v2723_v48 = vmul.f32 %v2659_v17, %v6276_v27  ;;  %v2094_v0 = vor.u32 1.1754944e-38, %v2093_v37  ;;  %vm1188_vm0 = vcmp.lt.f32.partialorder %v6217_v30, 0.0 }
 0x358   : > { %v4085_v55 = vpop.eup %4084  ;;  %v2090_v7 = vsel %vm2089_vm2, %v4079_v21, %v2086_v32  ;;  %vm2092_vm3 = vcmp.eq.f32.partialorder %v2091_v19, 8.507059e+37  ;;  %v6315_v5 = vadd.f32 1.0, %v1382_v38  ;;  %v3489_v9 = vadd.f32 1.0, %v3425_v18 }
 0x359   : > { %v3362_v61 = vsub.f32 1.0, %v3298_v39  ;;  %v2787_v23 = vadd.f32 -0.28449672, %v2723_v48  ;;  %v6317_v44 = vsel %vm2092_vm3, %v2094_v0, %v2090_v7  ;;  %v3213_v35 = vmul.f32 1.442695, %v3108_v42 }
 0x35a   : > { %v2468_v56 = vmul.f32 1.0614054, %v6317_v44  ;;  %v2098_v26 = vmul.f32 %v4085_v55, %v6283_v36  ;;  %4086 = vrcp.f32 %v6315_v5  ;;  %v6325_v50 = vadd.f32 %v859_v63, %v4690_v59 }
 0x35b   : > { %v3426_v33 = vmul.f32 %v3362_v61, %v6230_v34  ;;  %v2851_v21 = vmul.f32 %v2787_v23, %v6276_v27  ;;  %4088 = vpow2.f32 %v3211_v58  ;;  %v6330_v24 = vsel %vm1188_vm0, -1.0, %v7013_v53 }
 0x35c   : > { %v2532_v3 = vadd.f32 -1.4531521, %v2468_v56  ;;  %v2099_v57 = vsub.f32 1.0, %v2098_v26  ;;  %v2106_v29 = vand.u32 2147483647, %v6283_v36  ;;  %v3553_v28 = vmul.f32 %v3489_v9, %v6186_v40 }
 0x35d   : > { %v3490_v43 = vadd.f32 1.0, %v3426_v33  ;;  %v2915_v34 = vadd.f32 0.2548296, %v2851_v21  ;;  %v2108_v11 = vand.u32 2147483648, %v6283_v36  ;;  %4090 = vpow2.f32 %v3213_v35 }
 0x35e   : > { %v2596_v13 = vmul.f32 %v2532_v3, %v6317_v44  ;;  %v2100_v60 = vmul.f32 %v4085_v55, %v2099_v57  ;;  %vm2103_vm4 = vweird.f32 %v4085_v55  ;;  %v6339_v31 = vmul.f32 0.70710677, %v6325_v50 }
 0x35f   : > { %v3554_v30 = vmul.f32 %v3490_v43, %v6189_v52  ;;  %v2979_v49 = vmul.f32 %v2915_v34, %v6276_v27  ;;  %v6342_v1 = vadd.f32 %v908_v22, %v4696_v2  ;;  %vm2102_vm6 = vweird.f32 %v6283_v36  ;;  %v957_v22 = vpop.f32.mrf.mxu2 }
 0x360   : > { %v4087_v40 = vpop.eup %4086  ;;  %v2660_v46 = vadd.f32 1.4214138, %v2596_v13  ;;  %v2101_v4 = vadd.f32 %v4085_v55, %v2100_v60  ;;  %v3045_v10 = vsub.f32 0.0, %v6268_v47  ;;  %vm2104_vm7 = vmor %vm2102_vm6, %vm2103_vm4  ;;  %vm2107_vm8 = vcmp.eq.f32.partialorder %v2106_v29, 8.507059e+37 }
 0x361   : > { %v4089_v37 = vpop.eup %4088  ;;  %v3598_v51 = vpack.c.bf16 %v3554_v30, %v3553_v28  ;;  %v2109_v52 = vor.u32 1.1754944e-38, %v2108_v11  ;;  %v2113_v27 = vmul.f32 %v4087_v40, %v6315_v5  ;;  %v6349_v17 = vand.u32 2147483647, %v6339_v31 }
 0x362   : > { %v3299_v19 = vmul.f32 %v4089_v37, %v2979_v49  ;;  %v2724_v18 = vmul.f32 %v2660_v46, %v6317_v44  ;;  %v2105_v16 = vsel %vm2104_vm7, %v4085_v55, %v2101_v4  ;;  %v2123_v32 = vand.u32 2147483648, %v6315_v5 }
 0x363   : > { %3630 = vst [vmem:[%s4954_s28 + $0x98] sm:$0xff] %v3598_v51  ;;  %v6352_v62 = vsel %vm2107_vm8, %v2109_v52, %v2105_v16  ;;  %v2114_v36 = vsub.f32 1.0, %v2113_v27  ;;  %v6356_v42 = vmul.f32 0.70710677, %v6342_v1  ;;  %v4091_v38 = vpop.eup %4090  ;;  %v3109_v58 = vmul.f32 %v3045_v10, %v6268_v47 }
 0x364   : > { %v2788_v39 = vadd.f32 -0.28449672, %v2724_v18  ;;  %v2469_v48 = vmul.f32 1.0614054, %v6352_v62  ;;  %v1383_v0 = vmul.f32 0.3275911, %v6349_v17  ;;  %vm2118_vm9 = vweird.f32 %v4087_v40 }
 0x365   : > { %v2115_v55 = vmul.f32 %v4087_v40, %v2114_v36  ;;  %v2121_v7 = vand.u32 2147483647, %v6315_v5  ;;  %v3046_v63 = vsub.f32 0.0, %v6302_v15  ;;  %v3363_v9 = vsub.f32 1.0, %v3299_v19 }
 0x366   : > { %v2852_v61 = vmul.f32 %v2788_v39, %v6317_v44  ;;  %v2533_v23 = vadd.f32 -1.4531521, %v2469_v48  ;;  %v6364_v56 = vadd.f32 1.0, %v1383_v0  ;;  %vm1189_vm10 = vcmp.lt.f32.partialorder %v6259_v14, 0.0 }
 0x367   : > { %v2116_v35 = vadd.f32 %v4087_v40, %v2115_v55  ;;  %vm2117_vm11 = vweird.f32 %v6315_v5  ;;  %v6369_v47 = vand.u32 2147483647, %v6356_v42  ;;  %v2124_v21 = vor.u32 1.1754944e-38, %v2123_v32 }
 0x368   : > { %v2916_v26 = vadd.f32 0.2548296, %v2852_v61  ;;  %v2597_v33 = vmul.f32 %v2533_v23, %v6352_v62  ;;  %vm2119_vm12 = vmor %vm2117_vm11, %vm2118_vm9  ;;  %4092 = vrcp.f32 %v6364_v56  ;;  %v3215_v3 = vmul.f32 1.442695, %v3109_v58 }
 0x369   : > { %v2120_v57 = vsel %vm2119_vm12, %v4087_v40, %v2116_v35  ;;  %vm2122_vm13 = vcmp.eq.f32.partialorder %v2121_v7, 8.507059e+37  ;;  %v3110_v29 = vmul.f32 %v3046_v63, %v6302_v15  ;;  %v3427_v28 = vmul.f32 %v3363_v9, %v6293_v41 }
 0x36a   : > { %v2980_v5 = vmul.f32 %v2916_v26, %v6317_v44  ;;  %v2661_v43 = vadd.f32 1.4214138, %v2597_v33  ;;  %v6376_v34 = vsel %vm2122_vm13, %v2124_v21, %v2120_v57  ;;  %v6379_v11 = vmul.f32 0.5, %v6247_v12 }
 0x36b   : > { %v6384_v13 = vsel %vm1189_vm10, -1.0, %v7013_v53  ;;  %v2470_v60 = vmul.f32 1.0614054, %v6376_v34  ;;  %v1384_v15 = vmul.f32 0.3275911, %v6369_v47  ;;  %vm1190_vm5 = vcmp.lt.f32.partialorder %v6286_v6, 0.0 }
 0x36c   : > { %v3300_v30 = vmul.f32 %v4091_v38, %v2980_v5  ;;  %v2725_v41 = vmul.f32 %v2661_v43, %v6352_v62  ;;  %v6391_v44 = vadd.f32 %v957_v22, %v4720_v20  ;;  %v6394_v12 = vmul.f32 0.5, %v6271_v25  ;;  %v1006_v25 = vpop.f32.mrf.mxu3 }
 0x36d   : > { %v2534_v49 = vadd.f32 -1.4531521, %v2470_v60  ;;  %v3217_v40 = vmul.f32 1.442695, %v3110_v29  ;;  %v6396_v14 = vadd.f32 1.0, %v1384_v15  ;;  %v3491_v4 = vadd.f32 1.0, %v3427_v28 }
 0x36e   : > { %v4093_v46 = vpop.eup %4092  ;;  %v3364_v10 = vsub.f32 1.0, %v3300_v30  ;;  %v2789_v37 = vadd.f32 -0.28449672, %v2725_v41  ;;  %4094 = vpow2.f32 %v3215_v3  ;;  %v6399_v51 = vsel %vm1190_vm5, -1.0, %v7013_v53 }
 0x36f   : > { %v2598_v6 = vmul.f32 %v2534_v49, %v6376_v34  ;;  %v2128_v52 = vmul.f32 %v4093_v46, %v6364_v56  ;;  %4096 = vrcp.f32 %v6396_v14  ;;  %v6407_v18 = vmul.f32 0.5, %v6325_v50 }
 0x370   : > { %v3428_v27 = vmul.f32 %v3364_v10, %v6330_v24  ;;  %v2853_v19 = vmul.f32 %v2789_v37, %v6352_v62  ;;  %v6410_v16 = vmul.f32 0.70710677, %v6391_v44  ;;  %4098 = vpow2.f32 %v3217_v40 }
 0x371   : > { %v2662_v36 = vadd.f32 1.4214138, %v2598_v6  ;;  %v2129_v32 = vsub.f32 1.0, %v2128_v52  ;;  %v2138_v38 = vand.u32 2147483648, %v6364_v56  ;;  %v3555_v39 = vmul.f32 %v3491_v4, %v6233_v45  ;;  %v862_v52 = vpop.f32.mrf.mxu0 }
 0x372   : > { %v3492_v48 = vadd.f32 1.0, %v3428_v27  ;;  %v2917_v58 = vadd.f32 0.2548296, %v2853_v19  ;;  %v6415_v0 = vadd.f32 %v1006_v25, %v4760_v54  ;;  %vm2133_vm14 = vweird.f32 %v4093_v46 }
 0x373   : > { %v2726_v24 = vmul.f32 %v2662_v36, %v6376_v34  ;;  %v2130_v55 = vmul.f32 %v4093_v46, %v2129_v32  ;;  %v2136_v50 = vand.u32 2147483647, %v6364_v56  ;;  %v3047_v61 = vsub.f32 0.0, %v6349_v17 }
 0x374   : > { %v4095_v7 = vpop.eup %4094  ;;  %v3556_v63 = vmul.f32 %v3492_v48, %v6307_v8  ;;  %v2981_v9 = vmul.f32 %v2917_v58, %v6352_v62  ;;  %v6423_v45 = vand.u32 2147483647, %v6410_v16  ;;  %vm2132_vm15 = vweird.f32 %v6364_v56 }
 0x375   : > { %v4097_v23 = vpop.eup %4096  ;;  %v2790_v35 = vadd.f32 -0.28449672, %v2726_v24  ;;  %v2131_v26 = vadd.f32 %v4093_v46, %v2130_v55  ;;  %v2139_v33 = vor.u32 1.1754944e-38, %v2138_v38  ;;  %vm2134_vm1 = vmor %vm2132_vm15, %vm2133_vm14  ;;  %v6428_v8 = vmul.f32 0.70710677, %v6415_v0 }
 0x376   : > { %v3599_v21 = vpack.c.bf16 %v3556_v63, %v3555_v39  ;;  %v3301_v3 = vmul.f32 %v4095_v7, %v2981_v9  ;;  %v2143_v57 = vmul.f32 %v4097_v23, %v6396_v14  ;;  %v4099_v62 = vpop.eup %4098  ;;  %vm2137_vm2 = vcmp.eq.f32.partialorder %v2136_v50, 8.507059e+37 }
 0x377   : > { %v2854_v29 = vmul.f32 %v2790_v35, %v6376_v34  ;;  %v2135_v22 = vsel %vm2134_vm1, %v4093_v46, %v2131_v26  ;;  %v1385_v28 = vmul.f32 0.3275911, %v6423_v45  ;;  %v3048_v60 = vsub.f32 0.0, %v6369_v47 }
 0x378   : > { %3631 = vst [vmem:[%s4954_s28 + $0xa0] sm:$0xff] %v3599_v21  ;;  %v3365_v5 = vsub.f32 1.0, %v3301_v3  ;;  %v6433_v43 = vsel %vm2137_vm2, %v2139_v33, %v2135_v22  ;;  %v2144_v56 = vsub.f32 1.0, %v2143_v57  ;;  %v2153_v41 = vand.u32 2147483648, %v6396_v14 }
 0x379   : > { %v2918_v15 = vadd.f32 0.2548296, %v2854_v29  ;;  %v2471_v30 = vmul.f32 1.0614054, %v6433_v43  ;;  %v6438_v49 = vadd.f32 1.0, %v1385_v28  ;;  %vm2148_vm0 = vweird.f32 %v4097_v23 }
 0x37a   : > { %v2145_v40 = vmul.f32 %v4097_v23, %v2144_v56  ;;  %v2151_v46 = vand.u32 2147483647, %v6396_v14  ;;  %v6442_v4 = vand.u32 2147483647, %v6428_v8  ;;  %v3429_v10 = vmul.f32 %v3365_v5, %v6384_v13 }
 0x37b   : > { %v2982_v37 = vmul.f32 %v2918_v15, %v6376_v34  ;;  %v2535_v6 = vadd.f32 -1.4531521, %v2471_v30  ;;  %4100 = vrcp.f32 %v6438_v49  ;;  %vm1191_vm3 = vcmp.lt.f32.partialorder %v6339_v31, 0.0 }
 0x37c   : > { %v3111_v25 = vmul.f32 %v3047_v61, %v6349_v17  ;;  %v2146_v27 = vadd.f32 %v4097_v23, %v2145_v40  ;;  %vm2147_vm4 = vweird.f32 %v6396_v14  ;;  %v2154_v32 = vor.u32 1.1754944e-38, %v2153_v41 }
 0x37d   : > { %v3302_v19 = vmul.f32 %v4099_v62, %v2982_v37  ;;  %v2599_v36 = vmul.f32 %v2535_v6, %v6433_v43  ;;  %vm2149_vm6 = vmor %vm2147_vm4, %vm2148_vm0  ;;  %v1386_v13 = vmul.f32 0.3275911, %v6442_v4  ;;  %vm2152_vm7 = vcmp.eq.f32.partialorder %v2151_v46, 8.507059e+37 }
 0x37e   : > { %v2150_v38 = vsel %vm2149_vm6, %v4097_v23, %v2146_v27  ;;  %v3112_v34 = vmul.f32 %v3048_v60, %v6369_v47  ;;  %v6454_v39 = vadd.f32 %v862_v52, %v4690_v59  ;;  %v3493_v48 = vadd.f32 1.0, %v3429_v10 }
 0x37f   : > { %v3366_v58 = vsub.f32 1.0, %v3302_v19  ;;  %v2663_v17 = vadd.f32 1.4214138, %v2599_v36  ;;  %v6456_v24 = vsel %vm2152_vm7, %v2154_v32, %v2150_v38  ;;  %v3219_v14 = vmul.f32 1.442695, %v3111_v25 }
 0x380   : > { %v2472_v55 = vmul.f32 1.0614054, %v6456_v24  ;;  %v3049_v50 = vsub.f32 0.0, %v6423_v45  ;;  %v6460_v7 = vadd.f32 1.0, %v1386_v13  ;;  %v1255_v47 = vsel %vm1191_vm3, -1.0, %v7013_v53 }
 0x381   : > { %v4101_v63 = vpop.eup %4100  ;;  %v3430_v9 = vmul.f32 %v3366_v58, %v6399_v51  ;;  %v2727_v61 = vmul.f32 %v2663_v17, %v6433_v43  ;;  %v6468_v23 = vmul.f32 0.5, %v6342_v1  ;;  %v3221_v26 = vmul.f32 1.442695, %v3112_v34  ;;  %v960_v17 = vpop.f32.mrf.mxu2 }
 0x382   : > { %v2536_v35 = vadd.f32 -1.4531521, %v2472_v55  ;;  %v2158_v33 = vmul.f32 %v4101_v63, %v6438_v49  ;;  %4102 = vrcp.f32 %v6460_v7  ;;  %v3557_v21 = vmul.f32 %v3493_v48, %v6379_v11 }
 0x383   : > { %v3494_v3 = vadd.f32 1.0, %v3430_v9  ;;  %v2791_v57 = vadd.f32 -0.28449672, %v2727_v61  ;;  %v6474_v51 = vmul.f32 0.70710677, %v6454_v39  ;;  %4104 = vpow2.f32 %v3219_v14 }
 0x384   : > { %v2600_v31 = vmul.f32 %v2536_v35, %v6456_v24  ;;  %v2159_v62 = vsub.f32 1.0, %v2158_v33  ;;  %v3113_v1 = vmul.f32 %v3049_v50, %v6423_v45  ;;  %vm1192_vm8 = vcmp.lt.f32.partialorder %v6356_v42, 0.0  ;;  %v911_v45 = vpop.f32.mrf.mxu1 }
 0x385   : > { %v3558_v29 = vmul.f32 %v3494_v3, %v6394_v12  ;;  %v2855_v22 = vmul.f32 %v2791_v57, %v6433_v43  ;;  %v2168_v11 = vand.u32 2147483648, %v6438_v49  ;;  %vm2163_vm9 = vweird.f32 %v4101_v63 }
 0x386   : > { %v2664_v28 = vadd.f32 1.4214138, %v2600_v31  ;;  %v2160_v5 = vmul.f32 %v4101_v63, %v2159_v62  ;;  %v2166_v56 = vand.u32 2147483647, %v6438_v49  ;;  %4106 = vpow2.f32 %v3221_v26 }
 0x387   : > { %v3600_v60 = vpack.c.bf16 %v3558_v29, %v3557_v21  ;;  %v2919_v15 = vadd.f32 0.2548296, %v2855_v22  ;;  %v6484_v30 = vand.u32 2147483647, %v6474_v51  ;;  %vm2162_vm10 = vweird.f32 %v6438_v49 }
 0x388   : > { %v4103_v12 = vpop.eup %4102  ;;  %v2728_v41 = vmul.f32 %v2664_v28, %v6456_v24  ;;  %v2161_v40 = vadd.f32 %v4101_v63, %v2160_v5  ;;  %v3223_v46 = vmul.f32 1.442695, %v3113_v1  ;;  %vm2164_vm11 = vmor %vm2162_vm10, %vm2163_vm9  ;;  %v2169_v37 = vor.u32 1.1754944e-38, %v2168_v11 }
 0x389   : > { %3632 = vst [vmem:[%s4954_s28 + $0xa8] sm:$0xff] %v3600_v60  ;;  %v2983_v10 = vmul.f32 %v2919_v15, %v6433_v43  ;;  %v2173_v6 = vmul.f32 %v4103_v12, %v6460_v7  ;;  %v1387_v52 = vmul.f32 0.3275911, %v6484_v30  ;;  %v4105_v25 = vpop.eup %4104  ;;  %vm2167_vm12 = vcmp.eq.f32.partialorder %v2166_v56, 8.507059e+37 }
 0x38a   : > { %v2792_v27 = vadd.f32 -0.28449672, %v2728_v41  ;;  %v2165_v19 = vsel %vm2164_vm11, %v4101_v63, %v2161_v40  ;;  %v6493_v36 = vadd.f32 %v911_v45, %v4696_v2  ;;  %v2181_v48 = vand.u32 2147483647, %v6460_v7 }
 0x38b   : > { %v3303_v32 = vmul.f32 %v4105_v25, %v2983_v10  ;;  %v6495_v13 = vsel %vm2167_vm12, %v2169_v37, %v2165_v19  ;;  %v2174_v49 = vsub.f32 1.0, %v2173_v6  ;;  %v6497_v38 = vadd.f32 1.0, %v1387_v52 }
 0x38c   : > { %v2856_v43 = vmul.f32 %v2792_v27, %v6456_v24  ;;  %v2473_v34 = vmul.f32 1.0614054, %v6495_v13  ;;  %v2183_v58 = vand.u32 2147483648, %v6460_v7  ;;  %v4107_v14 = vpop.eup %4106  ;;  %vm2178_vm13 = vweird.f32 %v4103_v12 }
 0x38d   : > { %v3367_v55 = vsub.f32 1.0, %v3303_v32  ;;  %v2175_v50 = vmul.f32 %v4103_v12, %v2174_v49  ;;  %4108 = vrcp.f32 %v6497_v38  ;;  %v6505_v61 = vmul.f32 0.70710677, %v6493_v36 }
 0x38e   : > { %v2920_v63 = vadd.f32 0.2548296, %v2856_v43  ;;  %v2537_v9 = vadd.f32 -1.4531521, %v2473_v34  ;;  %vm2177_vm5 = vweird.f32 %v6460_v7  ;;  %v6509_v33 = vadd.f32 %v960_v17, %v4720_v20 }
 0x38f   : > { %v3431_v35 = vmul.f32 %v3367_v55, %v1255_v47  ;;  %v2176_v26 = vadd.f32 %v4103_v12, %v2175_v50  ;;  %v1256_v21 = vsel %vm1192_vm8, -1.0, %v7013_v53  ;;  %vm2179_vm14 = vmor %vm2177_vm5, %vm2178_vm13  ;;  %v2184_v31 = vor.u32 1.1754944e-38, %v2183_v58 }
 0x390   : > { %v2984_v3 = vmul.f32 %v2920_v63, %v6456_v24  ;;  %v2601_v57 = vmul.f32 %v2537_v9, %v6495_v13  ;;  %v6517_v62 = vmul.f32 0.5, %v6391_v44  ;;  %vm2182_vm15 = vcmp.eq.f32.partialorder %v2181_v48, 8.507059e+37  ;;  %v1009_v9 = vpop.f32.mrf.mxu3 }
 0x391   : > { %v2180_v47 = vsel %vm2179_vm14, %v4103_v12, %v2176_v26  ;;  %v3050_v7 = vsub.f32 0.0, %v6442_v4  ;;  %v6523_v42 = vand.u32 2147483647, %v6505_v61  ;;  %v3495_v24 = vadd.f32 1.0, %v3431_v35 }
 0x392   : > { %v3304_v1 = vmul.f32 %v4107_v14, %v2984_v3  ;;  %v2665_v29 = vadd.f32 1.4214138, %v2601_v57  ;;  %v6520_v22 = vsel %vm2182_vm15, %v2184_v31, %v2180_v47  ;;  %4110 = vpow2.f32 %v3223_v46 }
 0x393   : > { %v4109_v11 = vpop.eup %4108  ;;  %v2474_v28 = vmul.f32 1.0614054, %v6520_v22  ;;  %v6527_v5 = vmul.f32 0.70710677, %v6509_v33  ;;  %v3051_v15 = vsub.f32 0.0, %v6484_v30  ;;  %v3114_v12 = vmul.f32 %v3050_v7, %v6442_v4 }
 0x394   : > { %v3368_v44 = vsub.f32 1.0, %v3304_v1  ;;  %v2729_v56 = vmul.f32 %v2665_v29, %v6495_v13  ;;  %v2188_v60 = vmul.f32 %v4109_v11, %v6497_v38  ;;  %v2196_v41 = vand.u32 2147483647, %v6497_v38 }
 0x395   : > { %v2538_v45 = vadd.f32 -1.4531521, %v2474_v28  ;;  %v1388_v40 = vmul.f32 0.3275911, %v6523_v42  ;;  %v2198_v6 = vand.u32 2147483648, %v6497_v38  ;;  %v3559_v52 = vmul.f32 %v3495_v24, %v6407_v18 }
 0x396   : > { %v3432_v46 = vmul.f32 %v3368_v44, %v1256_v21  ;;  %v2793_v10 = vadd.f32 -0.28449672, %v2729_v56  ;;  %v2189_v37 = vsub.f32 1.0, %v2188_v60  ;;  %v6541_v19 = vand.u32 2147483647, %v6527_v5 }
 0x397   : > { %v2602_v25 = vmul.f32 %v2538_v45, %v6520_v22  ;;  %v6538_v27 = vadd.f32 1.0, %v1388_v40  ;;  %vm2193_vm1 = vweird.f32 %v4109_v11  ;;  %vm1193_vm2 = vcmp.lt.f32.partialorder %v6410_v16, 0.0 }
 0x398   : > { %v3496_v32 = vadd.f32 1.0, %v3432_v46  ;;  %v2857_v4 = vmul.f32 %v2793_v10, %v6495_v13  ;;  %v2190_v49 = vmul.f32 %v4109_v11, %v2189_v37  ;;  %v4111_v43 = vpop.eup %4110  ;;  %v3225_v48 = vmul.f32 1.442695, %v3114_v12 }
 0x399   : > { %v2666_v34 = vadd.f32 1.4214138, %v2602_v25  ;;  %4112 = vrcp.f32 %v6538_v27  ;;  %vm2192_vm0 = vweird.f32 %v6497_v38  ;;  %v2199_v55 = vor.u32 1.1754944e-38, %v2198_v6 }
 0x39a   : > { %v3560_v18 = vmul.f32 %v3496_v32, %v6468_v23  ;;  %v2921_v58 = vadd.f32 0.2548296, %v2857_v4  ;;  %v2191_v17 = vadd.f32 %v4109_v11, %v2190_v49  ;;  %vm2194_vm3 = vmor %vm2192_vm0, %vm2193_vm1  ;;  %v3115_v50 = vmul.f32 %v3051_v15, %v6484_v30 }
 0x39b   : > { %v2730_v14 = vmul.f32 %v2666_v34, %v6520_v22  ;;  %v1389_v63 = vmul.f32 0.3275911, %v6541_v19  ;;  %vm2197_vm4 = vcmp.eq.f32.partialorder %v2196_v41, 8.507059e+37  ;;  %vm1194_vm6 = vcmp.lt.f32.partialorder %v6428_v8, 0.0 }
 0x39c   : > { %v3601_v35 = vpack.c.bf16 %v3560_v18, %v3559_v52  ;;  %v2985_v26 = vmul.f32 %v2921_v58, %v6495_v13  ;;  %v2195_v21 = vsel %vm2194_vm3, %v4109_v11, %v2191_v17  ;;  %4114 = vpow2.f32 %v3225_v48 }
 0x39d   : > { %v2794_v23 = vadd.f32 -0.28449672, %v2730_v14  ;;  %v6553_v3 = vsel %vm2197_vm4, %v2199_v55, %v2195_v21  ;;  %v6555_v38 = vadd.f32 1.0, %v1389_v63  ;;  %v6560_v31 = vadd.f32 %v1009_v9, %v4760_v54 }
 0x39e   : > { %3633 = vst [vmem:[%s4954_s28 + $0xb0] sm:$0xff] %v3601_v35  ;;  %v3305_v57 = vmul.f32 %v4111_v43, %v2985_v26  ;;  %v2475_v30 = vmul.f32 1.0614054, %v6553_v3  ;;  %v3227_v7 = vmul.f32 1.442695, %v3115_v50  ;;  %v3052_v1 = vsub.f32 0.0, %v6523_v42 }
 0x39f   : > { %v4113_v47 = vpop.eup %4112  ;;  %v2858_v13 = vmul.f32 %v2794_v23, %v6520_v22  ;;  %4116 = vrcp.f32 %v6555_v38  ;;  %v1066_v11 = vmul.f32 0.5, %v6415_v0  ;;  %v1257_v44 = vsel %vm1193_vm2, -1.0, %v7013_v53 }
 0x3a0   : > { %v3369_v29 = vsub.f32 1.0, %v3305_v57  ;;  %v2539_v24 = vadd.f32 -1.4531521, %v2475_v30  ;;  %v2203_v28 = vmul.f32 %v4113_v47, %v6538_v27  ;;  %v2211_v60 = vand.u32 2147483647, %v6538_v27 }
 0x3a1   : > { %v2922_v56 = vadd.f32 0.2548296, %v2858_v13  ;;  %v2213_v15 = vand.u32 2147483648, %v6538_v27  ;;  %v1258_v45 = vsel %vm1194_vm6, -1.0, %v7013_v53  ;;  %v6577_v0 = vmul.f32 0.70710677, %v6560_v31 }
 0x3a2   : > { %v2603_v12 = vmul.f32 %v2539_v24, %v6553_v3  ;;  %v2204_v41 = vsub.f32 1.0, %v2203_v28  ;;  %v3433_v40 = vmul.f32 %v3369_v29, %v1257_v44  ;;  %4118 = vpow2.f32 %v3227_v7  ;;  %v4115_v10 = vpop.eup %4114 }
 0x3a3   : > { %v2986_v46 = vmul.f32 %v2922_v56, %v6520_v22  ;;  %v3116_v16 = vmul.f32 %v3052_v1, %v6523_v42  ;;  %vm2207_vm7 = vweird.f32 %v6538_v27  ;;  %vm2208_vm8 = vweird.f32 %v4113_v47  ;;  %v864_v22 = vpop.f32.mrf.mxu0 }
 0x3a4   : > { %v2667_v37 = vadd.f32 1.4214138, %v2603_v12  ;;  %v2205_v6 = vmul.f32 %v4113_v47, %v2204_v41  ;;  %vm6582_vm9 = vcmp.eq.f32.partialorder %v2211_v60, 8.507059e+37  ;;  %v2214_v32 = vor.u32 1.1754944e-38, %v2213_v15  ;;  %vm2209_vm10 = vmor %vm2207_vm7, %vm2208_vm8 }
 0x3a5   : > { %v4117_v8 = vpop.eup %4116  ;;  %v3306_v52 = vmul.f32 %v4115_v10, %v2986_v46  ;;  %v6587_v4 = vand.u32 2147483647, %v6577_v0  ;;  %v3053_v34 = vsub.f32 0.0, %v6541_v19  ;;  %v3497_v27 = vadd.f32 1.0, %v3433_v40  ;;  %v913_v46 = vpop.f32.mrf.mxu1 }
 0x3a6   : > { %v2731_v49 = vmul.f32 %v2667_v37, %v6553_v3  ;;  %v2206_v42 = vadd.f32 %v4113_v47, %v2205_v6  ;;  %v2218_v43 = vmul.f32 %v4117_v8, %v6555_v38  ;;  %v2226_v18 = vand.u32 2147483647, %v6555_v38 }
 0x3a7   : > { %v3370_v48 = vsub.f32 1.0, %v3306_v52  ;;  %v1390_v58 = vmul.f32 0.3275911, %v6587_v4  ;;  %v6595_v50 = vadd.f32 %v864_v22, %v4690_v59  ;;  %v2228_v26 = vand.u32 2147483648, %v6555_v38 }
 0x3a8   : > { %v2795_v17 = vadd.f32 -0.28449672, %v2731_v49  ;;  %v2210_v14 = vsel %vm2209_vm10, %v4113_v47, %v2206_v42  ;;  %v2219_v55 = vsub.f32 1.0, %v2218_v43  ;;  %v4119_v63 = vpop.eup %4118  ;;  %vm2223_vm11 = vweird.f32 %v4117_v8  ;;  %v962_v49 = vpop.f32.mrf.mxu2 }
 0x3a9   : > { %v3434_v9 = vmul.f32 %v3370_v48, %v1258_v45  ;;  %v6599_v35 = vsel %vm6582_vm9, %v2214_v32, %v2210_v14  ;;  %v6602_v21 = vadd.f32 1.0, %v1390_v58  ;;  %v3561_v47 = vmul.f32 %v3497_v27, %v6517_v62 }
 0x3aa   : > { %v2859_v23 = vmul.f32 %v2795_v17, %v6553_v3  ;;  %v2476_v57 = vmul.f32 1.0614054, %v6599_v35  ;;  %v2220_v30 = vmul.f32 %v4117_v8, %v2219_v55  ;;  %vm2222_vm12 = vweird.f32 %v6555_v38 }
 0x3ab   : > { %v3498_v13 = vadd.f32 1.0, %v3434_v9  ;;  %4120 = vrcp.f32 %v6602_v21  ;;  %v6610_v24 = vmul.f32 0.70710677, %v6595_v50  ;;  %vm2224_vm13 = vmor %vm2222_vm12, %vm2223_vm11  ;;  %v2229_v44 = vor.u32 1.1754944e-38, %v2228_v26 }
 0x3ac   : > { %v2923_v7 = vadd.f32 0.2548296, %v2859_v23  ;;  %v2540_v1 = vadd.f32 -1.4531521, %v2476_v57  ;;  %v2221_v29 = vadd.f32 %v4117_v8, %v2220_v30  ;;  %vm2227_vm5 = vcmp.eq.f32.partialorder %v2226_v18, 8.507059e+37 }
 0x3ad   : > { %v3562_v28 = vmul.f32 %v3498_v13, %v1066_v11  ;;  %vm1195_vm14 = vcmp.lt.f32.partialorder %v6474_v51, 0.0  ;;  %v3229_v38 = vmul.f32 1.442695, %v3116_v16  ;;  %v3117_v11 = vmul.f32 %v3053_v34, %v6541_v19 }
 0x3ae   : > { %v2987_v56 = vmul.f32 %v2923_v7, %v6553_v3  ;;  %v2604_v60 = vmul.f32 %v2540_v1, %v6599_v35  ;;  %v2225_v62 = vsel %vm2224_vm13, %v4117_v8, %v2221_v29  ;;  %v6620_v40 = vand.u32 2147483647, %v6610_v24 }
 0x3af   : > { %v3602_v15 = vpack.c.bf16 %v3562_v28, %v3561_v47  ;;  %v6615_v45 = vsel %vm2227_vm5, %v2229_v44, %v2225_v62  ;;  %v1259_v16 = vsel %vm1195_vm14, -1.0, %v7013_v53  ;;  %4122 = vpow2.f32 %v3229_v38 }
 0x3b0   : > { %v2668_v12 = vadd.f32 1.4214138, %v2604_v60  ;;  %v2477_v41 = vmul.f32 1.0614054, %v6615_v45  ;;  %v3307_v10 = vmul.f32 %v4119_v63, %v2987_v56  ;;  %v1391_v8 = vmul.f32 0.3275911, %v6620_v40 }
 0x3b1   : > { %v4121_v3 = vpop.eup %4120  ;;  %3634 = vst [vmem:[%s4954_s28 + $0xb8] sm:$0xff] %v3602_v15  ;;  %v6628_v52 = vadd.f32 %v913_v46, %v4696_v2  ;;  %v3231_v32 = vmul.f32 1.442695, %v3117_v11  ;;  %v2241_v43 = vand.u32 2147483647, %v6602_v21  ;;  %v2243_v34 = vand.u32 2147483648, %v6602_v21 }
 0x3b2   : > { %v2732_v37 = vmul.f32 %v2668_v12, %v6599_v35  ;;  %v2541_v6 = vadd.f32 -1.4531521, %v2477_v41  ;;  %v2233_v51 = vmul.f32 %v4121_v3, %v6602_v21  ;;  %v3371_v42 = vsub.f32 1.0, %v3307_v10 }
 0x3b3   : > { %v6633_v27 = vadd.f32 1.0, %v1391_v8  ;;  %vm2238_vm15 = vweird.f32 %v4121_v3  ;;  %v3054_v17 = vsub.f32 0.0, %v6587_v4  ;;  %v6639_v14 = vmul.f32 0.70710677, %v6628_v52  ;;  %v1011_v8 = vpop.f32.mrf.mxu3 }
 0x3b4   : > { %v2796_v19 = vadd.f32 -0.28449672, %v2732_v37  ;;  %v2605_v25 = vmul.f32 %v2541_v6, %v6615_v45  ;;  %v2234_v22 = vsub.f32 1.0, %v2233_v51  ;;  %v6642_v55 = vadd.f32 %v962_v49, %v4720_v20 }
 0x3b5   : > { %4124 = vrcp.f32 %v6633_v27  ;;  %vm2237_vm1 = vweird.f32 %v6602_v21  ;;  %v4123_v23 = vpop.eup %4122  ;;  %v1067_v57 = vmul.f32 0.5, %v6454_v39  ;;  %v3435_v30 = vmul.f32 %v3371_v42, %v1259_v16 }
 0x3b6   : > { %v2860_v48 = vmul.f32 %v2796_v19, %v6599_v35  ;;  %v2669_v18 = vadd.f32 1.4214138, %v2605_v25  ;;  %v2235_v58 = vmul.f32 %v4121_v3, %v2234_v22  ;;  %vm1196_vm2 = vcmp.lt.f32.partialorder %v6505_v61, 0.0  ;;  %vm2239_vm0 = vmor %vm2237_vm1, %vm2238_vm15 }
 0x3b7   : > { %v2244_v47 = vor.u32 1.1754944e-38, %v2243_v34  ;;  %vm2242_vm3 = vcmp.eq.f32.partialorder %v2241_v43, 8.507059e+37  ;;  %v3118_v28 = vmul.f32 %v3054_v17, %v6587_v4  ;;  %v6653_v44 = vand.u32 2147483647, %v6639_v14 }
 0x3b8   : > { %v2924_v63 = vadd.f32 0.2548296, %v2860_v48  ;;  %v2733_v9 = vmul.f32 %v2669_v18, %v6615_v45  ;;  %v2236_v26 = vadd.f32 %v4121_v3, %v2235_v58  ;;  %v6656_v21 = vmul.f32 0.70710677, %v6642_v55 }
 0x3b9   : > { %4126 = vpow2.f32 %v3231_v32  ;;  %v3499_v62 = vadd.f32 1.0, %v3435_v30  ;;  %v1068_v15 = vmul.f32 0.5, %v6493_v36  ;;  %v1260_v4 = vsel %vm1196_vm2, -1.0, %v7013_v53 }
 0x3ba   : > { %v2988_v13 = vmul.f32 %v2924_v63, %v6599_v35  ;;  %v2797_v7 = vadd.f32 -0.28449672, %v2733_v9  ;;  %v2240_v1 = vsel %vm2239_vm0, %v4121_v3, %v2236_v26  ;;  %v1392_v38 = vmul.f32 0.3275911, %v6653_v44 }
 0x3bb   : > { %v6649_v29 = vsel %vm2242_vm3, %v2244_v47, %v2240_v1  ;;  %v4125_v35 = vpop.eup %4124  ;;  %vm1197_vm4 = vcmp.lt.f32.partialorder %v6527_v5, 0.0  ;;  %v3233_v3 = vmul.f32 1.442695, %v3118_v28  ;;  %v3055_v10 = vsub.f32 0.0, %v6620_v40 }
 0x3bc   : > { %v3308_v39 = vmul.f32 %v4123_v23, %v2988_v13  ;;  %v2861_v56 = vmul.f32 %v2797_v7, %v6615_v45  ;;  %v2478_v60 = vmul.f32 1.0614054, %v6649_v29  ;;  %v2248_v46 = vmul.f32 %v4125_v35, %v6633_v27 }
 0x3bd   : > { %v6668_v37 = vadd.f32 1.0, %v1392_v38  ;;  %v6671_v36 = vand.u32 2147483647, %v6656_v21  ;;  %v3563_v19 = vmul.f32 %v3499_v62, %v1067_v57  ;;  %v2256_v25 = vand.u32 2147483647, %v6633_v27 }
 0x3be   : > { %v3372_v12 = vsub.f32 1.0, %v3308_v39  ;;  %v2925_v41 = vadd.f32 0.2548296, %v2861_v56  ;;  %v2542_v11 = vadd.f32 -1.4531521, %v2478_v60  ;;  %v2249_v16 = vsub.f32 1.0, %v2248_v46 }
 0x3bf   : > { %v2258_v32 = vand.u32 2147483648, %v6633_v27  ;;  %4128 = vrcp.f32 %v6668_v37  ;;  %v4127_v22 = vpop.eup %4126  ;;  %vm2253_vm6 = vweird.f32 %v4125_v35  ;;  %vm1198_vm7 = vcmp.lt.f32.partialorder %v6577_v0, 0.0 }
 0x3c0   : > { %v3436_v6 = vmul.f32 %v3372_v12, %v1260_v4  ;;  %v2989_v61 = vmul.f32 %v2925_v41, %v6615_v45  ;;  %v2606_v51 = vmul.f32 %v2542_v11, %v6649_v29  ;;  %v2250_v43 = vmul.f32 %v4125_v35, %v2249_v16 }
 0x3c1   : > { %v1393_v45 = vmul.f32 0.3275911, %v6671_v36  ;;  %v6681_v48 = vadd.f32 %v1011_v8, %v4760_v54  ;;  %vm2252_vm8 = vweird.f32 %v6633_v27  ;;  %4130 = vpow2.f32 %v3233_v3 }
 0x3c2   : > { %v3500_v49 = vadd.f32 1.0, %v3436_v6  ;;  %v2670_v42 = vadd.f32 1.4214138, %v2606_v51  ;;  %v3309_v34 = vmul.f32 %v4127_v22, %v2989_v61  ;;  %v2251_v17 = vadd.f32 %v4125_v35, %v2250_v43  ;;  %vm2254_vm9 = vmor %vm2252_vm8, %vm2253_vm6 }
 0x3c3   : > { %v2259_v63 = vor.u32 1.1754944e-38, %v2258_v32  ;;  %v3119_v9 = vmul.f32 %v3055_v10, %v6620_v40  ;;  %v6686_v26 = vadd.f32 1.0, %v1393_v45  ;;  %vm2257_vm10 = vcmp.eq.f32.partialorder %v2256_v25, 8.507059e+37 }
 0x3c4   : > { %v3564_v18 = vmul.f32 %v3500_v49, %v1068_v15  ;;  %v2734_v58 = vmul.f32 %v2670_v42, %v6649_v29  ;;  %v2255_v30 = vsel %vm2254_vm9, %v4125_v35, %v2251_v17  ;;  %v3373_v13 = vsub.f32 1.0, %v3309_v34 }
 0x3c5   : > { %v4129_v47 = vpop.eup %4128  ;;  %v6688_v7 = vsel %vm2257_vm10, %v2259_v63, %v2255_v30  ;;  %4132 = vrcp.f32 %v6686_v26  ;;  %v6692_v1 = vmul.f32 0.70710677, %v6681_v48  ;;  %v1069_v39 = vmul.f32 0.5, %v6509_v33 }
 0x3c6   : > { %v3603_v23 = vpack.c.bf16 %v3564_v18, %v3563_v19  ;;  %v2798_v57 = vadd.f32 -0.28449672, %v2734_v58  ;;  %v2479_v40 = vmul.f32 1.0614054, %v6688_v7  ;;  %v2263_v28 = vmul.f32 %v4129_v47, %v6668_v37 }
 0x3c7   : > { %v1261_v56 = vsel %vm1197_vm4, -1.0, %v7013_v53  ;;  %v2271_v60 = vand.u32 2147483647, %v6668_v37  ;;  %v1262_v35 = vsel %vm1198_vm7, -1.0, %v7013_v53  ;;  %v4131_v38 = vpop.eup %4130  ;;  %v3235_v41 = vmul.f32 1.442695, %v3119_v9 }
 0x3c8   : > { %3635 = vst [vmem:[%s4954_s28 + $0xc0] sm:$0xff] %v3603_v23  ;;  %v2862_v27 = vmul.f32 %v2798_v57, %v6649_v29  ;;  %v2543_v15 = vadd.f32 -1.4531521, %v2479_v40  ;;  %v2264_v4 = vsub.f32 1.0, %v2263_v28  ;;  %v3437_v12 = vmul.f32 %v3373_v13, %v1261_v56 }
 0x3c9   : > { %v2273_v11 = vand.u32 2147483648, %v6668_v37  ;;  %v6708_v33 = vand.u32 2147483647, %v6692_v1  ;;  %vm2268_vm11 = vweird.f32 %v4129_v47  ;;  %vm2267_vm12 = vweird.f32 %v6668_v37 }
 0x3ca   : > { %v2926_v62 = vadd.f32 0.2548296, %v2862_v27  ;;  %v2607_v46 = vmul.f32 %v2543_v15, %v6688_v7  ;;  %v2265_v3 = vmul.f32 %v4129_v47, %v2264_v4  ;;  %vm6713_vm13 = vcmp.eq.f32.partialorder %v2271_v60, 8.507059e+37  ;;  %vm2269_vm5 = vmor %vm2267_vm12, %vm2268_vm11 }
 0x3cb   : > { %v4133_v10 = vpop.eup %4132  ;;  %v3056_v6 = vsub.f32 0.0, %v6653_v44  ;;  %v1394_v61 = vmul.f32 0.3275911, %v6708_v33  ;;  %v3501_v19 = vadd.f32 1.0, %v3437_v12  ;;  %v2274_v25 = vor.u32 1.1754944e-38, %v2273_v11 }
 0x3cc   : > { %v2990_v5 = vmul.f32 %v2926_v62, %v6649_v29  ;;  %v2671_v16 = vadd.f32 1.4214138, %v2607_v46  ;;  %v2266_v8 = vadd.f32 %v4129_v47, %v2265_v3  ;;  %v2278_v29 = vmul.f32 %v4133_v10, %v6686_v26 }
 0x3cd   : > { %v2286_v32 = vand.u32 2147483647, %v6686_v26  ;;  %v6721_v22 = vadd.f32 1.0, %v1394_v61  ;;  %vm2283_vm14 = vweird.f32 %v4133_v10  ;;  %v2288_v45 = vand.u32 2147483648, %v6686_v26 }
 0x3ce   : > { %v3310_v51 = vmul.f32 %v4131_v38, %v2990_v5  ;;  %v2735_v49 = vmul.f32 %v2671_v16, %v6688_v7  ;;  %v2270_v42 = vsel %vm2269_vm5, %v4129_v47, %v2266_v8  ;;  %v2279_v43 = vsub.f32 1.0, %v2278_v29 }
 0x3cf   : > { %v6726_v34 = vsel %vm6713_vm13, %v2274_v25, %v2270_v42  ;;  %4134 = vrcp.f32 %v6721_v22  ;;  %v3565_v9 = vmul.f32 %v3501_v19, %v1069_v39  ;;  %v1070_v23 = vmul.f32 0.5, %v6560_v31 }
 0x3d0   : > { %v3374_v37 = vsub.f32 1.0, %v3310_v51  ;;  %v2799_v58 = vadd.f32 -0.28449672, %v2735_v49  ;;  %v2480_v17 = vmul.f32 1.0614054, %v6726_v34  ;;  %v2280_v63 = vmul.f32 %v4133_v10, %v2279_v43 }
 0x3d1   : > { %4136 = vpow2.f32 %v3235_v41  ;;  %vm2282_vm15 = vweird.f32 %v6686_v26  ;;  %v3120_v27 = vmul.f32 %v3056_v6, %v6653_v44  ;;  %vm2287_vm2 = vcmp.eq.f32.partialorder %v2286_v32, 8.507059e+37 }
 0x3d2   : > { %v3438_v18 = vmul.f32 %v3374_v37, %v1262_v35  ;;  %v2863_v30 = vmul.f32 %v2799_v58, %v6688_v7  ;;  %v2544_v47 = vadd.f32 -1.4531521, %v2480_v17  ;;  %v2281_v13 = vadd.f32 %v4133_v10, %v2280_v63  ;;  %vm2284_vm1 = vmor %vm2282_vm15, %vm2283_vm14 }
 0x3d3   : > { %v2289_v40 = vor.u32 1.1754944e-38, %v2288_v45  ;;  %v3057_v26 = vsub.f32 0.0, %v6671_v36  ;;  %v3237_v12 = vmul.f32 1.442695, %v3120_v27  ;;  %v2303_v61 = vand.u32 2147483648, %v6721_v22  ;;  %v867_v45 = vpop.f32.mrf.mxu0 }
 0x3d4   : > { %v3502_v57 = vadd.f32 1.0, %v3438_v18  ;;  %v2927_v56 = vadd.f32 0.2548296, %v2863_v30  ;;  %v2608_v39 = vmul.f32 %v2544_v47, %v6726_v34  ;;  %v2285_v31 = vsel %vm2284_vm1, %v4133_v10, %v2281_v13 }
 0x3d5   : > { %v4135_v60 = vpop.eup %4134  ;;  %v2290_v35 = vsel %vm2287_vm2, %v2289_v40, %v2285_v31  ;;  %v3121_v6 = vmul.f32 %v3057_v26, %v6671_v36  ;;  %4138 = vpow2.f32 %v3237_v12  ;;  %v2301_v51 = vand.u32 2147483647, %v6721_v22 }
 0x3d6   : > { %v3566_v28 = vmul.f32 %v3502_v57, %v1070_v23  ;;  %v2991_v15 = vmul.f32 %v2927_v56, %v6688_v7  ;;  %v2672_v4 = vadd.f32 1.4214138, %v2608_v39  ;;  %v2481_v38 = vmul.f32 1.0614054, %v2290_v35 }
 0x3d7   : > { %v4137_v44 = vpop.eup %4136  ;;  %v2293_v41 = vmul.f32 %v4135_v60, %v6721_v22  ;;  %vm2298_vm0 = vweird.f32 %v4135_v60  ;;  %vm1199_vm3 = vcmp.lt.f32.partialorder %v6610_v24, 0.0  ;;  %vm2297_vm4 = vweird.f32 %v6721_v22 }
 0x3d8   : > { %v3604_v62 = vpack.c.bf16 %v3566_v28, %v3565_v9  ;;  %v3311_v11 = vmul.f32 %v4137_v44, %v2991_v15  ;;  %v2736_v5 = vmul.f32 %v2672_v4, %v6726_v34  ;;  %v2545_v46 = vadd.f32 -1.4531521, %v2481_v38  ;;  %vm2299_vm6 = vmor %vm2297_vm4, %vm2298_vm0 }
 0x3d9   : > { %v2294_v3 = vsub.f32 1.0, %v2293_v41  ;;  %v3239_v37 = vmul.f32 1.442695, %v3121_v6  ;;  %v2304_v36 = vor.u32 1.1754944e-38, %v2303_v61  ;;  %v1263_v49 = vsel %vm1199_vm3, -1.0, %v7013_v53 }
 0x3da   : > { %3636 = vst [vmem:[%s4954_s28 + $0xc8] sm:$0xff] %v3604_v62  ;;  %v2800_v10 = vadd.f32 -0.28449672, %v2736_v5  ;;  %v2609_v0 = vmul.f32 %v2545_v46, %v2290_v35  ;;  %v3375_v16 = vsub.f32 1.0, %v3311_v11  ;;  %vm2302_vm7 = vcmp.eq.f32.partialorder %v2301_v51, 8.507059e+37 }
 0x3db   : > { %v2295_v7 = vmul.f32 %v4135_v60, %v2294_v3  ;;  %v3058_v43 = vsub.f32 0.0, %v6708_v33  ;;  %v4139_v63 = vpop.eup %4138  ;;  %v6752_v22 = vadd.f32 %v867_v45, %v4690_v59  ;;  %vm1200_vm8 = vcmp.lt.f32.partialorder %v6639_v14, 0.0 }
 0x3dc   : > { %v2864_v8 = vmul.f32 %v2800_v10, %v6726_v34  ;;  %v2673_v29 = vadd.f32 1.4214138, %v2609_v0  ;;  %v3439_v24 = vmul.f32 %v3375_v16, %v1263_v49  ;;  %4140 = vpow2.f32 %v3239_v37  ;;  %v916_v16 = vpop.f32.mrf.mxu1 }
 0x3dd   : > { %v2296_v19 = vadd.f32 %v4135_v60, %v2295_v7  ;;  %v6756_v47 = vmul.f32 0.70710677, %v6752_v22  ;;  %v1264_v28 = vsel %vm1200_vm8, -1.0, %v7013_v53  ;;  %v1071_v14 = vmul.f32 0.5, %v6595_v50 }
 0x3de   : > { %v2928_v25 = vadd.f32 0.2548296, %v2864_v8  ;;  %v2737_v32 = vmul.f32 %v2673_v29, %v2290_v35  ;;  %v3503_v13 = vadd.f32 1.0, %v3439_v24  ;;  %v1072_v38 = vmul.f32 0.5, %v6628_v52 }
 0x3df   : > { %v2300_v42 = vsel %vm2299_vm6, %v4135_v60, %v2296_v19  ;;  %v6761_v39 = vand.u32 2147483647, %v6756_v47  ;;  %vm1201_vm9 = vcmp.lt.f32.partialorder %v6656_v21, 0.0  ;;  %vm1202_vm10 = vcmp.lt.f32.partialorder %v6692_v1, 0.0 }
 0x3e0   : > { %v2992_v18 = vmul.f32 %v2928_v25, %v6726_v34  ;;  %v2801_v58 = vadd.f32 -0.28449672, %v2737_v32  ;;  %v2305_v17 = vsel %vm2302_vm7, %v2304_v36, %v2300_v42  ;;  %v3122_v34 = vmul.f32 %v3058_v43, %v6708_v33 }
 0x3e1   : > { %v2482_v9 = vmul.f32 1.0614054, %v2305_v17  ;;  %v1395_v62 = vmul.f32 0.3275911, %v6761_v39  ;;  %v3567_v4 = vmul.f32 %v3503_v13, %v1071_v14  ;;  %v1265_v0 = vsel %vm1201_vm9, -1.0, %v7013_v53 }
 0x3e2   : > { %v3312_v23 = vmul.f32 %v4139_v63, %v2992_v18  ;;  %v2865_v57 = vmul.f32 %v2801_v58, %v2290_v35  ;;  %v4141_v15 = vpop.eup %4140  ;;  %v3241_v33 = vmul.f32 1.442695, %v3122_v34  ;;  %v6771_v29 = vadd.f32 %v916_v16, %v4696_v2 }
 0x3e3   : > { %v2546_v30 = vadd.f32 -1.4531521, %v2482_v9  ;;  %v1459_v11 = vadd.f32 1.0, %v1395_v62  ;;  %v1266_v36 = vsel %vm1202_vm10, -1.0, %v7013_v53  ;;  %v1073_v43 = vmul.f32 0.5, %v6642_v55  ;;  %v869_v62 = vpop.f32.mrf.mxu0 }
 0x3e4   : > { %v3376_v27 = vsub.f32 1.0, %v3312_v23  ;;  %v2929_v40 = vadd.f32 0.2548296, %v2865_v57  ;;  %v6774_v37 = vmul.f32 0.70710677, %v6771_v29  ;;  %v1074_v24 = vmul.f32 0.5, %v6681_v48 }
 0x3e5   : > { %v2610_v56 = vmul.f32 %v2546_v30, %v2305_v17  ;;  %4142 = vrcp.f32 %v1459_v11  ;;  %v2318_v21 = vand.u32 2147483648, %v1459_v11  ;;  %v2316_v42 = vand.u32 2147483647, %v1459_v11  ;;  %v1014_v30 = vpop.f32.mrf.mxu3 }
 0x3e6   : > { %v3440_v31 = vmul.f32 %v3376_v27, %v1264_v28  ;;  %v2993_v60 = vmul.f32 %v2929_v40, %v2290_v35  ;;  %4144 = vpow2.f32 %v3241_v33  ;;  %v1332_v1 = vand.u32 2147483647, %v6774_v37 }
 0x3e7   : > { %v2674_v26 = vadd.f32 1.4214138, %v2610_v56  ;;  %vm2312_vm12 = vweird.f32 %v1459_v11  ;;  %v2319_v58 = vor.u32 1.1754944e-38, %v2318_v21  ;;  %vm2317_vm5 = vcmp.eq.f32.partialorder %v2316_v42, 8.507059e+37 }
 0x3e8   : > { %v3504_v44 = vadd.f32 1.0, %v3440_v31  ;;  %v3313_v12 = vmul.f32 %v4141_v15, %v2993_v60  ;;  %v1396_v23 = vmul.f32 0.3275911, %v1332_v1  ;;  %v3059_v40 = vsub.f32 0.0, %v6761_v39 }
 0x3e9   : > { %v2738_v41 = vmul.f32 %v2674_v26, %v2305_v17  ;;  %v6788_v56 = vadd.f32 %v1014_v30, %v4760_v54  ;;  %vm1203_vm14 = vcmp.lt.f32.partialorder %v6756_v47, 0.0  ;;  %vm1204_vm15 = vcmp.lt.f32.partialorder %v6774_v37, 0.0 }
 0x3ea   : > { %v3568_v5 = vmul.f32 %v3504_v44, %v1072_v38  ;;  %v3377_v50 = vsub.f32 1.0, %v3313_v12  ;;  %v1460_v48 = vadd.f32 1.0, %v1396_v23  ;;  %v3123_v60 = vmul.f32 %v3059_v40, %v6761_v39 }
 0x3eb   : > { %v2802_v46 = vadd.f32 -0.28449672, %v2738_v41  ;;  %v4143_v6 = vpop.eup %4142  ;;  %v3060_v38 = vsub.f32 0.0, %v1332_v1  ;;  %v6800_v41 = vadd.f32 %v869_v62, %v4690_v59  ;;  %v6832_v42 = vsel %vm1204_vm15, -1.0, %v7013_v53 }
 0x3ec   : > { %v3605_v3 = vpack.c.bf16 %v3568_v5, %v3567_v4  ;;  %v3441_v52 = vmul.f32 %v3377_v50, %v1265_v0  ;;  %v4145_v7 = vpop.eup %4144  ;;  %v2308_v51 = vmul.f32 %v4143_v6, %v1459_v11  ;;  %vm2313_vm11 = vweird.f32 %v4143_v6 }
 0x3ed   : > { %v2866_v35 = vmul.f32 %v2802_v46, %v2305_v17  ;;  %vm2314_vm13 = vmor %vm2312_vm12, %vm2313_vm11  ;;  %4146 = vrcp.f32 %v1460_v48  ;;  %v6794_v4 = vmul.f32 0.70710677, %v6788_v56  ;;  %v3243_v5 = vmul.f32 1.442695, %v3123_v60 }
 0x3ee   : > { %3637 = vst [vmem:[%s4954_s28 + $0xd0] sm:$0xff] %v3605_v3  ;;  %v2309_v19 = vsub.f32 1.0, %v2308_v51  ;;  %v3505_v25 = vadd.f32 1.0, %v3441_v52  ;;  %v3124_v0 = vmul.f32 %v3060_v38, %v1332_v1  ;;  %v2331_v47 = vand.u32 2147483647, %v1460_v48 }
 0x3ef   : > { %v2930_v10 = vadd.f32 0.2548296, %v2866_v35  ;;  %v6797_v12 = vand.u32 2147483647, %v6794_v4  ;;  %v918_v35 = vpop.f32.mrf.mxu1  ;;  %vm2327_vm2 = vweird.f32 %v1460_v48 }
 0x3f0   : > { %v2310_v49 = vmul.f32 %v4143_v6, %v2309_v19  ;;  %v3569_v63 = vmul.f32 %v3505_v25, %v1073_v43  ;;  %v6817_v51 = vadd.f32 %v918_v35, %v4696_v2  ;;  %v6827_v2 = vmul.f32 0.5, %v6771_v29 }
 0x3f1   : > { %v2994_v61 = vmul.f32 %v2930_v10, %v2305_v17  ;;  %v965_v17 = vpop.f32.mrf.mxu2  ;;  %v1398_v50 = vmul.f32 0.3275911, %v6797_v12  ;;  %v6806_v10 = vmul.f32 0.5, %v6752_v22  ;;  %vm2332_vm3 = vcmp.eq.f32.partialorder %v2331_v47, 8.507059e+37 }
 0x3f2   : > { %v2311_v18 = vadd.f32 %v4143_v6, %v2310_v49  ;;  %v6781_v57 = vadd.f32 %v965_v17, %v4720_v20 }
 0x3f3   : > { %v3314_v8 = vmul.f32 %v4145_v7, %v2994_v61  ;;  %v4147_v11 = vpop.eup %4146  ;;  %v6810_v52 = vadd.f32 1.0, %v1398_v50  ;;  %v6813_v61 = vmul.f32 0.70710677, %v6800_v41  ;;  %v2333_v7 = vand.u32 2147483648, %v1460_v48 }
 0x3f4   : > { %v2315_v13 = vsel %vm2314_vm13, %v4143_v6, %v2311_v18  ;;  %v6785_v28 = vmul.f32 0.70710677, %v6781_v57  ;;  %v2323_v3 = vmul.f32 %v4147_v11, %v1460_v48  ;;  %vm2328_vm1 = vweird.f32 %v4147_v11 }
 0x3f5   : > { %v3378_v32 = vsub.f32 1.0, %v3314_v8  ;;  %v2320_v27 = vsel %vm2317_vm5, %v2319_v58, %v2315_v13  ;;  %v6820_v8 = vsel %vm1203_vm14, -1.0, %v7013_v53  ;;  %vm2329_vm0 = vmor %vm2327_vm2, %vm2328_vm1  ;;  %v2334_v43 = vor.u32 1.1754944e-38, %v2333_v7 }
 0x3f6   : > { %v2483_v34 = vmul.f32 1.0614054, %v2320_v27  ;;  %v1333_v26 = vand.u32 2147483647, %v6785_v28  ;;  %v2324_v59 = vsub.f32 1.0, %v2323_v3  ;;  %vm2357_vm10 = vweird.f32 %v6810_v52 }
 0x3f7   : > { %v3442_v45 = vmul.f32 %v3378_v32, %v1266_v36  ;;  %v3245_v32 = vmul.f32 1.442695, %v3124_v0  ;;  %v6824_v36 = vand.u32 2147483647, %v6813_v61  ;;  %vm1205_vm1 = vcmp.lt.f32.partialorder %v6785_v28, 0.0 }
 0x3f8   : > { %v2547_v31 = vadd.f32 -1.4531521, %v2483_v34  ;;  %v1397_v44 = vmul.f32 0.3275911, %v1333_v26  ;;  %v2325_v16 = vmul.f32 %v4147_v11, %v2324_v59  ;;  %v3061_v19 = vsub.f32 0.0, %v1333_v26 }
 0x3f9   : > { %v3506_v9 = vadd.f32 1.0, %v3442_v45  ;;  %v6835_v45 = vmul.f32 0.70710677, %v6817_v51  ;;  %v1399_v37 = vmul.f32 0.3275911, %v6824_v36 }
 0x3fa   : > { %v2611_v15 = vmul.f32 %v2547_v31, %v2320_v27  ;;  %v6802_v46 = vadd.f32 1.0, %v1397_v44  ;;  %v2326_v25 = vadd.f32 %v4147_v11, %v2325_v16 }
 0x3fb   : > { %v3570_v55 = vmul.f32 %v3506_v9, %v1074_v24  ;;  %v6848_v40 = vand.u32 2147483647, %v6835_v45 }
 0x3fc   : > { %v2675_v33 = vadd.f32 1.4214138, %v2611_v15  ;;  %4148 = vrcp.f32 %v6802_v46  ;;  %v2330_v24 = vsel %vm2329_vm0, %v4147_v11, %v2326_v25  ;;  %v2346_v29 = vand.u32 2147483647, %v6802_v46 }
 0x3fd   : > { %v3606_v14 = vpack.c.bf16 %v3570_v55, %v3569_v63  ;;  %4150 = vpow2.f32 %v3243_v5  ;;  %v6838_v17 = vsel %vm2332_vm3, %v2334_v43, %v2330_v24  ;;  %v3125_v63 = vmul.f32 %v3061_v19, %v1333_v26  ;;  %v967_v43 = vpop.f32.mrf.mxu2 }
 0x3fe   : > { %v2739_v39 = vmul.f32 %v2675_v33, %v2320_v27  ;;  %4152 = vrcp.f32 %v6810_v52  ;;  %v2484_v9 = vmul.f32 1.0614054, %v6838_v17  ;;  %v2348_v30 = vand.u32 2147483648, %v6802_v46 }
 0x3ff   : > { %3638 = vst [vmem:[%s4954_s28 + $0xd8] sm:$0xff] %v3606_v14  ;;  %4154 = vpow2.f32 %v3245_v32  ;;  %vm2342_vm4 = vweird.f32 %v6802_v46  ;;  %vm6851_vm7 = vcmp.eq.f32.partialorder %v2346_v29, 8.507059e+37  ;;  %v3247_v60 = vmul.f32 1.442695, %v3125_v63 }
 0x400   : > { %v2803_v6 = vadd.f32 -0.28449672, %v2739_v39  ;;  %v2548_v48 = vadd.f32 -1.4531521, %v2484_v9  ;;  %v3062_v26 = vsub.f32 0.0, %v6797_v12  ;;  %v2349_v38 = vor.u32 1.1754944e-38, %v2348_v30 }
 0x401   : > { %v2361_v11 = vand.u32 2147483647, %v6810_v52  ;;  %v2363_v5 = vand.u32 2147483648, %v6810_v52  ;;  %v1400_v39 = vmul.f32 0.3275911, %v6848_v40  ;;  %v6885_v30 = vadd.f32 %v967_v43, %v4720_v20 }
 0x402   : > { %v2867_v22 = vmul.f32 %v2803_v6, %v2320_v27  ;;  %v4149_v49 = vpop.eup %4148  ;;  %v2612_v62 = vmul.f32 %v2548_v48, %v6838_v17  ;;  %v3126_v59 = vmul.f32 %v3062_v26, %v6797_v12 }
 0x403   : > { %v2338_v18 = vmul.f32 %v4149_v49, %v6802_v46  ;;  %v4151_v58 = vpop.eup %4150  ;;  %vm2343_vm6 = vweird.f32 %v4149_v49  ;;  %v6868_v46 = vadd.f32 1.0, %v1400_v39  ;;  %vm2362_vm12 = vcmp.eq.f32.partialorder %v2361_v11, 8.507059e+37  ;;  %v1016_v39 = vpop.f32.mrf.mxu3 }
 0x404   : > { %v2931_v21 = vadd.f32 0.2548296, %v2867_v22  ;;  %v4153_v13 = vpop.eup %4152  ;;  %vm2344_vm8 = vmor %vm2342_vm4, %vm2343_vm6  ;;  %v2676_v50 = vadd.f32 1.4214138, %v2612_v62  ;;  %v3249_v24 = vmul.f32 1.442695, %v3126_v59 }
 0x405   : > { %v2339_v23 = vsub.f32 1.0, %v2338_v18  ;;  %v2353_v14 = vmul.f32 %v4153_v13, %v6810_v52  ;;  %v4155_v3 = vpop.eup %4154  ;;  %vm2358_vm9 = vweird.f32 %v4153_v13  ;;  %v3063_v52 = vsub.f32 0.0, %v6824_v36 }
 0x406   : > { %v2995_v1 = vmul.f32 %v2931_v21, %v2320_v27  ;;  %v6845_v27 = vadd.f32 1.0, %v1399_v37  ;;  %v2740_v7 = vmul.f32 %v2676_v50, %v6838_v17  ;;  %vm2359_vm11 = vmor %vm2357_vm10, %vm2358_vm9  ;;  %v2364_v21 = vor.u32 1.1754944e-38, %v2363_v5 }
 0x407   : > { %v2340_v34 = vmul.f32 %v4149_v49, %v2339_v23  ;;  %v2354_v44 = vsub.f32 1.0, %v2353_v14  ;;  %vm2387_vm0 = vweird.f32 %v6868_v46  ;;  %vm1206_vm6 = vcmp.lt.f32.partialorder %v6794_v4, 0.0 }
 0x408   : > { %v3315_v55 = vmul.f32 %v4151_v58, %v2995_v1  ;;  %4156 = vrcp.f32 %v6845_v27  ;;  %v2804_v25 = vadd.f32 -0.28449672, %v2740_v7  ;;  %v2376_v18 = vand.u32 2147483647, %v6845_v27 }
 0x409   : > { %v2341_v15 = vadd.f32 %v4149_v49, %v2340_v34  ;;  %v2355_v0 = vmul.f32 %v4153_v13, %v2354_v44  ;;  %4158 = vpow2.f32 %v3247_v60  ;;  %v2378_v23 = vand.u32 2147483648, %v6845_v27 }
 0x40a   : > { %v3379_v33 = vsub.f32 1.0, %v3315_v55  ;;  %4160 = vrcp.f32 %v6868_v46  ;;  %vm2372_vm5 = vweird.f32 %v6845_v27  ;;  %vm6888_vm14 = vcmp.eq.f32.partialorder %v2376_v18, 8.507059e+37 }
 0x40b   : > { %v2345_v35 = vsel %vm2344_vm8, %v4149_v49, %v2341_v15  ;;  %v2356_v16 = vadd.f32 %v4153_v13, %v2355_v0  ;;  %4162 = vpow2.f32 %v3249_v24  ;;  %v3127_v60 = vmul.f32 %v3063_v52, %v6824_v36 }
 0x40c   : > { %v6865_v6 = vsel %vm6851_vm7, %v2349_v38, %v2345_v35  ;;  %v3443_v19 = vmul.f32 %v3379_v33, %v6820_v8  ;;  %v2868_v8 = vmul.f32 %v2804_v25, %v6838_v17  ;;  %v2379_v44 = vor.u32 1.1754944e-38, %v2378_v23 }
 0x40d   : > { %v2485_v22 = vmul.f32 1.0614054, %v6865_v6  ;;  %v2360_v12 = vsel %vm2359_vm11, %v4153_v13, %v2356_v16  ;;  %v6900_v33 = vmul.f32 0.70710677, %v6885_v30  ;;  %v2391_v35 = vand.u32 2147483647, %v6868_v46 }
 0x40e   : > { %v4157_v47 = vpop.eup %4156  ;;  %v6876_v1 = vsel %vm2362_vm12, %v2364_v21, %v2360_v12  ;;  %v3507_v9 = vadd.f32 1.0, %v3443_v19  ;;  %v2932_v13 = vadd.f32 0.2548296, %v2868_v8  ;;  %v2393_v0 = vand.u32 2147483648, %v6868_v46 }
 0x40f   : > { %v2549_v32 = vadd.f32 -1.4531521, %v2485_v22  ;;  %v2368_v49 = vmul.f32 %v4157_v47, %v6845_v27  ;;  %v2486_v29 = vmul.f32 1.0614054, %v6876_v1  ;;  %v4159_v37 = vpop.eup %4158  ;;  %vm2373_vm13 = vweird.f32 %v4157_v47 }
 0x410   : > { %v4161_v14 = vpop.eup %4160  ;;  %v2996_v26 = vmul.f32 %v2932_v13, %v6838_v17  ;;  %v3571_v38 = vmul.f32 %v3507_v9, %v6806_v10  ;;  %vm2374_vm15 = vmor %vm2372_vm5, %vm2373_vm13  ;;  %v6916_v21 = vadd.f32 %v1016_v39, %v4760_v54  ;;  %vm6920_vm3 = vcmp.eq.f32.partialorder %v2391_v35, 8.507059e+37 }
 0x411   : > { %v2613_v58 = vmul.f32 %v2549_v32, %v6865_v6  ;;  %v2369_v63 = vsub.f32 1.0, %v2368_v49  ;;  %v2550_v48 = vadd.f32 -1.4531521, %v2486_v29  ;;  %v2383_v27 = vmul.f32 %v4161_v14, %v6868_v46  ;;  %v4163_v16 = vpop.eup %4162 }
 0x412   : > { %v3316_v11 = vmul.f32 %v4155_v3, %v2996_v26  ;;  %vm2388_vm2 = vweird.f32 %v4161_v14  ;;  %v2394_v29 = vor.u32 1.1754944e-38, %v2393_v0  ;;  %v6932_v46 = vmul.f32 0.70710677, %v6916_v21 }
 0x413   : > { %v2677_v55 = vadd.f32 1.4214138, %v2613_v58  ;;  %v2370_v34 = vmul.f32 %v4157_v47, %v2369_v63  ;;  %v2614_v20 = vmul.f32 %v2550_v48, %v6876_v1  ;;  %v2384_v10 = vsub.f32 1.0, %v2383_v27  ;;  %vm2389_vm4 = vmor %vm2387_vm0, %vm2388_vm2 }
 0x414   : > { %v3380_v59 = vsub.f32 1.0, %v3316_v11  ;;  %v1077_v39 = vmul.f32 0.5, %v6781_v57  ;;  %vm1207_vm9 = vcmp.lt.f32.partialorder %v6813_v61, 0.0  ;;  %vm1208_vm12 = vcmp.lt.f32.partialorder %v6835_v45, 0.0 }
 0x415   : > { %v2741_v62 = vmul.f32 %v2677_v55, %v6865_v6  ;;  %v2371_v15 = vadd.f32 %v4157_v47, %v2370_v34  ;;  %v2678_v17 = vadd.f32 1.4214138, %v2614_v20  ;;  %v2385_v19 = vmul.f32 %v4161_v14, %v2384_v10 }
 0x416   : > { %v3444_v25 = vmul.f32 %v3380_v59, %v6832_v42  ;;  %v3064_v34 = vsub.f32 0.0, %v6848_v40  ;;  %v1078_v59 = vmul.f32 0.5, %v6788_v56  ;;  %vm1210_vm2 = vcmp.lt.f32.partialorder %v6932_v46, 0.0 }
 0x417   : > { %v2805_v36 = vadd.f32 -0.28449672, %v2741_v62  ;;  %v2375_v5 = vsel %vm2374_vm15, %v4157_v47, %v2371_v15  ;;  %v2742_v3 = vmul.f32 %v2678_v17, %v6876_v1  ;;  %v6913_v47 = vand.u32 2147483647, %v6900_v33 }
 0x418   : > { %v6905_v50 = vsel %vm6888_vm14, %v2379_v44, %v2375_v5  ;;  %v2386_v43 = vadd.f32 %v4161_v14, %v2385_v19  ;;  %v3508_v52 = vadd.f32 1.0, %v3444_v25  ;;  %v6950_v44 = vand.u32 2147483647, %v6932_v46 }
 0x419   : > { %v2869_v7 = vmul.f32 %v2805_v36, %v6865_v6  ;;  %v2487_v22 = vmul.f32 1.0614054, %v6905_v50  ;;  %v2806_v12 = vadd.f32 -0.28449672, %v2742_v3  ;;  %v1401_v18 = vmul.f32 0.3275911, %v6913_v47 }
 0x41a   : > { %v2390_v42 = vsel %vm2389_vm4, %v4161_v14, %v2386_v43  ;;  %v3572_v9 = vmul.f32 %v3508_v52, %v6827_v2  ;;  %v1269_v2 = vsel %vm1205_vm1, -1.0, %v7013_v53  ;;  %v1402_v36 = vmul.f32 0.3275911, %v6950_v44 }
 0x41b   : > { %v2933_v32 = vadd.f32 0.2548296, %v2869_v7  ;;  %v2551_v49 = vadd.f32 -1.4531521, %v2487_v22  ;;  %v2870_v54 = vmul.f32 %v2806_v12, %v6876_v1  ;;  %v6929_v63 = vadd.f32 1.0, %v1401_v18 }
 0x41c   : > { %v6937_v48 = vsel %vm6920_vm3, %v2394_v29, %v2390_v42  ;;  %v3607_v14 = vpack.c.bf16 %v3572_v9, %v3571_v38  ;;  %v1270_v17 = vsel %vm1206_vm6, -1.0, %v7013_v53  ;;  %v1466_v3 = vadd.f32 1.0, %v1402_v36 }
 0x41d   : > { %v2997_v8 = vmul.f32 %v2933_v32, %v6865_v6  ;;  %v2615_v58 = vmul.f32 %v2551_v49, %v6905_v50  ;;  %v2934_v13 = vadd.f32 0.2548296, %v2870_v54  ;;  %v3251_v6 = vmul.f32 1.442695, %v3127_v60 }
 0x41e   : > { %4164 = vrcp.f32 %v6929_v63  ;;  %3639 = vst [vmem:[%s4954_s28 + $0xe0] sm:$0xff] %v3607_v14  ;;  %v2406_v49 = vand.u32 2147483647, %v6929_v63  ;;  %v2408_v57 = vand.u32 2147483648, %v6929_v63  ;;  %vm2402_vm8 = vweird.f32 %v6929_v63 }
 0x41f   : > { %v3317_v23 = vmul.f32 %v4159_v37, %v2997_v8  ;;  %v2679_v55 = vadd.f32 1.4214138, %v2615_v58  ;;  %v2998_v26 = vmul.f32 %v2934_v13, %v6876_v1  ;;  %v2488_v37 = vmul.f32 1.0614054, %v6937_v48 }
 0x420   : > { %4166 = vpow2.f32 %v3251_v6  ;;  %v3128_v1 = vmul.f32 %v3064_v34, %v6848_v40  ;;  %v2409_v58 = vor.u32 1.1754944e-38, %v2408_v57  ;;  %vm2407_vm11 = vcmp.eq.f32.partialorder %v2406_v49, 8.507059e+37 }
 0x421   : > { %v3381_v31 = vsub.f32 1.0, %v3317_v23  ;;  %v2743_v62 = vmul.f32 %v2679_v55, %v6905_v50  ;;  %v3318_v20 = vmul.f32 %v4163_v16, %v2998_v26  ;;  %v2552_v38 = vadd.f32 -1.4531521, %v2488_v37 }
 0x422   : > { %v3253_v7 = vmul.f32 1.442695, %v3128_v1  ;;  %4168 = vrcp.f32 %v1466_v3  ;;  %v3065_v13 = vsub.f32 0.0, %v6913_v47  ;;  %v1271_v55 = vsel %vm1207_vm9, -1.0, %v7013_v53 }
 0x423   : > { %v3445_v60 = vmul.f32 %v3381_v31, %v1269_v2  ;;  %v2807_v15 = vadd.f32 -0.28449672, %v2743_v62  ;;  %v3382_v11 = vsub.f32 1.0, %v3318_v20  ;;  %v2616_v5 = vmul.f32 %v2552_v38, %v6937_v48 }
 0x424   : > { %v4165_v4 = vpop.eup %4164  ;;  %4170 = vpow2.f32 %v3253_v7  ;;  %v3129_v2 = vmul.f32 %v3065_v13, %v6913_v47  ;;  %v2423_v37 = vand.u32 2147483648, %v1466_v3  ;;  %vm2417_vm5 = vweird.f32 %v1466_v3 }
 0x425   : > { %v3509_v27 = vadd.f32 1.0, %v3445_v60  ;;  %v2871_v28 = vmul.f32 %v2807_v15, %v6905_v50  ;;  %v3446_v10 = vmul.f32 %v3382_v11, %v1270_v17  ;;  %v2398_v0 = vmul.f32 %v4165_v4, %v6929_v63 }
 0x426   : > { %v2680_v40 = vadd.f32 1.4214138, %v2616_v5  ;;  %v4167_v32 = vpop.eup %4166  ;;  %vm2403_vm7 = vweird.f32 %v4165_v4  ;;  %v2421_v15 = vand.u32 2147483647, %v1466_v3  ;;  %v2424_v45 = vor.u32 1.1754944e-38, %v2423_v37 }
 0x427   : > { %v2935_v35 = vadd.f32 0.2548296, %v2871_v28  ;;  %v3573_v22 = vmul.f32 %v3509_v27, %v1077_v39  ;;  %v3510_v16 = vadd.f32 1.0, %v3446_v10  ;;  %v2399_v25 = vsub.f32 1.0, %v2398_v0  ;;  %vm2404_vm10 = vmor %vm2402_vm8, %vm2403_vm7 }
 0x428   : > { %v2744_v12 = vmul.f32 %v2680_v40, %v6937_v48  ;;  %v4169_v29 = vpop.eup %4168  ;;  %v1272_v27 = vsel %vm1208_vm12, -1.0, %v7013_v53  ;;  %v1080_v47 = vmul.f32 0.5, %v6817_v51  ;;  %vm2422_vm15 = vcmp.eq.f32.partialorder %v2421_v15, 8.507059e+37 }
 0x429   : > { %v2999_v19 = vmul.f32 %v2935_v35, %v6905_v50  ;;  %v3574_v43 = vmul.f32 %v3510_v16, %v1078_v59  ;;  %v2400_v56 = vmul.f32 %v4165_v4, %v2399_v25  ;;  %v2413_v34 = vmul.f32 %v4169_v29, %v1466_v3 }
 0x42a   : > { %v2808_v18 = vadd.f32 -0.28449672, %v2744_v12  ;;  %v4171_v14 = vpop.eup %4170  ;;  %vm2418_vm13 = vweird.f32 %v4169_v29  ;;  %v3066_v0 = vsub.f32 0.0, %v6950_v44  ;;  %vm1209_vm1 = vcmp.lt.f32.partialorder %v6900_v33, 0.0 }
 0x42b   : > { %v3319_v24 = vmul.f32 %v4167_v32, %v2999_v19  ;;  %v3608_v52 = vpack.c.bf16 %v3574_v43, %v3573_v22  ;;  %v2401_v8 = vadd.f32 %v4165_v4, %v2400_v56  ;;  %v2414_v26 = vsub.f32 1.0, %v2413_v34  ;;  %vm2419_vm14 = vmor %vm2417_vm5, %vm2418_vm13 }
 0x42c   : > { %v2872_v54 = vmul.f32 %v2808_v18, %v6937_v48  ;;  %v3130_v16 = vmul.f32 %v3066_v0, %v6950_v44 }
 0x42d   : > { %v3383_v50 = vsub.f32 1.0, %v3319_v24  ;;  %3640 = vst [vmem:[%s4954_s28 + $0xe8] sm:$0xff] %v3608_v52  ;;  %v2405_v42 = vsel %vm2404_vm10, %v4165_v4, %v2401_v8  ;;  %v2415_v20 = vmul.f32 %v4169_v29, %v2414_v26  ;;  %v3255_v4 = vmul.f32 1.442695, %v3129_v2 }
 0x42e   : > { %v2936_v9 = vadd.f32 0.2548296, %v2872_v54  ;;  %v2410_v23 = vsel %vm2407_vm11, %v2409_v58, %v2405_v42  ;;  %v3257_v49 = vmul.f32 1.442695, %v3130_v16  ;;  %v1273_v8 = vsel %vm1209_vm1, -1.0, %v7013_v53 }
 0x42f   : > { %v2489_v6 = vmul.f32 1.0614054, %v2410_v23  ;;  %v3447_v63 = vmul.f32 %v3383_v50, %v1271_v55  ;;  %v2416_v28 = vadd.f32 %v4169_v29, %v2415_v20  ;;  %4172 = vpow2.f32 %v3255_v4 }
 0x430   : > { %v3000_v61 = vmul.f32 %v2936_v9, %v6937_v48  ;;  %v1079_v48 = vmul.f32 0.5, %v6800_v41  ;;  %4174 = vpow2.f32 %v3257_v49  ;;  %v1274_v9 = vsel %vm1210_vm2, -1.0, %v7013_v53 }
 0x431   : > { %v2553_v31 = vadd.f32 -1.4531521, %v2489_v6  ;;  %v3511_v38 = vadd.f32 1.0, %v3447_v63  ;;  %v2420_v5 = vsel %vm2419_vm14, %v4169_v29, %v2416_v28  ;;  %v1082_v55 = vmul.f32 0.5, %v6916_v21 }
 0x432   : > { %v3320_v62 = vmul.f32 %v4171_v14, %v3000_v61  ;;  %v2425_v35 = vsel %vm2422_vm15, %v2424_v45, %v2420_v5 }
 0x433   : > { %v2617_v60 = vmul.f32 %v2553_v31, %v2410_v23  ;;  %v3575_v39 = vmul.f32 %v3511_v38, %v1079_v48  ;;  %v2490_v40 = vmul.f32 1.0614054, %v2425_v35 }
 0x434   : > { %v3384_v1 = vsub.f32 1.0, %v3320_v62 }
 0x435   : > { %v2681_v11 = vadd.f32 1.4214138, %v2617_v60  ;;  %v2554_v3 = vadd.f32 -1.4531521, %v2490_v40  ;;  %v4173_v12 = vpop.eup %4172 }
 0x436   : > { %v3448_v36 = vmul.f32 %v3384_v1, %v1272_v27  ;;  %v4175_v54 = vpop.eup %4174 }
 0x437   : > { %v2745_v17 = vmul.f32 %v2681_v11, %v2410_v23  ;;  %v2618_v51 = vmul.f32 %v2554_v3, %v2425_v35 }
 0x438   : > { %v3512_v10 = vadd.f32 1.0, %v3448_v36 }
 0x439   : > { %v2809_v59 = vadd.f32 -0.28449672, %v2745_v17  ;;  %v2682_v32 = vadd.f32 1.4214138, %v2618_v51 }
 0x43a   : > { %v3576_v7 = vmul.f32 %v3512_v10, %v1080_v47 }
 0x43b   : > { %v2873_v41 = vmul.f32 %v2809_v59, %v2410_v23  ;;  %v2746_v43 = vmul.f32 %v2682_v32, %v2425_v35 }
 0x43c   : > { %v3609_v22 = vpack.c.bf16 %v3576_v7, %v3575_v39 }
 0x43d   : > { %v2937_v19 = vadd.f32 0.2548296, %v2873_v41  ;;  %v2810_v24 = vadd.f32 -0.28449672, %v2746_v43 }
 0x43e   : > { %3641 = vst [vmem:[%s4954_s28 + $0xf0] sm:$0xff] %v3609_v22 }
 0x43f   : > { %v3001_v25 = vmul.f32 %v2937_v19, %v2410_v23  ;;  %v2874_v18 = vmul.f32 %v2810_v24, %v2425_v35  ;;  %v1081_v23 = vmul.f32 0.5, %v6885_v30 }
 0x441   : > { %v3321_v57 = vmul.f32 %v4173_v12, %v3001_v25  ;;  %v2938_v52 = vadd.f32 0.2548296, %v2874_v18 }
 0x443   : > { %v3385_v56 = vsub.f32 1.0, %v3321_v57  ;;  %v3002_v50 = vmul.f32 %v2938_v52, %v2425_v35 }
 0x445   : > { %v3449_v44 = vmul.f32 %v3385_v56, %v1273_v8  ;;  %v3322_v58 = vmul.f32 %v4175_v54, %v3002_v50 }
 0x447   : > { %v3513_v42 = vadd.f32 1.0, %v3449_v44  ;;  %v3386_v29 = vsub.f32 1.0, %v3322_v58 }
 0x449   : > { %v3450_v13 = vmul.f32 %v3386_v29, %v1274_v9  ;;  %v3577_v33 = vmul.f32 %v3513_v42, %v1081_v23 }
 0x44b   : > { %v3514_v6 = vadd.f32 1.0, %v3450_v13 }
 0x44d   : > { %v3578_v34 = vmul.f32 %v3514_v6, %v1082_v55 }
 0x44f   : > { %v3610_v63 = vpack.c.bf16 %v3578_v34, %v3577_v33 }
 0x451   : > { %3642 = vst [vmem:[%s4954_s28 + $0xf8] sm:$0xff] %v3610_v63 }
 0x452 PF: > { %s15_s18 = sadd.s32 1, %s4186_s18  }
 0x453   : > { %p12_p4 = scmp.ge.s32.totalorder %s15_s18, 4  }
 0x455   :  { %14 = sbr.rel (!%p12_p4) target bundleno = 1 (0x1), region = 70 }

// kernel: block_forward.9
= control target key start
LH: loop header
LB: loop body
LE: loop exit
PB: predicated region body
PF: predicated region fallthrough
CT: control target
= control target key end

     0   :  { %9 = vsyncpa [#allocation3], 0  ;;  %s1795_s0 = inlined_call_operand.vmem [shape: bf16[256,512], index: 0, kind: input, shape index: {}]   ;;  %s1796_s1 = inlined_call_operand.vmem [shape: bf16[512,128], index: 1, kind: input, shape index: {}]   ;;  %s1797_s2 = inlined_call_operand.vmem [shape: f32[1,128], index: 2, kind: input, shape index: {}]   ;;  %s1798_s3 = inlined_call_operand.vmem [shape: f32[256,128], index: 3, kind: input, shape index: {}]   ;;  %s1799_s4 = inlined_call_operand.hbm [shape: f32[256,128], index: 4, kind: output, shape index: {}]  }
   0x1   :  { %11 = vsyncpa [#allocation3 + $0x1], 0  ;;  %s1480_s15 = smov 0   ;;  %s1482_s16 = smov 0  }
   0x2   :  { %s1484_s17 = smov 0   ;;  %s1486_s18 = smov 0  }
   0x3 LB: > { %s1501_s19 = sadd.s32 4294967295, %s1451_s18   ;;  %s1010_s20 = sadd.s32 4294967294, %s1451_s18   ;;  %s1451_s18 = sphi %s1486_s18, %s1805_s18   ;;  %s1447_s17 = sphi %s1484_s17, %s1804_s17   ;;  %s1443_s16 = sphi %s1482_s16, %s1803_s16   ;;  %s1439_s15 = sphi %s1480_s15, %s1802_s15  }
   0x4   : > { %s1505_s21 = sadd.s32 1, %s1451_s18   ;;  %s118_s22 = sadd.s32 1, %s1447_s17 }
   0x5   : > { %s115_s23 = ssub.s32 %s1451_s18, %s1505_s21  ;;  %p128_p0 = scmp.ne.s32.totalorder %s1447_s17, %s1443_s16 }
   0x6   : > { %p116_p1 = scmp.eq.s32.totalorder %s115_s23, 0  ;;  %p129_p2 = scmp.eq.s32.totalorder %s1501_s19, 1 }
   0x7   : > { %p134_p3 = scmp.ne.s32.totalorder %s1443_s16, %s1439_s15  ;;  %p135_p4 = scmp.eq.s32.totalorder %s1010_s20, 1 }
   0x8   : > { %s1516_s24 = scalar_select %p116_p1, %s1447_s17, %s118_s22  }
   0x9   : > { %p1518_p5 = por %p129_p2, %p128_p0  ;;  %p1522_p6 = por %p135_p4, %p134_p3 }
   0xa   : > { %p1013_p7 = scmp.ge.s32.totalorder %s1451_s18, 1  ;;  %p178_p8 = scmp.lt.s32.totalorder %s1451_s18, 3 }
   0xc   : > { %p179_p9 = pnand %p1013_p7, %p178_p8 }
   0xd   : > { %s1015_s8 = sshll.u32 (!%p179_p9), %s1501_s19, 4  ;;  %s1346_s13 = sshll.u32 (!%p179_p9), %s1501_s19, 7 }
   0xe   : > { %182 = sbr.rel (%p179_p9) target bundleno = 315 (0x13b), region = 36  ;;  %p211_p10 = scmp.lt.s32.totalorder (!%p179_p9), %s1015_s8, 31 }
   0xf   : > { %s932_s22 = scalar_lea.hbm (!%p179_p9), %s1799_s4, %s1346_s13 }
  0x10   : > { %s935_s27 = sshll.u32 (!%p179_p9), %s932_s22, 4  ;;  %s936_s27 = int_to_ptr.hbm [resolvable:$true] %s935_s27 }
  0x11   : > { %s1403_s28 = sshra.s32 (!%p179_p9), %s936_s27, 4  ;;  %s1404_s28 = int_to_ptr.hbm [resolvable:$true] %s1403_s28 }
  0x12   : > { %s1405_s29 = scalar_lea.hbm (!%p179_p9), %s1404_s28, 128  ;;  %p1410_p0 = scmp.lt.s32.totalorder (!%p179_p9), %s1404_s28, %s1799_s4 }
  0x13   : > { %v1321_v0 = vld [vmem:[%s1796_s1 + $0x38] sm:$0xff]  ;;  %v1320_v4 = vld [vmem:[%s1796_s1 + $0x30] sm:$0xff]  ;;  %v1319_v8 = vld [vmem:[%s1796_s1 + $0x28] sm:$0xff]  ;;  %s1807_s8 = smov (!%p211_p10, %s1015_s8), 31  ;;  %p1406_p11 = scmp.ne.s32.totalorder %s1404_s28, %s1405_s29 }
  0x14   : > { %v1329_v1 = vld [vmem:[%s1796_s1 + $0x78] sm:$0xff]  ;;  %676 = vmatpush.bf16.msra.mxu0 %v1321_v0  ;;  %v1328_v5 = vld [vmem:[%s1796_s1 + $0x70] sm:$0xff]  ;;  %v1327_v9 = vld [vmem:[%s1796_s1 + $0x68] sm:$0xff]  ;;  %s1281_s23 = sshll.u32 %s1807_s8, 4  ;;  %s1019_s6 = sshll.u32 %s1807_s8, 3 }
  0x15   : > { %v1337_v2 = vld [vmem:[%s1796_s1 + $0xb8] sm:$0xff]  ;;  %725 = vmatpush.bf16.msra.mxu1 %v1329_v1  ;;  %v1336_v6 = vld [vmem:[%s1796_s1 + $0xb0] sm:$0xff]  ;;  %v1335_v10 = vld [vmem:[%s1796_s1 + $0xa8] sm:$0xff]  ;;  %s1613_s7 = scalar_lea.vmem %s1795_s0, %s1281_s23  ;;  %s1708_s11 = scalar_lea.vmem %s1798_s3, %s1019_s6 }
  0x16   : > { %v1345_v3 = vld [vmem:[%s1796_s1 + $0xf8] sm:$0xff]  ;;  %774 = vmatpush.bf16.msra.mxu2 %v1337_v2  ;;  %v1344_v7 = vld [vmem:[%s1796_s1 + $0xf0] sm:$0xff]  ;;  %v1343_v11 = vld [vmem:[%s1796_s1 + $0xe8] sm:$0xff]  ;;  %p1407_p12 = pnand %p1406_p11, %p1518_p5  ;;  %s1409_s6 = scalar_lea.hbm %s1799_s4, 256 }
  0x17   : > { %823 = vmatpush.bf16.msra.mxu3 %v1345_v3  ;;  %v1318_v12 = vld [vmem:[%s1796_s1 + $0x20] sm:$0xff]  ;;  %v1317_v16 = vld [vmem:[%s1796_s1 + $0x18] sm:$0xff]  ;;  %v1316_v20 = vld [vmem:[%s1796_s1 + $0x10] sm:$0xff]  ;;  %p1411_p1 = scmp.lt.s32.totalorder %s1409_s6, %s1405_s29 }
  0x18   : > { %677 = vmatpush.bf16.msra.mxu0 %v1320_v4  ;;  %v1326_v13 = vld [vmem:[%s1796_s1 + $0x60] sm:$0xff]  ;;  %v1325_v17 = vld [vmem:[%s1796_s1 + $0x58] sm:$0xff]  ;;  %v1324_v21 = vld [vmem:[%s1796_s1 + $0x50] sm:$0xff]  ;;  %p1408_p13 = pneg %p1407_p12 }
  0x19   : > { %726 = vmatpush.bf16.msra.mxu1 %v1328_v5  ;;  %v1334_v14 = vld [vmem:[%s1796_s1 + $0xa0] sm:$0xff]  ;;  %v1333_v18 = vld [vmem:[%s1796_s1 + $0x98] sm:$0xff]  ;;  %v1332_v22 = vld [vmem:[%s1796_s1 + $0x90] sm:$0xff]  ;;  %p1412_p2 = por %p1411_p1, %p1410_p0 }
  0x1a   : > { %775 = vmatpush.bf16.msra.mxu2 %v1336_v6  ;;  %v1342_v15 = vld [vmem:[%s1796_s1 + $0xe0] sm:$0xff]  ;;  %v1341_v19 = vld [vmem:[%s1796_s1 + $0xd8] sm:$0xff]  ;;  %v1340_v23 = vld [vmem:[%s1796_s1 + $0xd0] sm:$0xff] }
  0x1b   : > { %824 = vmatpush.bf16.msra.mxu3 %v1344_v7  ;;  %v1315_v24 = vld [vmem:[%s1796_s1 + $0x8] sm:$0xff]  ;;  %v1314_v28 = vld [vmem:[%s1796_s1] sm:$0xff]  ;;  %v1284_v33 = vld [vmem:[%s1613_s7 + $0xc] sm:$0xf0]  ;;  %p1413_p3 = pnand %p1412_p2, %p1408_p13 }
  0x1c   : > { %678 = vmatpush.bf16.msra.mxu0 %v1319_v8  ;;  %v1323_v25 = vld [vmem:[%s1796_s1 + $0x48] sm:$0xff]  ;;  %v1322_v29 = vld [vmem:[%s1796_s1 + $0x40] sm:$0xff]  ;;  %v1024_v35 = vld [vmem:[%s1613_s7 + $0x10] sm:$0xf0] }
  0x1d   : > { %727 = vmatpush.bf16.msra.mxu1 %v1327_v9  ;;  %v1331_v26 = vld [vmem:[%s1796_s1 + $0x88] sm:$0xff]  ;;  %v1330_v30 = vld [vmem:[%s1796_s1 + $0x80] sm:$0xff]  ;;  %v1285_v37 = vld [vmem:[%s1613_s7 + $0x14] sm:$0xf0] }
  0x1e   : > { %776 = vmatpush.bf16.msra.mxu2 %v1335_v10  ;;  %v1339_v27 = vld [vmem:[%s1796_s1 + $0xc8] sm:$0xff]  ;;  %v1338_v31 = vld [vmem:[%s1796_s1 + $0xc0] sm:$0xff]  ;;  %v1032_v39 = vld [vmem:[%s1613_s7 + $0x18] sm:$0xf0] }
  0x1f   : > { %825 = vmatpush.bf16.msra.mxu3 %v1343_v11  ;;  %v1022_v32 = vld [vmem:[%s1613_s7] sm:$0xf]  ;;  %v1282_v34 = vld [vmem:[%s1613_s7 + $0x4] sm:$0xf]  ;;  %v1030_v36 = vld [vmem:[%s1613_s7 + $0x8] sm:$0xf] }
  0x20   : > { %679 = vmatpush.bf16.msra.mxu0 %v1318_v12  ;;  %v1283_v38 = vld [vmem:[%s1613_s7 + $0xc] sm:$0xf]  ;;  %v1023_v40 = vor.u32 %v1284_v33, %v1022_v32  ;;  %v1027_v41 = vor.u32 %v1282_v34, %v1024_v35  ;;  %v1031_v42 = vor.u32 %v1285_v37, %v1030_v36  ;;  %v1038_v44 = vld [vmem:[%s1613_s7 + $0x20] sm:$0xf]  ;;  %v1288_v45 = vld [vmem:[%s1613_s7 + $0x2c] sm:$0xf0] }
  0x21   : > { %728 = vmatpush.bf16.msra.mxu1 %v1326_v13  ;;  %v1035_v43 = vor.u32 %v1283_v38, %v1032_v39  ;;  %v1286_v46 = vld [vmem:[%s1613_s7 + $0x24] sm:$0xf]  ;;  %v1040_v47 = vld [vmem:[%s1613_s7 + $0x30] sm:$0xf0]  ;;  %v1046_v48 = vld [vmem:[%s1613_s7 + $0x28] sm:$0xf]  ;;  %v1039_v52 = vor.u32 %v1288_v45, %v1038_v44 }
  0x22   : > { %777 = vmatpush.bf16.msra.mxu2 %v1334_v14  ;;  %v1289_v49 = vld [vmem:[%s1613_s7 + $0x34] sm:$0xf0]  ;;  %v1287_v50 = vld [vmem:[%s1613_s7 + $0x2c] sm:$0xf]  ;;  %v1048_v51 = vld [vmem:[%s1613_s7 + $0x38] sm:$0xf0]  ;;  %v1043_v53 = vor.u32 %v1286_v46, %v1040_v47 }
  0x23   : > { %826 = vmatpush.bf16.msra.mxu3 %v1342_v15  ;;  %v1047_v54 = vor.u32 %v1289_v49, %v1046_v48  ;;  %v1051_v55 = vor.u32 %v1287_v50, %v1048_v51  ;;  %v1054_v56 = vld [vmem:[%s1613_s7 + $0x40] sm:$0xf]  ;;  %v1292_v57 = vld [vmem:[%s1613_s7 + $0x4c] sm:$0xf0]  ;;  %v1290_v58 = vld [vmem:[%s1613_s7 + $0x44] sm:$0xf] }
  0x24   : > { %680 = vmatpush.bf16.msra.mxu0 %v1317_v16  ;;  %v1056_v59 = vld [vmem:[%s1613_s7 + $0x50] sm:$0xf0]  ;;  %v1062_v60 = vld [vmem:[%s1613_s7 + $0x48] sm:$0xf]  ;;  %v1293_v61 = vld [vmem:[%s1613_s7 + $0x54] sm:$0xf0]  ;;  %v1055_v0 = vor.u32 %v1292_v57, %v1054_v56 }
  0x25   : > { %729 = vmatpush.bf16.msra.mxu1 %v1325_v17  ;;  %v1291_v62 = vld [vmem:[%s1613_s7 + $0x4c] sm:$0xf]  ;;  %v1064_v63 = vld [vmem:[%s1613_s7 + $0x58] sm:$0xf0]  ;;  %v1059_v1 = vor.u32 %v1290_v58, %v1056_v59  ;;  %v1063_v2 = vor.u32 %v1293_v61, %v1062_v60  ;;  %v1070_v4 = vld [vmem:[%s1613_s7 + $0x60] sm:$0xf] }
  0x26   : > { %778 = vmatpush.bf16.msra.mxu2 %v1333_v18  ;;  %v1067_v3 = vor.u32 %v1291_v62, %v1064_v63  ;;  %v1296_v5 = vld [vmem:[%s1613_s7 + $0x6c] sm:$0xf0]  ;;  %v1294_v6 = vld [vmem:[%s1613_s7 + $0x64] sm:$0xf]  ;;  %v1072_v7 = vld [vmem:[%s1613_s7 + $0x70] sm:$0xf0] }
  0x27   : > { %827 = vmatpush.bf16.msra.mxu3 %v1341_v19  ;;  %v1078_v8 = vld [vmem:[%s1613_s7 + $0x68] sm:$0xf]  ;;  %v1297_v9 = vld [vmem:[%s1613_s7 + $0x74] sm:$0xf0]  ;;  %v1295_v10 = vld [vmem:[%s1613_s7 + $0x6c] sm:$0xf]  ;;  %v1071_v12 = vor.u32 %v1296_v5, %v1070_v4  ;;  %v1075_v13 = vor.u32 %v1294_v6, %v1072_v7 }
  0x28   : > { %681 = vmatpush.bf16.msra.mxu0 %v1316_v20  ;;  %v1080_v11 = vld [vmem:[%s1613_s7 + $0x78] sm:$0xf0]  ;;  %v1079_v14 = vor.u32 %v1297_v9, %v1078_v8  ;;  %v1086_v16 = vld [vmem:[%s1613_s7 + $0x80] sm:$0xf]  ;;  %v1300_v17 = vld [vmem:[%s1613_s7 + $0x8c] sm:$0xf0] }
  0x29   : > { %730 = vmatpush.bf16.msra.mxu1 %v1324_v21  ;;  %v1083_v15 = vor.u32 %v1295_v10, %v1080_v11  ;;  %v1298_v18 = vld [vmem:[%s1613_s7 + $0x84] sm:$0xf]  ;;  %v1088_v19 = vld [vmem:[%s1613_s7 + $0x90] sm:$0xf0]  ;;  %v1094_v20 = vld [vmem:[%s1613_s7 + $0x88] sm:$0xf] }
  0x2a   : > { %779 = vmatpush.bf16.msra.mxu2 %v1332_v22  ;;  %v1301_v21 = vld [vmem:[%s1613_s7 + $0x94] sm:$0xf0]  ;;  %v1299_v22 = vld [vmem:[%s1613_s7 + $0x8c] sm:$0xf]  ;;  %v1110_v32 = vld [vmem:[%s1613_s7 + $0xa8] sm:$0xf] }
  0x2b   : > { %828 = vmatpush.bf16.msra.mxu3 %v1340_v23  ;;  %v1096_v23 = vld [vmem:[%s1613_s7 + $0x98] sm:$0xf0]  ;;  %v1305_v33 = vld [vmem:[%s1613_s7 + $0xb4] sm:$0xf0]  ;;  %v1303_v34 = vld [vmem:[%s1613_s7 + $0xac] sm:$0xf] }
  0x2c   : > { %682 = vmatpush.bf16.msra.mxu0 %v1315_v24  ;;  %v1087_v24 = vor.u32 %v1300_v17, %v1086_v16  ;;  %v1112_v35 = vld [vmem:[%s1613_s7 + $0xb8] sm:$0xf0]  ;;  %v1111_v38 = vor.u32 %v1305_v33, %v1110_v32  ;;  %v1126_v44 = vld [vmem:[%s1613_s7 + $0xc8] sm:$0xf]  ;;  %v1309_v45 = vld [vmem:[%s1613_s7 + $0xd4] sm:$0xf0] }
  0x2d   : > { %731 = vmatpush.bf16.msra.mxu1 %v1323_v25  ;;  %v1091_v25 = vor.u32 %v1298_v18, %v1088_v19  ;;  %v1115_v39 = vor.u32 %v1303_v34, %v1112_v35  ;;  %v1307_v46 = vld [vmem:[%s1613_s7 + $0xcc] sm:$0xf]  ;;  %v1128_v47 = vld [vmem:[%s1613_s7 + $0xd8] sm:$0xf0]  ;;  %v1127_v50 = vor.u32 %v1309_v45, %v1126_v44  ;;  %v1142_v56 = vld [vmem:[%s1613_s7 + $0xe8] sm:$0xf] }
  0x2e   : > { %780 = vmatpush.bf16.msra.mxu2 %v1331_v26  ;;  %v1095_v26 = vor.u32 %v1301_v21, %v1094_v20  ;;  %v1131_v51 = vor.u32 %v1307_v46, %v1128_v47  ;;  %v1313_v57 = vld [vmem:[%s1613_s7 + $0xf4] sm:$0xf0]  ;;  %v1311_v58 = vld [vmem:[%s1613_s7 + $0xec] sm:$0xf]  ;;  %v1144_v59 = vld [vmem:[%s1613_s7 + $0xf8] sm:$0xf0] }
  0x2f   : > { %829 = vmatpush.bf16.msra.mxu3 %v1339_v27  ;;  %v1099_v27 = vor.u32 %v1299_v22, %v1096_v23  ;;  %v1143_v62 = vor.u32 %v1313_v57, %v1142_v56  ;;  %v1147_v63 = vor.u32 %v1311_v58, %v1144_v59  ;;  %v872_v10 = vld [vmem:[%s1708_s11] sm:$0xff]  ;;  %v873_v20 = vld [vmem:[%s1708_s11 + $0x8] sm:$0xff] }
  0x30   : > { %683 = vmatpush.bf16.msra.mxu0 %v1314_v28  ;;  %v1102_v28 = vld [vmem:[%s1613_s7 + $0xa0] sm:$0xf] }
  0x31   : > { %732 = vmatpush.bf16.msra.mxu1 %v1322_v29  ;;  %v1304_v29 = vld [vmem:[%s1613_s7 + $0xac] sm:$0xf0] }
  0x32   : > { %781 = vmatpush.bf16.msra.mxu2 %v1330_v30  ;;  %v1302_v30 = vld [vmem:[%s1613_s7 + $0xa4] sm:$0xf]  ;;  %v1103_v36 = vor.u32 %v1304_v29, %v1102_v28 }
  0x33   : > { %830 = vmatpush.bf16.msra.mxu3 %v1338_v31  ;;  %684 = vmatmul.bf16.vlgmr.msra.gmra.mxu0 %v1023_v40  ;;  %v1104_v31 = vld [vmem:[%s1613_s7 + $0xb0] sm:$0xf0]  ;;  %v1118_v40 = vld [vmem:[%s1613_s7 + $0xc0] sm:$0xf] }
  0x34   : > { %733 = vmatmul.bf16.vlgmr.msra.gmra.mxu1 %v1027_v41  ;;  %v1107_v37 = vor.u32 %v1302_v30, %v1104_v31  ;;  %v1308_v41 = vld [vmem:[%s1613_s7 + $0xcc] sm:$0xf0] }
  0x35   : > { %782 = vmatmul.bf16.vlgmr.msra.gmra.mxu2 %v1031_v42  ;;  %v1306_v42 = vld [vmem:[%s1613_s7 + $0xc4] sm:$0xf]  ;;  %v1119_v48 = vor.u32 %v1308_v41, %v1118_v40  ;;  %v874_v30 = vld [vmem:[%s1708_s11 + $0x10] sm:$0xff]  ;;  %v875_v40 = vld [vmem:[%s1708_s11 + $0x18] sm:$0xff] }
  0x36   : > { %831 = vmatmul.bf16.vlgmr.msra.gmra.mxu3 %v1035_v43  ;;  %v1120_v43 = vld [vmem:[%s1613_s7 + $0xd0] sm:$0xf0] }
  0x37   : > { %v1123_v49 = vor.u32 %v1306_v42, %v1120_v43 }
  0x43   : > { %689 = vmatmul.bf16.gmra.mxu0 %v1039_v52  ;;  %v1134_v52 = vld [vmem:[%s1613_s7 + $0xe0] sm:$0xf] }
  0x44   : > { %738 = vmatmul.bf16.gmra.mxu1 %v1043_v53  ;;  %v1312_v53 = vld [vmem:[%s1613_s7 + $0xec] sm:$0xf0] }
  0x45   : > { %787 = vmatmul.bf16.gmra.mxu2 %v1047_v54  ;;  %v1310_v54 = vld [vmem:[%s1613_s7 + $0xe4] sm:$0xf]  ;;  %v1135_v60 = vor.u32 %v1312_v53, %v1134_v52 }
  0x46   : > { %836 = vmatmul.bf16.gmra.mxu3 %v1051_v55  ;;  %v1136_v55 = vld [vmem:[%s1613_s7 + $0xf0] sm:$0xf0]  ;;  %s207_s7 = sand.u32 1, %s1443_s16  }
  0x47   : > { %v1139_v61 = vor.u32 %v1310_v54, %v1136_v55  ;;  %s1014_s12 = sshll.u32 %s207_s7, 7  ;;  %s921_s19 = scalar_lea.sflag [#allocation3], %s207_s7 }
  0x48   : > { %s1714_s8 = scalar_lea.vmem [#allocation2], %s1014_s12 }
  0x49   : > { %s933_s23 = sshll.u32 %s1714_s8, 4  ;;  %s934_s23 = int_to_ptr.vmem [resolvable:$true] %s933_s23 }
  0x53   : > { %694 = vmatmul.bf16.gmra.mxu0 %v1055_v0  ;;  %v1700_v0 = vld [vmem:[%s1797_s2] ss:$0 sm:$0xff] }
  0x54   : > { %743 = vmatmul.bf16.gmra.mxu1 %v1059_v1 }
  0x55   : > { %792 = vmatmul.bf16.gmra.mxu2 %v1063_v2 }
  0x56   : > { %841 = vmatmul.bf16.gmra.mxu3 %v1067_v3 }
  0x63   : > { %699 = vmatmul.bf16.gmra.mxu0 %v1071_v12 }
  0x64   : > { %748 = vmatmul.bf16.gmra.mxu1 %v1075_v13 }
  0x65   : > { %797 = vmatmul.bf16.gmra.mxu2 %v1079_v14 }
  0x66   : > { %846 = vmatmul.bf16.gmra.mxu3 %v1083_v15 }
  0x73   : > { %704 = vmatmul.bf16.gmra.mxu0 %v1087_v24 }
  0x74   : > { %753 = vmatmul.bf16.gmra.mxu1 %v1091_v25 }
  0x75   : > { %802 = vmatmul.bf16.gmra.mxu2 %v1095_v26 }
  0x76   : > { %851 = vmatmul.bf16.gmra.mxu3 %v1099_v27 }
  0x83   : > { %709 = vmatmul.bf16.gmra.mxu0 %v1103_v36 }
  0x84   : > { %758 = vmatmul.bf16.gmra.mxu1 %v1107_v37 }
  0x85   : > { %807 = vmatmul.bf16.gmra.mxu2 %v1111_v38 }
  0x86   : > { %856 = vmatmul.bf16.gmra.mxu3 %v1115_v39 }
  0x93   : > { %714 = vmatmul.bf16.gmra.mxu0 %v1119_v48 }
  0x94   : > { %763 = vmatmul.bf16.gmra.mxu1 %v1123_v49 }
  0x95   : > { %812 = vmatmul.bf16.gmra.mxu2 %v1127_v50  ;;  %v876_v50 = vld [vmem:[%s1708_s11 + $0x20] sm:$0xff] }
  0x96   : > { %861 = vmatmul.bf16.gmra.mxu3 %v1131_v51 }
  0xa3   : > { %719 = vmatmul.bf16.gmra.mxu0 %v1135_v60  ;;  %v877_v60 = vld [vmem:[%s1708_s11 + $0x28] sm:$0xff] }
  0xa4   : > { %768 = vmatmul.bf16.gmra.mxu1 %v1139_v61 }
  0xa5   : > { %817 = vmatmul.bf16.gmra.mxu2 %v1143_v62 }
  0xa6   : > { %866 = vmatmul.bf16.gmra.mxu3 %v1147_v63 }
  0xb0   : > { %v685_v1 = vpop.f32.mrf.mxu0 }
  0xb1   : > { %v734_v2 = vpop.f32.mrf.mxu1  ;;  %v686_v3 = vadd.f32 %v1700_v0, %v685_v1 }
  0xb3   : > { %v735_v4 = vadd.f32 %v734_v2, %v686_v3 }
  0xb8   : > { %v783_v5 = vpop.f32.mrf.mxu2  ;;  %v687_v8 = vpop.f32.mrf.mxu0 }
  0xb9   : > { %v832_v6 = vpop.f32.mrf.mxu3  ;;  %v784_v7 = vadd.f32 %v783_v5, %v735_v4  ;;  %v736_v9 = vpop.f32.mrf.mxu1  ;;  %v688_v12 = vadd.f32 %v1700_v0, %v687_v8 }
  0xbb   : > { %v833_v11 = vadd.f32 %v832_v6, %v784_v7  ;;  %v737_v14 = vadd.f32 %v736_v9, %v688_v12  ;;  %v878_v7 = vld [vmem:[%s1708_s11 + $0x30] sm:$0xff] }
  0xbd   : > { %v888_v13 = vadd.f32 %v872_v10, %v833_v11 }
  0xbf   : > { %904 = vst [vmem:[%s1714_s8] sm:$0xff] %v888_v13 }
  0xc0   : > { %v785_v15 = vpop.f32.mrf.mxu2  ;;  %v690_v18 = vpop.f32.mrf.mxu0 }
  0xc1   : > { %v834_v16 = vpop.f32.mrf.mxu3  ;;  %v786_v17 = vadd.f32 %v785_v15, %v737_v14  ;;  %v739_v19 = vpop.f32.mrf.mxu1  ;;  %v691_v21 = vadd.f32 %v1700_v0, %v690_v18 }
  0xc3   : > { %v835_v22 = vadd.f32 %v834_v16, %v786_v17  ;;  %v740_v24 = vadd.f32 %v739_v19, %v691_v21  ;;  %v879_v17 = vld [vmem:[%s1708_s11 + $0x38] sm:$0xff] }
  0xc5   : > { %v889_v23 = vadd.f32 %v873_v20, %v835_v22 }
  0xc7   : > { %905 = vst [vmem:[%s1714_s8 + $0x8] sm:$0xff] %v889_v23 }
  0xc8   : > { %v788_v25 = vpop.f32.mrf.mxu2  ;;  %v692_v28 = vpop.f32.mrf.mxu0 }
  0xc9   : > { %v837_v26 = vpop.f32.mrf.mxu3  ;;  %v789_v27 = vadd.f32 %v788_v25, %v740_v24  ;;  %v741_v29 = vpop.f32.mrf.mxu1  ;;  %v693_v32 = vadd.f32 %v1700_v0, %v692_v28 }
  0xcb   : > { %v838_v31 = vadd.f32 %v837_v26, %v789_v27  ;;  %v742_v34 = vadd.f32 %v741_v29, %v693_v32  ;;  %v880_v27 = vld [vmem:[%s1708_s11 + $0x40] sm:$0xff] }
  0xcd   : > { %v890_v33 = vadd.f32 %v874_v30, %v838_v31 }
  0xcf   : > { %906 = vst [vmem:[%s1714_s8 + $0x10] sm:$0xff] %v890_v33 }
  0xd0   : > { %v790_v35 = vpop.f32.mrf.mxu2  ;;  %v695_v38 = vpop.f32.mrf.mxu0 }
  0xd1   : > { %v839_v36 = vpop.f32.mrf.mxu3  ;;  %v791_v37 = vadd.f32 %v790_v35, %v742_v34  ;;  %v744_v39 = vpop.f32.mrf.mxu1  ;;  %v696_v41 = vadd.f32 %v1700_v0, %v695_v38 }
  0xd3   : > { %v840_v42 = vadd.f32 %v839_v36, %v791_v37  ;;  %v745_v44 = vadd.f32 %v744_v39, %v696_v41  ;;  %v881_v37 = vld [vmem:[%s1708_s11 + $0x48] sm:$0xff] }
  0xd5   : > { %v891_v43 = vadd.f32 %v875_v40, %v840_v42 }
  0xd7   : > { %907 = vst [vmem:[%s1714_s8 + $0x18] sm:$0xff] %v891_v43 }
  0xd8   : > { %v793_v45 = vpop.f32.mrf.mxu2  ;;  %v697_v48 = vpop.f32.mrf.mxu0 }
  0xd9   : > { %v842_v46 = vpop.f32.mrf.mxu3  ;;  %v794_v47 = vadd.f32 %v793_v45, %v745_v44  ;;  %v746_v49 = vpop.f32.mrf.mxu1  ;;  %v698_v52 = vadd.f32 %v1700_v0, %v697_v48 }
  0xdb   : > { %v843_v51 = vadd.f32 %v842_v46, %v794_v47  ;;  %v747_v54 = vadd.f32 %v746_v49, %v698_v52  ;;  %v882_v47 = vld [vmem:[%s1708_s11 + $0x50] sm:$0xff] }
  0xdd   : > { %v892_v53 = vadd.f32 %v876_v50, %v843_v51 }
  0xdf   : > { %908 = vst [vmem:[%s1714_s8 + $0x20] sm:$0xff] %v892_v53 }
  0xe0   : > { %v795_v55 = vpop.f32.mrf.mxu2  ;;  %v700_v58 = vpop.f32.mrf.mxu0 }
  0xe1   : > { %v844_v56 = vpop.f32.mrf.mxu3  ;;  %v796_v57 = vadd.f32 %v795_v55, %v747_v54  ;;  %v749_v59 = vpop.f32.mrf.mxu1  ;;  %v701_v61 = vadd.f32 %v1700_v0, %v700_v58 }
  0xe3   : > { %v845_v62 = vadd.f32 %v844_v56, %v796_v57  ;;  %v750_v1 = vadd.f32 %v749_v59, %v701_v61  ;;  %v883_v57 = vld [vmem:[%s1708_s11 + $0x58] sm:$0xff] }
  0xe5   : > { %v893_v63 = vadd.f32 %v877_v60, %v845_v62 }
  0xe7   : > { %909 = vst [vmem:[%s1714_s8 + $0x28] sm:$0xff] %v893_v63 }
  0xe8   : > { %v798_v2 = vpop.f32.mrf.mxu2  ;;  %v702_v5 = vpop.f32.mrf.mxu0 }
  0xe9   : > { %v847_v3 = vpop.f32.mrf.mxu3  ;;  %v799_v4 = vadd.f32 %v798_v2, %v750_v1  ;;  %v751_v6 = vpop.f32.mrf.mxu1  ;;  %v703_v9 = vadd.f32 %v1700_v0, %v702_v5 }
  0xeb   : > { %v848_v8 = vadd.f32 %v847_v3, %v799_v4  ;;  %v752_v11 = vadd.f32 %v751_v6, %v703_v9  ;;  %v884_v3 = vld [vmem:[%s1708_s11 + $0x60] sm:$0xff] }
  0xed   : > { %v894_v10 = vadd.f32 %v878_v7, %v848_v8 }
  0xef   : > { %910 = vst [vmem:[%s1714_s8 + $0x30] sm:$0xff] %v894_v10 }
  0xf0   : > { %v800_v12 = vpop.f32.mrf.mxu2  ;;  %v705_v15 = vpop.f32.mrf.mxu0 }
  0xf1   : > { %v849_v13 = vpop.f32.mrf.mxu3  ;;  %v801_v14 = vadd.f32 %v800_v12, %v752_v11  ;;  %v754_v16 = vpop.f32.mrf.mxu1  ;;  %v706_v18 = vadd.f32 %v1700_v0, %v705_v15 }
  0xf3   : > { %v850_v19 = vadd.f32 %v849_v13, %v801_v14  ;;  %v755_v21 = vadd.f32 %v754_v16, %v706_v18  ;;  %v885_v13 = vld [vmem:[%s1708_s11 + $0x68] sm:$0xff] }
  0xf5   : > { %v895_v20 = vadd.f32 %v879_v17, %v850_v19 }
  0xf7   : > { %911 = vst [vmem:[%s1714_s8 + $0x38] sm:$0xff] %v895_v20 }
  0xf8   : > { %v803_v22 = vpop.f32.mrf.mxu2  ;;  %v707_v25 = vpop.f32.mrf.mxu0 }
  0xf9   : > { %v852_v23 = vpop.f32.mrf.mxu3  ;;  %v804_v24 = vadd.f32 %v803_v22, %v755_v21  ;;  %v756_v26 = vpop.f32.mrf.mxu1  ;;  %v708_v29 = vadd.f32 %v1700_v0, %v707_v25 }
  0xfb   : > { %v853_v28 = vadd.f32 %v852_v23, %v804_v24  ;;  %v757_v31 = vadd.f32 %v756_v26, %v708_v29  ;;  %v886_v23 = vld [vmem:[%s1708_s11 + $0x70] sm:$0xff] }
  0xfd   : > { %v896_v30 = vadd.f32 %v880_v27, %v853_v28 }
  0xff   : > { %912 = vst [vmem:[%s1714_s8 + $0x40] sm:$0xff] %v896_v30 }
 0x100   : > { %v805_v32 = vpop.f32.mrf.mxu2  ;;  %v710_v35 = vpop.f32.mrf.mxu0 }
 0x101   : > { %v854_v33 = vpop.f32.mrf.mxu3  ;;  %v806_v34 = vadd.f32 %v805_v32, %v757_v31  ;;  %v759_v36 = vpop.f32.mrf.mxu1  ;;  %v711_v38 = vadd.f32 %v1700_v0, %v710_v35  ;;  %v887_v32 = vld [vmem:[%s1708_s11 + $0x78] sm:$0xff] }
 0x103   : > { %v855_v39 = vadd.f32 %v854_v33, %v806_v34  ;;  %v760_v41 = vadd.f32 %v759_v36, %v711_v38 }
 0x105   : > { %v897_v40 = vadd.f32 %v881_v37, %v855_v39 }
 0x107   : > { %913 = vst [vmem:[%s1714_s8 + $0x48] sm:$0xff] %v897_v40 }
 0x108   : > { %v808_v42 = vpop.f32.mrf.mxu2  ;;  %v712_v45 = vpop.f32.mrf.mxu0 }
 0x109   : > { %v857_v43 = vpop.f32.mrf.mxu3  ;;  %v809_v44 = vadd.f32 %v808_v42, %v760_v41  ;;  %v761_v46 = vpop.f32.mrf.mxu1  ;;  %v713_v49 = vadd.f32 %v1700_v0, %v712_v45 }
 0x10b   : > { %v858_v48 = vadd.f32 %v857_v43, %v809_v44  ;;  %v762_v51 = vadd.f32 %v761_v46, %v713_v49 }
 0x10d   : > { %v898_v50 = vadd.f32 %v882_v47, %v858_v48 }
 0x10f   : > { %914 = vst [vmem:[%s1714_s8 + $0x50] sm:$0xff] %v898_v50 }
 0x110   : > { %v810_v52 = vpop.f32.mrf.mxu2  ;;  %v715_v55 = vpop.f32.mrf.mxu0 }
 0x111   : > { %v859_v53 = vpop.f32.mrf.mxu3  ;;  %v811_v54 = vadd.f32 %v810_v52, %v762_v51  ;;  %v764_v56 = vpop.f32.mrf.mxu1  ;;  %v716_v58 = vadd.f32 %v1700_v0, %v715_v55 }
 0x113   : > { %v860_v59 = vadd.f32 %v859_v53, %v811_v54  ;;  %v765_v61 = vadd.f32 %v764_v56, %v716_v58 }
 0x115   : > { %v899_v60 = vadd.f32 %v883_v57, %v860_v59 }
 0x117   : > { %915 = vst [vmem:[%s1714_s8 + $0x58] sm:$0xff] %v899_v60 }
 0x118   : > { %v813_v62 = vpop.f32.mrf.mxu2  ;;  %v717_v2 = vpop.f32.mrf.mxu0 }
 0x119   : > { %v862_v63 = vpop.f32.mrf.mxu3  ;;  %v814_v1 = vadd.f32 %v813_v62, %v765_v61  ;;  %v766_v4 = vpop.f32.mrf.mxu1  ;;  %v718_v6 = vadd.f32 %v1700_v0, %v717_v2 }
 0x11b   : > { %v863_v5 = vadd.f32 %v862_v63, %v814_v1  ;;  %v767_v8 = vadd.f32 %v766_v4, %v718_v6 }
 0x11d   : > { %v900_v7 = vadd.f32 %v884_v3, %v863_v5 }
 0x11f   : > { %916 = vst [vmem:[%s1714_s8 + $0x60] sm:$0xff] %v900_v7 }
 0x120   : > { %v815_v9 = vpop.f32.mrf.mxu2  ;;  %v720_v12 = vpop.f32.mrf.mxu0 }
 0x121   : > { %v864_v10 = vpop.f32.mrf.mxu3  ;;  %v816_v11 = vadd.f32 %v815_v9, %v767_v8  ;;  %v721_v14 = vadd.f32 %v1700_v0, %v720_v12  ;;  %v769_v16 = vpop.f32.mrf.mxu1 }
 0x123   : > { %v865_v15 = vadd.f32 %v864_v10, %v816_v11  ;;  %v770_v18 = vadd.f32 %v769_v16, %v721_v14 }
 0x125   : > { %v901_v17 = vadd.f32 %v885_v13, %v865_v15 }
 0x127   : > { %917 = vst [vmem:[%s1714_s8 + $0x68] sm:$0xff] %v901_v17 }
 0x128   : > { %v818_v19 = vpop.f32.mrf.mxu2  ;;  %v722_v22 = vpop.f32.mrf.mxu0 }
 0x129   : > { %v867_v20 = vpop.f32.mrf.mxu3  ;;  %v819_v21 = vadd.f32 %v818_v19, %v770_v18  ;;  %v723_v25 = vadd.f32 %v1700_v0, %v722_v22  ;;  %v771_v27 = vpop.f32.mrf.mxu1 }
 0x12b   : > { %v868_v24 = vadd.f32 %v867_v20, %v819_v21  ;;  %v772_v28 = vadd.f32 %v771_v27, %v723_v25 }
 0x12d   : > { %v902_v26 = vadd.f32 %v886_v23, %v868_v24 }
 0x12f   : > { %918 = vst [vmem:[%s1714_s8 + $0x70] sm:$0xff] %v902_v26 }
 0x130   : > { %v820_v29 = vpop.f32.mrf.mxu2 }
 0x131   : > { %v821_v30 = vadd.f32 %v820_v29, %v772_v28  ;;  %v869_v31 = vpop.f32.mrf.mxu3 }
 0x133   : > { %v870_v33 = vadd.f32 %v869_v31, %v821_v30 }
 0x135   : > { %v903_v0 = vadd.f32 %v887_v32, %v870_v33 }
 0x137   : > { %919 = vst [vmem:[%s1714_s8 + $0x78] sm:$0xff] %v903_v0 }
 0x138   : > { %1416 = shalt.err (!%p1413_p3)
}
 0x139   : > { %s1453_s7 = smov 128   ;;  %s1454_s11 = smov 8  }
 0x13a   : > { %1347 = dma.vmem_to_hbm [thread:$0]  (%p1518_p5), %s934_s23, 2048, %s936_s27, %s921_s19, %s1453_s7, %s1453_s7, %s1454_s11  }
 0x13b PF: > { %p1353_p4 = scmp.ge.s32.totalorder %s1451_s18, 2  ;;  %s950_s12 = sand.u32 1, %s1439_s15  }
 0x13c   : > { %s951_s8 = scalar_lea.sflag [#allocation3], %s950_s12 }
 0x13d   : > { %p1350_p7 = pnand %p1353_p4, %p1522_p6 }
 0x13f   : > { %p1351_p8 = pneg %p1350_p7 }
 0x141   : > { %1434 = dma.done.wait (%p1351_p8), %s951_s8, 2048  }
 0x142   : > { %1436 = vsyncadd (%p1351_p8), %s951_s8, 4294965248  ;;  %p14_p9 = scmp.ge.s32.totalorder %s1505_s21, 4   ;;  %s1802_s15 = smov %s1443_s16 }
 0x143   : > { %s1803_s16 = smov %s1447_s17  ;;  %s1804_s17 = smov %s1516_s24 }
 0x144   : > { %s1805_s18 = smov %s1505_s21  ;;  %16 = sbr.rel (!%p14_p9) target bundleno = 3 (0x3), region = 74 }
 0x149   :  { %957 = vsyncpa [#allocation3], 1 }
 0x14a   :  { %959 = vsyncpa [#allocation3 + $0x1], 1 }

</bundles_post_ra>
